<compile_context>
chip_gen: v6e
topology: v6e:2x2x1
jax: 0.10.0
libtpu: 0.0.40
codegen_flags: <defaults>
</compile_context>

<pallas_src>
import functools

import jax
import jax.numpy as jnp
from jax.experimental import pallas as pl
from jax.experimental.pallas import tpu as pltpu

# --- constants (hyperbolic-NN util semantics, f32-safe guards) ---
C = 1.0                      # curvature
PROJ_EPS = 1e-5              # ball-projection margin
MAX_TANH_ARG = 15.0
MIN_NORM = 1e-7              # f32-meaningful norm floor (replaces the old 1e-15 EPS hack)
ATANH_MAX = 1.0 - 1e-6       # f32-meaningful atanh clip (1 - 1e-15 rounds to 1.0 in f32)
_SQRT_C = C ** 0.5
_CLIP = (1.0 - PROJ_EPS) / _SQRT_C


def _round_up(n, m):
    return ((n + m - 1) // m) * m


def _pick_tk(din_p, tk_max):
    """Largest multiple of 128 that divides din_p and is <= tk_max."""
    tk = max(128, min(tk_max, din_p) // 128 * 128)
    while din_p % tk:
        tk -= 128
    return tk


def _tanh(x):
    return jnp.tanh(jnp.clip(x, -MAX_TANH_ARG, MAX_TANH_ARG))


def _atanh(x):
    x = jnp.minimum(x, ATANH_MAX)
    return 0.5 * jnp.log((1.0 + x) / (1.0 - x))


def exp_map_zero(b):
    """Poincare-ball exp map at the origin + projection (pure JAX; runs once, outside kernel)."""
    b = b.astype(jnp.float32)
    bn = jnp.maximum(jnp.sqrt(jnp.sum(b * b)), MIN_NORM)
    hb = (_tanh(_SQRT_C * bn) / (_SQRT_C * bn)) * b
    hn = jnp.maximum(jnp.sqrt(jnp.sum(hb * hb)), MIN_NORM)
    return hb * jnp.minimum(1.0, _CLIP / hn)


# ------------------------------ kernel ------------------------------

def mobius_linear_kernel(x_ref, w_ref, hb_ref, nv_ref, o_ref, acc_mx, acc_xsq):
    """grid = (batch_tiles, k_tiles); K (reduction over in_features) is the last axis."""
    k = pl.program_id(1)

    @pl.when(k == 0)
    def _():
        acc_mx[...] = jnp.zeros_like(acc_mx)
        acc_xsq[...] = jnp.zeros_like(acc_xsq)

    x = x_ref[...].astype(jnp.float32)                        # (tm, tk) f32
    # MXU in bf16 with f32 accumulate; W arrives as bf16 from the wrapper.
    acc_mx[...] += jnp.dot(x.astype(jnp.bfloat16), w_ref[...],
                           preferred_element_type=jnp.float32)
    acc_xsq[...] += jnp.sum(x * x, axis=-1, keepdims=True)    # (tm, 1)

    @pl.when(k == pl.num_programs(1) - 1)
    def _():
        sqrt_c = jnp.float32(_SQRT_C)
        clip = jnp.float32(_CLIP)

        mx = acc_mx[...]                                                   # (tm, Dout)
        x_norm = jnp.maximum(jnp.sqrt(acc_xsq[...]), MIN_NORM)             # (tm, 1)
        mx_norm = jnp.maximum(
            jnp.sqrt(jnp.sum(mx * mx, axis=-1, keepdims=True)), MIN_NORM)  # (tm, 1)
        inv_mx = pl.reciprocal(mx_norm, approx=True)
        inv_x = pl.reciprocal(x_norm, approx=True)

        # ---- wx = project(mob_mat_mul(W, x)) ----
        # wx has direction mx/||mx|| and norm t, so the ball projection is a clamp of that
        # norm; the clamped norm is reused below for ||wx||^2 (no extra reduction).
        t = _tanh((mx_norm * inv_x) * _atanh(sqrt_c * x_norm)) / sqrt_c
        wx_n = jnp.minimum(t, clip)                                        # ||project(wx)||
        wx = mx * (wx_n * inv_mx)                                          # (tm, Dout)

        # ---- out = project(mob_add(wx, hyp_b)) ----
        v = hb_ref[...]                                                    # (1, Dout)
        nv = nv_ref[0]                                                     # c*||hyp_b||^2
        dot_uv = 2.0 * C * jnp.sum(wx * v, axis=-1, keepdims=True)         # (tm, 1)
        nu = C * wx_n * wx_n
        inv_den = pl.reciprocal(1.0 + dot_uv + nv * nu, approx=True)
        res = ((1.0 + dot_uv + nv) * inv_den) * wx + ((1.0 - nu) * inv_den) * v

        r_norm = jnp.maximum(
            jnp.sqrt(jnp.sum(res * res, axis=-1, keepdims=True)), MIN_NORM)
        res = res * jnp.minimum(1.0, clip * pl.reciprocal(r_norm, approx=True))

        o_ref[...] = res.astype(o_ref.dtype)


# ------------------------------ wrapper ------------------------------

@functools.partial(jax.jit, static_argnames=("tm", "tk", "single_buffer_consts"))
def _mobius_linear_impl(x, w, b, *, tm, tk, single_buffer_consts):
    B, Din = x.shape
    Dout = w.shape[1]

    # Hoisted, grid-constant bias math (exp_map_zero + projection + norm) -> runs once.
    hyp_b = exp_map_zero(b).reshape(1, Dout)
    nv = (C * jnp.sum(hyp_b * hyp_b)).reshape(1).astype(jnp.float32)

    # Lane-dense padding: feature dims to multiples of 128, batch to a multiple of tm.
    # Zero padding is exact for this math (padded rows/cols stay zero; norms are floored).
    tm = _round_up(min(tm, _round_up(B, 8)), 8)
    tk = _pick_tk(_round_up(Din, 128), tk)
    B_p = _round_up(B, tm)
    Din_p = _round_up(Din, 128)
    Dout_p = _round_up(Dout, 128)

    x_p = jnp.pad(x.astype(jnp.float32), ((0, B_p - B), (0, Din_p - Din)))
    w_p = jnp.pad(w.astype(jnp.bfloat16), ((0, Din_p - Din), (0, Dout_p - Dout)))
    hb_p = jnp.pad(hyp_b.astype(jnp.float32), ((0, 0), (0, Dout_p - Dout)))

    const_kwargs = {}
    if single_buffer_consts:
        # hyp_b is grid-constant -> no need to double-buffer it (VMEM saving; v7x concern).
        const_kwargs = dict(pipeline_mode=pl.Buffered(1))

    grid_spec = pltpu.PrefetchScalarGridSpec(
        num_scalar_prefetch=0,
        grid=(B_p // tm, Din_p // tk),
        in_specs=[
            pl.BlockSpec((tm, tk), lambda i, k: (i, k)),              # x: batch x K tiles
            pl.BlockSpec((tk, Dout_p), lambda i, k: (k, 0)),          # W: K-tiled, bf16
            pl.BlockSpec((1, Dout_p), lambda i, k: (0, 0), **const_kwargs),   # hyp_b
            pl.BlockSpec(memory_space=pltpu.MemorySpace.SMEM),        # c*||hyp_b||^2 scalar
        ],
        out_specs=pl.BlockSpec((tm, Dout_p), lambda i, k: (i, 0)),
        scratch_shapes=[
            pltpu.VMEM((tm, Dout_p), jnp.float32),                    # accumulated x @ W
            pltpu.VMEM((tm, 1), jnp.float32),                         # accumulated ||x||^2
        ],
    )

    out = pl.pallas_call(
        mobius_linear_kernel,
        out_shape=jax.ShapeDtypeStruct((B_p, Dout_p), jnp.float32),
        grid_spec=grid_spec,
        compiler_params=pltpu.CompilerParams(
            dimension_semantics=("parallel", "arbitrary"),
            vmem_limit_bytes=32 * 1024 * 1024,
        ),
    )(x_p, w_p, hb_p, nv)

    return out[:B, :Dout].astype(x.dtype)


def mobius_linear(x, w, b, *, tm=256, tk=512):
    """x: (B, Din); w: (Din, Dout); b: (Dout,). Returns mob_add(mob_mat_mul(w, x), exp0(b))."""
    try:
        return _mobius_linear_impl(x, w, b, tm=tm, tk=tk, single_buffer_consts=True)
    except Exception:
        # Portability fallback for Pallas versions without BlockSpec(pipeline_mode=...).
        return _mobius_linear_impl(x, w, b, tm=tm, tk=tk, single_buffer_consts=False)


# ------------------------------ reference ------------------------------

def mobius_linear_ref(x, w, b):
    """Pure-JAX reference mirroring the kernel math (bf16 matmul, exact divides/sqrts)."""
    x = x.astype(jnp.float32)
    hyp_b = exp_map_zero(b).reshape(1, -1)

    mx = jnp.dot(x.astype(jnp.bfloat16), w.astype(jnp.bfloat16),
                 preferred_element_type=jnp.float32)
    x_norm = jnp.maximum(jnp.sqrt(jnp.sum(x * x, -1, keepdims=True)), MIN_NORM)
    mx_norm = jnp.maximum(jnp.sqrt(jnp.sum(mx * mx, -1, keepdims=True)), MIN_NORM)

    t = _tanh((mx_norm / x_norm) * _atanh(_SQRT_C * x_norm)) / _SQRT_C
    wx_n = jnp.minimum(t, _CLIP)
    wx = mx * (wx_n / mx_norm)

    v = hyp_b
    nv = C * jnp.sum(v * v)
    dot_uv = 2.0 * C * jnp.sum(wx * v, -1, keepdims=True)
    nu = C * wx_n * wx_n
    den = 1.0 + dot_uv + nv * nu
    res = ((1.0 + dot_uv + nv) / den) * wx + ((1.0 - nu) / den) * v
    r_norm = jnp.maximum(jnp.sqrt(jnp.sum(res * res, -1, keepdims=True)), MIN_NORM)
    return res * jnp.minimum(1.0, _CLIP / r_norm)


if __name__ == "__main__":
    in_features, out_features = 256, 128      # lane-dense feature dims (multiples of 128)
    batch = 512                               # two 256-row batch tiles -> both v7x TCs busy

    key = jax.random.PRNGKey(0)
    kx, kw, kb = jax.random.split(key, 3)

    # Module init: w ~ U(-k, k) with k = (1/in_features)**0.5 ; b is a learnable parameter
    # (init zeros in the module) -- a small non-zero b is used to exercise mob_add fully.
    kinit = (1.0 / in_features) ** 0.5
    w = jax.random.uniform(kw, (in_features, out_features), jnp.float32,
                           minval=-kinit, maxval=kinit)
    b = 0.05 * jax.random.normal(kb, (out_features,), jnp.float32)

    # Inputs: points strictly inside the unit Poincare ball (row norms ~ 0.5).
    x = 0.03 * jax.random.normal(kx, (batch, in_features), jnp.float32)

    out = mobius_linear(x, w, b, tm=256, tk=128)   # tk=128 -> exercises 2-step K accumulation
    out = jax.block_until_ready(out)

    ref = mobius_linear_ref(x, w, b)
    assert out.shape == (batch, out_features)
    assert bool(jnp.all(jnp.isfinite(out)))
    max_err = float(jnp.max(jnp.abs(out - ref)))
    assert jnp.allclose(out, ref, atol=2e-3, rtol=2e-2), f"mismatch vs reference: {max_err}"

    print("KERNEL_OK")
</pallas_src>

<mosaic_0001>
module attributes {stable_mosaic.version = 11 : i64} {
  func.func @mobius_linear_kernel(%arg0: i32, %arg1: i32, %arg2: memref<256x128xf32, #tpu.memory_space<vmem>>, %arg3: memref<128x128xbf16, #tpu.memory_space<vmem>>, %arg4: memref<1x128xf32, #tpu.memory_space<vmem>>, %arg5: memref<1xf32, #tpu.memory_space<smem>>, %arg6: memref<256x128xf32, #tpu.memory_space<vmem>>, %arg7: memref<256x128xf32, #tpu.memory_space<vmem>>, %arg8: memref<256x1xf32, #tpu.memory_space<vmem>>) attributes {dimension_semantics = [#tpu.dimension_semantics<parallel>, #tpu.dimension_semantics<arbitrary>], iteration_bounds = array<i64: 2, 2>, scalar_prefetch = 0 : i64, scratch_operands = 2 : i64, tpu.core_type = #tpu.core_type<tc>, window_params = [{transform_indices = @transform_0, window_bounds = array<i64: 256, 128>}, {transform_indices = @transform_1, window_bounds = array<i64: 128, 128>}, {pipeline_mode = #tpu.pipeline_mode<synchronous>, transform_indices = @transform_2, window_bounds = array<i64: 1, 128>}, {transform_indices = @transform_3, window_bounds = array<i64: 1>}, {transform_indices = @transform_4, window_bounds = array<i64: 256, 128>}]} {
    %c0_i32 = arith.constant 0 : i32
    %0 = arith.cmpi eq, %arg1, %c0_i32 : i32
    %1 = arith.extui %0 : i1 to i32
    %c0_i32_0 = arith.constant 0 : i32
    %2 = arith.cmpi ne, %1, %c0_i32_0 : i32
    scf.if %2 {
      %cst_14 = arith.constant 0.000000e+00 : f32
      %19 = vector.broadcast %cst_14 : f32 to vector<256x128xf32>
      %c0_15 = arith.constant 0 : index
      %c0_16 = arith.constant 0 : index
      %20 = vector.load %arg7[%c0_15, %c0_16] : memref<256x128xf32, #tpu.memory_space<vmem>>, vector<256x128xf32>
      tpu.vector_store %arg7[%c0_15, %c0_16], %19 {strides = array<i32>} : memref<256x128xf32, #tpu.memory_space<vmem>>, vector<256x128xf32>,
      %cst_17 = arith.constant 0.000000e+00 : f32
      %21 = vector.broadcast %cst_17 : f32 to vector<256x1xf32>
      %c0_18 = arith.constant 0 : index
      %c0_19 = arith.constant 0 : index
      %22 = vector.load %arg8[%c0_18, %c0_19] : memref<256x1xf32, #tpu.memory_space<vmem>>, vector<256x1xf32>
      tpu.vector_store %arg8[%c0_18, %c0_19], %21 {strides = array<i32>} : memref<256x1xf32, #tpu.memory_space<vmem>>, vector<256x1xf32>,
    } else {
    }
    %c0 = arith.constant 0 : index
    %c0_1 = arith.constant 0 : index
    %3 = vector.load %arg2[%c0, %c0_1] : memref<256x128xf32, #tpu.memory_space<vmem>>, vector<256x128xf32>
    %c0_2 = arith.constant 0 : index
    %c0_3 = arith.constant 0 : index
    %4 = vector.load %arg7[%c0_2, %c0_3] : memref<256x128xf32, #tpu.memory_space<vmem>>, vector<256x128xf32>
    %5 = arith.truncf %3 : vector<256x128xf32> to vector<256x128xbf16>
    %c0_4 = arith.constant 0 : index
    %c0_5 = arith.constant 0 : index
    %6 = vector.load %arg3[%c0_4, %c0_5] : memref<128x128xbf16, #tpu.memory_space<vmem>>, vector<128x128xbf16>
    %cst = arith.constant dense<0.000000e+00> : vector<256x128xf32>
    %7 = tpu.matmul %5, %6, %cst {dimension_numbers = #tpu.dot_dimension_numbers<[1], [0], [0], [1], [0, 0, 1, 1], [], []>} : vector<256x128xbf16>, vector<128x128xbf16>, vector<256x128xf32> -> vector<256x128xf32>
    %8 = arith.addf %4, %7 : vector<256x128xf32>
    %c0_6 = arith.constant 0 : index
    %c0_7 = arith.constant 0 : index
    %9 = vector.load %arg7[%c0_6, %c0_7] : memref<256x128xf32, #tpu.memory_space<vmem>>, vector<256x128xf32>
    tpu.vector_store %arg7[%c0_6, %c0_7], %8 {strides = array<i32>} : memref<256x128xf32, #tpu.memory_space<vmem>>, vector<256x128xf32>,
    %c0_8 = arith.constant 0 : index
    %c0_9 = arith.constant 0 : index
    %10 = vector.load %arg8[%c0_8, %c0_9] : memref<256x1xf32, #tpu.memory_space<vmem>>, vector<256x1xf32>
    %11 = arith.mulf %3, %3 : vector<256x128xf32>
    %cst_10 = arith.constant dense<0.000000e+00> : vector<256xf32>
    %12 = vector.multi_reduction <add>, %11, %cst_10 [1] : vector<256x128xf32> to vector<256xf32>
    %13 = vector.shape_cast %12 : vector<256xf32> to vector<256x1xf32>
    %14 = arith.addf %10, %13 : vector<256x1xf32>
    %c0_11 = arith.constant 0 : index
    %c0_12 = arith.constant 0 : index
    %15 = vector.load %arg8[%c0_11, %c0_12] : memref<256x1xf32, #tpu.memory_space<vmem>>, vector<256x1xf32>
    tpu.vector_store %arg8[%c0_11, %c0_12], %14 {strides = array<i32>} : memref<256x1xf32, #tpu.memory_space<vmem>>, vector<256x1xf32>,
    %c1_i32 = arith.constant 1 : i32
    %16 = arith.cmpi eq, %arg1, %c1_i32 : i32
    %17 = arith.extui %16 : i1 to i32
    %c0_i32_13 = arith.constant 0 : i32
    %18 = arith.cmpi ne, %17, %c0_i32_13 : i32
    scf.if %18 {
      %c0_14 = arith.constant 0 : index
      %c0_15 = arith.constant 0 : index
      %19 = vector.load %arg7[%c0_14, %c0_15] : memref<256x128xf32, #tpu.memory_space<vmem>>, vector<256x128xf32>
      %c0_16 = arith.constant 0 : index
      %c0_17 = arith.constant 0 : index
      %20 = vector.load %arg8[%c0_16, %c0_17] : memref<256x1xf32, #tpu.memory_space<vmem>>, vector<256x1xf32>
      %21 = math.sqrt %20 : vector<256x1xf32>
      %cst_18 = arith.constant 1.000000e-07 : f32
      %22 = vector.broadcast %cst_18 : f32 to vector<256x1xf32>
      %23 = arith.maximumf %21, %22 : vector<256x1xf32>
      %24 = arith.mulf %19, %19 : vector<256x128xf32>
      %cst_19 = arith.constant dense<0.000000e+00> : vector<256xf32>
      %25 = vector.multi_reduction <add>, %24, %cst_19 [1] : vector<256x128xf32> to vector<256xf32>
      %26 = vector.shape_cast %25 : vector<256xf32> to vector<256x1xf32>
      %27 = math.sqrt %26 : vector<256x1xf32>
      %cst_20 = arith.constant 1.000000e-07 : f32
      %28 = vector.broadcast %cst_20 : f32 to vector<256x1xf32>
      %29 = arith.maximumf %27, %28 : vector<256x1xf32>
      %30 = tpu.reciprocal %29 {approx = true} : vector<256x1xf32> -> vector<256x1xf32>
      %31 = tpu.reciprocal %23 {approx = true} : vector<256x1xf32> -> vector<256x1xf32>
      %32 = arith.mulf %29, %31 : vector<256x1xf32>
      %cst_21 = arith.constant 1.000000e+00 : f32
      %33 = vector.broadcast %cst_21 : f32 to vector<256x1xf32>
      %34 = arith.mulf %33, %23 : vector<256x1xf32>
      %cst_22 = arith.constant 0.999998986 : f32
      %35 = vector.broadcast %cst_22 : f32 to vector<256x1xf32>
      %36 = arith.minimumf %34, %35 : vector<256x1xf32>
      %cst_23 = arith.constant 1.000000e+00 : f32
      %37 = vector.broadcast %cst_23 : f32 to vector<256x1xf32>
      %38 = arith.addf %37, %36 : vector<256x1xf32>
      %cst_24 = arith.constant 1.000000e+00 : f32
      %39 = vector.broadcast %cst_24 : f32 to vector<256x1xf32>
      %40 = arith.subf %39, %36 : vector<256x1xf32>
      %41 = arith.divf %38, %40 : vector<256x1xf32>
      %42 = math.log %41 : vector<256x1xf32>
      %cst_25 = arith.constant 5.000000e-01 : f32
      %43 = vector.broadcast %cst_25 : f32 to vector<256x1xf32>
      %44 = arith.mulf %43, %42 : vector<256x1xf32>
      %45 = arith.mulf %32, %44 : vector<256x1xf32>
      %cst_26 = arith.constant -1.500000e+01 : f32
      %cst_27 = arith.constant 1.500000e+01 : f32
      %46 = vector.broadcast %cst_26 : f32 to vector<256x1xf32>
      %47 = arith.maximumf %46, %45 : vector<256x1xf32>
      %48 = vector.broadcast %cst_27 : f32 to vector<256x1xf32>
      %49 = arith.minimumf %48, %47 : vector<256x1xf32>
      %50 = math.tanh %49 : vector<256x1xf32>
      %cst_28 = arith.constant 1.000000e+00 : f32
      %51 = vector.broadcast %cst_28 : f32 to vector<256x1xf32>
      %52 = arith.divf %50, %51 : vector<256x1xf32>
      %cst_29 = arith.constant 0.999989986 : f32
      %53 = vector.broadcast %cst_29 : f32 to vector<256x1xf32>
      %54 = arith.minimumf %52, %53 : vector<256x1xf32>
      %55 = arith.mulf %54, %30 : vector<256x1xf32>
      %56 = vector.broadcast %55 : vector<256x1xf32> to vector<256x128xf32>
      %57 = arith.mulf %19, %56 : vector<256x128xf32>
      %c0_30 = arith.constant 0 : index
      %c0_31 = arith.constant 0 : index
      %58 = vector.load %arg4[%c0_30, %c0_31] : memref<1x128xf32, #tpu.memory_space<vmem>>, vector<1x128xf32>
      %c0_32 = arith.constant 0 : index
      %59 = memref.load %arg5[%c0_32] : memref<1xf32, #tpu.memory_space<smem>>
      %60 = vector.broadcast %58 : vector<1x128xf32> to vector<256x128xf32>
      %61 = arith.mulf %57, %60 : vector<256x128xf32>
      %cst_33 = arith.constant dense<0.000000e+00> : vector<256xf32>
      %62 = vector.multi_reduction <add>, %61, %cst_33 [1] : vector<256x128xf32> to vector<256xf32>
      %63 = vector.shape_cast %62 : vector<256xf32> to vector<256x1xf32>
      %cst_34 = arith.constant 2.000000e+00 : f32
      %64 = vector.broadcast %cst_34 : f32 to vector<256x1xf32>
      %65 = arith.mulf %64, %63 : vector<256x1xf32>
      %cst_35 = arith.constant 1.000000e+00 : f32
      %66 = vector.broadcast %cst_35 : f32 to vector<256x1xf32>
      %67 = arith.mulf %66, %54 : vector<256x1xf32>
      %68 = arith.mulf %67, %54 : vector<256x1xf32>
      %cst_36 = arith.constant 1.000000e+00 : f32
      %69 = vector.broadcast %cst_36 : f32 to vector<256x1xf32>
      %70 = arith.addf %69, %65 : vector<256x1xf32>
      %71 = vector.broadcast %59 : f32 to vector<256x1xf32>
      %72 = arith.mulf %71, %68 : vector<256x1xf32>
      %73 = arith.addf %70, %72 : vector<256x1xf32>
      %74 = tpu.reciprocal %73 {approx = true} : vector<256x1xf32> -> vector<256x1xf32>
      %cst_37 = arith.constant 1.000000e+00 : f32
      %75 = vector.broadcast %cst_37 : f32 to vector<256x1xf32>
      %76 = arith.addf %75, %65 : vector<256x1xf32>
      %77 = vector.broadcast %59 : f32 to vector<256x1xf32>
      %78 = arith.addf %76, %77 : vector<256x1xf32>
      %79 = arith.mulf %78, %74 : vector<256x1xf32>
      %80 = vector.broadcast %79 : vector<256x1xf32> to vector<256x128xf32>
      %81 = arith.mulf %80, %57 : vector<256x128xf32>
      %cst_38 = arith.constant 1.000000e+00 : f32
      %82 = vector.broadcast %cst_38 : f32 to vector<256x1xf32>
      %83 = arith.subf %82, %68 : vector<256x1xf32>
      %84 = arith.mulf %83, %74 : vector<256x1xf32>
      %85 = vector.broadcast %84 : vector<256x1xf32> to vector<256x128xf32>
      %86 = vector.broadcast %58 : vector<1x128xf32> to vector<256x128xf32>
      %87 = arith.mulf %85, %86 : vector<256x128xf32>
      %88 = arith.addf %81, %87 : vector<256x128xf32>
      %89 = arith.mulf %88, %88 : vector<256x128xf32>
      %cst_39 = arith.constant dense<0.000000e+00> : vector<256xf32>
      %90 = vector.multi_reduction <add>, %89, %cst_39 [1] : vector<256x128xf32> to vector<256xf32>
      %91 = vector.shape_cast %90 : vector<256xf32> to vector<256x1xf32>
      %92 = math.sqrt %91 : vector<256x1xf32>
      %cst_40 = arith.constant 1.000000e-07 : f32
      %93 = vector.broadcast %cst_40 : f32 to vector<256x1xf32>
      %94 = arith.maximumf %92, %93 : vector<256x1xf32>
      %95 = tpu.reciprocal %94 {approx = true} : vector<256x1xf32> -> vector<256x1xf32>
      %cst_41 = arith.constant 0.999989986 : f32
      %96 = vector.broadcast %cst_41 : f32 to vector<256x1xf32>
      %97 = arith.mulf %96, %95 : vector<256x1xf32>
      %cst_42 = arith.constant 1.000000e+00 : f32
      %98 = vector.broadcast %cst_42 : f32 to vector<256x1xf32>
      %99 = arith.minimumf %98, %97 : vector<256x1xf32>
      %100 = vector.broadcast %99 : vector<256x1xf32> to vector<256x128xf32>
      %101 = arith.mulf %88, %100 : vector<256x128xf32>
      %c0_43 = arith.constant 0 : index
      %c0_44 = arith.constant 0 : index
      %102 = vector.load %arg6[%c0_43, %c0_44] : memref<256x128xf32, #tpu.memory_space<vmem>>, vector<256x128xf32>
      tpu.vector_store %arg6[%c0_43, %c0_44], %101 {strides = array<i32>} : memref<256x128xf32, #tpu.memory_space<vmem>>, vector<256x128xf32>,
    } else {
    }
    return
  }
  func.func @transform_0(%arg0: i32, %arg1: i32) -> (i32, i32) {
    %c0_i32 = arith.constant 0 : i32
    return %arg0, %arg1 : i32, i32
  }
  func.func @transform_1(%arg0: i32, %arg1: i32) -> (i32, i32) {
    %c0_i32 = arith.constant 0 : i32
    %c0_i32_0 = arith.constant 0 : i32
    return %arg1, %c0_i32 : i32, i32
  }
  func.func @transform_2(%arg0: i32, %arg1: i32) -> (i32, i32) {
    %c0_i32 = arith.constant 0 : i32
    %c0_i32_0 = arith.constant 0 : i32
    %c0_i32_1 = arith.constant 0 : i32
    return %c0_i32, %c0_i32_0 : i32, i32
  }
  func.func @transform_3(%arg0: i32, %arg1: i32) -> i32 {
    %c0_i32 = arith.constant 0 : i32
    %c0_i32_0 = arith.constant 0 : i32
    return %c0_i32 : i32
  }
  func.func @transform_4(%arg0: i32, %arg1: i32) -> (i32, i32) {
    %c0_i32 = arith.constant 0 : i32
    %c0_i32_0 = arith.constant 0 : i32
    return %arg0, %c0_i32 : i32, i32
  }
}

module attributes {stable_mosaic.version = 11 : i64} {
  func.func @mobius_linear_kernel(%arg0: i32, %arg1: i32, %arg2: memref<256x128xf32, #tpu.memory_space<vmem>>, %arg3: memref<128x128xbf16, #tpu.memory_space<vmem>>, %arg4: memref<1x128xf32, #tpu.memory_space<vmem>>, %arg5: memref<1xf32, #tpu.memory_space<smem>>, %arg6: memref<256x128xf32, #tpu.memory_space<vmem>>, %arg7: memref<256x128xf32, #tpu.memory_space<vmem>>, %arg8: memref<256x1xf32, #tpu.memory_space<vmem>>) attributes {dimension_semantics = [#tpu.dimension_semantics<parallel>, #tpu.dimension_semantics<arbitrary>], iteration_bounds = array<i64: 2, 2>, scalar_prefetch = 0 : i64, scratch_operands = 2 : i64, tpu.core_type = #tpu.core_type<tc>, window_params = [{transform_indices = @transform_0, window_bounds = array<i64: 256, 128>}, {transform_indices = @transform_1, window_bounds = array<i64: 128, 128>}, {pipeline_mode = #tpu.pipeline_mode<synchronous>, transform_indices = @transform_2, window_bounds = array<i64: 1, 128>}, {transform_indices = @transform_3, window_bounds = array<i64: 1>}, {transform_indices = @transform_4, window_bounds = array<i64: 256, 128>}]} {
    %c0_i32 = arith.constant 0 : i32
    %0 = arith.cmpi eq, %arg1, %c0_i32 : i32
    %1 = arith.extui %0 : i1 to i32
    %c0_i32_0 = arith.constant 0 : i32
    %2 = arith.cmpi ne, %1, %c0_i32_0 : i32
    scf.if %2 {
      %cst_14 = arith.constant 0.000000e+00 : f32
      %19 = vector.broadcast %cst_14 : f32 to vector<256x128xf32>
      %c0_15 = arith.constant 0 : index
      %c0_16 = arith.constant 0 : index
      %20 = vector.load %arg7[%c0_15, %c0_16] : memref<256x128xf32, #tpu.memory_space<vmem>>, vector<256x128xf32>
      tpu.vector_store %arg7[%c0_15, %c0_16], %19 {strides = array<i32>} : memref<256x128xf32, #tpu.memory_space<vmem>>, vector<256x128xf32>,
      %cst_17 = arith.constant 0.000000e+00 : f32
      %21 = vector.broadcast %cst_17 : f32 to vector<256x1xf32>
      %c0_18 = arith.constant 0 : index
      %c0_19 = arith.constant 0 : index
      %22 = vector.load %arg8[%c0_18, %c0_19] : memref<256x1xf32, #tpu.memory_space<vmem>>, vector<256x1xf32>
      tpu.vector_store %arg8[%c0_18, %c0_19], %21 {strides = array<i32>} : memref<256x1xf32, #tpu.memory_space<vmem>>, vector<256x1xf32>,
    } else {
    }
    %c0 = arith.constant 0 : index
    %c0_1 = arith.constant 0 : index
    %3 = vector.load %arg2[%c0, %c0_1] : memref<256x128xf32, #tpu.memory_space<vmem>>, vector<256x128xf32>
    %c0_2 = arith.constant 0 : index
    %c0_3 = arith.constant 0 : index
    %4 = vector.load %arg7[%c0_2, %c0_3] : memref<256x128xf32, #tpu.memory_space<vmem>>, vector<256x128xf32>
    %5 = arith.truncf %3 : vector<256x128xf32> to vector<256x128xbf16>
    %c0_4 = arith.constant 0 : index
    %c0_5 = arith.constant 0 : index
    %6 = vector.load %arg3[%c0_4, %c0_5] : memref<128x128xbf16, #tpu.memory_space<vmem>>, vector<128x128xbf16>
    %cst = arith.constant dense<0.000000e+00> : vector<256x128xf32>
    %7 = tpu.matmul %5, %6, %cst {dimension_numbers = #tpu.dot_dimension_numbers<[1], [0], [0], [1], [0, 0, 1, 1], [], []>} : vector<256x128xbf16>, vector<128x128xbf16>, vector<256x128xf32> -> vector<256x128xf32>
    %8 = arith.addf %4, %7 : vector<256x128xf32>
    %c0_6 = arith.constant 0 : index
    %c0_7 = arith.constant 0 : index
    %9 = vector.load %arg7[%c0_6, %c0_7] : memref<256x128xf32, #tpu.memory_space<vmem>>, vector<256x128xf32>
    tpu.vector_store %arg7[%c0_6, %c0_7], %8 {strides = array<i32>} : memref<256x128xf32, #tpu.memory_space<vmem>>, vector<256x128xf32>,
    %c0_8 = arith.constant 0 : index
    %c0_9 = arith.constant 0 : index
    %10 = vector.load %arg8[%c0_8, %c0_9] : memref<256x1xf32, #tpu.memory_space<vmem>>, vector<256x1xf32>
    %11 = arith.mulf %3, %3 : vector<256x128xf32>
    %cst_10 = arith.constant dense<0.000000e+00> : vector<256xf32>
    %12 = vector.multi_reduction <add>, %11, %cst_10 [1] : vector<256x128xf32> to vector<256xf32>
    %13 = vector.shape_cast %12 : vector<256xf32> to vector<256x1xf32>
    %14 = arith.addf %10, %13 : vector<256x1xf32>
    %c0_11 = arith.constant 0 : index
    %c0_12 = arith.constant 0 : index
    %15 = vector.load %arg8[%c0_11, %c0_12] : memref<256x1xf32, #tpu.memory_space<vmem>>, vector<256x1xf32>
    tpu.vector_store %arg8[%c0_11, %c0_12], %14 {strides = array<i32>} : memref<256x1xf32, #tpu.memory_space<vmem>>, vector<256x1xf32>,
    %c1_i32 = arith.constant 1 : i32
    %16 = arith.cmpi eq, %arg1, %c1_i32 : i32
    %17 = arith.extui %16 : i1 to i32
    %c0_i32_13 = arith.constant 0 : i32
    %18 = arith.cmpi ne, %17, %c0_i32_13 : i32
    scf.if %18 {
      %c0_14 = arith.constant 0 : index
      %c0_15 = arith.constant 0 : index
      %19 = vector.load %arg7[%c0_14, %c0_15] : memref<256x128xf32, #tpu.memory_space<vmem>>, vector<256x128xf32>
      %c0_16 = arith.constant 0 : index
      %c0_17 = arith.constant 0 : index
      %20 = vector.load %arg8[%c0_16, %c0_17] : memref<256x1xf32, #tpu.memory_space<vmem>>, vector<256x1xf32>
      %21 = math.sqrt %20 : vector<256x1xf32>
      %cst_18 = arith.constant 1.000000e-07 : f32
      %22 = vector.broadcast %cst_18 : f32 to vector<256x1xf32>
      %23 = arith.maximumf %21, %22 : vector<256x1xf32>
      %24 = arith.mulf %19, %19 : vector<256x128xf32>
      %cst_19 = arith.constant dense<0.000000e+00> : vector<256xf32>
      %25 = vector.multi_reduction <add>, %24, %cst_19 [1] : vector<256x128xf32> to vector<256xf32>
      %26 = vector.shape_cast %25 : vector<256xf32> to vector<256x1xf32>
      %27 = math.sqrt %26 : vector<256x1xf32>
      %cst_20 = arith.constant 1.000000e-07 : f32
      %28 = vector.broadcast %cst_20 : f32 to vector<256x1xf32>
      %29 = arith.maximumf %27, %28 : vector<256x1xf32>
      %30 = tpu.reciprocal %29 {approx = true} : vector<256x1xf32> -> vector<256x1xf32>
      %31 = tpu.reciprocal %23 {approx = true} : vector<256x1xf32> -> vector<256x1xf32>
      %32 = arith.mulf %29, %31 : vector<256x1xf32>
      %cst_21 = arith.constant 1.000000e+00 : f32
      %33 = vector.broadcast %cst_21 : f32 to vector<256x1xf32>
      %34 = arith.mulf %33, %23 : vector<256x1xf32>
      %cst_22 = arith.constant 0.999998986 : f32
      %35 = vector.broadcast %cst_22 : f32 to vector<256x1xf32>
      %36 = arith.minimumf %34, %35 : vector<256x1xf32>
      %cst_23 = arith.constant 1.000000e+00 : f32
      %37 = vector.broadcast %cst_23 : f32 to vector<256x1xf32>
      %38 = arith.addf %37, %36 : vector<256x1xf32>
      %cst_24 = arith.constant 1.000000e+00 : f32
      %39 = vector.broadcast %cst_24 : f32 to vector<256x1xf32>
      %40 = arith.subf %39, %36 : vector<256x1xf32>
      %41 = arith.divf %38, %40 : vector<256x1xf32>
      %42 = math.log %41 : vector<256x1xf32>
      %cst_25 = arith.constant 5.000000e-01 : f32
      %43 = vector.broadcast %cst_25 : f32 to vector<256x1xf32>
      %44 = arith.mulf %43, %42 : vector<256x1xf32>
      %45 = arith.mulf %32, %44 : vector<256x1xf32>
      %cst_26 = arith.constant -1.500000e+01 : f32
      %cst_27 = arith.constant 1.500000e+01 : f32
      %46 = vector.broadcast %cst_26 : f32 to vector<256x1xf32>
      %47 = arith.maximumf %46, %45 : vector<256x1xf32>
      %48 = vector.broadcast %cst_27 : f32 to vector<256x1xf32>
      %49 = arith.minimumf %48, %47 : vector<256x1xf32>
      %50 = math.tanh %49 : vector<256x1xf32>
      %cst_28 = arith.constant 1.000000e+00 : f32
      %51 = vector.broadcast %cst_28 : f32 to vector<256x1xf32>
      %52 = arith.divf %50, %51 : vector<256x1xf32>
      %cst_29 = arith.constant 0.999989986 : f32
      %53 = vector.broadcast %cst_29 : f32 to vector<256x1xf32>
      %54 = arith.minimumf %52, %53 : vector<256x1xf32>
      %55 = arith.mulf %54, %30 : vector<256x1xf32>
      %56 = vector.broadcast %55 : vector<256x1xf32> to vector<256x128xf32>
      %57 = arith.mulf %19, %56 : vector<256x128xf32>
      %c0_30 = arith.constant 0 : index
      %c0_31 = arith.constant 0 : index
      %58 = vector.load %arg4[%c0_30, %c0_31] : memref<1x128xf32, #tpu.memory_space<vmem>>, vector<1x128xf32>
      %c0_32 = arith.constant 0 : index
      %59 = memref.load %arg5[%c0_32] : memref<1xf32, #tpu.memory_space<smem>>
      %60 = vector.broadcast %58 : vector<1x128xf32> to vector<256x128xf32>
      %61 = arith.mulf %57, %60 : vector<256x128xf32>
      %cst_33 = arith.constant dense<0.000000e+00> : vector<256xf32>
      %62 = vector.multi_reduction <add>, %61, %cst_33 [1] : vector<256x128xf32> to vector<256xf32>
      %63 = vector.shape_cast %62 : vector<256xf32> to vector<256x1xf32>
      %cst_34 = arith.constant 2.000000e+00 : f32
      %64 = vector.broadcast %cst_34 : f32 to vector<256x1xf32>
      %65 = arith.mulf %64, %63 : vector<256x1xf32>
      %cst_35 = arith.constant 1.000000e+00 : f32
      %66 = vector.broadcast %cst_35 : f32 to vector<256x1xf32>
      %67 = arith.mulf %66, %54 : vector<256x1xf32>
      %68 = arith.mulf %67, %54 : vector<256x1xf32>
      %cst_36 = arith.constant 1.000000e+00 : f32
      %69 = vector.broadcast %cst_36 : f32 to vector<256x1xf32>
      %70 = arith.addf %69, %65 : vector<256x1xf32>
      %71 = vector.broadcast %59 : f32 to vector<256x1xf32>
      %72 = arith.mulf %71, %68 : vector<256x1xf32>
      %73 = arith.addf %70, %72 : vector<256x1xf32>
      %74 = tpu.reciprocal %73 {approx = true} : vector<256x1xf32> -> vector<256x1xf32>
      %cst_37 = arith.constant 1.000000e+00 : f32
      %75 = vector.broadcast %cst_37 : f32 to vector<256x1xf32>
      %76 = arith.addf %75, %65 : vector<256x1xf32>
      %77 = vector.broadcast %59 : f32 to vector<256x1xf32>
      %78 = arith.addf %76, %77 : vector<256x1xf32>
      %79 = arith.mulf %78, %74 : vector<256x1xf32>
      %80 = vector.broadcast %79 : vector<256x1xf32> to vector<256x128xf32>
      %81 = arith.mulf %80, %57 : vector<256x128xf32>
      %cst_38 = arith.constant 1.000000e+00 : f32
      %82 = vector.broadcast %cst_38 : f32 to vector<256x1xf32>
      %83 = arith.subf %82, %68 : vector<256x1xf32>
      %84 = arith.mulf %83, %74 : vector<256x1xf32>
      %85 = vector.broadcast %84 : vector<256x1xf32> to vector<256x128xf32>
      %86 = vector.broadcast %58 : vector<1x128xf32> to vector<256x128xf32>
      %87 = arith.mulf %85, %86 : vector<256x128xf32>
      %88 = arith.addf %81, %87 : vector<256x128xf32>
      %89 = arith.mulf %88, %88 : vector<256x128xf32>
      %cst_39 = arith.constant dense<0.000000e+00> : vector<256xf32>
      %90 = vector.multi_reduction <add>, %89, %cst_39 [1] : vector<256x128xf32> to vector<256xf32>
      %91 = vector.shape_cast %90 : vector<256xf32> to vector<256x1xf32>
      %92 = math.sqrt %91 : vector<256x1xf32>
      %cst_40 = arith.constant 1.000000e-07 : f32
      %93 = vector.broadcast %cst_40 : f32 to vector<256x1xf32>
      %94 = arith.maximumf %92, %93 : vector<256x1xf32>
      %95 = tpu.reciprocal %94 {approx = true} : vector<256x1xf32> -> vector<256x1xf32>
      %cst_41 = arith.constant 0.999989986 : f32
      %96 = vector.broadcast %cst_41 : f32 to vector<256x1xf32>
      %97 = arith.mulf %96, %95 : vector<256x1xf32>
      %cst_42 = arith.constant 1.000000e+00 : f32
      %98 = vector.broadcast %cst_42 : f32 to vector<256x1xf32>
      %99 = arith.minimumf %98, %97 : vector<256x1xf32>
      %100 = vector.broadcast %99 : vector<256x1xf32> to vector<256x128xf32>
      %101 = arith.mulf %88, %100 : vector<256x128xf32>
      %c0_43 = arith.constant 0 : index
      %c0_44 = arith.constant 0 : index
      %102 = vector.load %arg6[%c0_43, %c0_44] : memref<256x128xf32, #tpu.memory_space<vmem>>, vector<256x128xf32>
      tpu.vector_store %arg6[%c0_43, %c0_44], %101 {strides = array<i32>} : memref<256x128xf32, #tpu.memory_space<vmem>>, vector<256x128xf32>,
    } else {
    }
    return
  }
  func.func @transform_0(%arg0: i32, %arg1: i32) -> (i32, i32) {
    %c0_i32 = arith.constant 0 : i32
    return %arg0, %arg1 : i32, i32
  }
  func.func @transform_1(%arg0: i32, %arg1: i32) -> (i32, i32) {
    %c0_i32 = arith.constant 0 : i32
    %c0_i32_0 = arith.constant 0 : i32
    return %arg1, %c0_i32 : i32, i32
  }
  func.func @transform_2(%arg0: i32, %arg1: i32) -> (i32, i32) {
    %c0_i32 = arith.constant 0 : i32
    %c0_i32_0 = arith.constant 0 : i32
    %c0_i32_1 = arith.constant 0 : i32
    return %c0_i32, %c0_i32_0 : i32, i32
  }
  func.func @transform_3(%arg0: i32, %arg1: i32) -> i32 {
    %c0_i32 = arith.constant 0 : i32
    %c0_i32_0 = arith.constant 0 : i32
    return %c0_i32 : i32
  }
  func.func @transform_4(%arg0: i32, %arg1: i32) -> (i32, i32) {
    %c0_i32 = arith.constant 0 : i32
    %c0_i32_0 = arith.constant 0 : i32
    return %arg0, %c0_i32 : i32, i32
  }
}

</mosaic_0001>

<bundles_post_ra>
// kernel: _mobius_linear_impl.1
= control target key start
LH: loop header
LB: loop body
LE: loop exit
PB: predicated region body
PF: predicated region fallthrough
CT: control target
= control target key end

     0   :  { %s7876_s0 = inlined_call_operand.hbm [shape: f32[512,256], index: 0, kind: input, shape index: {}]   ;;  %s7877_s1 = inlined_call_operand.vmem [shape: bf16[256,128], index: 1, kind: input, shape index: {}]   ;;  %s7878_s2 = inlined_call_operand.vmem [shape: f32[1,128], index: 2, kind: input, shape index: {}]   ;;  %s7879_s3 = inlined_call_operand.<no memory space> [shape: f32[1], index: 3, kind: input, shape index: {}]   ;;  %s7880_s4 = inlined_call_operand.hbm [shape: f32[512,128], index: 4, kind: output, shape index: {}]  }
   0x1   :  { %9 = sst [smem:[#allocation4]] %s7879_s3 }
   0x2   :  { %10 = vsyncpa [#allocation6], 0 }
   0x3   :  { %12 = vsyncpa [#allocation6 + $0x1], 0 }
   0x4   :  { %13 = vsyncpa [#allocation7], 0 }
   0x5   :  { %15 = vsyncpa [#allocation7 + $0x1], 0  ;;  %s4899_s17 = smov 0   ;;  %s4901_s18 = smov 0  }
   0x6   :  { %s4903_s19 = smov 0   ;;  %s4905_s20 = smov 0  }
   0x7   :  { %s4907_s21 = smov 0   ;;  %s4909_s22 = smov 0  }
   0x8   :  { %s4911_s23 = smov 0   ;;  %s4913_s24 = smov 0  }
   0x9   :  { %s4915_s3 = smov 0   ;;  %s4917_s25 = smov 0  }
   0xa   :  { %s4919_s26 = smov 0  }
   0xb LB: > { %7918 = sst [smem:[#allocation11_spill]] %s4840_s22  ;;  %s3766_s27 = sadd.s32 4294967295, %s4860_s26   ;;  %s4860_s26 = sphi %s4919_s26, %s21_s26   ;;  %s4856_s25 = sphi %s4917_s25, %s8084_s25   ;;  %s4852_s3 = sphi %s4915_s3, %s8083_s3   ;;  %s4848_s24 = sphi %s4913_s24, %s8082_s24   ;;  %s4844_s23 = sphi %s4911_s23, %s8081_s23   ;;  %s4840_s22 = sphi %s4909_s22, %s8073_s22   ;;  %s4836_s21 = sphi %s4907_s21, %s8080_s21   ;;  %s4832_s20 = sphi %s4905_s20, %s8079_s20   ;;  %s4828_s19 = sphi %s4903_s19, %s8078_s19   ;;  %s4824_s18 = sphi %s4901_s18, %s8077_s18   ;;  %s4820_s17 = sphi %s4899_s17, %s8076_s17  }
   0xc   : > { %s3767_s28 = sadd.s32 4294967294, %s4860_s26   ;;  %s30_s29 = sadd.s32 1, %s4852_s3 }
   0xd   : > { %s33_s30 = sadd.s32 1, %s4856_s25  ;;  %p31_p0 = scmp.ge.s32.totalorder %s30_s29, 2 }
   0xe   : > { %s42_s5 = sadd.s32 1, %s4840_s22  ;;  %p49_p1 = scmp.ne.s32.totalorder %s4840_s22, %s4836_s21 }
   0xf   : > { %p50_p2 = scmp.eq.s32.totalorder %s4860_s26, 0  ;;  %s8086_s29 = smov (%p31_p0, %s30_s29), 0 }
  0x10   : > { %7919 = sst [smem:[#allocation12_spill]] %s8086_s29  ;;  %s8088_s30 = smov (!%p31_p0, %s33_s30), %s4856_s25 }
  0x11   : > { %s38_s6 = ssub.s32 %s4852_s3, %s8086_s29  ;;  %p4965_p3 = por %p50_p2, %p49_p1 }
  0x12   : > { %p35_p4 = scmp.ge.s32.totalorder %s8088_s30, 2  ;;  %p55_p5 = scmp.ne.s32.totalorder %s4836_s21, %s4832_s20 }
  0x13   : > { %p56_p6 = scmp.eq.s32.totalorder %s3766_s27, 0  ;;  %s136_s8 = sadd.s32 1, %s4828_s19 }
  0x14   : > { %s8090_s30 = smov (%p35_p4, %s8088_s30), 0  ;;  %p146_p8 = scmp.ne.s32.totalorder %s4828_s19, %s4824_s18 }
  0x15   : > { %7921 = sst [smem:[#allocation13_spill]] %s8090_s30  ;;  %p4973_p7 = por %p56_p6, %p55_p5 }
  0x16   : > { %s37_s10 = ssub.s32 %s4856_s25, %s8090_s30  ;;  %p147_p9 = scmp.eq.s32.totalorder %s3766_s27, 3 }
  0x17   : > { %s39_s11 = sor.u32 %s38_s6, %s37_s10  ;;  %p134_p10 = scmp.eq.s32.totalorder %s37_s10, 0 }
  0x18   : > { %p40_p11 = scmp.eq.s32.totalorder %s39_s11, 0  ;;  %p4981_p12 = por %p147_p9, %p146_p8 }
  0x19   : > { %s4986_s13 = scalar_select %p134_p10, %s4828_s19, %s136_s8  }
  0x1a   : > { %s4989_s14 = scalar_select %p40_p11, %s4840_s22, %s42_s5  }
  0x1b   : > { %p152_p13 = scmp.ne.s32.totalorder %s4824_s18, %s4820_s17  ;;  %p153_p0 = scmp.eq.s32.totalorder %s3767_s28, 3 }
  0x1c   : > { %7924 = sst [smem:[#allocation14_spill]] %s4989_s14  ;;  %p3929_p1 = scmp.lt.s32.totalorder %s4860_s26, 4 }
  0x1d   : > { %p4994_p2 = por %p153_p0, %p152_p13  ;;  %s179_s16 = sand.u32 1, %s4840_s22  }
  0x1e   : > { %s3770_s20 = sshll.u32 %s179_s16, 8  ;;  %s3827_s27 = sshll.u32 %s4856_s25, 6 }
  0x1f   : > { %s189_s6 = sadd.s32 %s4852_s3, %s3827_s27  ;;  %s183_s10 = scalar_lea.vmem [#allocation5], %s3770_s20 }
  0x20   : > { %s192_s11 = sshll.u32 %s183_s10, 4  ;;  %s3773_s30 = sshll.u32 %s189_s6, 7  ;;  %s193_s11 = int_to_ptr.vmem [resolvable:$true] %s192_s11 }
  0x21   : > { %s191_s5 = scalar_lea.hbm %s7876_s0, %s3773_s30  ;;  %p5006_p4 = pnand %p3929_p1, %p4965_p3 }
  0x22   : > { %s180_s14 = scalar_lea.sflag [#allocation6], %s179_s16  ;;  %s4725_s22 = scalar_lea.vmem %s193_s11, 4096 }
  0x23   : > { %p4714_p5 = pneg %p5006_p4  ;;  %p4726_p6 = scmp.ne.s32.totalorder %s193_s11, %s4725_s22 }
  0x24   : > { %s4862_s20 = smov [#allocation5]  }
  0x25   : > { %p4728_p8 = pnand %p4726_p6, %p4714_p5  ;;  %s4730_s27 = sshll.u32 %s4862_s20, 4  ;;  %s4731_s27 = int_to_ptr.vmem [resolvable:$false] %s4730_s27 }
  0x26   : > { %s4732_s6 = scalar_lea.vmem %s4731_s27, 8192  ;;  %p4733_p10 = scmp.lt.s32.totalorder %s193_s11, %s4731_s27 }
  0x27   : > { %p4729_p9 = pneg %p4728_p8  ;;  %p4734_p11 = scmp.lt.s32.totalorder %s4732_s6, %s4725_s22 }
  0x29   : > { %p4735_p13 = por %p4734_p11, %p4733_p10 }
  0x2b   : > { %p4736_p0 = pnand %p4735_p13, %p4729_p9 }
  0x2d   : > { %4739 = shalt.err (!%p4736_p0)
}
  0x2e   : > { %s4863_s29 = smov 256   ;;  %s4864_s30 = smov 128  }
  0x2f   : > { %s4865_s7 = smov 8   ;;  %p3774_p3 = scmp.ge.s32.totalorder %s4860_s26, 1 }
  0x30   : > { %3924 = dma.hbm_to_vmem [thread:$0]  (!%p5006_p4), %s191_s5, 4096, %s193_s11, %s180_s14, %s4863_s29, %s4864_s30, %s4865_s7  }
  0x31   : > { %p209_p1 = scmp.lt.s32.totalorder %s4860_s26, 5 }
  0x33   : > { %p210_p5 = pnand %p3774_p3, %p209_p1 }
  0x34   : > { %s215_s16 = sand.u32 (!%p210_p5), 1, %s4836_s21  }
  0x35   : > { %213 = sbr.rel (%p210_p5) target bundleno = 1430 (0x596), region = 36  ;;  %s3775_s10 = sshll.u32 (!%p210_p5), %s215_s16, 8 }
  0x36   : > { %s216_s22 = scalar_lea.sflag (!%p210_p5), [#allocation6], %s215_s16  ;;  %s5017_s8 = scalar_lea.vmem (!%p210_p5), [#allocation5], %s3775_s10 }
  0x3a   : > { %4811 = dma.done.wait (%p4973_p7), %s216_s22, 4096  }
  0x3b   : > { %4813 = vsyncadd (%p4973_p7), %s216_s22, 4294963200  ;;  %s246_s14 = sand.u32 1, %s4824_s18   ;;  %s3777_s11 = sshll.u32 %s4844_s23, 4 }
  0x3c   : > { %s3776_s5 = sshll.u32 %s246_s14, 8  ;;  %p251_p4 = scmp.lt.s32.totalorder %s3777_s11, 31 }
  0x3d   : > { %s5032_s29 = scalar_lea.vmem [#allocation8], %s3776_s5  ;;  %p3779_p6 = scmp.ne.s32.totalorder %s4844_s23, 0 }
  0x3e   : > { %s8092_s11 = smov (!%p251_p4, %s3777_s11), 31 }
  0x3f   : > { %s3778_s28 = sshll.u32 %s8092_s11, 2  ;;  %261 = sbr.rel (%p3779_p6) target bundleno = 101 (0x65), region = 44 }
  0x40   : > { %s5030_s6 = scalar_lea.vmem %s7877_s1, %s3778_s28 }
  0x44   : > { %vm294_vm0 = vcmask 7168   ;;  %v4866_v0 = vmov 0.0  }
  0x45   : > { %262 = vst [vmem:[#allocation2 + $0xb0] sm:$0xff] %v4866_v0  ;;  %263 = vst [vmem:[#allocation2] sm:$0xff] %v4866_v0 }
  0x46   : > { %264 = vst [vmem:[#allocation2 + $0xd8] sm:$0xff] %v4866_v0  ;;  %265 = vst [vmem:[#allocation2 + $0x18] sm:$0xff] %v4866_v0 }
  0x47   : > { %266 = vst [vmem:[#allocation2 + $0x50] sm:$0xff] %v4866_v0  ;;  %267 = vst [vmem:[#allocation2 + $0x68] sm:$0xff] %v4866_v0 }
  0x48   : > { %268 = vst [vmem:[#allocation2 + $0x30] sm:$0xff] %v4866_v0  ;;  %269 = vst [vmem:[#allocation2 + $0x48] sm:$0xff] %v4866_v0 }
  0x49   : > { %270 = vst [vmem:[#allocation2 + $0x80] sm:$0xff] %v4866_v0  ;;  %271 = vst [vmem:[#allocation2 + $0x88] sm:$0xff] %v4866_v0 }
  0x4a   : > { %272 = vst [vmem:[#allocation2 + $0xe8] sm:$0xff] %v4866_v0  ;;  %273 = vst [vmem:[#allocation2 + $0xb8] sm:$0xff] %v4866_v0 }
  0x4b   : > { %274 = vst [vmem:[#allocation2 + $0x60] sm:$0xff] %v4866_v0  ;;  %275 = vst [vmem:[#allocation2 + $0xf0] sm:$0xff] %v4866_v0 }
  0x4c   : > { %276 = vst [vmem:[#allocation2 + $0x8] sm:$0xff] %v4866_v0  ;;  %277 = vst [vmem:[#allocation2 + $0x78] sm:$0xff] %v4866_v0 }
  0x4d   : > { %278 = vst [vmem:[#allocation2 + $0x38] sm:$0xff] %v4866_v0  ;;  %279 = vst [vmem:[#allocation2 + $0x58] sm:$0xff] %v4866_v0 }
  0x4e   : > { %280 = vst [vmem:[#allocation2 + $0x40] sm:$0xff] %v4866_v0  ;;  %281 = vst [vmem:[#allocation2 + $0xc8] sm:$0xff] %v4866_v0 }
  0x4f   : > { %282 = vst [vmem:[#allocation2 + $0xe0] sm:$0xff] %v4866_v0  ;;  %283 = vst [vmem:[#allocation2 + $0x90] sm:$0xff] %v4866_v0 }
  0x50   : > { %284 = vst [vmem:[#allocation2 + $0x70] sm:$0xff] %v4866_v0  ;;  %285 = vst [vmem:[#allocation2 + $0xc0] sm:$0xff] %v4866_v0 }
  0x51   : > { %286 = vst [vmem:[#allocation2 + $0xa8] sm:$0xff] %v4866_v0  ;;  %287 = vst [vmem:[#allocation2 + $0xd0] sm:$0xff] %v4866_v0 }
  0x52   : > { %288 = vst [vmem:[#allocation2 + $0x10] sm:$0xff] %v4866_v0  ;;  %289 = vst [vmem:[#allocation2 + $0x28] sm:$0xff] %v4866_v0 }
  0x53   : > { %290 = vst [vmem:[#allocation2 + $0xa0] sm:$0xff] %v4866_v0  ;;  %291 = vst [vmem:[#allocation2 + $0xf8] sm:$0xff] %v4866_v0 }
  0x54   : > { %292 = vst [vmem:[#allocation2 + $0x20] sm:$0xff] %v4866_v0  ;;  %293 = vst [vmem:[#allocation2 + $0x98] sm:$0xff] %v4866_v0 }
  0x55   : > { %295 = vst.msk [vmem:[#allocation3] sm:$0xff] %vm294_vm0, %v4866_v0  ;;  %296 = vst.msk [vmem:[#allocation3 + $0x8] sm:$0xff] %vm294_vm0, %v4866_v0 }
  0x56   : > { %297 = vst.msk [vmem:[#allocation3 + $0x10] sm:$0xff] %vm294_vm0, %v4866_v0  ;;  %298 = vst.msk [vmem:[#allocation3 + $0x18] sm:$0xff] %vm294_vm0, %v4866_v0 }
  0x57   : > { %299 = vst.msk [vmem:[#allocation3 + $0x20] sm:$0xff] %vm294_vm0, %v4866_v0  ;;  %300 = vst.msk [vmem:[#allocation3 + $0x28] sm:$0xff] %vm294_vm0, %v4866_v0 }
  0x58   : > { %301 = vst.msk [vmem:[#allocation3 + $0x30] sm:$0xff] %vm294_vm0, %v4866_v0  ;;  %302 = vst.msk [vmem:[#allocation3 + $0x38] sm:$0xff] %vm294_vm0, %v4866_v0 }
  0x59   : > { %303 = vst.msk [vmem:[#allocation3 + $0x40] sm:$0xff] %vm294_vm0, %v4866_v0  ;;  %304 = vst.msk [vmem:[#allocation3 + $0x48] sm:$0xff] %vm294_vm0, %v4866_v0 }
  0x5a   : > { %305 = vst.msk [vmem:[#allocation3 + $0x50] sm:$0xff] %vm294_vm0, %v4866_v0  ;;  %306 = vst.msk [vmem:[#allocation3 + $0x58] sm:$0xff] %vm294_vm0, %v4866_v0 }
  0x5b   : > { %307 = vst.msk [vmem:[#allocation3 + $0x60] sm:$0xff] %vm294_vm0, %v4866_v0  ;;  %308 = vst.msk [vmem:[#allocation3 + $0x68] sm:$0xff] %vm294_vm0, %v4866_v0 }
  0x5c   : > { %309 = vst.msk [vmem:[#allocation3 + $0x70] sm:$0xff] %vm294_vm0, %v4866_v0  ;;  %310 = vst.msk [vmem:[#allocation3 + $0x78] sm:$0xff] %vm294_vm0, %v4866_v0 }
  0x5d   : > { %311 = vst.msk [vmem:[#allocation3 + $0x80] sm:$0xff] %vm294_vm0, %v4866_v0  ;;  %312 = vst.msk [vmem:[#allocation3 + $0x88] sm:$0xff] %vm294_vm0, %v4866_v0 }
  0x5e   : > { %313 = vst.msk [vmem:[#allocation3 + $0x90] sm:$0xff] %vm294_vm0, %v4866_v0  ;;  %314 = vst.msk [vmem:[#allocation3 + $0x98] sm:$0xff] %vm294_vm0, %v4866_v0 }
  0x5f   : > { %315 = vst.msk [vmem:[#allocation3 + $0xa0] sm:$0xff] %vm294_vm0, %v4866_v0  ;;  %316 = vst.msk [vmem:[#allocation3 + $0xa8] sm:$0xff] %vm294_vm0, %v4866_v0 }
  0x60   : > { %317 = vst.msk [vmem:[#allocation3 + $0xb0] sm:$0xff] %vm294_vm0, %v4866_v0  ;;  %318 = vst.msk [vmem:[#allocation3 + $0xb8] sm:$0xff] %vm294_vm0, %v4866_v0 }
  0x61   : > { %319 = vst.msk [vmem:[#allocation3 + $0xc0] sm:$0xff] %vm294_vm0, %v4866_v0  ;;  %320 = vst.msk [vmem:[#allocation3 + $0xc8] sm:$0xff] %vm294_vm0, %v4866_v0 }
  0x62   : > { %321 = vst.msk [vmem:[#allocation3 + $0xd0] sm:$0xff] %vm294_vm0, %v4866_v0  ;;  %322 = vst.msk [vmem:[#allocation3 + $0xd8] sm:$0xff] %vm294_vm0, %v4866_v0 }
  0x63   : > { %323 = vst.msk [vmem:[#allocation3 + $0xe0] sm:$0xff] %vm294_vm0, %v4866_v0  ;;  %324 = vst.msk [vmem:[#allocation3 + $0xe8] sm:$0xff] %vm294_vm0, %v4866_v0 }
  0x64   : > { %325 = vst.msk [vmem:[#allocation3 + $0xf0] sm:$0xff] %vm294_vm0, %v4866_v0  ;;  %326 = vst.msk [vmem:[#allocation3 + $0xf8] sm:$0xff] %vm294_vm0, %v4866_v0 }
  0x65 PF: > { %v4026_v1 = vld [vmem:[%s5030_s6 + $0x38] sm:$0xff]   ;;  %v4027_v2 = vld [vmem:[%s5030_s6 + $0x30] sm:$0xff]   ;;  %v4028_v3 = vld [vmem:[%s5030_s6 + $0x28] sm:$0xff]   ;;  %vm856_vm1 = vcmask 7168   ;;  %p3788_p7 = scmp.ne.s32.totalorder %s4844_s23, 1 }
  0x66   : > { %3853 = vmatprep.subr.bf16.mxu0 %v4026_v1  ;;  %3901 = vmatprep.subr.bf16.mxu1 %v4026_v1  ;;  %v4029_v4 = vld [vmem:[%s5030_s6 + $0x20] sm:$0xff]   ;;  %v328_v6 = vld [vmem:[%s5017_s8 + $0x8] sm:$0xff]  ;;  %v5144_v10 = vld [vmem:[%s5017_s8 + $0x10] sm:$0xff] }
  0x67   : > { %3854 = vmatpush3.bf16.msra.mxu0 %v4026_v1  ;;  %3909 = vmatpush3.bf16.msra.mxu1 %v4026_v1  ;;  %v327_v5 = vld [vmem:[%s5017_s8] sm:$0xff]  ;;  %v5141_v9 = vld [vmem:[%s5017_s8 + $0x88] sm:$0xff]  ;;  %v730_v12 = vmul.f32 %v5144_v10, %v5144_v10  ;;  %v4030_v14 = vld [vmem:[%s5030_s6 + $0x18] sm:$0xff]   ;;  %v729_v17 = vmul.f32 %v328_v6, %v328_v6 }
  0x68   : > { %3855 = vmatprep.subr.bf16.mxu0 %v4027_v2  ;;  %3902 = vmatprep.subr.bf16.mxu1 %v4027_v2  ;;  %v5138_v7 = vld [vmem:[%s5017_s8 + $0x80] sm:$0xff]  ;;  %v391_v8 = vpack.c.bf16 %v328_v6, %v327_v5  ;;  %v728_v13 = vmul.f32 %v327_v5, %v327_v5  ;;  %v330_v15 = vld [vmem:[%s5017_s8 + $0x18] sm:$0xff]  ;;  %v4031_v18 = vld [vmem:[%s5030_s6 + $0x10] sm:$0xff]   ;;  %v745_v1 = vmul.f32 %v5141_v9, %v5141_v9 }
  0x69   : > { %v399_v11 = vpack.c.bf16 %v5141_v9, %v5138_v7  ;;  %764 = vadd.xlane.f32.xlu1 %v730_v12  ;;  %v731_v16 = vmul.f32 %v330_v15, %v330_v15  ;;  %v331_v19 = vld [vmem:[%s5017_s8 + $0x20] sm:$0xff]  ;;  %v332_v20 = vld [vmem:[%s5017_s8 + $0x28] sm:$0xff]  ;;  %v333_v24 = vld [vmem:[%s5017_s8 + $0x30] sm:$0xff]  ;;  %v392_v37 = vpack.c.bf16 %v330_v15, %v5144_v10 }
  0x6a   : > { %3869 = vmatprep.mubr.bf16.mxu0 %v391_v8  ;;  %760 = vadd.xlane.f32.xlu0 %v728_v13  ;;  %v733_v21 = vmul.f32 %v332_v20, %v332_v20  ;;  %v732_v22 = vmul.f32 %v331_v19, %v331_v19  ;;  %v4032_v23 = vld [vmem:[%s5030_s6 + $0x8] sm:$0xff]   ;;  %v334_v25 = vld [vmem:[%s5017_s8 + $0x38] sm:$0xff]  ;;  %v734_v27 = vmul.f32 %v333_v24, %v333_v24  ;;  %v4033_v28 = vld [vmem:[%s5030_s6] sm:$0xff]  }
  0x6b   : > { %3856 = vmatpush3.bf16.msra.mxu0 %v4027_v2  ;;  %3910 = vmatpush3.bf16.msra.mxu1 %v4027_v2  ;;  %v735_v26 = vmul.f32 %v334_v25, %v334_v25  ;;  %v335_v29 = vld [vmem:[%s5017_s8 + $0x40] sm:$0xff]  ;;  %v336_v30 = vld [vmem:[%s5017_s8 + $0x48] sm:$0xff]  ;;  %v345_v33 = vld [vmem:[%s5017_s8 + $0x90] sm:$0xff]  ;;  %v393_v39 = vpack.c.bf16 %v332_v20, %v331_v19  ;;  %v394_v53 = vpack.c.bf16 %v334_v25, %v333_v24 }
  0x6c   : > { %3857 = vmatprep.subr.bf16.mxu0 %v4028_v3  ;;  %3903 = vmatprep.subr.bf16.mxu1 %v4028_v3  ;;  %v737_v31 = vmul.f32 %v336_v30, %v336_v30  ;;  %v736_v32 = vmul.f32 %v335_v29, %v335_v29  ;;  %v346_v34 = vld [vmem:[%s5017_s8 + $0x98] sm:$0xff]  ;;  %v5164_v35 = vld [vmem:[%s5017_s8 + $0xa0] sm:$0xff]  ;;  %v5167_v36 = vld [vmem:[%s5017_s8 + $0xa8] sm:$0xff]  ;;  %v395_v55 = vpack.c.bf16 %v336_v30, %v335_v29 }
  0x6d   : > { %3885 = vmatprep.mubr.bf16.mxu1 %v399_v11  ;;  %766 = vadd.xlane.f32.xlu1 %v731_v16  ;;  %v400_v38 = vpack.c.bf16 %v346_v34, %v345_v33  ;;  %v401_v40 = vpack.c.bf16 %v5167_v36, %v5164_v35  ;;  %v337_v41 = vld [vmem:[%s5017_s8 + $0x50] sm:$0xff]  ;;  %v338_v42 = vld [vmem:[%s5017_s8 + $0x58] sm:$0xff]  ;;  %v339_v47 = vld [vmem:[%s5017_s8 + $0x60] sm:$0xff]  ;;  %v744_v2 = vmul.f32 %v5138_v7, %v5138_v7 }
  0x6e   : > { %762 = vadd.xlane.f32.xlu0 %v729_v17  ;;  %v739_v43 = vmul.f32 %v338_v42, %v338_v42  ;;  %v738_v44 = vmul.f32 %v337_v41, %v337_v41  ;;  %v349_v45 = vld [vmem:[%s5017_s8 + $0xb0] sm:$0xff]  ;;  %v350_v46 = vld [vmem:[%s5017_s8 + $0xb8] sm:$0xff]  ;;  %v340_v48 = vld [vmem:[%s5017_s8 + $0x68] sm:$0xff]  ;;  %v740_v52 = vmul.f32 %v339_v47, %v339_v47  ;;  %v747_v8 = vmul.f32 %v346_v34, %v346_v34 }
  0x6f   : > { %3858 = vmatpush3.bf16.msra.mxu0 %v4028_v3  ;;  %3911 = vmatpush3.bf16.msra.mxu1 %v4028_v3  ;;  %v351_v49 = vld [vmem:[%s5017_s8 + $0xc0] sm:$0xff]  ;;  %v352_v50 = vld [vmem:[%s5017_s8 + $0xc8] sm:$0xff]  ;;  %v741_v51 = vmul.f32 %v340_v48, %v340_v48  ;;  %v402_v54 = vpack.c.bf16 %v350_v46, %v349_v45  ;;  %v341_v57 = vld [vmem:[%s5017_s8 + $0x70] sm:$0xff]  ;;  %v396_v3 = vpack.c.bf16 %v338_v42, %v337_v41 }
  0x70   : > { %3859 = vmatprep.subr.bf16.mxu0 %v4029_v4  ;;  %3904 = vmatprep.subr.bf16.mxu1 %v4029_v4  ;;  %v403_v56 = vpack.c.bf16 %v352_v50, %v351_v49  ;;  %v342_v58 = vld [vmem:[%s5017_s8 + $0x78] sm:$0xff]  ;;  %v742_v60 = vmul.f32 %v341_v57, %v341_v57  ;;  %v353_v61 = vld [vmem:[%s5017_s8 + $0xd0] sm:$0xff]  ;;  %v355_v63 = vld [vmem:[%s5017_s8 + $0xe0] sm:$0xff]  ;;  %v397_v5 = vpack.c.bf16 %v340_v48, %v339_v47 }
  0x71   : > { %770 = vadd.xlane.f32.xlu1 %v733_v21  ;;  %v743_v59 = vmul.f32 %v342_v58, %v342_v58  ;;  %v354_v62 = vld [vmem:[%s5017_s8 + $0xd8] sm:$0xff]  ;;  %v356_v0 = vld [vmem:[%s5017_s8 + $0xe8] sm:$0xff]  ;;  %v746_v10 = vmul.f32 %v345_v33, %v345_v33  ;;  %v357_v11 = vld [vmem:[%s5017_s8 + $0xf0] sm:$0xff]  ;;  %v749_v9 = vmul.f32 %v5167_v36, %v5167_v36  ;;  %v748_v7 = vmul.f32 %v5164_v35, %v5164_v35 }
  0x72   : > { %768 = vadd.xlane.f32.xlu0 %v732_v22  ;;  %v405_v6 = vpack.c.bf16 %v356_v0, %v355_v63  ;;  %v358_v12 = vld [vmem:[%s5017_s8 + $0xf8] sm:$0xff]  ;;  %v398_v13 = vpack.c.bf16 %v342_v58, %v341_v57  ;;  %v751_v15 = vmul.f32 %v350_v46, %v350_v46  ;;  %v750_v16 = vmul.f32 %v349_v45, %v349_v45  ;;  %v698_v25 = vld [vmem:[#allocation3 + $0x10] sm:$0xff] }
  0x73   : > { %3860 = vmatpush3.bf16.msra.mxu0 %v4029_v4  ;;  %3912 = vmatpush3.bf16.msra.mxu1 %v4029_v4  ;;  %v404_v4 = vpack.c.bf16 %v354_v62, %v353_v61  ;;  %v753_v17 = vmul.f32 %v352_v50, %v352_v50  ;;  %v755_v19 = vmul.f32 %v354_v62, %v354_v62  ;;  %v704_v50 = vld [vmem:[#allocation3 + $0x40] sm:$0xff] }
  0x74   : > { %3861 = vmatprep.subr.bf16.mxu0 %v4030_v14  ;;  %3905 = vmatprep.subr.bf16.mxu1 %v4030_v14  ;;  %v754_v20 = vmul.f32 %v353_v61, %v353_v61  ;;  %v757_v21 = vmul.f32 %v356_v0, %v356_v0  ;;  %v756_v22 = vmul.f32 %v355_v63, %v355_v63  ;;  %v709_v61 = vld [vmem:[#allocation3 + $0x68] sm:$0xff]  ;;  %v708_v62 = vld [vmem:[#allocation3 + $0x60] sm:$0xff] }
  0x75   : > { %774 = vadd.xlane.f32.xlu1 %v735_v26  ;;  %v758_v24 = vmul.f32 %v357_v11, %v357_v11  ;;  %v696_v26 = vld [vmem:[#allocation3] sm:$0xff] }
  0x76   : > { %772 = vadd.xlane.f32.xlu0 %v734_v27 }
  0x77   : > { %3862 = vmatpush3.bf16.msra.mxu0 %v4030_v14  ;;  %3913 = vmatpush3.bf16.msra.mxu1 %v4030_v14  ;;  %v406_v14 = vpack.c.bf16 %v358_v12, %v357_v11  ;;  %v713_v11 = vld [vmem:[#allocation3 + $0x88] sm:$0xff] }
  0x78   : > { %3863 = vmatprep.subr.bf16.mxu0 %v4031_v18  ;;  %3906 = vmatprep.subr.bf16.mxu1 %v4031_v18 }
  0x79   : > { %778 = vadd.xlane.f32.xlu1 %v737_v31  ;;  %v699_v31 = vld [vmem:[#allocation3 + $0x18] sm:$0xff] }
  0x7a   : > { %776 = vadd.xlane.f32.xlu0 %v736_v32  ;;  %v697_v32 = vld [vmem:[#allocation3 + $0x8] sm:$0xff] }
  0x7b   : > { %3864 = vmatpush3.bf16.msra.mxu0 %v4031_v18  ;;  %3914 = vmatpush3.bf16.msra.mxu1 %v4031_v18  ;;  %v752_v18 = vmul.f32 %v351_v49, %v351_v49  ;;  %v705_v49 = vld [vmem:[#allocation3 + $0x48] sm:$0xff] }
  0x7c   : > { %3865 = vmatprep.subr.bf16.mxu0 %v4032_v23  ;;  %3907 = vmatprep.subr.bf16.mxu1 %v4032_v23 }
  0x7d   : > { %782 = vadd.xlane.f32.xlu1 %v739_v43  ;;  %v703_v43 = vld [vmem:[#allocation3 + $0x38] sm:$0xff] }
  0x7e   : > { %780 = vadd.xlane.f32.xlu0 %v738_v44  ;;  %v702_v44 = vld [vmem:[#allocation3 + $0x30] sm:$0xff] }
  0x7f   : > { %3866 = vmatpush3.bf16.msra.mxu0 %v4032_v23  ;;  %3915 = vmatpush3.bf16.msra.mxu1 %v4032_v23  ;;  %v759_v23 = vmul.f32 %v358_v12, %v358_v12  ;;  %v712_v12 = vld [vmem:[#allocation3 + $0x80] sm:$0xff] }
  0x80   : > { %3867 = vmatprep.subr.bf16.mxu0 %v4033_v28  ;;  %3908 = vmatprep.subr.bf16.mxu1 %v4033_v28 }
  0x81   : > { %786 = vadd.xlane.f32.xlu1 %v741_v51 }
  0x82   : > { %784 = vadd.xlane.f32.xlu0 %v740_v52 }
  0x83   : > { %3868 = vmatpush3.bf16.msra.mxu0 %v4033_v28  ;;  %3916 = vmatpush3.bf16.msra.mxu1 %v4033_v28 }
  0x85   : > { %790 = vadd.xlane.f32.xlu1 %v743_v59 }
  0x86   : > { %3870 = vmatmul.mubr.bf16.vlgmr.msra.gmra.mxu0 %v392_v37  ;;  %3886 = vmatmul.mubr.bf16.vlgmr.msra.gmra.mxu1 %v400_v38  ;;  %v701_v37 = vld [vmem:[#allocation3 + $0x28] sm:$0xff]  ;;  %v700_v38 = vld [vmem:[#allocation3 + $0x20] sm:$0xff] }
  0x87   : > { %3873 = vmatprep.mubr.bf16.mxu0 %v393_v39  ;;  %3889 = vmatprep.mubr.bf16.mxu1 %v401_v40 }
  0x88   : > { %788 = vadd.xlane.f32.xlu0 %v742_v60 }
  0x89   : > { %794 = vadd.xlane.f32.xlu1 %v745_v1 }
  0x8c   : > { %792 = vadd.xlane.f32.xlu0 %v744_v2 }
  0x8d   : > { %798 = vadd.xlane.f32.xlu1 %v747_v8 }
  0x8e   : > { %3874 = vmatmul.mubr.bf16.gmra.mxu0 %v394_v53  ;;  %3890 = vmatmul.mubr.bf16.gmra.mxu1 %v402_v54 }
  0x8f   : > { %3877 = vmatprep.mubr.bf16.mxu0 %v395_v55  ;;  %3893 = vmatprep.mubr.bf16.mxu1 %v403_v56  ;;  %v707_v55 = vld [vmem:[#allocation3 + $0x58] sm:$0xff]  ;;  %v706_v56 = vld [vmem:[#allocation3 + $0x50] sm:$0xff] }
  0x90   : > { %796 = vadd.xlane.f32.xlu0 %v746_v10 }
  0x91   : > { %802 = vadd.xlane.f32.xlu1 %v749_v9 }
  0x94   : > { %800 = vadd.xlane.f32.xlu0 %v748_v7 }
  0x95   : > { %806 = vadd.xlane.f32.xlu1 %v751_v15  ;;  %v715_v15 = vld [vmem:[#allocation3 + $0x98] sm:$0xff] }
  0x96   : > { %3878 = vmatmul.mubr.bf16.gmra.mxu0 %v396_v3  ;;  %3894 = vmatmul.mubr.bf16.gmra.mxu1 %v404_v4  ;;  %v711_v3 = vld [vmem:[#allocation3 + $0x78] sm:$0xff]  ;;  %v710_v4 = vld [vmem:[#allocation3 + $0x70] sm:$0xff] }
  0x97   : > { %3881 = vmatprep.mubr.bf16.mxu0 %v397_v5  ;;  %3897 = vmatprep.mubr.bf16.mxu1 %v405_v6 }
  0x98   : > { %804 = vadd.xlane.f32.xlu0 %v750_v16  ;;  %v714_v16 = vld [vmem:[#allocation3 + $0x90] sm:$0xff] }
  0x99   : > { %810 = vadd.xlane.f32.xlu1 %v753_v17 }
  0x9c   : > { %808 = vadd.xlane.f32.xlu0 %v752_v18 }
  0x9d   : > { %814 = vadd.xlane.f32.xlu1 %v755_v19 }
  0x9e   : > { %3882 = vmatmul.mubr.bf16.gmra.mxu0 %v398_v13  ;;  %3898 = vmatmul.mubr.bf16.gmra.mxu1 %v406_v14 }
  0xa0   : > { %812 = vadd.xlane.f32.xlu0 %v754_v20 }
  0xa1   : > { %818 = vadd.xlane.f32.xlu1 %v757_v21  ;;  %v717_v21 = vld [vmem:[#allocation3 + $0xa8] sm:$0xff] }
  0xa4   : > { %816 = vadd.xlane.f32.xlu0 %v756_v22  ;;  %v716_v22 = vld [vmem:[#allocation3 + $0xa0] sm:$0xff] }
  0xa5   : > { %822 = vadd.xlane.f32.xlu1 %v759_v23 }
  0xa8   : > { %820 = vadd.xlane.f32.xlu0 %v758_v24 }
  0xf2   : > { %v765_v27 = vpop.xlane.xlu1 %764 }
  0xf3   : > { %v761_v28 = vpop.xlane.xlu0 %760  ;;  %v826_v29 = vadd.f32 %v765_v27, %v698_v25  ;;  %v719_v27 = vld [vmem:[#allocation3 + $0xb8] sm:$0xff] }
  0xf4   : > { %v824_v30 = vadd.f32 %v761_v28, %v696_v26  ;;  %v718_v28 = vld [vmem:[#allocation3 + $0xb0] sm:$0xff] }
  0xf5   : > { %859 = vst.msk [vmem:[#allocation3 + $0x10] sm:$0xff] %vm856_vm1, %v826_v29 }
  0xf6   : > { %857 = vst.msk [vmem:[#allocation3] sm:$0xff] %vm856_vm1, %v824_v30  ;;  %v767_v33 = vpop.xlane.xlu1 %766 }
  0xf7   : > { %v763_v34 = vpop.xlane.xlu0 %762  ;;  %v827_v35 = vadd.f32 %v767_v33, %v699_v31  ;;  %v721_v33 = vld [vmem:[#allocation3 + $0xc8] sm:$0xff] }
  0xf8   : > { %v825_v36 = vadd.f32 %v763_v34, %v697_v32  ;;  %v720_v34 = vld [vmem:[#allocation3 + $0xc0] sm:$0xff] }
  0xf9   : > { %860 = vst.msk [vmem:[#allocation3 + $0x18] sm:$0xff] %vm856_vm1, %v827_v35 }
  0xfa   : > { %858 = vst.msk [vmem:[#allocation3 + $0x8] sm:$0xff] %vm856_vm1, %v825_v36  ;;  %v771_v39 = vpop.xlane.xlu1 %770 }
  0xfb   : > { %v769_v40 = vpop.xlane.xlu0 %768  ;;  %v829_v41 = vadd.f32 %v771_v39, %v701_v37  ;;  %v723_v39 = vld [vmem:[#allocation3 + $0xd8] sm:$0xff] }
  0xfc   : > { %v828_v42 = vadd.f32 %v769_v40, %v700_v38  ;;  %v722_v40 = vld [vmem:[#allocation3 + $0xd0] sm:$0xff] }
  0xfd   : > { %862 = vst.msk [vmem:[#allocation3 + $0x28] sm:$0xff] %vm856_vm1, %v829_v41 }
  0xfe   : > { %861 = vst.msk [vmem:[#allocation3 + $0x20] sm:$0xff] %vm856_vm1, %v828_v42  ;;  %v775_v45 = vpop.xlane.xlu1 %774 }
  0xff   : > { %v773_v46 = vpop.xlane.xlu0 %772  ;;  %v831_v47 = vadd.f32 %v775_v45, %v703_v43  ;;  %v725_v45 = vld [vmem:[#allocation3 + $0xe8] sm:$0xff] }
 0x100   : > { %v830_v48 = vadd.f32 %v773_v46, %v702_v44  ;;  %v724_v46 = vld [vmem:[#allocation3 + $0xe0] sm:$0xff] }
 0x101   : > { %864 = vst.msk [vmem:[#allocation3 + $0x38] sm:$0xff] %vm856_vm1, %v831_v47 }
 0x102   : > { %863 = vst.msk [vmem:[#allocation3 + $0x30] sm:$0xff] %vm856_vm1, %v830_v48  ;;  %v779_v51 = vpop.xlane.xlu1 %778 }
 0x103   : > { %v777_v52 = vpop.xlane.xlu0 %776  ;;  %v833_v53 = vadd.f32 %v779_v51, %v705_v49  ;;  %v727_v51 = vld [vmem:[#allocation3 + $0xf8] sm:$0xff] }
 0x104   : > { %v832_v54 = vadd.f32 %v777_v52, %v704_v50  ;;  %v726_v52 = vld [vmem:[#allocation3 + $0xf0] sm:$0xff] }
 0x105   : > { %866 = vst.msk [vmem:[#allocation3 + $0x48] sm:$0xff] %vm856_vm1, %v833_v53 }
 0x106   : > { %865 = vst.msk [vmem:[#allocation3 + $0x40] sm:$0xff] %vm856_vm1, %v832_v54  ;;  %v783_v57 = vpop.xlane.xlu1 %782 }
 0x107   : > { %v781_v58 = vpop.xlane.xlu0 %780  ;;  %v835_v59 = vadd.f32 %v783_v57, %v707_v55  ;;  %v361_v57 = vld [vmem:[#allocation2 + $0xd8] sm:$0xff] }
 0x108   : > { %v834_v60 = vadd.f32 %v781_v58, %v706_v56  ;;  %v377_v58 = vld [vmem:[#allocation2 + $0x40] sm:$0xff] }
 0x109   : > { %868 = vst.msk [vmem:[#allocation3 + $0x58] sm:$0xff] %vm856_vm1, %v835_v59 }
 0x10a   : > { %867 = vst.msk [vmem:[#allocation3 + $0x50] sm:$0xff] %vm856_vm1, %v834_v60  ;;  %v787_v63 = vpop.xlane.xlu1 %786 }
 0x10b   : > { %v785_v0 = vpop.xlane.xlu0 %784  ;;  %v837_v1 = vadd.f32 %v787_v63, %v709_v61  ;;  %v375_v61 = vld [vmem:[#allocation2 + $0x38] sm:$0xff] }
 0x10c   : > { %v836_v2 = vadd.f32 %v785_v0, %v708_v62  ;;  %v359_v62 = vld [vmem:[#allocation2 + $0xb0] sm:$0xff] }
 0x10d   : > { %870 = vst.msk [vmem:[#allocation3 + $0x68] sm:$0xff] %vm856_vm1, %v837_v1 }
 0x10e   : > { %869 = vst.msk [vmem:[#allocation3 + $0x60] sm:$0xff] %vm856_vm1, %v836_v2  ;;  %v791_v5 = vpop.xlane.xlu1 %790 }
 0x10f   : > { %v839_v8 = vadd.f32 %v791_v5, %v711_v3  ;;  %v362_v3 = vld [vmem:[#allocation2 + $0x18] sm:$0xff] }
 0x111   : > { %v789_v6 = vpop.xlane.xlu0 %788  ;;  %872 = vst.msk [vmem:[#allocation3 + $0x78] sm:$0xff] %vm856_vm1, %v839_v8 }
 0x112   : > { %v838_v10 = vadd.f32 %v789_v6, %v710_v4  ;;  %v795_v9 = vpop.xlane.xlu1 %794  ;;  %v378_v4 = vld [vmem:[#allocation2 + $0xc8] sm:$0xff] }
 0x113   : > { %v841_v13 = vadd.f32 %v795_v9, %v713_v11  ;;  %v376_v11 = vld [vmem:[#allocation2 + $0x58] sm:$0xff] }
 0x114   : > { %871 = vst.msk [vmem:[#allocation3 + $0x70] sm:$0xff] %vm856_vm1, %v838_v10 }
 0x115   : > { %v793_v7 = vpop.xlane.xlu0 %792  ;;  %874 = vst.msk [vmem:[#allocation3 + $0x88] sm:$0xff] %vm856_vm1, %v841_v13 }
 0x116   : > { %v840_v14 = vadd.f32 %v793_v7, %v712_v12  ;;  %v799_v17 = vpop.xlane.xlu1 %798  ;;  %v360_v12 = vld [vmem:[#allocation2] sm:$0xff] }
 0x117   : > { %v843_v19 = vadd.f32 %v799_v17, %v715_v15  ;;  %v365_v15 = vld [vmem:[#allocation2 + $0x30] sm:$0xff] }
 0x118   : > { %873 = vst.msk [vmem:[#allocation3 + $0x80] sm:$0xff] %vm856_vm1, %v840_v14 }
 0x119   : > { %v797_v18 = vpop.xlane.xlu0 %796  ;;  %876 = vst.msk [vmem:[#allocation3 + $0x98] sm:$0xff] %vm856_vm1, %v843_v19 }
 0x11a   : > { %v842_v20 = vadd.f32 %v797_v18, %v714_v16  ;;  %v803_v23 = vpop.xlane.xlu1 %802  ;;  %v381_v16 = vld [vmem:[#allocation2 + $0x70] sm:$0xff] }
 0x11b   : > { %v845_v25 = vadd.f32 %v803_v23, %v717_v21  ;;  %v379_v21 = vld [vmem:[#allocation2 + $0xe0] sm:$0xff] }
 0x11c   : > { %875 = vst.msk [vmem:[#allocation3 + $0x90] sm:$0xff] %vm856_vm1, %v842_v20 }
 0x11d   : > { %v801_v24 = vpop.xlane.xlu0 %800  ;;  %878 = vst.msk [vmem:[#allocation3 + $0xa8] sm:$0xff] %vm856_vm1, %v845_v25 }
 0x11e   : > { %v844_v26 = vadd.f32 %v801_v24, %v716_v22  ;;  %v807_v29 = vpop.xlane.xlu1 %806  ;;  %v363_v22 = vld [vmem:[#allocation2 + $0x50] sm:$0xff] }
 0x11f   : > { %v847_v31 = vadd.f32 %v807_v29, %v719_v27  ;;  %v366_v27 = vld [vmem:[#allocation2 + $0x48] sm:$0xff] }
 0x120   : > { %877 = vst.msk [vmem:[#allocation3 + $0xa0] sm:$0xff] %vm856_vm1, %v844_v26 }
 0x121   : > { %v805_v30 = vpop.xlane.xlu0 %804  ;;  %880 = vst.msk [vmem:[#allocation3 + $0xb8] sm:$0xff] %vm856_vm1, %v847_v31 }
 0x122   : > { %v846_v32 = vadd.f32 %v805_v30, %v718_v28  ;;  %v811_v35 = vpop.xlane.xlu1 %810  ;;  %v382_v28 = vld [vmem:[#allocation2 + $0xc0] sm:$0xff] }
 0x123   : > { %v849_v37 = vadd.f32 %v811_v35, %v721_v33  ;;  %v380_v33 = vld [vmem:[#allocation2 + $0x90] sm:$0xff] }
 0x124   : > { %879 = vst.msk [vmem:[#allocation3 + $0xb0] sm:$0xff] %vm856_vm1, %v846_v32 }
 0x125   : > { %v809_v36 = vpop.xlane.xlu0 %808  ;;  %882 = vst.msk [vmem:[#allocation3 + $0xc8] sm:$0xff] %vm856_vm1, %v849_v37 }
 0x126   : > { %v848_v38 = vadd.f32 %v809_v36, %v720_v34  ;;  %v815_v41 = vpop.xlane.xlu1 %814  ;;  %v364_v34 = vld [vmem:[#allocation2 + $0x68] sm:$0xff] }
 0x127   : > { %v851_v43 = vadd.f32 %v815_v41, %v723_v39  ;;  %v369_v39 = vld [vmem:[#allocation2 + $0xe8] sm:$0xff] }
 0x128   : > { %881 = vst.msk [vmem:[#allocation3 + $0xc0] sm:$0xff] %vm856_vm1, %v848_v38 }
 0x129   : > { %v813_v42 = vpop.xlane.xlu0 %812  ;;  %884 = vst.msk [vmem:[#allocation3 + $0xd8] sm:$0xff] %vm856_vm1, %v851_v43 }
 0x12a   : > { %v850_v44 = vadd.f32 %v813_v42, %v722_v40  ;;  %v819_v47 = vpop.xlane.xlu1 %818  ;;  %v385_v40 = vld [vmem:[#allocation2 + $0x10] sm:$0xff] }
 0x12b   : > { %v853_v49 = vadd.f32 %v819_v47, %v725_v45  ;;  %v383_v45 = vld [vmem:[#allocation2 + $0xa8] sm:$0xff] }
 0x12c   : > { %883 = vst.msk [vmem:[#allocation3 + $0xd0] sm:$0xff] %vm856_vm1, %v850_v44 }
 0x12d   : > { %v817_v48 = vpop.xlane.xlu0 %816  ;;  %886 = vst.msk [vmem:[#allocation3 + $0xe8] sm:$0xff] %vm856_vm1, %v853_v49 }
 0x12e   : > { %v852_v50 = vadd.f32 %v817_v48, %v724_v46  ;;  %v823_v53 = vpop.xlane.xlu1 %822  ;;  %v367_v46 = vld [vmem:[#allocation2 + $0x80] sm:$0xff] }
 0x12f   : > { %v855_v55 = vadd.f32 %v823_v53, %v727_v51  ;;  %v370_v51 = vld [vmem:[#allocation2 + $0xb8] sm:$0xff] }
 0x130   : > { %885 = vst.msk [vmem:[#allocation3 + $0xe0] sm:$0xff] %vm856_vm1, %v852_v50 }
 0x131   : > { %v821_v54 = vpop.xlane.xlu0 %820  ;;  %888 = vst.msk [vmem:[#allocation3 + $0xf8] sm:$0xff] %vm856_vm1, %v855_v55 }
 0x132   : > { %v854_v56 = vadd.f32 %v821_v54, %v726_v52  ;;  %v386_v52 = vld [vmem:[#allocation2 + $0x28] sm:$0xff] }
 0x134   : > { %887 = vst.msk [vmem:[#allocation3 + $0xf0] sm:$0xff] %vm856_vm1, %v854_v56 }
 0x146   : > { %v3871_v59 = vpop.f32.mrf.mxu0  ;;  %v3887_v60 = vpop.f32.mrf.mxu1 }
 0x147   : > { %v634_v63 = vadd.f32 %v3871_v59, %v361_v57  ;;  %v650_v0 = vadd.f32 %v3887_v60, %v377_v58  ;;  %v384_v57 = vld [vmem:[#allocation2 + $0xd0] sm:$0xff]  ;;  %v368_v58 = vld [vmem:[#allocation2 + $0x88] sm:$0xff] }
 0x148   : > { %v569_v1 = vpop.f32.mrf.mxu1  ;;  %v505_v2 = vpop.f32.mrf.mxu0 }
 0x149   : > { %666 = vst [vmem:[#allocation2 + $0xd8] sm:$0xff] %v634_v63  ;;  %682 = vst [vmem:[#allocation2 + $0x40] sm:$0xff] %v650_v0  ;;  %v648_v5 = vadd.f32 %v569_v1, %v375_v61  ;;  %v632_v6 = vadd.f32 %v505_v2, %v359_v62  ;;  %v373_v63 = vld [vmem:[#allocation2 + $0x8] sm:$0xff]  ;;  %v389_v0 = vld [vmem:[#allocation2 + $0x20] sm:$0xff] }
 0x14a   : > { %v3872_v8 = vpop.f32.mrf.mxu0  ;;  %v3888_v10 = vpop.f32.mrf.mxu1 }
 0x14b   : > { %680 = vst [vmem:[#allocation2 + $0x38] sm:$0xff] %v648_v5  ;;  %664 = vst [vmem:[#allocation2 + $0xb0] sm:$0xff] %v632_v6  ;;  %v635_v9 = vadd.f32 %v3872_v8, %v362_v3  ;;  %v651_v7 = vadd.f32 %v3888_v10, %v378_v4  ;;  %v387_v5 = vld [vmem:[#allocation2 + $0xa0] sm:$0xff] }
 0x14c   : > { %v572_v13 = vpop.f32.mrf.mxu1  ;;  %v508_v14 = vpop.f32.mrf.mxu0  ;;  %v371_v6 = vld [vmem:[#allocation2 + $0x60] sm:$0xff] }
 0x14d   : > { %667 = vst [vmem:[#allocation2 + $0x18] sm:$0xff] %v635_v9  ;;  %683 = vst [vmem:[#allocation2 + $0xc8] sm:$0xff] %v651_v7  ;;  %v649_v17 = vadd.f32 %v572_v13, %v376_v11  ;;  %v633_v18 = vadd.f32 %v508_v14, %v360_v12  ;;  %v374_v9 = vld [vmem:[#allocation2 + $0x78] sm:$0xff] }
 0x14e   : > { %v3875_v19 = vpop.f32.mrf.mxu0  ;;  %v3891_v20 = vpop.f32.mrf.mxu1  ;;  %v390_v7 = vld [vmem:[#allocation2 + $0x98] sm:$0xff] }
 0x14f   : > { %681 = vst [vmem:[#allocation2 + $0x58] sm:$0xff] %v649_v17  ;;  %665 = vst [vmem:[#allocation2] sm:$0xff] %v633_v18  ;;  %v638_v23 = vadd.f32 %v3875_v19, %v365_v15  ;;  %v654_v24 = vadd.f32 %v3891_v20, %v381_v16  ;;  %v388_v17 = vld [vmem:[#allocation2 + $0xf8] sm:$0xff]  ;;  %v372_v18 = vld [vmem:[#allocation2 + $0xf0] sm:$0xff] }
 0x150   : > { %v585_v25 = vpop.f32.mrf.mxu1  ;;  %v521_v26 = vpop.f32.mrf.mxu0 }
 0x151   : > { %670 = vst [vmem:[#allocation2 + $0x30] sm:$0xff] %v638_v23  ;;  %686 = vst [vmem:[#allocation2 + $0x70] sm:$0xff] %v654_v24  ;;  %v652_v29 = vadd.f32 %v585_v25, %v379_v21  ;;  %v636_v30 = vadd.f32 %v521_v26, %v363_v22 }
 0x152   : > { %v3876_v31 = vpop.f32.mrf.mxu0  ;;  %v3892_v32 = vpop.f32.mrf.mxu1 }
 0x153   : > { %684 = vst [vmem:[#allocation2 + $0xe0] sm:$0xff] %v652_v29  ;;  %668 = vst [vmem:[#allocation2 + $0x50] sm:$0xff] %v636_v30  ;;  %v639_v35 = vadd.f32 %v3876_v31, %v366_v27  ;;  %v655_v36 = vadd.f32 %v3892_v32, %v382_v28 }
 0x154   : > { %v588_v37 = vpop.f32.mrf.mxu1  ;;  %v524_v38 = vpop.f32.mrf.mxu0 }
 0x155   : > { %671 = vst [vmem:[#allocation2 + $0x48] sm:$0xff] %v639_v35  ;;  %687 = vst [vmem:[#allocation2 + $0xc0] sm:$0xff] %v655_v36  ;;  %v653_v41 = vadd.f32 %v588_v37, %v380_v33  ;;  %v637_v42 = vadd.f32 %v524_v38, %v364_v34 }
 0x156   : > { %v3879_v43 = vpop.f32.mrf.mxu0  ;;  %v3895_v44 = vpop.f32.mrf.mxu1 }
 0x157   : > { %685 = vst [vmem:[#allocation2 + $0x90] sm:$0xff] %v653_v41  ;;  %669 = vst [vmem:[#allocation2 + $0x68] sm:$0xff] %v637_v42  ;;  %v642_v47 = vadd.f32 %v3879_v43, %v369_v39  ;;  %v658_v48 = vadd.f32 %v3895_v44, %v385_v40 }
 0x158   : > { %v601_v49 = vpop.f32.mrf.mxu1  ;;  %v537_v50 = vpop.f32.mrf.mxu0 }
 0x159   : > { %674 = vst [vmem:[#allocation2 + $0xe8] sm:$0xff] %v642_v47  ;;  %690 = vst [vmem:[#allocation2 + $0x10] sm:$0xff] %v658_v48  ;;  %v656_v53 = vadd.f32 %v601_v49, %v383_v45  ;;  %v640_v54 = vadd.f32 %v537_v50, %v367_v46 }
 0x15a   : > { %v3880_v55 = vpop.f32.mrf.mxu0  ;;  %v3896_v56 = vpop.f32.mrf.mxu1 }
 0x15b   : > { %688 = vst [vmem:[#allocation2 + $0xa8] sm:$0xff] %v656_v53  ;;  %672 = vst [vmem:[#allocation2 + $0x80] sm:$0xff] %v640_v54  ;;  %v643_v59 = vadd.f32 %v3880_v55, %v370_v51  ;;  %v659_v60 = vadd.f32 %v3896_v56, %v386_v52 }
 0x15c   : > { %v604_v61 = vpop.f32.mrf.mxu1  ;;  %v540_v62 = vpop.f32.mrf.mxu0 }
 0x15d   : > { %675 = vst [vmem:[#allocation2 + $0xb8] sm:$0xff] %v643_v59  ;;  %691 = vst [vmem:[#allocation2 + $0x28] sm:$0xff] %v659_v60  ;;  %v657_v1 = vadd.f32 %v604_v61, %v384_v57  ;;  %v641_v2 = vadd.f32 %v540_v62, %v368_v58 }
 0x15e   : > { %v3883_v3 = vpop.f32.mrf.mxu0  ;;  %v3899_v4 = vpop.f32.mrf.mxu1 }
 0x15f   : > { %689 = vst [vmem:[#allocation2 + $0xd0] sm:$0xff] %v657_v1  ;;  %673 = vst [vmem:[#allocation2 + $0x88] sm:$0xff] %v641_v2  ;;  %v646_v8 = vadd.f32 %v3883_v3, %v373_v63  ;;  %v662_v10 = vadd.f32 %v3899_v4, %v389_v0 }
 0x160   : > { %v617_v11 = vpop.f32.mrf.mxu1  ;;  %v553_v12 = vpop.f32.mrf.mxu0 }
 0x161   : > { %678 = vst [vmem:[#allocation2 + $0x8] sm:$0xff] %v646_v8  ;;  %694 = vst [vmem:[#allocation2 + $0x20] sm:$0xff] %v662_v10  ;;  %v660_v13 = vadd.f32 %v617_v11, %v387_v5  ;;  %v644_v14 = vadd.f32 %v553_v12, %v371_v6 }
 0x162   : > { %v3884_v15 = vpop.f32.mrf.mxu0  ;;  %v3900_v16 = vpop.f32.mrf.mxu1 }
 0x163   : > { %692 = vst [vmem:[#allocation2 + $0xa0] sm:$0xff] %v660_v13  ;;  %676 = vst [vmem:[#allocation2 + $0x60] sm:$0xff] %v644_v14  ;;  %v647_v19 = vadd.f32 %v3884_v15, %v374_v9  ;;  %v663_v20 = vadd.f32 %v3900_v16, %v390_v7  ;;  %892 = sbr.rel (%p3788_p7) target bundleno = 1406 (0x57e), region = 48 }
 0x164   : > { %v620_v21 = vpop.f32.mrf.mxu1  ;;  %v556_v22 = vpop.f32.mrf.mxu0 }
 0x165   : > { %679 = vst [vmem:[#allocation2 + $0x78] sm:$0xff] %v647_v19  ;;  %695 = vst [vmem:[#allocation2 + $0x98] sm:$0xff] %v663_v20  ;;  %v661_v23 = vadd.f32 %v620_v21, %v388_v17  ;;  %v645_v24 = vadd.f32 %v556_v22, %v372_v18 }
 0x167   : > { %693 = vst [vmem:[#allocation2 + $0xf8] sm:$0xff] %v661_v23  ;;  %677 = vst [vmem:[#allocation2 + $0xf0] sm:$0xff] %v645_v24 }
 0x168   : > { %v895_v25 = vld [vmem:[#allocation2 + $0xd8] sm:$0xff]  ;;  %v893_v26 = vld [vmem:[#allocation2 + $0xb0] sm:$0xff]  ;;  %v894_v30 = vld [vmem:[#allocation2] sm:$0xff]  ;;  %s2302_s30 = sld [smem:[#allocation4]] }
 0x169   : > { %v896_v27 = vld [vmem:[#allocation2 + $0x18] sm:$0xff]  ;;  %v1215_v28 = vmul.f32 %v895_v25, %v895_v25  ;;  %v1213_v29 = vmul.f32 %v893_v26, %v893_v26  ;;  %v1214_v32 = vmul.f32 %v894_v30, %v894_v30  ;;  %v898_v33 = vld [vmem:[#allocation2 + $0x68] sm:$0xff]  ;;  %v897_v34 = vld [vmem:[#allocation2 + $0x50] sm:$0xff] }
 0x16a   : > { %v1216_v31 = vmul.f32 %v896_v27, %v896_v27  ;;  %v1218_v35 = vmul.f32 %v898_v33, %v898_v33  ;;  %v1217_v36 = vmul.f32 %v897_v34, %v897_v34  ;;  %v900_v37 = vld [vmem:[#allocation2 + $0x48] sm:$0xff]  ;;  %v899_v38 = vld [vmem:[#allocation2 + $0x30] sm:$0xff]  ;;  %v5229_v41 = vld [vmem:[#allocation3] sm:$0xff] }
 0x16b   : > { %1249 = vadd.xlane.f32.xlu1 %v1215_v28  ;;  %1245 = vadd.xlane.f32.xlu0 %v1213_v29  ;;  %v1220_v39 = vmul.f32 %v900_v37, %v900_v37  ;;  %v1219_v40 = vmul.f32 %v899_v38, %v899_v38  ;;  %v902_v42 = vld [vmem:[#allocation2 + $0x88] sm:$0xff]  ;;  %v901_v43 = vld [vmem:[#allocation2 + $0x80] sm:$0xff]  ;;  %v5233_v45 = vld [vmem:[#allocation3 + $0x10] sm:$0xff]  ;;  %4036 = vrsqrt.f32 %v5229_v41  ;;  %vm959_vm2 = vcmp.eq.f32.partialorder %v5229_v41, inf }
 0x16c   : > { %v5231_v44 = vld [vmem:[#allocation3 + $0x8] sm:$0xff]  ;;  %v1222_v46 = vmul.f32 %v902_v42, %v902_v42  ;;  %v1221_v47 = vmul.f32 %v901_v43, %v901_v43  ;;  %v904_v48 = vld [vmem:[#allocation2 + $0xb8] sm:$0xff]  ;;  %v905_v54 = vld [vmem:[#allocation2 + $0x60] sm:$0xff]  ;;  %v962_v14 = vand.u32 2147483648, %v5229_v41  ;;  %vm973_vm4 = vcmp.eq.f32.partialorder %v5233_v45, inf }
 0x16d   : > { %4038 = vrsqrt.f32 %v5231_v44  ;;  %v903_v49 = vld [vmem:[#allocation2 + $0xe8] sm:$0xff]  ;;  %v5238_v50 = vld [vmem:[#allocation3 + $0x18] sm:$0xff]  ;;  %v1224_v51 = vmul.f32 %v904_v48, %v904_v48  ;;  %v5241_v55 = vld [vmem:[#allocation3 + $0x20] sm:$0xff]  ;;  %v1225_v57 = vmul.f32 %v905_v54, %v905_v54  ;;  %vm966_vm3 = vcmp.eq.f32.partialorder %v5231_v44, inf }
 0x16e   : > { %4040 = vrsqrt.f32 %v5233_v45  ;;  %v1223_v52 = vmul.f32 %v903_v49, %v903_v49  ;;  %v906_v53 = vld [vmem:[#allocation2 + $0xf0] sm:$0xff]  ;;  %v908_v58 = vld [vmem:[#allocation2 + $0x78] sm:$0xff]  ;;  %v907_v59 = vld [vmem:[#allocation2 + $0x8] sm:$0xff]  ;;  %vm961_vm5 = vcmp.eq.f32.partialorder %v5229_v41, 0.0  ;;  %vm968_vm6 = vcmp.eq.f32.partialorder %v5231_v44, 0.0 }
 0x16f   : > { %1251 = vadd.xlane.f32.xlu1 %v1216_v31  ;;  %1247 = vadd.xlane.f32.xlu0 %v1214_v32  ;;  %4042 = vrsqrt.f32 %v5238_v50  ;;  %v1226_v56 = vmul.f32 %v906_v53, %v906_v53  ;;  %v5243_v60 = vld [vmem:[#allocation3 + $0x48] sm:$0xff]  ;;  %v1228_v63 = vmul.f32 %v908_v58, %v908_v58  ;;  %v1227_v0 = vmul.f32 %v907_v59, %v907_v59  ;;  %v910_v2 = vld [vmem:[#allocation2 + $0x58] sm:$0xff]  ;;  %v5251_v6 = vld [vmem:[#allocation3 + $0x30] sm:$0xff] }
 0x170   : > { %4044 = vrsqrt.f32 %v5241_v55  ;;  %v5246_v61 = vld [vmem:[#allocation3 + $0x28] sm:$0xff]  ;;  %v909_v3 = vld [vmem:[#allocation2 + $0x38] sm:$0xff]  ;;  %v1230_v8 = vmul.f32 %v910_v2, %v910_v2  ;;  %v911_v12 = vld [vmem:[#allocation2 + $0x40] sm:$0xff]  ;;  %v969_v20 = vand.u32 2147483648, %v5231_v44  ;;  %v976_v21 = vand.u32 2147483648, %v5233_v45 }
 0x171   : > { %4046 = vrsqrt.f32 %v5243_v60  ;;  %v1229_v10 = vmul.f32 %v909_v3, %v909_v3  ;;  %v912_v11 = vld [vmem:[#allocation2 + $0xc8] sm:$0xff]  ;;  %v1231_v16 = vmul.f32 %v911_v12, %v911_v12  ;;  %v914_v18 = vld [vmem:[#allocation2 + $0x90] sm:$0xff]  ;;  %v913_v19 = vld [vmem:[#allocation2 + $0xe0] sm:$0xff]  ;;  %vm975_vm7 = vcmp.eq.f32.partialorder %v5233_v45, 0.0 }
 0x172   : > { %4048 = vrsqrt.f32 %v5246_v61  ;;  %v1232_v15 = vmul.f32 %v912_v11, %v912_v11  ;;  %vm980_vm8 = vcmp.eq.f32.partialorder %v5238_v50, inf  ;;  %v1234_v27 = vmul.f32 %v914_v18, %v914_v18  ;;  %v916_v29 = vld [vmem:[#allocation2 + $0xc0] sm:$0xff]  ;;  %v915_v31 = vld [vmem:[#allocation2 + $0x70] sm:$0xff]  ;;  %v917_v42 = vld [vmem:[#allocation2 + $0xa8] sm:$0xff] }
 0x173   : > { %1255 = vadd.xlane.f32.xlu1 %v1218_v35  ;;  %1253 = vadd.xlane.f32.xlu0 %v1217_v36  ;;  %4050 = vrsqrt.f32 %v5251_v6  ;;  %v1233_v28 = vmul.f32 %v913_v19, %v913_v19  ;;  %v983_v30 = vand.u32 2147483648, %v5238_v50  ;;  %vm982_vm9 = vcmp.eq.f32.partialorder %v5238_v50, 0.0  ;;  %v918_v36 = vld [vmem:[#allocation2 + $0xd0] sm:$0xff]  ;;  %v920_v2 = vld [vmem:[#allocation2 + $0x28] sm:$0xff]  ;;  %v5345_v19 = vld [vmem:[#allocation3 + $0x78] sm:$0xff] }
 0x174   : > { %vm987_vm10 = vcmp.eq.f32.partialorder %v5241_v55, inf  ;;  %vm989_vm11 = vcmp.eq.f32.partialorder %v5241_v55, 0.0  ;;  %v990_v49 = vand.u32 2147483648, %v5241_v55  ;;  %vm1022_vm12 = vcmp.eq.f32.partialorder %v5243_v60, inf  ;;  %v919_v3 = vld [vmem:[#allocation2 + $0x10] sm:$0xff] }
 0x175   : > { %v1237_v54 = vmul.f32 %v917_v42, %v917_v42  ;;  %vm994_vm13 = vcmp.eq.f32.partialorder %v5246_v61, inf  ;;  %vm1024_vm14 = vcmp.eq.f32.partialorder %v5243_v60, 0.0  ;;  %vm996_vm15 = vcmp.eq.f32.partialorder %v5246_v61, 0.0 }
 0x176   : > { %vm1001_vm0 = vcmp.eq.f32.partialorder %v5251_v6, inf  ;;  %v1240_v12 = vmul.f32 %v920_v2, %v920_v2  ;;  %vm1003_vm1 = vcmp.eq.f32.partialorder %v5251_v6, 0.0 }
 0x177   : > { %1259 = vadd.xlane.f32.xlu1 %v1220_v39  ;;  %1257 = vadd.xlane.f32.xlu0 %v1219_v40  ;;  %v1236_v40 = vmul.f32 %v916_v29, %v916_v29  ;;  %v4867_v29 = vmov 0  }
 0x178   : > { %v4037_v62 = vpop.eup %4036  ;;  %4034 = vset.pattern.permute.xlu0 %v4867_v29  ;;  %4035 = vset.pattern.permute.xlu1 %v4867_v29 }
 0x179   : > { %v958_v5 = vmul.f32 %v4037_v62, %v5229_v41  ;;  %v1025_v62 = vand.u32 2147483648, %v5243_v60 }
 0x17a   : > { %v4039_v1 = vpop.eup %4038 }
 0x17b   : > { %1263 = vadd.xlane.f32.xlu1 %v1222_v46  ;;  %1261 = vadd.xlane.f32.xlu0 %v1221_v47  ;;  %v4041_v4 = vpop.eup %4040  ;;  %v965_v7 = vmul.f32 %v4039_v1, %v5231_v44  ;;  %v960_v17 = vsel %vm959_vm2, %v5229_v41, %v958_v5  ;;  %v1235_v41 = vmul.f32 %v915_v31, %v915_v31  ;;  %v5288_v46 = vld [vmem:[#allocation3 + $0x58] sm:$0xff]  ;;  %v997_v1 = vand.u32 2147483648, %v5246_v61 }
 0x17c   : > { %v4043_v9 = vpop.eup %4042  ;;  %v972_v13 = vmul.f32 %v4041_v4, %v5233_v45  ;;  %v5270_v26 = vsel %vm961_vm5, %v962_v14, %v960_v17  ;;  %v1238_v47 = vmul.f32 %v918_v36, %v918_v36  ;;  %4052 = vrsqrt.f32 %v5288_v46  ;;  %v921_v14 = vld [vmem:[#allocation2 + $0xa0] sm:$0xff] }
 0x17d   : > { %v979_v22 = vmul.f32 %v4043_v9, %v5238_v50  ;;  %v967_v23 = vsel %vm966_vm3, %v5231_v44, %v965_v7  ;;  %v4045_v25 = vpop.eup %4044  ;;  %v1181_v37 = vmax.f32 %v5270_v26, 1e-07  ;;  %v1239_v9 = vmul.f32 %v919_v3, %v919_v3 }
 0x17e   : > { %v974_v24 = vsel %vm973_vm4, %v5233_v45, %v972_v13  ;;  %v5275_v32 = vsel %vm968_vm6, %v969_v20, %v967_v23  ;;  %v4047_v35 = vpop.eup %4046  ;;  %v986_v38 = vmul.f32 %v4045_v25, %v5241_v55  ;;  %v922_v13 = vld [vmem:[#allocation2 + $0xf8] sm:$0xff]  ;;  %v1241_v23 = vmul.f32 %v921_v14, %v921_v14 }
 0x17f   : > { %1267 = vadd.xlane.f32.xlu1 %v1224_v51  ;;  %1265 = vadd.xlane.f32.xlu0 %v1223_v52  ;;  %v5277_v33 = vsel %vm975_vm7, %v976_v21, %v974_v24  ;;  %v981_v34 = vsel %vm980_vm8, %v5238_v50, %v979_v22  ;;  %v4049_v39 = vpop.eup %4048  ;;  %v1182_v43 = vmax.f32 %v5275_v32, 1e-07  ;;  %v1021_v48 = vmul.f32 %v4047_v35, %v5243_v60  ;;  %v5293_v50 = vld [vmem:[#allocation3 + $0x68] sm:$0xff]  ;;  %v5352_v24 = vld [vmem:[#allocation3 + $0x38] sm:$0xff] }
 0x180   : > { %v1183_v44 = vmax.f32 %v5277_v33, 1e-07  ;;  %v5286_v45 = vsel %vm982_vm9, %v983_v30, %v981_v34  ;;  %v5297_v51 = vmin.f32 %v1181_v37, 0.999999  ;;  %v988_v52 = vsel %vm987_vm10, %v5241_v55, %v986_v38  ;;  %v924_v25 = vld [vmem:[#allocation2 + $0x98] sm:$0xff] }
 0x181   : > { %v993_v53 = vmul.f32 %v4049_v39, %v5246_v61  ;;  %v5309_v58 = vmin.f32 %v1182_v43, 0.999999  ;;  %4054 = vrsqrt.f32 %v5293_v50  ;;  %v1242_v22 = vmul.f32 %v922_v13, %v922_v13 }
 0x182   : > { %v5313_v59 = vmin.f32 %v1183_v44, 0.999999  ;;  %v1725_v4 = vsub.f32 1.0, %v5297_v51  ;;  %v1244_v38 = vmul.f32 %v924_v25, %v924_v25  ;;  %vm1036_vm2 = vcmp.eq.f32.partialorder %v5288_v46, inf }
 0x183   : > { %1271 = vadd.xlane.f32.xlu1 %v1226_v56  ;;  %1269 = vadd.xlane.f32.xlu0 %v1225_v57  ;;  %v1184_v56 = vmax.f32 %v5286_v45, 1e-07  ;;  %v4051_v57 = vpop.eup %4050  ;;  %v995_v5 = vsel %vm994_vm13, %v5246_v61, %v993_v53  ;;  %v1726_v55 = vsub.f32 1.0, %v5309_v58  ;;  %vm1050_vm3 = vcmp.eq.f32.partialorder %v5293_v50, inf }
 0x184   : > { %v1727_v61 = vsub.f32 1.0, %v5313_v59  ;;  %v5338_v7 = vsel %vm996_vm15, %v997_v1, %v995_v5  ;;  %4056 = vrcp.f32 %v1725_v4  ;;  %v1039_v53 = vand.u32 2147483648, %v5288_v46  ;;  %v5408_v4 = vld [vmem:[#allocation3 + $0x98] sm:$0xff] }
 0x185   : > { %4058 = vrcp.f32 %v1726_v55  ;;  %v1186_v21 = vmax.f32 %v5338_v7, 1e-07  ;;  %vm1038_vm4 = vcmp.eq.f32.partialorder %v5288_v46, 0.0  ;;  %vm1052_vm5 = vcmp.eq.f32.partialorder %v5293_v50, 0.0  ;;  %v5509_v7 = vld [vmem:[#allocation3 + $0x60] sm:$0xff] }
 0x186   : > { %4060 = vrcp.f32 %v1727_v61  ;;  %v1695_v3 = vadd.f32 1.0, %v5313_v59  ;;  %vm1064_vm6 = vcmp.eq.f32.partialorder %v5345_v19, inf  ;;  %vm1008_vm7 = vcmp.eq.f32.partialorder %v5352_v24, inf }
 0x187   : > { %1275 = vadd.xlane.f32.xlu1 %v1228_v63  ;;  %1273 = vadd.xlane.f32.xlu0 %v1227_v0  ;;  %v1023_v63 = vsel %vm1022_vm12, %v5243_v60, %v1021_v48  ;;  %v5321_v0 = vsel %vm989_vm11, %v990_v49, %v988_v52  ;;  %v1000_v60 = vmul.f32 %v4051_v57, %v5251_v6  ;;  %4062 = vrsqrt.f32 %v5345_v19 }
 0x188   : > { %v1185_v11 = vmax.f32 %v5321_v0, 1e-07  ;;  %v5366_v35 = vmin.f32 %v1186_v21, 0.999999  ;;  %v1693_v52 = vadd.f32 1.0, %v5297_v51  ;;  %vm1066_vm8 = vcmp.eq.f32.partialorder %v5345_v19, 0.0 }
 0x189   : > { %v1002_v18 = vsel %vm1001_vm0, %v5251_v6, %v1000_v60  ;;  %v4053_v31 = vpop.eup %4052  ;;  %vm1010_vm10 = vcmp.eq.f32.partialorder %v5352_v24, 0.0  ;;  %vm1092_vm15 = vcmp.eq.f32.partialorder %v5408_v4, inf }
 0x18a   : > { %v5349_v20 = vmin.f32 %v1185_v11, 0.999999  ;;  %v1035_v42 = vmul.f32 %v4053_v31, %v5288_v46 }
 0x18b   : > { %1279 = vadd.xlane.f32.xlu1 %v1230_v8  ;;  %1277 = vadd.xlane.f32.xlu0 %v1229_v10  ;;  %v5329_v8 = vmin.f32 %v1184_v56, 0.999999  ;;  %v5333_v10 = vsel %vm1024_vm14, %v1025_v62, %v1023_v63  ;;  %v1694_v62 = vadd.f32 1.0, %v5309_v58  ;;  %v5397_v63 = vld [vmem:[#allocation3 + $0x50] sm:$0xff] }
 0x18c   : > { %v1190_v17 = vmax.f32 %v5333_v10, 1e-07  ;;  %v1729_v34 = vsub.f32 1.0, %v5349_v20  ;;  %v1037_v26 = vsel %vm1036_vm2, %v5288_v46, %v1035_v42  ;;  %vm1029_vm14 = vcmp.eq.f32.partialorder %v5397_v63, inf }
 0x18d   : > { %v5401_v46 = vsel %vm1038_vm4, %v1039_v53, %v1037_v26  ;;  %v1696_v33 = vadd.f32 1.0, %v5329_v8  ;;  %vm1031_vm0 = vcmp.eq.f32.partialorder %v5397_v63, 0.0  ;;  %vm1043_vm4 = vcmp.eq.f32.partialorder %v5509_v7, inf }
 0x18e   : > { %v5361_v30 = vmin.f32 %v1190_v17, 0.999999  ;;  %v4055_v36 = vpop.eup %4054 }
 0x18f   : > { %1283 = vadd.xlane.f32.xlu1 %v1232_v15  ;;  %1281 = vadd.xlane.f32.xlu0 %v1231_v16  ;;  %v1004_v15 = vand.u32 2147483648, %v5251_v6  ;;  %v1728_v16 = vsub.f32 1.0, %v5329_v8  ;;  %v5357_v6 = vld [vmem:[#allocation3 + $0x40] sm:$0xff]  ;;  %v1049_v48 = vmul.f32 %v4055_v36, %v5293_v50 }
 0x190   : > { %vm1015_vm9 = vcmp.eq.f32.partialorder %v5357_v6, inf  ;;  %v1702_v25 = vadd.f32 1.0, %v5361_v30  ;;  %vm1017_vm11 = vcmp.eq.f32.partialorder %v5357_v6, 0.0 }
 0x191   : > { %4064 = vrcp.f32 %v1728_v16  ;;  %v4057_v57 = vpop.eup %4056  ;;  %v1051_v51 = vsel %vm1050_vm3, %v5293_v50, %v1049_v48 }
 0x192   : > { %4066 = vrsqrt.f32 %v5352_v24  ;;  %v4059_v32 = vpop.eup %4058  ;;  %v1758_v58 = vmul.f32 %v4057_v57, %v1693_v52 }
 0x193   : > { %1287 = vadd.xlane.f32.xlu1 %v1234_v27  ;;  %1285 = vadd.xlane.f32.xlu0 %v1233_v28  ;;  %v923_v27 = vld [vmem:[#allocation2 + $0x20] sm:$0xff]  ;;  %v5354_v28 = vsel %vm1003_vm1, %v1004_v15, %v1002_v18  ;;  %4068 = vrsqrt.f32 %v5357_v6  ;;  %v4061_v1 = vpop.eup %4060  ;;  %v1760_v60 = vmul.f32 %v4059_v32, %v1694_v62  ;;  %v1067_v15 = vand.u32 2147483648, %v5345_v19 }
 0x194   : > { %v1243_v39 = vmul.f32 %v923_v27, %v923_v27  ;;  %4070 = vrcp.f32 %v1729_v34  ;;  %v4063_v2 = vpop.eup %4062  ;;  %v1011_v27 = vand.u32 2147483648, %v5352_v24  ;;  %vm1094_vm1 = vcmp.eq.f32.partialorder %v5408_v4, 0.0 }
 0x195   : > { %4072 = vrcp.f32 %v1181_v37  ;;  %v1053_v37 = vand.u32 2147483648, %v5293_v50  ;;  %v1063_v45 = vmul.f32 %v4063_v2, %v5345_v19 }
 0x196   : > { %4074 = vrcp.f32 %v1182_v43 }
 0x197   : > { %1291 = vadd.xlane.f32.xlu1 %v1236_v40  ;;  %1289 = vadd.xlane.f32.xlu0 %v1235_v41  ;;  %v1187_v40 = vmax.f32 %v5354_v28, 1e-07  ;;  %v1734_v41 = vsub.f32 1.0, %v5361_v30  ;;  %v5406_v50 = vsel %vm1052_vm5, %v1053_v37, %v1051_v51  ;;  %v5466_v37 = vld [vmem:[#allocation3 + $0xa8] sm:$0xff]  ;;  %vm1045_vm5 = vcmp.eq.f32.partialorder %v5509_v7, 0.0 }
 0x198   : > { %v1194_v59 = vmax.f32 %v5406_v50, 1e-07  ;;  %vm1106_vm2 = vcmp.eq.f32.partialorder %v5466_v37, inf  ;;  %vm1108_vm3 = vcmp.eq.f32.partialorder %v5466_v37, 0.0 }
 0x199   : > { %v5381_v49 = vmin.f32 %v1187_v40, 0.999999  ;;  %4076 = vrcp.f32 %v1734_v41 }
 0x19b   : > { %1295 = vadd.xlane.f32.xlu1 %v1238_v47  ;;  %1293 = vadd.xlane.f32.xlu0 %v1237_v54  ;;  %v1730_v47 = vsub.f32 1.0, %v5366_v35  ;;  %v5387_v54 = vld [vmem:[#allocation3 + $0x88] sm:$0xff]  ;;  %v1731_v43 = vsub.f32 1.0, %v5381_v49  ;;  %v1699_v51 = vadd.f32 1.0, %v5381_v49 }
 0x19c   : > { %vm1078_vm12 = vcmp.eq.f32.partialorder %v5387_v54, inf  ;;  %vm1080_vm13 = vcmp.eq.f32.partialorder %v5387_v54, 0.0 }
 0x19d   : > { %4078 = vrcp.f32 %v1730_v47 }
 0x19e   : > { %4080 = vrsqrt.f32 %v5387_v54  ;;  %v4065_v5 = vpop.eup %4064 }
 0x19f   : > { %1299 = vadd.xlane.f32.xlu1 %v1240_v12  ;;  %1297 = vadd.xlane.f32.xlu0 %v1239_v9  ;;  %4082 = vrcp.f32 %v1183_v44  ;;  %v4067_v55 = vpop.eup %4066  ;;  %v1192_v44 = vmax.f32 %v5401_v46, 1e-07  ;;  %v1697_v9 = vadd.f32 1.0, %v5349_v20  ;;  %v1764_v13 = vmul.f32 %v4065_v5, %v1696_v33  ;;  %v5543_v46 = vld [vmem:[#allocation3 + $0xc8] sm:$0xff] }
 0x1a0   : > { %4084 = vrcp.f32 %v1184_v56  ;;  %v4069_v12 = vpop.eup %4068  ;;  %v1762_v56 = vmul.f32 %v4061_v1, %v1695_v3  ;;  %v1007_v61 = vmul.f32 %v4067_v55, %v5352_v24  ;;  %v1065_v20 = vsel %vm1064_vm6, %v5345_v19, %v1063_v45 }
 0x1a1   : > { %4086 = vrsqrt.f32 %v5397_v63  ;;  %v4071_v8 = vpop.eup %4070  ;;  %v5422_v14 = vmin.f32 %v1192_v44, 0.999999  ;;  %v1014_v16 = vmul.f32 %v4069_v12, %v5357_v6  ;;  %v1018_v19 = vand.u32 2147483648, %v5357_v6 }
 0x1a2   : > { %4088 = vrcp.f32 %v1731_v43  ;;  %v5426_v18 = vpop.eup %4072  ;;  %v1766_v31 = vmul.f32 %v4071_v8, %v1697_v9  ;;  %v1009_v34 = vsel %vm1008_vm7, %v5352_v24, %v1007_v61  ;;  %v5447_v30 = vsel %vm1066_vm8, %v1067_v15, %v1065_v20  ;;  %v5533_v20 = vld [vmem:[#allocation3 + $0xb8] sm:$0xff] }
 0x1a3   : > { %1303 = vadd.xlane.f32.xlu1 %v1242_v22  ;;  %1301 = vadd.xlane.f32.xlu0 %v1241_v23  ;;  %4090 = vrsqrt.f32 %v5408_v4  ;;  %v5430_v22 = vmin.f32 %v1194_v59, 0.999999  ;;  %v5435_v23 = vpop.eup %4074  ;;  %v1016_v41 = vsel %vm1015_vm9, %v5357_v6, %v1014_v16  ;;  %v5457_v52 = vsel %vm1010_vm10, %v1011_v27, %v1009_v34 }
 0x1a4   : > { %4092 = vlog2.f32 %v1758_v58  ;;  %v1196_v57 = vmax.f32 %v5447_v30, 1e-07  ;;  %v5464_v26 = vsel %vm1017_vm11, %v1018_v19, %v1016_v41  ;;  %v1188_v32 = vmax.f32 %v5457_v52, 1e-07 }
 0x1a5   : > { %4094 = vlog2.f32 %v1760_v60  ;;  %v1738_v47 = vsub.f32 1.0, %v5430_v22  ;;  %v1189_v6 = vmax.f32 %v5464_v26, 1e-07  ;;  %v1081_v58 = vand.u32 2147483648, %v5387_v54 }
 0x1a6   : > { %4096 = vlog2.f32 %v1762_v56  ;;  %v4077_v29 = vpop.eup %4076  ;;  %v5478_v2 = vmin.f32 %v1196_v57, 0.999999  ;;  %v5491_v55 = vmin.f32 %v1188_v32, 0.999999  ;;  %v1706_v27 = vadd.f32 1.0, %v5430_v22 }
 0x1a7   : > { %1307 = vadd.xlane.f32.xlu1 %v1244_v38  ;;  %1305 = vadd.xlane.f32.xlu0 %v1243_v39  ;;  %v1736_v38 = vsub.f32 1.0, %v5422_v14  ;;  %v1698_v39 = vadd.f32 1.0, %v5366_v35  ;;  %4098 = vlog2.f32 %v1764_v13  ;;  %v1776_v35 = vmul.f32 %v4077_v29, %v1702_v25 }
 0x1a8   : > { %4100 = vrcp.f32 %v1190_v17  ;;  %v5498_v0 = vmin.f32 %v1189_v6, 0.999999  ;;  %v1740_v12 = vsub.f32 1.0, %v5478_v2  ;;  %v1732_v9 = vsub.f32 1.0, %v5491_v55 }
 0x1a9   : > { %4102 = vlog2.f32 %v1766_v31  ;;  %v5537_v31 = vld [vmem:[#allocation3 + $0x70] sm:$0xff]  ;;  %v1700_v50 = vadd.f32 1.0, %v5491_v55  ;;  %v1046_v26 = vand.u32 2147483648, %v5509_v7  ;;  %v5608_v55 = vld [vmem:[#allocation3 + $0xa0] sm:$0xff]  ;;  %vm1120_vm8 = vcmp.eq.f32.partialorder %v5533_v20, inf }
 0x1aa   : > { %v4079_v36 = vpop.eup %4078  ;;  %4104 = vrcp.f32 %v1736_v38  ;;  %v5550_v38 = vld [vmem:[#allocation3 + $0x80] sm:$0xff]  ;;  %vm1057_vm6 = vcmp.eq.f32.partialorder %v5537_v31, inf  ;;  %vm1059_vm7 = vcmp.eq.f32.partialorder %v5537_v31, 0.0  ;;  %vm1122_vm9 = vcmp.eq.f32.partialorder %v5533_v20, 0.0 }
 0x1ab   : > { %v4081_v42 = vpop.eup %4080  ;;  %v1768_v10 = vmul.f32 %v4079_v36, %v1698_v39  ;;  %4106 = vrcp.f32 %v1738_v47  ;;  %vm1134_vm10 = vcmp.eq.f32.partialorder %v5543_v46, inf  ;;  %vm1071_vm11 = vcmp.eq.f32.partialorder %v5550_v38, inf }
 0x1ac   : > { %v5451_v48 = vpop.eup %4082  ;;  %v1077_v17 = vmul.f32 %v4081_v42, %v5387_v54  ;;  %4108 = vrsqrt.f32 %v5466_v37 }
 0x1ad   : > { %v5459_v53 = vpop.eup %4084  ;;  %4110 = vlog2.f32 %v1776_v35 }
 0x1ae   : > { %v4087_v62 = vpop.eup %4086  ;;  %4112 = vrcp.f32 %v1185_v11  ;;  %v1079_v5 = vsel %vm1078_vm12, %v5387_v54, %v1077_v17  ;;  %v1032_v11 = vand.u32 2147483648, %v5397_v63  ;;  %vm1073_vm12 = vcmp.eq.f32.partialorder %v5550_v38, 0.0 }
 0x1af   : > { %v4089_v24 = vpop.eup %4088  ;;  %v1028_v49 = vmul.f32 %v4087_v62, %v5397_v63  ;;  %4114 = vlog2.f32 %v1768_v10  ;;  %v5505_v45 = vsel %vm1080_vm13, %v1081_v58, %v1079_v5  ;;  %vm1136_vm13 = vcmp.eq.f32.partialorder %v5543_v46, 0.0 }
 0x1b0   : > { %v4091_v43 = vpop.eup %4090  ;;  %v1770_v60 = vmul.f32 %v4089_v24, %v1699_v51  ;;  %4116 = vrcp.f32 %v1186_v21  ;;  %v1095_v21 = vand.u32 2147483648, %v5408_v4  ;;  %v1198_v13 = vmax.f32 %v5505_v45, 1e-07  ;;  %v5571_v24 = vld [vmem:[#allocation3 + $0xd8] sm:$0xff] }
 0x1b1   : > { %v5474_v1 = vpop.eup %4092  ;;  %v1091_v33 = vmul.f32 %v4091_v43, %v5408_v4  ;;  %v1030_v56 = vsel %vm1029_vm14, %v5397_v63, %v1028_v49  ;;  %4118 = vrcp.f32 %v1187_v40  ;;  %v1733_v63 = vsub.f32 1.0, %v5498_v0 }
 0x1b2   : > { %v5482_v3 = vpop.eup %4094  ;;  %4120 = vlog2.f32 %v1770_v60  ;;  %v5521_v15 = vsel %vm1031_vm0, %v1032_v11, %v1030_v56  ;;  %v5541_v19 = vmin.f32 %v1198_v13, 0.999999 }
 0x1b3   : > { %v5502_v54 = vpop.eup %4096  ;;  %v1093_v61 = vsel %vm1092_vm15, %v5408_v4, %v1091_v33  ;;  %4122 = vrsqrt.f32 %v5509_v7  ;;  %v1704_v4 = vadd.f32 1.0, %v5422_v14  ;;  %v1191_v29 = vmax.f32 %v5521_v15, 1e-07 }
 0x1b4   : > { %v5517_v8 = vpop.eup %4098  ;;  %4124 = vrcp.f32 %v1740_v12  ;;  %v5531_v16 = vsel %vm1094_vm1, %v1095_v21, %v1093_v61  ;;  %v1742_v35 = vsub.f32 1.0, %v5541_v19  ;;  %v5588_v12 = vld [vmem:[#allocation3 + $0x90] sm:$0xff]  ;;  %v1708_v21 = vadd.f32 1.0, %v5478_v2 }
 0x1b5   : > { %v5524_v28 = vpop.eup %4100  ;;  %4126 = vrcp.f32 %v1192_v44  ;;  %v1200_v14 = vmax.f32 %v5531_v16, 1e-07  ;;  %v1671_v42 = vmin.f32 %v1191_v29, 0.999999  ;;  %v1710_v15 = vadd.f32 1.0, %v5541_v19 }
 0x1b6   : > { %v5526_v40 = vpop.eup %4102  ;;  %4128 = vrcp.f32 %v1732_v9  ;;  %v5594_v9 = vld [vmem:[#allocation3 + $0xe8] sm:$0xff]  ;;  %vm1085_vm14 = vcmp.eq.f32.partialorder %v5588_v12, inf  ;;  %vm1148_vm15 = vcmp.eq.f32.partialorder %v5571_v24, inf  ;;  %vm1087_vm0 = vcmp.eq.f32.partialorder %v5588_v12, 0.0 }
 0x1b7   : > { %v4105_v25 = vpop.eup %4104  ;;  %4130 = vrcp.f32 %v1733_v63  ;;  %v5567_v17 = vmin.f32 %v1200_v14, 0.999999  ;;  %v1735_v52 = vsub.f32 1.0, %v1671_v42  ;;  %v5603_v2 = vadd.f32 1.0, %v1671_v42 }
 0x1b8   : > { %v4107_v34 = vpop.eup %4106  ;;  %4132 = vrsqrt.f32 %v5533_v20  ;;  %v1780_v22 = vmul.f32 %v4105_v25, %v1704_v4  ;;  %vm1150_vm1 = vcmp.eq.f32.partialorder %v5571_v24, 0.0 }
 0x1b9   : > { %v4109_v44 = vpop.eup %4108  ;;  %4134 = vrsqrt.f32 %v5537_v31  ;;  %v1784_v41 = vmul.f32 %v4107_v34, %v1706_v27  ;;  %v1744_v5 = vsub.f32 1.0, %v5567_v17 }
 0x1ba   : > { %v5547_v36 = vpop.eup %4110  ;;  %4136 = vrsqrt.f32 %v5543_v46  ;;  %v1105_v62 = vmul.f32 %v4109_v44, %v5466_v37 }
 0x1bb   : > { %v5552_v39 = vpop.eup %4112  ;;  %4138 = vrcp.f32 %v1188_v32  ;;  %v1109_v32 = vand.u32 2147483648, %v5466_v37 }
 0x1bc   : > { %v5557_v47 = vpop.eup %4114  ;;  %4140 = vrsqrt.f32 %v5550_v38  ;;  %v1107_v58 = vsel %vm1106_vm2, %v5466_v37, %v1105_v62  ;;  %vm1162_vm2 = vcmp.eq.f32.partialorder %v5594_v9, inf }
 0x1bd   : > { %v5563_v10 = vpop.eup %4116  ;;  %4142 = vlog2.f32 %v1780_v22  ;;  %v5586_v11 = vsel %vm1108_vm3, %v1109_v32, %v1107_v58  ;;  %vm1099_vm3 = vcmp.eq.f32.partialorder %v5608_v55, inf }
 0x1be   : > { %v5573_v51 = vpop.eup %4118  ;;  %4144 = vlog2.f32 %v1784_v41  ;;  %v1202_v4 = vmax.f32 %v5586_v11, 1e-07  ;;  %v1123_v41 = vand.u32 2147483648, %v5533_v20 }
 0x1bf   : > { %v5576_v43 = vpop.eup %4120  ;;  %4146 = vrcp.f32 %v1742_v35 }
 0x1c0   : > { %v4123_v49 = vpop.eup %4122  ;;  %4148 = vrsqrt.f32 %v5571_v24  ;;  %v5621_v35 = vmin.f32 %v1202_v4, 0.999999 }
 0x1c1   : > { %v4125_v60 = vpop.eup %4124  ;;  %4150 = vrcp.f32 %v1194_v59  ;;  %v1042_v37 = vmul.f32 %v4123_v49, %v5509_v7  ;;  %v1701_v59 = vadd.f32 1.0, %v5498_v0 }
 0x1c2   : > { %v5584_v33 = vpop.eup %4126  ;;  %4152 = vrcp.f32 %v1735_v52  ;;  %v1788_v25 = vmul.f32 %v4125_v60, %v1708_v21  ;;  %v1060_v52 = vand.u32 2147483648, %v5537_v31  ;;  %v5645_v60 = vld [vmem:[#allocation3 + $0xf8] sm:$0xff]  ;;  %v1746_v21 = vsub.f32 1.0, %v5621_v35 }
 0x1c3   : > { %v4129_v56 = vpop.eup %4128  ;;  %4154 = vrcp.f32 %v1189_v6  ;;  %v1044_v27 = vsel %vm1043_vm4, %v5509_v7, %v1042_v37  ;;  %vm1164_vm4 = vcmp.eq.f32.partialorder %v5594_v9, 0.0 }
 0x1c4   : > { %v4131_v61 = vpop.eup %4130  ;;  %4156 = vrcp.f32 %v1744_v5  ;;  %v1772_v44 = vmul.f32 %v4129_v56, %v1700_v50  ;;  %v1137_v50 = vand.u32 2147483648, %v5543_v46 }
 0x1c5   : > { %v4133_v63 = vpop.eup %4132  ;;  %4158 = vrsqrt.f32 %v5588_v12  ;;  %v1774_v30 = vmul.f32 %v4131_v61, %v1701_v59 }
 0x1c6   : > { %v4135_v6 = vpop.eup %4134  ;;  %4160 = vrsqrt.f32 %v5594_v9  ;;  %v1119_v22 = vmul.f32 %v4133_v63, %v5533_v20  ;;  %v1074_v63 = vand.u32 2147483648, %v5550_v38 }
 0x1c7   : > { %v4137_v0 = vpop.eup %4136  ;;  %4162 = vrcp.f32 %v1196_v57  ;;  %v1056_v62 = vmul.f32 %v4135_v6, %v5537_v31  ;;  %v5632_v57 = vsel %vm1045_vm5, %v1046_v26, %v1044_v27  ;;  %v1712_v6 = vadd.f32 1.0, %v5567_v17 }
 0x1c8   : > { %v5613_v34 = vpop.eup %4138  ;;  %4164 = vrsqrt.f32 %v5608_v55  ;;  %v1133_v58 = vmul.f32 %v4137_v0, %v5543_v46  ;;  %v1121_v7 = vsel %vm1120_vm8, %v5533_v20, %v1119_v22  ;;  %v1193_v37 = vmax.f32 %v5632_v57, 1e-07 }
 0x1c9   : > { %v4141_v42 = vpop.eup %4140  ;;  %4166 = vrcp.f32 %v1191_v29  ;;  %v1058_v61 = vsel %vm1057_vm6, %v5537_v31, %v1056_v62  ;;  %v1124_v0 = vsel %vm1122_vm9, %v1123_v41, %v1121_v7  ;;  %vm1101_vm5 = vcmp.eq.f32.partialorder %v5608_v55, 0.0 }
 0x1ca   : > { %v5626_v32 = vpop.eup %4142  ;;  %4168 = vlog2.f32 %v1788_v25  ;;  %v1070_v29 = vmul.f32 %v4141_v42, %v5550_v38  ;;  %v1135_v59 = vsel %vm1134_vm10, %v5543_v46, %v1133_v58  ;;  %v5675_v20 = vmin.f32 %v1193_v37, 0.999999 }
 0x1cb   : > { %v5635_v49 = vpop.eup %4144  ;;  %4170 = vlog2.f32 %v1772_v44  ;;  %v1061_v44 = vsel %vm1059_vm7, %v1060_v52, %v1058_v61  ;;  %v5677_v41 = vsel %vm1136_vm13, %v1137_v50, %v1135_v59  ;;  %v1204_v62 = vmax.f32 %v1124_v0, 1e-07 }
 0x1cc   : > { %v4147_v5 = vpop.eup %4146  ;;  %4172 = vlog2.f32 %v1774_v30  ;;  %v1072_v46 = vsel %vm1071_vm11, %v5550_v38, %v1070_v29  ;;  %v1195_v30 = vmax.f32 %v1061_v44, 1e-07  ;;  %v1206_v45 = vmax.f32 %v5677_v41, 1e-07 }
 0x1cd   : > { %v4149_v56 = vpop.eup %4148  ;;  %4174 = vrsqrt.f32 %v5645_v60  ;;  %v1792_v27 = vmul.f32 %v4147_v5, %v1710_v15  ;;  %v5686_v58 = vsel %vm1073_vm12, %v1074_v63, %v1072_v46  ;;  %v1151_v5 = vand.u32 2147483648, %v5571_v24 }
 0x1ce   : > { %v5653_v19 = vpop.eup %4150  ;;  %v1147_v22 = vmul.f32 %v4149_v56, %v5571_v24  ;;  %4176 = vrcp.f32 %v1746_v21  ;;  %v1737_v7 = vsub.f32 1.0, %v5675_v20  ;;  %v1088_v29 = vand.u32 2147483648, %v5588_v12 }
 0x1cf   : > { %v4153_v26 = vpop.eup %4152  ;;  %4178 = vrcp.f32 %v1198_v13  ;;  %v5699_v21 = vmin.f32 %v1204_v62, 0.999999  ;;  %v1197_v61 = vmax.f32 %v5686_v58, 1e-07  ;;  %v5707_v16 = vmin.f32 %v1195_v30, 0.999999 }
 0x1d0   : > { %v5665_v25 = vpop.eup %4154  ;;  %v1778_v31 = vmul.f32 %v4153_v26, %v5603_v2  ;;  %4180 = vlog2.f32 %v1792_v27  ;;  %v1149_v13 = vsel %vm1148_vm15, %v5571_v24, %v1147_v22  ;;  %v5716_v26 = vmin.f32 %v1206_v45, 0.999999 }
 0x1d1   : > { %v4157_v17 = vpop.eup %4156  ;;  %4182 = vrcp.f32 %v1200_v14  ;;  %v5711_v14 = vsel %vm1150_vm1, %v1151_v5, %v1149_v13  ;;  %v5730_v27 = vmin.f32 %v1197_v61, 0.999999  ;;  %v1714_v5 = vadd.f32 1.0, %v5621_v35 }
 0x1d2   : > { %v4159_v42 = vpop.eup %4158  ;;  %v1796_v15 = vmul.f32 %v4157_v17, %v1712_v6  ;;  %4184 = vlog2.f32 %v1778_v31  ;;  %v1165_v6 = vand.u32 2147483648, %v5594_v9  ;;  %v1208_v44 = vmax.f32 %v5711_v14, 1e-07 }
 0x1d3   : > { %v4161_v52 = vpop.eup %4160  ;;  %v1084_v38 = vmul.f32 %v4159_v42, %v5588_v12  ;;  %4186 = vrcp.f32 %v1202_v4  ;;  %v1748_v4 = vsub.f32 1.0, %v5699_v21  ;;  %v1739_v17 = vsub.f32 1.0, %v5707_v16 }
 0x1d4   : > { %v5692_v2 = vpop.eup %4162  ;;  %v1161_v50 = vmul.f32 %v4161_v52, %v5594_v9  ;;  %4188 = vlog2.f32 %v1796_v15  ;;  %v1750_v42 = vsub.f32 1.0, %v5716_v26  ;;  %v1102_v52 = vand.u32 2147483648, %v5608_v55 }
 0x1d5   : > { %v4165_v56 = vpop.eup %4164  ;;  %4190 = vrcp.f32 %v1737_v7  ;;  %v1086_v24 = vsel %vm1085_vm14, %v5588_v12, %v1084_v38  ;;  %v5753_v13 = vmin.f32 %v1208_v44, 0.999999  ;;  %vm1176_vm6 = vcmp.eq.f32.partialorder %v5645_v60, inf }
 0x1d6   : > { %v5703_v59 = vpop.eup %4166  ;;  %v1098_v11 = vmul.f32 %v4165_v56, %v5608_v55  ;;  %v1163_v46 = vsel %vm1162_vm2, %v5594_v9, %v1161_v50  ;;  %4192 = vrcp.f32 %v1193_v37  ;;  %v1089_v31 = vsel %vm1087_vm0, %v1088_v29, %v1086_v24 }
 0x1d7   : > { %7927 = vst [vmem:[#allocation15_spill] sm:$0xff] %v5703_v59  ;;  %v5714_v63 = vpop.eup %4168  ;;  %4194 = vrcp.f32 %v1204_v62  ;;  %v5747_v57 = vsel %vm1164_vm4, %v1165_v6, %v1163_v46  ;;  %v1741_v62 = vsub.f32 1.0, %v5730_v27  ;;  %v1199_v7 = vmax.f32 %v1089_v31, 1e-07 }
 0x1d8   : > { %v5720_v0 = vpop.eup %4170  ;;  %4196 = vrcp.f32 %v1195_v30  ;;  %v1100_v37 = vsel %vm1099_vm3, %v5608_v55, %v1098_v11  ;;  %v1210_v9 = vmax.f32 %v5747_v57, 1e-07  ;;  %v1752_v6 = vsub.f32 1.0, %v5753_v13 }
 0x1d9   : > { %v5734_v22 = vpop.eup %4172  ;;  %4198 = vrcp.f32 %v1748_v4  ;;  %v5761_v30 = vsel %vm1101_vm5, %v1102_v52, %v1100_v37  ;;  %vm1178_vm7 = vcmp.eq.f32.partialorder %v5645_v60, 0.0  ;;  %v1179_v55 = vand.u32 2147483648, %v5645_v60 }
 0x1da   : > { %v4175_v41 = vpop.eup %4174  ;;  %4200 = vrcp.f32 %v1739_v17  ;;  %v5778_v11 = vmin.f32 %v1199_v7, 0.999999  ;;  %v5785_v17 = vmin.f32 %v1210_v9, 0.999999 }
 0x1db   : > { %v4177_v15 = vpop.eup %4176  ;;  %v1175_v35 = vmul.f32 %v4175_v41, %v5645_v60  ;;  %4202 = vrcp.f32 %v1750_v42 }
 0x1dc   : > { %v5755_v12 = vpop.eup %4178  ;;  %v1800_v29 = vmul.f32 %v4177_v15, %v1714_v5  ;;  %4204 = vrcp.f32 %v1206_v45  ;;  %v1201_v45 = vmax.f32 %v5761_v30, 1e-07  ;;  %v1705_v5 = vadd.f32 1.0, %v5675_v20 }
 0x1dd   : > { %v5764_v38 = vpop.eup %4180  ;;  %4206 = vrcp.f32 %v1741_v62  ;;  %v1177_v4 = vsel %vm1176_vm6, %v5645_v60, %v1175_v35  ;;  %v1743_v37 = vsub.f32 1.0, %v5778_v11  ;;  %v1754_v35 = vsub.f32 1.0, %v5785_v17 }
 0x1de   : > { %v5766_v56 = vpop.eup %4182  ;;  %v5796_v57 = vsel %vm1178_vm7, %v1179_v55, %v1177_v4  ;;  %v5801_v15 = vmin.f32 %v1201_v45, 0.999999  ;;  %v1707_v4 = vadd.f32 1.0, %v5707_v16  ;;  %v1718_v60 = vadd.f32 1.0, %v5716_v26 }
 0x1df   : > { %v5775_v24 = vpop.eup %4184  ;;  %7929 = vst [vmem:[#allocation17_spill] sm:$0xff] %v5796_v57  ;;  %v1828_v26 = vmul.f32 0.6931472, %v5517_v8 }
 0x1e0   : > { %v5782_v46 = vpop.eup %4186 }
 0x1e1   : > { %7928 = vst [vmem:[#allocation16_spill] sm:$0xff] %v5782_v46  ;;  %v5787_v41 = vpop.eup %4188  ;;  %v1824_v46 = vmul.f32 0.6931472, %v5482_v3 }
 0x1e2   : > { %v4191_v42 = vpop.eup %4190 }
 0x1e3   : > { %v5803_v62 = vpop.eup %4192 }
 0x1e4   : > { %7930 = vst [vmem:[#allocation18_spill] sm:$0xff] %v5803_v62  ;;  %v5807_v30 = vpop.eup %4194  ;;  %v1745_v62 = vsub.f32 1.0, %v5801_v15 }
 0x1e5   : > { %7931 = vst [vmem:[#allocation19_spill] sm:$0xff] %v5807_v30  ;;  %v5810_v20 = vpop.eup %4196 }
 0x1e6   : > { %7932 = vst [vmem:[#allocation20_spill] sm:$0xff] %v5810_v20  ;;  %v4199_v55 = vpop.eup %4198 }
 0x1e7   : > { %v4201_v30 = vpop.eup %4200 }
 0x1e8   : > { %v4203_v20 = vpop.eup %4202 }
 0x1e9   : > { %v5827_v16 = vpop.eup %4204 }
 0x1ea   : > { %7935 = vst [vmem:[#allocation22_spill] sm:$0xff] %v5827_v16  ;;  %v5838_v16 = vmul.f32 0.5, %v1824_v46 }
 0x1f4   : > { %v5768_v50 = vpop.xlane.xlu1 %1249  ;;  %v5770_v14 = vpop.xlane.xlu0 %1245 }
 0x1f5   : > { %4208 = vrsqrt.f32 %v5768_v50  ;;  %vm1311_vm8 = vcmp.eq.f32.partialorder %v5770_v14, inf  ;;  %v1314_v46 = vand.u32 2147483648, %v5770_v14  ;;  %vm1313_vm9 = vcmp.eq.f32.partialorder %v5770_v14, 0.0 }
 0x1f6   : > { %4210 = vrsqrt.f32 %v5770_v14  ;;  %vm1325_vm10 = vcmp.eq.f32.partialorder %v5768_v50, inf  ;;  %vm1327_vm12 = vcmp.eq.f32.partialorder %v5768_v50, 0.0 }
 0x1f7   : > { %4212 = vlog2.f32 %v1800_v29 }
 0x1f8   : > { %v5789_v31 = vpop.xlane.xlu1 %1251  ;;  %v5791_v52 = vpop.xlane.xlu0 %1247  ;;  %4214 = vrcp.f32 %v1752_v6  ;;  %v1716_v6 = vadd.f32 1.0, %v5699_v21  ;;  %v7933_v21 = vmax.f32 %v5796_v57, 1e-07 }
 0x1f9   : > { %4216 = vrcp.f32 %v1197_v61  ;;  %v1782_v61 = vmul.f32 %v4191_v42, %v1705_v5  ;;  %v1826_v42 = vmul.f32 0.6931472, %v5502_v54  ;;  %vm1318_vm11 = vcmp.eq.f32.partialorder %v5791_v52, inf }
 0x1fa   : > { %4218 = vrsqrt.f32 %v5791_v52  ;;  %vm1320_vm13 = vcmp.eq.f32.partialorder %v5791_v52, 0.0  ;;  %vm1332_vm14 = vcmp.eq.f32.partialorder %v5789_v31, inf  ;;  %vm1334_vm15 = vcmp.eq.f32.partialorder %v5789_v31, 0.0 }
 0x1fb   : > { %4220 = vrcp.f32 %v1208_v44  ;;  %v1822_v44 = vmul.f32 0.6931472, %v5474_v1  ;;  %v4207_v1 = vpop.eup %4206 }
 0x1fc   : > { %v5812_v29 = vpop.xlane.xlu1 %1255  ;;  %v5814_v58 = vpop.xlane.xlu0 %1253  ;;  %4222 = vrcp.f32 %v1199_v7  ;;  %v5825_v7 = vmin.f32 %v7933_v21, 0.999999  ;;  %v1709_v21 = vadd.f32 1.0, %v5730_v27 }
 0x1fd   : > { %4224 = vrcp.f32 %v1743_v37  ;;  %v1804_v37 = vmul.f32 %v4199_v55, %v1716_v6  ;;  %v5835_v54 = vmul.f32 0.5, %v1822_v44  ;;  %vm1346_vm0 = vcmp.eq.f32.partialorder %v5812_v29, inf }
 0x1fe   : > { %4226 = vrcp.f32 %v1754_v35  ;;  %7934 = vst [vmem:[#allocation21_spill] sm:$0xff] %v5825_v7  ;;  %v1786_v35 = vmul.f32 %v4201_v30, %v1707_v4  ;;  %v1756_v8 = vsub.f32 1.0, %v5825_v7  ;;  %v1840_v7 = vmul.f32 0.6931472, %v5547_v36 }
 0x1ff   : > { %4228 = vrcp.f32 %v1210_v9  ;;  %v1808_v9 = vmul.f32 %v4203_v20, %v1718_v60  ;;  %v1720_v60 = vadd.f32 1.0, %v5753_v13  ;;  %v5852_v20 = vmul.f32 0.5, %v1828_v26 }
 0x200   : > { %v5829_v5 = vpop.xlane.xlu1 %1259  ;;  %4230 = vlog2.f32 %v1782_v61  ;;  %v5833_v3 = vpop.xlane.xlu0 %1257  ;;  %v5840_v61 = vmul.f32 0.5, %v1826_v42  ;;  %v1830_v42 = vmul.f32 0.6931472, %v5526_v40  ;;  %v1328_v40 = vand.u32 2147483648, %v5768_v50 }
 0x201   : > { %4232 = vrcp.f32 %v1745_v62  ;;  %vm1339_vm1 = vcmp.eq.f32.partialorder %v5814_v58, inf  ;;  %vm1360_vm3 = vcmp.eq.f32.partialorder %v5829_v5, inf  ;;  %vm1353_vm4 = vcmp.eq.f32.partialorder %v5833_v3, inf }
 0x202   : > { %v4209_v59 = vpop.eup %4208  ;;  %4234 = vrsqrt.f32 %v5789_v31  ;;  %vm1341_vm6 = vcmp.eq.f32.partialorder %v5814_v58, 0.0 }
 0x203   : > { %v4211_v57 = vpop.eup %4210  ;;  %4236 = vrcp.f32 %v1201_v45  ;;  %v1324_v62 = vmul.f32 %v4209_v59, %v5768_v50  ;;  %v1790_v59 = vmul.f32 %v4207_v1, %v1709_v21  ;;  %v5873_v21 = vld [vmem:[#allocation3 + $0xc0] sm:$0xff]  ;;  %v1321_v1 = vand.u32 2147483648, %v5791_v52 }
 0x204   : > { %v5843_v30 = vpop.eup %4212  ;;  %v1310_v6 = vmul.f32 %v4211_v57, %v5770_v14  ;;  %v5847_v55 = vpop.xlane.xlu1 %1263  ;;  %4238 = vlog2.f32 %v1804_v37  ;;  %v5858_v57 = vld [vmem:[#allocation3 + $0xb0] sm:$0xff]  ;;  %7939 = vst [vmem:[#allocation26_spill] sm:$0xff] %v5873_v21 }
 0x205   : > { %v4215_v27 = vpop.eup %4214  ;;  %4240 = vlog2.f32 %v1786_v35  ;;  %7937 = vst [vmem:[#allocation24_spill] sm:$0xff] %v5858_v57  ;;  %v1326_v26 = vsel %vm1325_vm10, %v5768_v50, %v1324_v62  ;;  %vm1374_vm2 = vcmp.eq.f32.partialorder %v5847_v55, inf  ;;  %vm1376_vm5 = vcmp.eq.f32.partialorder %v5847_v55, 0.0 }
 0x206   : > { %v5854_v45 = vpop.eup %4216  ;;  %v1312_v4 = vsel %vm1311_vm8, %v5770_v14, %v1310_v6  ;;  %4242 = vlog2.f32 %v1808_v9  ;;  %v5868_v6 = vpop.xlane.xlu0 %1261  ;;  %v1812_v9 = vmul.f32 %v4215_v27, %v1720_v60  ;;  %v1722_v60 = vadd.f32 1.0, %v5785_v17  ;;  %v951_v27 = vld [vmem:[#allocation3 + $0xd0] sm:$0xff] }
 0x207   : > { %7936 = vst [vmem:[#allocation23_spill] sm:$0xff] %v5854_v45  ;;  %v4219_v44 = vpop.eup %4218  ;;  %v5861_v13 = vsel %vm1313_vm9, %v1314_v46, %v1312_v4  ;;  %4244 = vrcp.f32 %v1756_v8  ;;  %v1711_v8 = vadd.f32 1.0, %v5778_v11  ;;  %vm1367_vm7 = vcmp.eq.f32.partialorder %v5868_v6, inf }
 0x208   : > { %v5864_v37 = vpop.eup %4220  ;;  %v1317_v35 = vmul.f32 %v4219_v44, %v5791_v52  ;;  %v5870_v14 = vpop.xlane.xlu1 %1267  ;;  %4246 = vrsqrt.f32 %v5858_v57 }
 0x209   : > { %7938 = vst [vmem:[#allocation25_spill] sm:$0xff] %v5864_v37  ;;  %v5875_v46 = vpop.eup %4222  ;;  %4248 = vlog2.f32 %v1790_v59  ;;  %v7942_v59 = vmax.f32 %v5861_v13, 1e-07  ;;  %vm1388_vm8 = vcmp.eq.f32.partialorder %v5870_v14, inf }
 0x20a   : > { %7940 = vst [vmem:[#allocation27_spill] sm:$0xff] %v5875_v46  ;;  %v4225_v62 = vpop.eup %4224  ;;  %v1319_v4 = vsel %vm1318_vm11, %v5791_v52, %v1317_v35  ;;  %v5885_v46 = vsel %vm1327_vm12, %v1328_v40, %v1326_v26  ;;  %4250 = vrsqrt.f32 %v5873_v21  ;;  %v1832_v35 = vmul.f32 0.6931472, %v5557_v47  ;;  %v5904_v52 = vpop.xlane.xlu0 %1265 }
 0x20b   : > { %v4227_v44 = vpop.eup %4226  ;;  %v1629_v17 = vmul.f32 %v5426_v18, %v7942_v59  ;;  %4252 = vlog2.f32 %v1812_v9  ;;  %v5900_v26 = vsel %vm1320_vm13, %v1321_v1, %v1319_v4  ;;  %v1794_v36 = vmul.f32 %v4225_v62, %v1711_v8 }
 0x20c   : > { %v5889_v11 = vpop.eup %4228  ;;  %v5892_v50 = vpop.xlane.xlu1 %1271  ;;  %v1713_v40 = vadd.f32 1.0, %v5801_v15  ;;  %4254 = vrsqrt.f32 %v951_v27  ;;  %v7886_v45 = vmax.f32 %v5885_v46, 1e-07  ;;  %v1834_v18 = vmul.f32 0.6931472, %v5576_v43 }
 0x20d   : > { %7941 = vst [vmem:[#allocation28_spill] sm:$0xff] %v5889_v11  ;;  %v5898_v37 = vpop.eup %4230  ;;  %4256 = vrsqrt.f32 %v5847_v55  ;;  %v1816_v59 = vmul.f32 %v4227_v44, %v1722_v60  ;;  %v1917_v1 = vmul.f32 %v5835_v54, %v1629_v17  ;;  %v5910_v9 = vmul.f32 0.5, %v1830_v42 }
 0x20e   : > { %v4233_v11 = vpop.eup %4232  ;;  %4258 = vrsqrt.f32 %v5812_v29  ;;  %v1844_v15 = vmul.f32 0.6931472, %v5626_v32  ;;  %v5919_v27 = vmul.f32 0.5, %v1840_v7  ;;  %v1848_v43 = vmul.f32 0.6931472, %v5635_v49 }
 0x20f   : > { %v4235_v47 = vpop.eup %4234  ;;  %4260 = vrsqrt.f32 %v5814_v58  ;;  %v5922_v44 = vmul.f32 0.5, %v1832_v35  ;;  %v1852_v54 = vmul.f32 0.6931472, %v5714_v63  ;;  %v1798_v42 = vmul.f32 %v4233_v11, %v1713_v40 }
 0x210   : > { %v5913_v8 = vpop.eup %4236  ;;  %v5916_v62 = vpop.xlane.xlu1 %1275  ;;  %4262 = vlog2.f32 %v1794_v36  ;;  %v1331_v17 = vmul.f32 %v4235_v47, %v5789_v31  ;;  %v5931_v4 = vmul.f32 0.5, %v1834_v18  ;;  %v3789_v49 = vclamps-f32 %v1917_v1, 15.0 }
 0x211   : > { %7943 = vst [vmem:[#allocation29_spill] sm:$0xff] %v5913_v8  ;;  %v4239_v60 = vpop.eup %4238  ;;  %v1631_v8 = vmul.f32 %v5451_v48, %v7886_v45  ;;  %4264 = vlog2.f32 %v1816_v59  ;;  %v5936_v35 = vmul.f32 0.5, %v1844_v15  ;;  %v1836_v63 = vmul.f32 0.6931472, %v5720_v0  ;;  %v5942_v36 = vpop.xlane.xlu0 %1269 }
 0x212   : > { %v5925_v32 = vpop.eup %4240  ;;  %4266 = vrsqrt.f32 %v5829_v5  ;;  %v7945_v48 = vmax.f32 %v5900_v26, 1e-07  ;;  %v5949_v59 = vmul.f32 0.5, %v1848_v43  ;;  %v1838_v47 = vmul.f32 0.6931472, %v5734_v22 }
 0x213   : > { %v5933_v7 = vpop.eup %4242  ;;  %4268 = vrsqrt.f32 %v5833_v3  ;;  %v5953_v1 = vmul.f32 0.5, %v1852_v54  ;;  %v1856_v0 = vmul.f32 0.6931472, %v5764_v38  ;;  %v1333_v45 = vsel %vm1332_vm14, %v5789_v31, %v1331_v17 }
 0x214   : > { %v5939_v11 = vpop.eup %4244  ;;  %v5944_v40 = vpop.xlane.xlu1 %1279  ;;  %v1630_v18 = vmul.f32 %v5435_v23, %v7945_v48  ;;  %4270 = vlog2.f32 %v1798_v42  ;;  %v1842_v23 = vmul.f32 0.6931472, %v5775_v24  ;;  %v1335_v22 = vand.u32 2147483648, %v5789_v31 }
 0x215   : > { %7944 = vst [vmem:[#allocation30_spill] sm:$0xff] %v5939_v11  ;;  %v5956_v15 = vpop.eup %4246  ;;  %4272 = vrsqrt.f32 %v5868_v6  ;;  %v1919_v11 = vmul.f32 %v5840_v61, %v1631_v8  ;;  %v5965_v54 = vmul.f32 0.5, %v1836_v63  ;;  %v1860_v38 = vmul.f32 0.6931472, %v5787_v41 }
 0x216   : > { %7946 = vst [vmem:[#allocation31_spill] sm:$0xff] %v5956_v15  ;;  %v5962_v43 = vpop.eup %4248  ;;  %4274 = vtanh.f32 %v3789_v49  ;;  %v1918_v61 = vmul.f32 %v5838_v16, %v1630_v18  ;;  %v5975_v24 = vmul.f32 0.5, %v1838_v47  ;;  %v7949_v49 = vmax.f32 %v5861_v13, 1e-07 }
 0x217   : > { %v5968_v42 = vpop.eup %4250  ;;  %4276 = vrsqrt.f32 %v5870_v14  ;;  %v5981_v63 = vsel %vm1334_vm15, %v1335_v22, %v1333_v45  ;;  %v1864_v41 = vmul.f32 0.6931472, %v5843_v30  ;;  %v1846_v48 = vmul.f32 0.6931472, %v5898_v37 }
 0x218   : > { %7947 = vst [vmem:[#allocation32_spill] sm:$0xff] %v5968_v42  ;;  %v5972_v17 = vpop.xlane.xlu1 %1283  ;;  %v5977_v8 = vpop.eup %4252  ;;  %4278 = vrcp.f32 %v7949_v49  ;;  %v3791_v16 = vclamps-f32 %v1919_v11, 15.0  ;;  %v5990_v18 = vmul.f32 0.5, %v1856_v0  ;;  %v5992_v47 = vmul.f32 0.5, %v1842_v23 }
 0x219   : > { %7948 = vst [vmem:[#allocation33_spill] sm:$0xff] %v5977_v8  ;;  %v5985_v31 = vpop.eup %4254  ;;  %4280 = vrsqrt.f32 %v5904_v52  ;;  %v5988_v42 = vpop.xlane.xlu0 %1273  ;;  %v3790_v45 = vclamps-f32 %v1918_v61, 15.0  ;;  %v5995_v13 = vmul.f32 0.5, %v1860_v38  ;;  %v1868_v30 = vmul.f32 0.6931472, %v4239_v60 }
 0x21a   : > { %7950 = vst [vmem:[#allocation34_spill] sm:$0xff] %v5985_v31  ;;  %7951 = vst [vmem:[#allocation35_spill] sm:$0xff] %v5992_v47  ;;  %v4257_v15 = vpop.eup %4256  ;;  %4282 = vrsqrt.f32 %v5892_v50  ;;  %v6003_v31 = vmul.f32 0.5, %v1864_v41  ;;  %v6005_v61 = vmul.f32 0.5, %v1846_v48  ;;  %v1850_v23 = vmul.f32 0.6931472, %v5925_v32 }
 0x21b   : > { %7952 = vst [vmem:[#allocation36_spill] sm:$0xff] %v5995_v13  ;;  %v4259_v22 = vpop.eup %4258  ;;  %4284 = vrsqrt.f32 %v5942_v36  ;;  %v1373_v49 = vmul.f32 %v4257_v15, %v5847_v55  ;;  %v6019_v41 = vmul.f32 0.5, %v1868_v30  ;;  %v1872_v48 = vmul.f32 0.6931472, %v5933_v7 }
 0x21c   : > { %v4261_v0 = vpop.eup %4260  ;;  %4286 = vrsqrt.f32 %v5916_v62  ;;  %7953 = vst [vmem:[#allocation37_spill] sm:$0xff] %v6003_v31  ;;  %7954 = vst [vmem:[#allocation38_spill] sm:$0xff] %v6005_v61  ;;  %v6013_v11 = vpop.xlane.xlu1 %1287  ;;  %v7958_v32 = vmax.f32 %v5981_v63, 1e-07  ;;  %v1377_v7 = vand.u32 2147483648, %v5847_v55  ;;  %vm1381_vm9 = vcmp.eq.f32.partialorder %v5904_v52, inf }
 0x21d   : > { %v6007_v38 = vpop.eup %4262  ;;  %4288 = vtanh.f32 %v3791_v16  ;;  %7957 = vst [vmem:[#allocation41_spill] sm:$0xff] %v6019_v41  ;;  %v6025_v15 = vpop.xlane.xlu0 %1277  ;;  %v7959_v30 = vmax.f32 %v5900_v26, 1e-07  ;;  %v1375_v60 = vsel %vm1374_vm2, %v5847_v55, %v1373_v49  ;;  %v6047_v26 = vmul.f32 0.5, %v1872_v48 }
 0x21e   : > { %7955 = vst [vmem:[#allocation39_spill] sm:$0xff] %v6007_v38  ;;  %v6016_v37 = vpop.eup %4264  ;;  %4290 = vtanh.f32 %v3790_v45  ;;  %v1632_v16 = vmul.f32 %v5459_v53, %v7958_v32  ;;  %v6042_v53 = vmul.f32 0.5, %v1850_v23  ;;  %v1345_v45 = vmul.f32 %v4259_v22, %v5812_v29 }
 0x21f   : > { %7956 = vst [vmem:[#allocation40_spill] sm:$0xff] %v6016_v37  ;;  %v4267_v21 = vpop.eup %4266  ;;  %4292 = vrsqrt.f32 %v5988_v42  ;;  %v1338_v38 = vmul.f32 %v4261_v0, %v5814_v58  ;;  %7962 = vst [vmem:[#allocation44_spill] sm:$0xff] %v6047_v26  ;;  %v6056_v8 = vmul.f32 0.6931472, %v5962_v43  ;;  %v7965_v48 = vmax.f32 %v5885_v46, 1e-07 }
 0x220   : > { %v4269_v37 = vpop.eup %4268  ;;  %4294 = vrcp.f32 %v7959_v30  ;;  %7961 = vst [vmem:[#allocation43_spill] sm:$0xff] %v6042_v53  ;;  %v1920_v23 = vmul.f32 %v5852_v20, %v1632_v16  ;;  %v1359_v0 = vmul.f32 %v4267_v21, %v5829_v5  ;;  %v6065_v26 = vsel %vm1376_vm5, %v1377_v7, %v1375_v60 }
 0x221   : > { %v6035_v57 = vpop.eup %4270  ;;  %4296 = vrsqrt.f32 %v5944_v40  ;;  %7963 = vst [vmem:[#allocation45_spill] sm:$0xff] %v6056_v8  ;;  %v1352_v41 = vmul.f32 %v4269_v37, %v5833_v3  ;;  %v6075_v46 = vsel %vm1346_vm0, %v5812_v29, %v1345_v45  ;;  %v1340_v55 = vsel %vm1339_vm1, %v5814_v58, %v1338_v38  ;;  %v6081_v37 = vpop.xlane.xlu0 %1281 }
 0x222   : > { %7960 = vst [vmem:[#allocation42_spill] sm:$0xff] %v6035_v57  ;;  %v4273_v32 = vpop.eup %4272  ;;  %4298 = vrsqrt.f32 %v6025_v15  ;;  %v6052_v57 = vpop.xlane.xlu1 %1291  ;;  %vm1402_vm10 = vcmp.eq.f32.partialorder %v5892_v50, inf  ;;  %v7891_v21 = vmax.f32 %v6065_v26, 1e-07  ;;  %v6090_v20 = vsel %vm1360_vm3, %v5829_v5, %v1359_v0 }
 0x223   : > { %v4275_v30 = vpop.eup %4274  ;;  %4300 = vrcp.f32 %v7965_v48  ;;  %v1366_v7 = vmul.f32 %v4273_v32, %v5868_v6  ;;  %v3792_v48 = vclamps-f32 %v1920_v23, 15.0  ;;  %vm1395_vm11 = vcmp.eq.f32.partialorder %v5942_v36, inf }
 0x224   : > { %v4277_v22 = vpop.eup %4276  ;;  %v6059_v53 = vmin.f32 %v4275_v30, 0.99999  ;;  %4302 = vrsqrt.f32 %v5972_v17  ;;  %v6098_v32 = vsel %vm1353_vm4, %v5833_v3, %v1352_v41  ;;  %vm1390_vm12 = vcmp.eq.f32.partialorder %v5870_v14, 0.0 }
 0x225   : > { %v4279_v49 = vpop.eup %4278  ;;  %vm1404_vm13 = vcmp.eq.f32.partialorder %v5892_v50, 0.0  ;;  %vm1416_vm14 = vcmp.eq.f32.partialorder %v5916_v62, inf  ;;  %4304 = vrsqrt.f32 %v6081_v37  ;;  %vm1409_vm15 = vcmp.eq.f32.partialorder %v5988_v42, inf  ;;  %v6123_v31 = vpop.xlane.xlu0 %1285 }
 0x226   : > { %7964 = vst [vmem:[#allocation46_spill] sm:$0xff] %v6059_v53  ;;  %v4281_v43 = vpop.eup %4280  ;;  %v2077_v60 = vmul.f32 %v4279_v49, %v6059_v53  ;;  %v6105_v0 = vpop.xlane.xlu1 %1295  ;;  %vm1430_vm0 = vcmp.eq.f32.partialorder %v5944_v40, inf  ;;  %4306 = vrsqrt.f32 %v6013_v11  ;;  %vm1348_vm1 = vcmp.eq.f32.partialorder %v5812_v29, 0.0 }
 0x227   : > { %v4283_v16 = vpop.eup %4282  ;;  %v6115_v23 = vsel %vm1367_vm7, %v5868_v6, %v1366_v7  ;;  %4308 = vtanh.f32 %v3792_v48  ;;  %v1638_v53 = vmul.f32 %v5524_v28, %v7891_v21  ;;  %v1387_v8 = vmul.f32 %v4277_v22, %v5870_v14 }
 0x228   : > { %v4285_v45 = vpop.eup %4284  ;;  %2111 = vperm.xlu0 %4034, %v2077_v60   ;;  %v1380_v61 = vmul.f32 %v4281_v43, %v5904_v52  ;;  %v7966_v13 = vand.u32 2147483648, %v5814_v58  ;;  %v1401_v30 = vmul.f32 %v4283_v16, %v5892_v50  ;;  %vm1423_vm2 = vcmp.eq.f32.partialorder %v6025_v15, inf }
 0x229   : > { %v4287_v49 = vpop.eup %4286  ;;  %v1394_v28 = vmul.f32 %v4285_v45, %v5942_v36  ;;  %v7967_v22 = vmax.f32 %v5981_v63, 1e-07  ;;  %vm1355_vm3 = vcmp.eq.f32.partialorder %v5833_v3, 0.0  ;;  %v1926_v63 = vmul.f32 %v5919_v27, %v1638_v53 }
 0x22a   : > { %v4289_v38 = vpop.eup %4288  ;;  %v6131_v7 = vsel %vm1341_vm6, %v7966_v13, %v1340_v55  ;;  %v6146_v45 = vpop.xlane.xlu1 %1299  ;;  %v1403_v27 = vsel %vm1402_vm10, %v5892_v50, %v1401_v30  ;;  %vm1418_vm4 = vcmp.eq.f32.partialorder %v5916_v62, 0.0  ;;  %vm1444_vm5 = vcmp.eq.f32.partialorder %v5972_v17, inf }
 0x22b   : > { %v4291_v41 = vpop.eup %4290  ;;  %4310 = vrcp.f32 %v7967_v22  ;;  %v6142_v13 = vmin.f32 %v4289_v38, 0.99999  ;;  %v1537_v22 = vmax.f32 %v6131_v7, 1e-07  ;;  %v6156_v38 = vsel %vm1381_vm9, %v5904_v52, %v1380_v61 }
 0x22c   : > { %v4293_v60 = vpop.eup %4292  ;;  %v6125_v47 = vmin.f32 %v4291_v41, 0.99999  ;;  %v1415_v41 = vmul.f32 %v4287_v49, %v5916_v62  ;;  %4312 = vrsqrt.f32 %v6123_v31  ;;  %v1389_v49 = vsel %vm1388_vm8, %v5870_v14, %v1387_v8 }
 0x22d   : > { %v4295_v48 = vpop.eup %4294  ;;  %v1408_v16 = vmul.f32 %v4293_v60, %v5988_v42  ;;  %v6166_v53 = vsel %vm1395_vm11, %v5942_v36, %v1394_v28  ;;  %4314 = vrsqrt.f32 %v6052_v57  ;;  %vm1437_vm6 = vcmp.eq.f32.partialorder %v6081_v37, inf }
 0x22e   : > { %v4297_v43 = vpop.eup %4296  ;;  %v2078_v58 = vmul.f32 %v4295_v48, %v6125_v47  ;;  %v6173_v7 = vsel %vm1416_vm14, %v5916_v62, %v1415_v41  ;;  %v3798_v41 = vclamps-f32 %v1926_v63, 15.0  ;;  %v1633_v60 = vmul.f32 %v5552_v39, %v1537_v22 }
 0x22f   : > { %v4299_v55 = vpop.eup %4298  ;;  %v1429_v8 = vmul.f32 %v4297_v43, %v5944_v40  ;;  %v6183_v28 = vsel %vm1409_vm15, %v5988_v42, %v1408_v16  ;;  %vm1362_vm7 = vcmp.eq.f32.partialorder %v5829_v5, 0.0  ;;  %v7970_v16 = vand.u32 2147483648, %v5812_v29 }
 0x230   : > { %2116 = vperm.xlu1 %4035, %v2078_v58   ;;  %v4301_v21 = vpop.eup %4300  ;;  %v1422_v58 = vmul.f32 %v4299_v55, %v6025_v15  ;;  %v7968_v55 = vmax.f32 %v6065_v26, 1e-07  ;;  %v7971_v63 = vand.u32 2147483648, %v5892_v50  ;;  %vm1458_vm8 = vcmp.eq.f32.partialorder %v6013_v11, inf }
 0x231   : > { %v2079_v30 = vmul.f32 %v4301_v21, %v6142_v13  ;;  %v7969_v21 = vand.u32 2147483648, %v5870_v14  ;;  %v1350_v43 = vsel %vm1348_vm1, %v7970_v16, %v6075_v46  ;;  %v6209_v26 = vsel %vm1430_vm0, %v5944_v40, %v1429_v8  ;;  %v6212_v14 = vpop.xlane.xlu1 %1303 }
 0x232   : > { %4316 = vrcp.f32 %v7968_v55  ;;  %v6204_v39 = vsel %vm1404_vm13, %v7971_v63, %v1403_v27  ;;  %v1921_v29 = vmul.f32 %v5910_v9, %v1633_v60  ;;  %vm1369_vm9 = vcmp.eq.f32.partialorder %v5868_v6, 0.0 }
 0x233   : > { %v1392_v61 = vsel %vm1390_vm12, %v7969_v21, %v1389_v49  ;;  %4318 = vtanh.f32 %v3798_v41  ;;  %vm1432_vm10 = vcmp.eq.f32.partialorder %v5944_v40, 0.0  ;;  %v6220_v50 = vsel %vm1423_vm2, %v6025_v15, %v1422_v58 }
 0x234   : > { %2121 = vperm.xlu1 %4035, %v2079_v30   ;;  %v4303_v30 = vpop.eup %4302  ;;  %v1544_v46 = vmax.f32 %v1392_v61, 1e-07  ;;  %4320 = vrsqrt.f32 %v6105_v0  ;;  %v1538_v27 = vmax.f32 %v1350_v43, 1e-07  ;;  %v1546_v8 = vmax.f32 %v6204_v39, 1e-07 }
 0x235   : > { %v4305_v49 = vpop.eup %4304  ;;  %4322 = vrsqrt.f32 %v6146_v45  ;;  %v3793_v9 = vclamps-f32 %v1921_v29, 15.0  ;;  %v7972_v61 = vand.u32 2147483648, %v5833_v3  ;;  %v1443_v58 = vmul.f32 %v4303_v30, %v5972_v17 }
 0x236   : > { %v4307_v55 = vpop.eup %4306  ;;  %v1640_v60 = vmul.f32 %v5584_v33, %v1544_v46  ;;  %vm1446_vm11 = vcmp.eq.f32.partialorder %v5972_v17, 0.0  ;;  %4324 = vrsqrt.f32 %v6212_v14  ;;  %v1634_v43 = vmul.f32 %v5563_v10, %v1538_v27 }
 0x237   : > { %v1357_v41 = vsel %vm1355_vm3, %v7972_v61, %v6098_v32  ;;  %v4309_v21 = vpop.eup %4308  ;;  %v1642_v16 = vmul.f32 %v5653_v19, %v1546_v8  ;;  %v1436_v63 = vmul.f32 %v4305_v49, %v6081_v37  ;;  %4326 = vtanh.f32 %v3793_v9 }
 0x238   : > { %v6237_v33 = vmin.f32 %v4309_v21, 0.99999  ;;  %v1928_v39 = vmul.f32 %v5936_v35, %v1640_v60  ;;  %v4311_v3 = vpop.eup %4310  ;;  %4328 = vrcp.f32 %v1537_v22  ;;  %v1922_v32 = vmul.f32 %v5922_v44, %v1634_v43 }
 0x239   : > { %v1930_v30 = vmul.f32 %v5949_v59, %v1642_v16  ;;  %v1539_v29 = vmax.f32 %v1357_v41, 1e-07  ;;  %v1457_v61 = vmul.f32 %v4307_v55, %v6013_v11  ;;  %4330 = vrcp.f32 %v1544_v46  ;;  %v4313_v48 = vpop.eup %4312 }
 0x23a   : > { %v2080_v10 = vmul.f32 %v4311_v3, %v6237_v33  ;;  %v3800_v19 = vclamps-f32 %v1928_v39, 15.0  ;;  %vm1383_vm12 = vcmp.eq.f32.partialorder %v5904_v52, 0.0  ;;  %vm1460_vm13 = vcmp.eq.f32.partialorder %v6013_v11, 0.0  ;;  %v4315_v60 = vpop.eup %4314 }
 0x23b   : > { %4332 = vrcp.f32 %v1538_v27  ;;  %v3794_v35 = vclamps-f32 %v1922_v32, 15.0  ;;  %v3802_v49 = vclamps-f32 %v1930_v30, 15.0  ;;  %v1635_v22 = vmul.f32 %v5573_v51, %v1539_v29 }
 0x23c   : > { %v1445_v44 = vsel %vm1444_vm5, %v5972_v17, %v1443_v58  ;;  %v1489_v59 = vand.u32 2147483648, %v6105_v0  ;;  %2126 = vperm.xlu1 %4035, %v2080_v10   ;;  %4334 = vtanh.f32 %v3800_v19  ;;  %v7973_v46 = vand.u32 2147483648, %v5916_v62 }
 0x23d   : > { %v6259_v27 = vsel %vm1437_vm6, %v6081_v37, %v1436_v63  ;;  %4336 = vtanh.f32 %v3794_v35  ;;  %v1923_v51 = vmul.f32 %v5931_v4, %v1635_v22  ;;  %vm1397_vm14 = vcmp.eq.f32.partialorder %v5942_v36, 0.0 }
 0x23e   : > { %v1420_v55 = vsel %vm1418_vm4, %v7973_v46, %v6173_v7  ;;  %v6264_v41 = vmul.f32 %v4313_v48, %v6123_v31  ;;  %v1503_v21 = vand.u32 2147483648, %v6146_v45  ;;  %4338 = vtanh.f32 %v3802_v49 }
 0x23f   : > { %v1548_v9 = vmax.f32 %v1420_v55, 1e-07  ;;  %v7974_v62 = vand.u32 2147483648, %v5829_v5  ;;  %v1459_v4 = vsel %vm1458_vm8, %v6013_v11, %v1457_v61  ;;  %vm1472_vm15 = vcmp.eq.f32.partialorder %v6052_v57, inf  ;;  %v4317_v43 = vpop.eup %4316 }
 0x240   : > { %4340 = vrcp.f32 %v1546_v8  ;;  %v3795_v58 = vclamps-f32 %v1923_v51, 15.0  ;;  %v7975_v63 = vand.u32 2147483648, %v5944_v40  ;;  %v4319_v3 = vpop.eup %4318  ;;  %vm1486_vm0 = vcmp.eq.f32.partialorder %v6105_v0, inf }
 0x241   : > { %v1364_v7 = vsel %vm1362_vm7, %v7974_v62, %v6090_v20  ;;  %v1644_v48 = vmul.f32 %v5692_v2, %v1548_v9  ;;  %4342 = vrcp.f32 %v1539_v29  ;;  %v7976_v20 = vand.u32 2147483648, %v5868_v6  ;;  %v4321_v30 = vpop.eup %4320 }
 0x242   : > { %v1540_v16 = vmax.f32 %v1364_v7, 1e-07  ;;  %v1434_v5 = vsel %vm1432_vm10, %v7975_v63, %v6209_v26  ;;  %4344 = vtanh.f32 %v3795_v58  ;;  %v6289_v29 = vmin.f32 %v4319_v3, 0.99999  ;;  %v7982_v3 = vld [vmem:[#allocation15_spill] sm:$0xff] }
 0x243   : > { %v1371_v39 = vsel %vm1369_vm9, %v7976_v20, %v6115_v23  ;;  %v1932_v8 = vmul.f32 %v5953_v1, %v1644_v48  ;;  %v1550_v2 = vmax.f32 %v1434_v5, 1e-07  ;;  %4346 = vrcp.f32 %v1548_v9  ;;  %v6296_v23 = vpop.eup %4322 }
 0x244   : > { %v1541_v32 = vmax.f32 %v1371_v39, 1e-07  ;;  %v1636_v40 = vmul.f32 %v5613_v34, %v1540_v16  ;;  %v7977_v26 = vand.u32 2147483648, %v5972_v17  ;;  %4348 = vrcp.f32 %v1540_v16  ;;  %v6300_v19 = vpop.eup %4324  ;;  %v7980_v16 = vld [vmem:[#allocation36_spill] sm:$0xff] }
 0x245   : > { %v3804_v61 = vclamps-f32 %v1932_v8, 15.0  ;;  %v1646_v1 = vmul.f32 %v5755_v12, %v1550_v2  ;;  %v1471_v35 = vmul.f32 %v4315_v60, %v6052_v57  ;;  %v2086_v49 = vmul.f32 %v4317_v43, %v6289_v29  ;;  %v4327_v22 = vpop.eup %4326 }
 0x246   : > { %v1448_v6 = vsel %vm1446_vm11, %v7977_v26, %v1445_v44  ;;  %v1637_v10 = vmul.f32 %v5665_v25, %v1541_v32  ;;  %v1924_v34 = vmul.f32 %v5965_v54, %v1636_v40  ;;  %4350 = vrcp.f32 %v1550_v2  ;;  %v4329_v44 = vpop.eup %4328 }
 0x247   : > { %vm1411_vm1 = vcmp.eq.f32.partialorder %v5988_v42, 0.0  ;;  %vm1474_vm2 = vcmp.eq.f32.partialorder %v6052_v57, 0.0  ;;  %vm1488_vm3 = vcmp.eq.f32.partialorder %v6105_v0, 0.0  ;;  %4352 = vtanh.f32 %v3804_v61  ;;  %2156 = vperm.xlu0 %4034, %v2086_v49  }
 0x248   : > { %v1934_v12 = vmul.f32 %v5990_v18, %v1646_v1  ;;  %v1925_v25 = vmul.f32 %v5975_v24, %v1637_v10  ;;  %v1552_v17 = vmax.f32 %v1448_v6, 1e-07  ;;  %v6310_v46 = vmin.f32 %v4327_v22, 0.99999  ;;  %v4331_v18 = vpop.eup %4330  ;;  %v7984_v1 = vld [vmem:[#allocation35_spill] sm:$0xff]  ;;  %v7985_v22 = vld [vmem:[#allocation37_spill] sm:$0xff] }
 0x249   : > { %v3796_v55 = vclamps-f32 %v1924_v34, 15.0  ;;  %v7978_v54 = vand.u32 2147483648, %v5904_v52  ;;  %v7979_v9 = vand.u32 2147483648, %v6013_v11  ;;  %vm1425_vm4 = vcmp.eq.f32.partialorder %v6025_v15, 0.0  ;;  %v4333_v58 = vpop.eup %4332 }
 0x24a   : > { %v3806_v24 = vclamps-f32 %v1934_v12, 15.0  ;;  %4354 = vrcp.f32 %v1541_v32  ;;  %v3797_v62 = vclamps-f32 %v1925_v25, 15.0  ;;  %v1648_v7 = vmul.f32 %v5766_v56, %v1552_v17 }
 0x24b   : > { %v1385_v51 = vsel %vm1383_vm12, %v7978_v54, %v6156_v38  ;;  %v1462_v60 = vsel %vm1460_vm13, %v7979_v9, %v1459_v4  ;;  %v1485_v48 = vmul.f32 %v4321_v30, %v6105_v0  ;;  %v2081_v43 = vmul.f32 %v4329_v44, %v6310_v46  ;;  %v4335_v38 = vpop.eup %4334 }
 0x24c   : > { %4356 = vtanh.f32 %v3796_v55  ;;  %v1543_v52 = vmax.f32 %v1385_v51, 1e-07  ;;  %v1936_v11 = vmul.f32 %v7980_v16, %v1648_v7  ;;  %v1554_v4 = vmax.f32 %v1462_v60, 1e-07  ;;  %v4337_v56 = vpop.eup %4336  ;;  %v7986_v60 = vld [vmem:[#allocation18_spill] sm:$0xff] }
 0x24d   : > { %4358 = vtanh.f32 %v3806_v24  ;;  %v7981_v63 = vand.u32 2147483648, %v5942_v36  ;;  %v1473_v20 = vsel %vm1472_vm15, %v6052_v57, %v1471_v35  ;;  %vm1500_vm5 = vcmp.eq.f32.partialorder %v6146_v45, inf  ;;  %2131 = vperm.xlu1 %4035, %v2081_v43   ;;  %v4339_v2 = vpop.eup %4338  ;;  %v7983_v36 = vld [vmem:[#allocation16_spill] sm:$0xff] }
 0x24e   : > { %v6337_v39 = vmin.f32 %v4335_v38, 0.99999  ;;  %4360 = vtanh.f32 %v3797_v62  ;;  %v1639_v8 = vmul.f32 %v7982_v3, %v1543_v52  ;;  %v6340_v32 = vmin.f32 %v4337_v56, 0.99999  ;;  %v4341_v26 = vpop.eup %4340 }
 0x24f   : > { %v6331_v5 = vsel %vm1397_vm14, %v7981_v63, %v6166_v53  ;;  %v3808_v30 = vclamps-f32 %v1936_v11, 15.0  ;;  %v1650_v53 = vmul.f32 %v7983_v36, %v1554_v4  ;;  %v6345_v61 = vmin.f32 %v4339_v2, 0.99999  ;;  %v4343_v35 = vpop.eup %4342  ;;  %v7989_v11 = vld [vmem:[#allocation38_spill] sm:$0xff]  ;;  %v7992_v36 = vld [vmem:[#allocation19_spill] sm:$0xff] }
 0x250   : > { %v1545_v40 = vmax.f32 %v6331_v5, 1e-07  ;;  %v2088_v6 = vmul.f32 %v4331_v18, %v6337_v39  ;;  %4362 = vrcp.f32 %v1552_v17  ;;  %v1927_v10 = vmul.f32 %v7984_v1, %v1639_v8  ;;  %v4345_v25 = vpop.eup %4344  ;;  %v7991_v8 = vld [vmem:[#allocation45_spill] sm:$0xff] }
 0x251   : > { %v1487_v49 = vsel %vm1486_vm0, %v6105_v0, %v1485_v48  ;;  %v2082_v34 = vmul.f32 %v4333_v58, %v6340_v32  ;;  %4364 = vtanh.f32 %v3808_v30  ;;  %v1938_v12 = vmul.f32 %v7985_v22, %v1650_v53  ;;  %v4347_v54 = vpop.eup %4346 }
 0x252   : > { %v1517_v44 = vand.u32 2147483648, %v6212_v14  ;;  %2166 = vperm.xlu0 %4034, %v2088_v6   ;;  %v2090_v55 = vmul.f32 %v4341_v26, %v6345_v61  ;;  %4366 = vrcp.f32 %v1543_v52  ;;  %v3799_v17 = vclamps-f32 %v1927_v10, 15.0  ;;  %v4349_v24 = vpop.eup %4348  ;;  %v7994_v26 = vld [vmem:[#allocation22_spill] sm:$0xff] }
 0x253   : > { %vm1514_vm6 = vcmp.eq.f32.partialorder %v6212_v14, inf  ;;  %2136 = vperm.xlu1 %4035, %v2082_v34   ;;  %v6356_v51 = vmin.f32 %v4345_v25, 0.99999  ;;  %4368 = vrcp.f32 %v1554_v4  ;;  %v3810_v9 = vclamps-f32 %v1938_v12, 15.0  ;;  %v4351_v52 = vpop.eup %4350 }
 0x254   : > { %v1641_v18 = vmul.f32 %v7986_v60, %v1545_v40  ;;  %vm1502_vm7 = vcmp.eq.f32.partialorder %v6146_v45, 0.0  ;;  %4370 = vtanh.f32 %v3799_v17  ;;  %v7987_v62 = vand.u32 2147483648, %v6052_v57  ;;  %v6380_v57 = vpop.xlane.xlu1 %1307 }
 0x255   : > { %v7988_v58 = vand.u32 2147483648, %v5988_v42  ;;  %v6375_v43 = vsel %vm1488_vm3, %v1489_v59, %v1487_v49  ;;  %vm1439_vm8 = vcmp.eq.f32.partialorder %v6081_v37, 0.0  ;;  %v1499_v38 = vmul.f32 %v6296_v23, %v6146_v45  ;;  %v7995_v49 = vld [vmem:[#allocation23_spill] sm:$0xff] }
 0x256   : > { %v1476_v7 = vsel %vm1474_vm2, %v7987_v62, %v1473_v20  ;;  %v2083_v16 = vmul.f32 %v4343_v35, %v6356_v51  ;;  %4372 = vtanh.f32 %v3810_v9  ;;  %v1929_v42 = vmul.f32 %v7989_v11, %v1641_v18  ;;  %2176 = vperm.xlu0 %4034, %v2090_v55   ;;  %v7996_v55 = vld [vmem:[#allocation41_spill] sm:$0xff]  ;;  %v7997_v9 = vld [vmem:[#allocation43_spill] sm:$0xff]  ;;  %v7998_v62 = vld [vmem:[#allocation44_spill] sm:$0xff] }
 0x257   : > { %v1413_v48 = vsel %vm1411_vm1, %v7988_v58, %v6183_v28  ;;  %v4353_v28 = vpop.eup %4352  ;;  %v1556_v4 = vmax.f32 %v1476_v7, 1e-07  ;;  %v1558_v0 = vmax.f32 %v6375_v43, 1e-07  ;;  %v7990_v59 = vand.u32 2147483648, %v6025_v15  ;;  %v7993_v15 = vld [vmem:[#allocation20_spill] sm:$0xff] }
 0x258   : > { %v1547_v63 = vmax.f32 %v1413_v48, 1e-07  ;;  %2141 = vperm.xlu1 %4035, %v2083_v16   ;;  %v6392_v23 = vmin.f32 %v4353_v28, 0.99999  ;;  %v3801_v20 = vclamps-f32 %v1929_v42, 15.0  ;;  %v1901_v2 = vmul.f32 0.5, %v7991_v8  ;;  %v4355_v30 = vpop.eup %4354 }
 0x259   : > { %v6390_v56 = vsel %vm1425_vm4, %v7990_v59, %v6220_v50  ;;  %vm1451_vm9 = vcmp.eq.f32.partialorder %v6123_v31, inf  ;;  %vm1516_vm10 = vcmp.eq.f32.partialorder %v6212_v14, 0.0  ;;  %4374 = vrsqrt.f32 %v6380_v57  ;;  %v4357_v1 = vpop.eup %4356 }
 0x25a   : > { %v1549_v3 = vmax.f32 %v6390_v56, 1e-07  ;;  %v1652_v53 = vmul.f32 %v7992_v36, %v1556_v4  ;;  %v1643_v50 = vmul.f32 %v7993_v15, %v1547_v63  ;;  %v1654_v6 = vmul.f32 %v7994_v26, %v1558_v0  ;;  %v4359_v22 = vpop.eup %4358 }
 0x25b   : > { %v1501_v10 = vsel %vm1500_vm5, %v6146_v45, %v1499_v38  ;;  %v2092_v35 = vmul.f32 %v4347_v54, %v6392_v23  ;;  %4376 = vtanh.f32 %v3801_v20  ;;  %v1513_v12 = vmul.f32 %v6300_v19, %v6212_v14  ;;  %v4361_v18 = vpop.eup %4360 }
 0x25c   : > { %v1645_v34 = vmul.f32 %v7995_v49, %v1549_v3  ;;  %v6411_v25 = vmin.f32 %v4357_v1, 0.99999  ;;  %v1940_v17 = vmul.f32 %v7996_v55, %v1652_v53  ;;  %v1931_v60 = vmul.f32 %v7997_v9, %v1643_v50  ;;  %v8001_v53 = vld [vmem:[#allocation39_spill] sm:$0xff]  ;;  %v8002_v50 = vld [vmem:[#allocation24_spill] sm:$0xff]  ;;  %v8004_v9 = vld [vmem:[#allocation21_spill] sm:$0xff] }
 0x25d   : > { %vm1453_vm11 = vcmp.eq.f32.partialorder %v6123_v31, 0.0  ;;  %2186 = vperm.xlu0 %4034, %v2092_v35   ;;  %v6416_v54 = vmin.f32 %v4359_v22, 0.99999  ;;  %4378 = vrcp.f32 %v1545_v40  ;;  %v1942_v7 = vmul.f32 %v7998_v62, %v1654_v6  ;;  %v4363_v38 = vpop.eup %4362  ;;  %v6447_v1 = vld [vmem:[#allocation3 + $0xe0] sm:$0xff] }
 0x25e   : > { %v1933_v58 = vmul.f32 %v1901_v2, %v1645_v34  ;;  %v2084_v19 = vmul.f32 %v4349_v24, %v6411_v25  ;;  %v6422_v48 = vmin.f32 %v4361_v18, 0.99999  ;;  %4380 = vrcp.f32 %v1556_v4  ;;  %v4365_v28 = vpop.eup %4364  ;;  %v8005_v62 = vld [vmem:[#allocation27_spill] sm:$0xff] }
 0x25f   : > { %v3812_v43 = vclamps-f32 %v1940_v17, 15.0  ;;  %v2094_v16 = vmul.f32 %v4351_v52, %v6416_v54  ;;  %4382 = vrcp.f32 %v1547_v63  ;;  %v3803_v11 = vclamps-f32 %v1931_v60, 15.0  ;;  %v4367_v59 = vpop.eup %4366  ;;  %v7999_v63 = vld [vmem:[#allocation33_spill] sm:$0xff] }
 0x260   : > { %v3814_v42 = vclamps-f32 %v1942_v7, 15.0  ;;  %v1515_v5 = vsel %vm1514_vm6, %v6212_v14, %v1513_v12  ;;  %2146 = vperm.xlu1 %4035, %v2084_v19   ;;  %v2085_v40 = vmul.f32 %v4355_v30, %v6422_v48  ;;  %v3805_v24 = vclamps-f32 %v1933_v58, 15.0  ;;  %v4369_v8 = vpop.eup %4368  ;;  %v8006_v19 = vld [vmem:[#allocation40_spill] sm:$0xff] }
 0x261   : > { %4384 = vtanh.f32 %v3812_v43  ;;  %2196 = vperm.xlu0 %4034, %v2094_v16   ;;  %v6429_v4 = vmin.f32 %v4365_v28, 0.99999  ;;  %v1504_v52 = vsel %vm1502_vm7, %v1503_v21, %v1501_v10  ;;  %v1876_v20 = vmul.f32 0.6931472, %v7999_v63  ;;  %v4371_v26 = vpop.eup %4370  ;;  %v8007_v16 = vld [vmem:[#allocation42_spill] sm:$0xff]  ;;  %v8008_v28 = vld [vmem:[#allocation28_spill] sm:$0xff] }
 0x262   : > { %4386 = vtanh.f32 %v3803_v11  ;;  %v1560_v2 = vmax.f32 %v1504_v52, 1e-07  ;;  %v8000_v30 = vand.u32 2147483648, %v6081_v37  ;;  %v1858_v15 = vmul.f32 0.6931472, %v8001_v53  ;;  %v8003_v37 = vld [vmem:[#allocation25_spill] sm:$0xff] }
 0x263   : > { %4388 = vtanh.f32 %v3814_v42  ;;  %vm1113_vm12 = vcmp.eq.f32.partialorder %v8002_v50, inf  ;;  %v1454_v45 = vand.u32 2147483648, %v6123_v31  ;;  %v2096_v21 = vmul.f32 %v4363_v38, %v6429_v4  ;;  %v4373_v10 = vpop.eup %4372  ;;  %v6480_v42 = vld [vmem:[#allocation3 + $0xc0] sm:$0xff]  ;;  %v8010_v53 = vld [vmem:[#allocation17_spill] sm:$0xff] }
 0x264   : > { %v6441_v36 = vsel %vm1439_vm8, %v8000_v30, %v6259_v27  ;;  %4390 = vrcp.f32 %v1558_v0  ;;  %v1912_v6 = vmul.f32 0.5, %v1876_v20  ;;  %2151 = vperm.xlu1 %4035, %v2085_v40   ;;  %v6449_v35 = vmin.f32 %v4371_v26, 0.99999  ;;  %v4677_v40 = vld [vmem:[#allocation3 + $0xb0] sm:$0xff]  ;;  %v8012_v26 = vld [vmem:[#allocation30_spill] sm:$0xff] }
 0x265   : > { %4392 = vtanh.f32 %v3805_v24  ;;  %v1656_v27 = vmul.f32 %v8003_v37, %v1560_v2  ;;  %v1551_v49 = vmax.f32 %v6441_v36, 1e-07  ;;  %vm1115_vm13 = vcmp.eq.f32.partialorder %v8002_v50, 0.0  ;;  %2206 = vperm.xlu0 %4034, %v2096_v21   ;;  %v8009_v24 = vld [vmem:[#allocation31_spill] sm:$0xff] }
 0x266   : > { %v1452_v34 = vsel %vm1451_vm9, %v6123_v31, %v6264_v41  ;;  %v6458_v0 = vmin.f32 %v4373_v10, 0.99999  ;;  %v1903_v22 = vmul.f32 0.5, %v1858_v15  ;;  %v6464_v12 = vsel %vm1516_vm10, %v1517_v44, %v1515_v5  ;;  %v4375_v18 = vpop.eup %4374  ;;  %v8013_v10 = vld [vmem:[#allocation29_spill] sm:$0xff] }
 0x267   : > { %v2087_v55 = vmul.f32 %v4367_v59, %v6449_v35  ;;  %v1944_v17 = vmul.f32 %v1912_v6, %v1656_v27  ;;  %v1724_v60 = vadd.f32 1.0, %v8004_v9  ;;  %4394 = vrsqrt.f32 %v6447_v1 }
 0x268   : > { %v2098_v41 = vmul.f32 %v4369_v8, %v6458_v0  ;;  %4396 = vrcp.f32 %v1549_v3  ;;  %v1647_v7 = vmul.f32 %v8005_v62, %v1551_v49  ;;  %v1562_v58 = vmax.f32 %v6464_v12, 1e-07  ;;  %v4377_v14 = vpop.eup %4376 }
 0x269   : > { %2161 = vperm.xlu1 %4035, %v2087_v55   ;;  %v3816_v44 = vclamps-f32 %v1944_v17, 15.0  ;;  %v1880_v43 = vmul.f32 0.6931472, %v8006_v19  ;;  %v6477_v38 = vsel %vm1453_vm11, %v1454_v45, %v1452_v34  ;;  %v1862_v11 = vmul.f32 0.6931472, %v8007_v16  ;;  %v6494_v34 = vpop.xlane.xlu0 %1289  ;;  %v6499_v55 = vld [vmem:[#allocation3 + $0xd0] sm:$0xff] }
 0x26a   : > { %vm1127_vm14 = vcmp.eq.f32.partialorder %v6480_v42, inf  ;;  %2216 = vperm.xlu0 %4034, %v2098_v41   ;;  %v6483_v56 = vmin.f32 %v4377_v14, 0.99999  ;;  %v1935_v3 = vmul.f32 %v1903_v22, %v1647_v7  ;;  %v1658_v5 = vmul.f32 %v8008_v28, %v1562_v58  ;;  %v4379_v52 = vpop.eup %4378  ;;  %v8015_v14 = vld [vmem:[#allocation32_spill] sm:$0xff] }
 0x26b   : > { %v1112_v59 = vmul.f32 %v4677_v40, %v8009_v24  ;;  %4398 = vtanh.f32 %v3816_v44  ;;  %v1914_v31 = vmul.f32 0.5, %v1880_v43  ;;  %v1553_v63 = vmax.f32 %v6477_v38, 1e-07  ;;  %v4381_v8 = vpop.eup %4380 }
 0x26c   : > { %v1905_v20 = vmul.f32 0.5, %v1862_v11  ;;  %v2089_v30 = vmul.f32 %v4379_v52, %v6483_v56  ;;  %v3807_v36 = vclamps-f32 %v1935_v3, 15.0  ;;  %v8011_v15 = vmax.f32 %v8010_v53, 1e-07  ;;  %v4383_v21 = vpop.eup %4382 }
 0x26d   : > { %v1820_v45 = vmul.f32 %v8012_v26, %v1724_v60  ;;  %v1946_v6 = vmul.f32 %v1914_v31, %v1658_v5  ;;  %v1649_v37 = vmul.f32 %v8013_v10, %v1553_v63  ;;  %vm1129_vm15 = vcmp.eq.f32.partialorder %v6480_v42, 0.0  ;;  %v6525_v24 = vpop.xlane.xlu0 %1293 }
 0x26e   : > { %4400 = vrcp.f32 %v8011_v15  ;;  %v4385_v27 = vpop.eup %4384  ;;  %v1527_v22 = vmul.f32 %v4375_v18, %v6380_v57  ;;  %2171 = vperm.xlu1 %4035, %v2089_v30   ;;  %v1114_v12 = vsel %vm1113_vm12, %v4677_v40, %v1112_v59  ;;  %vm1141_vm0 = vcmp.eq.f32.partialorder %v6499_v55, inf }
 0x26f   : > { %4402 = vrcp.f32 %v1560_v2  ;;  %v4387_v2 = vpop.eup %4386  ;;  %v6502_v17 = vmin.f32 %v4385_v27, 0.99999  ;;  %v3818_v9 = vclamps-f32 %v1946_v6, 15.0  ;;  %v1937_v60 = vmul.f32 %v1905_v20, %v1649_v37 }
 0x270   : > { %4404 = vtanh.f32 %v3807_v36  ;;  %v4389_v41 = vpop.eup %4388  ;;  %v6504_v62 = vmin.f32 %v4387_v2, 0.99999  ;;  %v8014_v18 = vand.u32 2147483648, %v8002_v50  ;;  %v1126_v44 = vmul.f32 %v6480_v42, %v8015_v14 }
 0x271   : > { %4406 = vrcp.f32 %v1551_v49  ;;  %v4391_v19 = vpop.eup %4390  ;;  %vm1528_vm1 = vcmp.eq.f32.partialorder %v6380_v57, inf  ;;  %v2100_v49 = vmul.f32 %v4381_v8, %v6502_v17  ;;  %v6516_v43 = vmin.f32 %v4389_v41, 0.99999  ;;  %v8016_v8 = vld [vmem:[#allocation26_spill] sm:$0xff] }
 0x272   : > { %4408 = vlog2.f32 %v1820_v45  ;;  %v6510_v7 = vsel %vm1115_vm13, %v8014_v18, %v1114_v12  ;;  %v4393_v38 = vpop.eup %4392  ;;  %vm1530_vm2 = vcmp.eq.f32.partialorder %v6380_v57, 0.0  ;;  %v2091_v16 = vmul.f32 %v4383_v21, %v6504_v62  ;;  %v8018_v45 = vld [vmem:[#allocation34_spill] sm:$0xff] }
 0x273   : > { %4410 = vtanh.f32 %v3818_v9  ;;  %v3809_v11 = vclamps-f32 %v1937_v60, 15.0  ;;  %v1203_v50 = vmax.f32 %v6510_v7, 1e-07  ;;  %v1531_v3 = vand.u32 2147483648, %v6380_v57  ;;  %2226 = vperm.xlu0 %4034, %v2100_v49   ;;  %v6567_v9 = vpop.xlane.xlu0 %1297 }
 0x274   : > { %v2102_v28 = vmul.f32 %v4391_v19, %v6516_v43  ;;  %v6523_v5 = vmin.f32 %v4393_v38, 0.99999  ;;  %4412 = vrcp.f32 %v1562_v58  ;;  %v4395_v40 = vpop.eup %4394  ;;  %v1529_v59 = vsel %vm1528_vm1, %v6380_v57, %v1527_v22  ;;  %2181 = vperm.xlu1 %4035, %v2091_v16  }
 0x275   : > { %4414 = vtanh.f32 %v3809_v11  ;;  %v1683_v52 = vmin.f32 %v1203_v50, 0.999999  ;;  %v1128_v31 = vsel %vm1127_vm14, %v6480_v42, %v1126_v44  ;;  %v4397_v20 = vpop.eup %4396  ;;  %v8017_v30 = vand.u32 2147483648, %v8016_v8 }
 0x276   : > { %vm1143_vm3 = vcmp.eq.f32.partialorder %v6499_v55, 0.0  ;;  %v1144_v36 = vand.u32 2147483648, %v6499_v55  ;;  %vm1155_vm4 = vcmp.eq.f32.partialorder %v6447_v1, inf  ;;  %v2093_v53 = vmul.f32 %v4397_v20, %v6523_v5 }
 0x277   : > { %v6539_v58 = vsel %vm1129_vm15, %v8017_v30, %v1128_v31  ;;  %4416 = vrcp.f32 %v1553_v63  ;;  %v1747_v15 = vsub.f32 1.0, %v1683_v52  ;;  %2236 = vperm.xlu0 %4034, %v2102_v28   ;;  %v6549_v42 = vsel %vm1530_vm2, %v1531_v3, %v1529_v59  ;;  %v6583_v3 = vld [vmem:[#allocation3 + $0xf0] sm:$0xff] }
 0x278   : > { %v1205_v26 = vmax.f32 %v6539_v58, 1e-07  ;;  %4418 = vrsqrt.f32 %v6494_v34  ;;  %v1140_v21 = vmul.f32 %v6499_v55, %v8018_v45  ;;  %v1154_v6 = vmul.f32 %v4395_v40, %v6447_v1  ;;  %v4399_v10 = vpop.eup %4398  ;;  %2191 = vperm.xlu1 %4035, %v2093_v53  }
 0x279   : > { %4420 = vrcp.f32 %v1747_v15  ;;  %v1158_v37 = vand.u32 2147483648, %v6447_v1  ;;  %v6557_v22 = vmin.f32 %v4399_v10, 0.99999  ;;  %vm1157_vm5 = vcmp.eq.f32.partialorder %v6447_v1, 0.0 }
 0x27a   : > { %v1685_v63 = vmin.f32 %v1205_v26, 0.999999  ;;  %v1142_v57 = vsel %vm1141_vm0, %v6499_v55, %v1140_v21  ;;  %v1156_v12 = vsel %vm1155_vm4, %v6447_v1, %v1154_v6  ;;  %4422 = vrsqrt.f32 %v6525_v24 }
 0x27b   : > { %v4401_v27 = vpop.eup %4400  ;;  %v1564_v60 = vmax.f32 %v6549_v42, 1e-07  ;;  %v6572_v18 = vsel %vm1143_vm3, %v1144_v36, %v1142_v57  ;;  %v6578_v1 = vsel %vm1157_vm5, %v1158_v37, %v1156_v12  ;;  %v6589_v36 = vpop.xlane.xlu0 %1301  ;;  %v1715_v10 = vadd.f32 1.0, %v1683_v52 }
 0x27c   : > { %v4403_v2 = vpop.eup %4402  ;;  %v1749_v41 = vsub.f32 1.0, %v1685_v63  ;;  %v1207_v19 = vmax.f32 %v6572_v18, 1e-07  ;;  %v1209_v55 = vmax.f32 %v6578_v1, 1e-07  ;;  %vm1465_vm6 = vcmp.eq.f32.partialorder %v6494_v34, inf }
 0x27d   : > { %v4405_v14 = vpop.eup %4404  ;;  %v2104_v44 = vmul.f32 %v4403_v2, %v6557_v22  ;;  %v1660_v59 = vmul.f32 %v4401_v27, %v1564_v60  ;;  %vm1479_vm7 = vcmp.eq.f32.partialorder %v6525_v24, inf  ;;  %vm1467_vm8 = vcmp.eq.f32.partialorder %v6494_v34, 0.0 }
 0x27e   : > { %v4407_v49 = vpop.eup %4406  ;;  %v6576_v38 = vmin.f32 %v4405_v14, 0.99999  ;;  %4424 = vrcp.f32 %v1749_v41  ;;  %v1687_v11 = vmin.f32 %v1207_v19, 0.999999  ;;  %v1689_v15 = vmin.f32 %v1209_v55, 0.999999 }
 0x27f   : > { %v4409_v16 = vpop.eup %4408  ;;  %2246 = vperm.xlu0 %4034, %v2104_v44   ;;  %4426 = vrsqrt.f32 %v6567_v9  ;;  %v1717_v44 = vadd.f32 1.0, %v1685_v63  ;;  %vm1481_vm9 = vcmp.eq.f32.partialorder %v6525_v24, 0.0  ;;  %vm1169_vm10 = vcmp.eq.f32.partialorder %v6583_v3, inf }
 0x280   : > { %v4411_v28 = vpop.eup %4410  ;;  %v2095_v40 = vmul.f32 %v4407_v49, %v6576_v38  ;;  %v1884_v31 = vmul.f32 0.6931472, %v4409_v16  ;;  %v1751_v8 = vsub.f32 1.0, %v1687_v11  ;;  %4428 = vrsqrt.f32 %v6583_v3 }
 0x281   : > { %v6587_v20 = vmin.f32 %v4411_v28, 0.99999  ;;  %v4413_v30 = vpop.eup %4412  ;;  %v1753_v37 = vsub.f32 1.0, %v1689_v15  ;;  %v1172_v58 = vand.u32 2147483648, %v6583_v3  ;;  %vm1171_vm11 = vcmp.eq.f32.partialorder %v6583_v3, 0.0 }
 0x282   : > { %2201 = vperm.xlu1 %4035, %v2095_v40   ;;  %v1916_v53 = vmul.f32 0.5, %v1884_v31  ;;  %v4415_v42 = vpop.eup %4414  ;;  %4430 = vrcp.f32 %v1751_v8  ;;  %v1719_v40 = vadd.f32 1.0, %v1687_v11  ;;  %v1482_v8 = vand.u32 2147483648, %v6525_v24 }
 0x283   : > { %v2106_v45 = vmul.f32 %v4413_v30, %v6587_v20  ;;  %v6595_v21 = vmin.f32 %v4415_v42, 0.99999  ;;  %4432 = vrsqrt.f32 %v6589_v36  ;;  %vm1493_vm12 = vcmp.eq.f32.partialorder %v6567_v9, inf }
 0x284   : > { %v1948_v6 = vmul.f32 %v1916_v53, %v1660_v59  ;;  %v4417_v27 = vpop.eup %4416  ;;  %4434 = vrcp.f32 %v1203_v50  ;;  %v1468_v50 = vand.u32 2147483648, %v6494_v34  ;;  %v1721_v53 = vadd.f32 1.0, %v1689_v15 }
 0x285   : > { %2256 = vperm.xlu0 %4034, %v2106_v45   ;;  %v4419_v57 = vpop.eup %4418  ;;  %v2097_v12 = vmul.f32 %v4417_v27, %v6595_v21  ;;  %4436 = vrcp.f32 %v1753_v37  ;;  %vm1495_vm13 = vcmp.eq.f32.partialorder %v6567_v9, 0.0  ;;  %vm1507_vm14 = vcmp.eq.f32.partialorder %v6589_v36, inf }
 0x286   : > { %v3820_v2 = vclamps-f32 %v1948_v6, 15.0  ;;  %v4421_v41 = vpop.eup %4420  ;;  %v1464_v52 = vmul.f32 %v4419_v57, %v6494_v34  ;;  %vm1509_vm15 = vcmp.eq.f32.partialorder %v6589_v36, 0.0 }
 0x287   : > { %2211 = vperm.xlu1 %4035, %v2097_v12   ;;  %v1802_v14 = vmul.f32 %v4421_v41, %v1715_v10  ;;  %v4423_v49 = vpop.eup %4422  ;;  %v6632_v41 = vpop.xlane.xlu0 %1305 }
 0x288   : > { %4438 = vtanh.f32 %v3820_v2  ;;  %v1478_v28 = vmul.f32 %v4423_v49, %v6525_v24  ;;  %v1496_v2 = vand.u32 2147483648, %v6567_v9  ;;  %vm1521_vm0 = vcmp.eq.f32.partialorder %v6632_v41, inf }
 0x289   : > { %4440 = vrcp.f32 %v1564_v60  ;;  %v1466_v60 = vsel %vm1465_vm6, %v6494_v34, %v1464_v52  ;;  %vm1523_vm1 = vcmp.eq.f32.partialorder %v6632_v41, 0.0 }
 0x28a   : > { %4442 = vlog2.f32 %v1802_v14  ;;  %v1480_v31 = vsel %vm1479_vm7, %v6525_v24, %v1478_v28  ;;  %v1469_v30 = vsel %vm1467_vm8, %v1468_v50, %v1466_v60 }
 0x28b   : > { %v4425_v16 = vpop.eup %4424  ;;  %4444 = vrcp.f32 %v1205_v26  ;;  %v1555_v57 = vmax.f32 %v1469_v30, 1e-07  ;;  %v1483_v12 = vsel %vm1481_vm9, %v1482_v8, %v1480_v31 }
 0x28c   : > { %v1806_v7 = vmul.f32 %v4425_v16, %v1717_v44  ;;  %v4427_v63 = vpop.eup %4426  ;;  %v1557_v16 = vmax.f32 %v1483_v12, 1e-07 }
 0x28d   : > { %v4429_v59 = vpop.eup %4428  ;;  %v1492_v10 = vmul.f32 %v4427_v63, %v6567_v9 }
 0x28e   : > { %4446 = vlog2.f32 %v1806_v7  ;;  %v1168_v11 = vmul.f32 %v4429_v59, %v6583_v3 }
 0x28f   : > { %v4431_v26 = vpop.eup %4430  ;;  %4448 = vrcp.f32 %v1207_v19  ;;  %v1494_v49 = vsel %vm1493_vm12, %v6567_v9, %v1492_v10 }
 0x290   : > { %v1810_v34 = vmul.f32 %v4431_v26, %v1719_v40  ;;  %v4433_v42 = vpop.eup %4432  ;;  %v1170_v45 = vsel %vm1169_vm10, %v6583_v3, %v1168_v11  ;;  %v1510_v40 = vand.u32 2147483648, %v6589_v36  ;;  %v1497_v60 = vsel %vm1495_vm13, %v1496_v2, %v1494_v49 }
 0x291   : > { %v4435_v6 = vpop.eup %4434  ;;  %v6621_v37 = vsel %vm1171_vm11, %v1172_v58, %v1170_v45  ;;  %v1506_v52 = vmul.f32 %v4433_v42, %v6589_v36  ;;  %v1559_v11 = vmax.f32 %v1497_v60, 1e-07 }
 0x292   : > { %4450 = vlog2.f32 %v1810_v34  ;;  %v4437_v27 = vpop.eup %4436  ;;  %v1211_v18 = vmax.f32 %v6621_v37, 1e-07 }
 0x293   : > { %4452 = vrcp.f32 %v1209_v55  ;;  %v1814_v3 = vmul.f32 %v4437_v27, %v1721_v53  ;;  %v1651_v55 = vmul.f32 %v4435_v6, %v1555_v57  ;;  %v1508_v58 = vsel %vm1507_vm14, %v6589_v36, %v1506_v52 }
 0x294   : > { %v1691_v24 = vmin.f32 %v1211_v18, 0.999999  ;;  %v1511_v42 = vsel %vm1509_vm15, %v1510_v40, %v1508_v58  ;;  %v1524_v40 = vand.u32 2147483648, %v6632_v41 }
 0x295   : > { %v4439_v19 = vpop.eup %4438  ;;  %4454 = vlog2.f32 %v1814_v3  ;;  %v1561_v37 = vmax.f32 %v1511_v42, 1e-07  ;;  %v6663_v42 = vld [vmem:[%s7878_s2] ss:$0 sm:$0xff] }
 0x296   : > { %v4441_v15 = vpop.eup %4440  ;;  %v6634_v14 = vmin.f32 %v4439_v19, 0.99999  ;;  %v1755_v7 = vsub.f32 1.0, %v1691_v24  ;;  %4456 = vrsqrt.f32 %v6632_v41  ;;  %v1723_v36 = vadd.f32 1.0, %v1691_v24 }
 0x297   : > { %v4443_v44 = vpop.eup %4442 }
 0x298   : > { %v2108_v1 = vmul.f32 %v4441_v15, %v6634_v14  ;;  %v1866_v28 = vmul.f32 0.6931472, %v4443_v44  ;;  %v4445_v50 = vpop.eup %4444  ;;  %4458 = vrcp.f32 %v1755_v7 }
 0x299   : > { %v1653_v31 = vmul.f32 %v4445_v50, %v1557_v16 }
 0x29a   : > { %2266 = vperm.xlu0 %4034, %v2108_v1   ;;  %v1907_v63 = vmul.f32 0.5, %v1866_v28 }
 0x29b   : > { %v4447_v59 = vpop.eup %4446 }
 0x29c   : > { %v1939_v26 = vmul.f32 %v1907_v63, %v1651_v55  ;;  %v1870_v8 = vmul.f32 0.6931472, %v4447_v59  ;;  %v4449_v30 = vpop.eup %4448 }
 0x29d   : > { %v1655_v6 = vmul.f32 %v4449_v30, %v1559_v11 }
 0x29e   : > { %v3811_v34 = vclamps-f32 %v1939_v26, 15.0  ;;  %v1909_v53 = vmul.f32 0.5, %v1870_v8 }
 0x29f   : > { %v4451_v45 = vpop.eup %4450 }
 0x2a0   : > { %4460 = vtanh.f32 %v3811_v34  ;;  %v1941_v9 = vmul.f32 %v1909_v53, %v1653_v31  ;;  %v1874_v10 = vmul.f32 0.6931472, %v4451_v45  ;;  %v4453_v27 = vpop.eup %4452  ;;  %v4679_v34 = vld [vmem:[#allocation2] sm:$0xff] }
 0x2a1   : > { %4462 = vrcp.f32 %v1555_v57  ;;  %v1657_v2 = vmul.f32 %v4453_v27, %v1561_v37 }
 0x2a2   : > { %v3813_v12 = vclamps-f32 %v1941_v9, 15.0  ;;  %v1911_v19 = vmul.f32 0.5, %v1874_v10  ;;  %v4455_v3 = vpop.eup %4454 }
 0x2a3   : > { %v1878_v44 = vmul.f32 0.6931472, %v4455_v3  ;;  %v4457_v49 = vpop.eup %4456  ;;  %v4680_v3 = vld [vmem:[#allocation2 + $0xd8] sm:$0xff] }
 0x2a4   : > { %4464 = vtanh.f32 %v3813_v12  ;;  %v1943_v15 = vmul.f32 %v1911_v19, %v1655_v6  ;;  %v1520_v50 = vmul.f32 %v4457_v49, %v6632_v41 }
 0x2a5   : > { %4466 = vrcp.f32 %v1557_v16  ;;  %v4459_v52 = vpop.eup %4458  ;;  %v1913_v55 = vmul.f32 0.5, %v1878_v44 }
 0x2a6   : > { %v3815_v1 = vclamps-f32 %v1943_v15, 15.0  ;;  %4468 = vrcp.f32 %v1211_v18  ;;  %v1818_v28 = vmul.f32 %v4459_v52, %v1723_v36  ;;  %v1522_v16 = vsel %vm1521_vm0, %v6632_v41, %v1520_v50 }
 0x2a7   : > { %v1945_v7 = vmul.f32 %v1913_v55, %v1657_v2  ;;  %v1525_v58 = vsel %vm1523_vm1, %v1524_v40, %v1522_v16 }
 0x2a8   : > { %4470 = vtanh.f32 %v3815_v1  ;;  %v1563_v30 = vmax.f32 %v1525_v58, 1e-07 }
 0x2a9   : > { %4472 = vlog2.f32 %v1818_v28  ;;  %v3817_v57 = vclamps-f32 %v1945_v7, 15.0 }
 0x2aa   : > { %4474 = vrcp.f32 %v1559_v11 }
 0x2ab   : > { %4476 = vtanh.f32 %v3817_v57  ;;  %v2117_v8 = vpop.permute.xlu1 %2116 }
 0x2ac   : > { %4478 = vrcp.f32 %v1561_v37  ;;  %v6658_v53 = vmul.f32 %v4679_v34, %v2117_v8 }
 0x2ad   : > { %v4461_v24 = vpop.eup %4460 }
 0x2ae   : > { %v6652_v63 = vmin.f32 %v4461_v24, 0.99999  ;;  %v4463_v18 = vpop.eup %4462  ;;  %v2310_v9 = vmul.f32 %v6663_v42, %v6658_v53 }
 0x2af   : > { %v2122_v37 = vpop.permute.xlu1 %2121 }
 0x2b0   : > { %v2099_v60 = vmul.f32 %v4463_v18, %v6652_v63  ;;  %v6669_v36 = vmul.f32 %v4680_v3, %v2122_v37  ;;  %v4681_v18 = vld [vmem:[#allocation2 + $0x50] sm:$0xff]  ;;  %v4684_v3 = vld [vmem:[#allocation2 + $0xe8] sm:$0xff] }
 0x2b1   : > { %v4465_v59 = vpop.eup %4464 }
 0x2b2   : > { %2221 = vperm.xlu1 %4035, %v2099_v60   ;;  %v6655_v26 = vmin.f32 %v4465_v59, 0.99999  ;;  %v4467_v31 = vpop.eup %4466  ;;  %v2311_v49 = vmul.f32 %v6663_v42, %v6669_v36 }
 0x2b3   : > { %v4469_v41 = vpop.eup %4468 }
 0x2b4   : > { %v2101_v11 = vmul.f32 %v4467_v31, %v6655_v26  ;;  %v1659_v12 = vmul.f32 %v4469_v41, %v1563_v30 }
 0x2b5   : > { %v4471_v45 = vpop.eup %4470 }
 0x2b6   : > { %2231 = vperm.xlu1 %4035, %v2101_v11   ;;  %v4473_v6 = vpop.eup %4472  ;;  %v6667_v10 = vmin.f32 %v4471_v45, 0.99999  ;;  %v4682_v11 = vld [vmem:[#allocation2 + $0x30] sm:$0xff] }
 0x2b7   : > { %v4475_v27 = vpop.eup %4474  ;;  %v1882_v19 = vmul.f32 0.6931472, %v4473_v6  ;;  %v2127_v50 = vpop.permute.xlu1 %2126  ;;  %v4683_v6 = vld [vmem:[#allocation2 + $0x80] sm:$0xff] }
 0x2b8   : > { %v2103_v15 = vmul.f32 %v4475_v27, %v6667_v10  ;;  %v4477_v2 = vpop.eup %4476 }
 0x2b9   : > { %2343 = vadd.xlane.f32.xlu0 %v2310_v9  ;;  %v1915_v44 = vmul.f32 0.5, %v1882_v19  ;;  %v6674_v52 = vmin.f32 %v4477_v2, 0.99999  ;;  %v4479_v1 = vpop.eup %4478  ;;  %v2112_v9 = vpop.permute.xlu0 %2111 }
 0x2ba   : > { %2241 = vperm.xlu1 %4035, %v2103_v15  }
 0x2bb   : > { %v1947_v55 = vmul.f32 %v1915_v44, %v1659_v12  ;;  %v2105_v28 = vmul.f32 %v4479_v1, %v6674_v52 }
 0x2bd   : > { %2345 = vadd.xlane.f32.xlu0 %v2311_v49  ;;  %v3819_v7 = vclamps-f32 %v1947_v55, 15.0  ;;  %v4685_v49 = vld [vmem:[#allocation2 + $0x60] sm:$0xff] }
 0x2be   : > { %2251 = vperm.xlu1 %4035, %v2105_v28   ;;  %v4686_v28 = vld [vmem:[#allocation2 + $0xb0] sm:$0xff] }
 0x2bf   : > { %4480 = vtanh.f32 %v3819_v7  ;;  %v6698_v7 = vmul.f32 %v4686_v28, %v2112_v9 }
 0x2c0   : > { %4482 = vrcp.f32 %v1563_v30 }
 0x2c2   : > { %v2157_v19 = vpop.permute.xlu0 %2156 }
 0x2c8   : > { %v2132_v40 = vpop.permute.xlu1 %2131 }
 0x2c9   : > { %v6679_v60 = vmul.f32 %v4681_v18, %v2132_v40  ;;  %v4687_v18 = vld [vmem:[#allocation2 + $0x18] sm:$0xff] }
 0x2cb   : > { %v2313_v58 = vmul.f32 %v6663_v42, %v6679_v60 }
 0x2cc   : > { %v4481_v57 = vpop.eup %4480 }
 0x2cd   : > { %v6677_v24 = vmin.f32 %v4481_v57, 0.99999  ;;  %v4483_v16 = vpop.eup %4482  ;;  %2349 = vadd.xlane.f32.xlu0 %v2313_v58  ;;  %v2167_v55 = vpop.permute.xlu0 %2166  ;;  %v4688_v58 = vld [vmem:[#allocation2 + $0x8] sm:$0xff] }
 0x2ce   : > { %v2137_v31 = vpop.permute.xlu1 %2136 }
 0x2cf   : > { %v2107_v59 = vmul.f32 %v4483_v16, %v6677_v24  ;;  %v2309_v16 = vmul.f32 %v6663_v42, %v6698_v7 }
 0x2d1   : > { %2261 = vperm.xlu1 %4035, %v2107_v59   ;;  %v6704_v59 = vmul.f32 %v4687_v18, %v2127_v50 }
 0x2d3   : > { %v2142_v8 = vpop.permute.xlu1 %2141  ;;  %v2312_v9 = vmul.f32 %v6663_v42, %v6704_v59 }
 0x2d4   : > { %v6684_v30 = vmul.f32 %v4682_v11, %v2142_v8  ;;  %v2177_v11 = vpop.permute.xlu0 %2176 }
 0x2d6   : > { %8019 = vst [vmem:[#allocation36_spill] sm:$0xff] %v6684_v30  ;;  %v2315_v34 = vmul.f32 %v6663_v42, %v6684_v30 }
 0x2d8   : > { %2353 = vadd.xlane.f32.xlu0 %v2315_v34 }
 0x2db   : > { %v2147_v41 = vpop.permute.xlu1 %2146 }
 0x2df   : > { %v2152_v45 = vpop.permute.xlu1 %2151 }
 0x2e0   : > { %v6688_v37 = vmul.f32 %v4683_v6, %v2152_v45  ;;  %v4689_v6 = vld [vmem:[#allocation2 + $0x68] sm:$0xff] }
 0x2e2   : > { %8020 = vst [vmem:[#allocation15_spill] sm:$0xff] %v6688_v37  ;;  %v2317_v27 = vmul.f32 %v6663_v42, %v6688_v37 }
 0x2e4   : > { %v2162_v12 = vpop.permute.xlu1 %2161  ;;  %2357 = vadd.xlane.f32.xlu0 %v2317_v27  ;;  %v6712_v27 = vmul.f32 %v4689_v6, %v2137_v31 }
 0x2e5   : > { %v6692_v15 = vmul.f32 %v4684_v3, %v2162_v12  ;;  %v4690_v12 = vld [vmem:[#allocation2 + $0x38] sm:$0xff] }
 0x2e7   : > { %8021 = vst [vmem:[#allocation16_spill] sm:$0xff] %v6692_v15  ;;  %v2319_v2 = vmul.f32 %v6663_v42, %v6692_v15 }
 0x2e9   : > { %v2172_v44 = vpop.permute.xlu1 %2171  ;;  %2361 = vadd.xlane.f32.xlu0 %v2319_v2  ;;  %v2187_v2 = vpop.permute.xlu0 %2186 }
 0x2ea   : > { %v6696_v1 = vmul.f32 %v4685_v49, %v2172_v44  ;;  %v2314_v44 = vmul.f32 %v6663_v42, %v6712_v27  ;;  %v4691_v49 = vld [vmem:[#allocation2 + $0x48] sm:$0xff] }
 0x2eb   : > { %v6720_v28 = vmul.f32 %v4691_v49, %v2147_v41 }
 0x2ec   : > { %8022 = vst [vmem:[#allocation35_spill] sm:$0xff] %v6696_v1  ;;  %v2321_v57 = vmul.f32 %v6663_v42, %v6696_v1 }
 0x2ed   : > { %8025 = vst [vmem:[#allocation38_spill] sm:$0xff] %v6720_v28  ;;  %v2316_v31 = vmul.f32 %v6663_v42, %v6720_v28  ;;  %v2197_v18 = vpop.permute.xlu0 %2196 }
 0x2ee   : > { %2365 = vadd.xlane.f32.xlu0 %v2321_v57 }
 0x2ef   : > { %v2182_v40 = vpop.permute.xlu1 %2181 }
 0x2f0   : > { %v6706_v8 = vmul.f32 %v4688_v58, %v2182_v40  ;;  %v4692_v40 = vld [vmem:[#allocation2 + $0x40] sm:$0xff]  ;;  %v4693_v58 = vld [vmem:[#allocation2 + $0x88] sm:$0xff] }
 0x2f1   : > { %v2207_v49 = vpop.permute.xlu0 %2206 }
 0x2f2   : > { %8023 = vst [vmem:[#allocation37_spill] sm:$0xff] %v6706_v8  ;;  %v2323_v34 = vmul.f32 %v6663_v42, %v6706_v8 }
 0x2f3   : > { %v2192_v45 = vpop.permute.xlu1 %2191 }
 0x2f4   : > { %v6714_v3 = vmul.f32 %v4690_v12, %v2192_v45  ;;  %2369 = vadd.xlane.f32.xlu0 %v2323_v34  ;;  %v6726_v34 = vmul.f32 %v4693_v58, %v2157_v19  ;;  %v4697_v58 = vld [vmem:[#allocation2 + $0x78] sm:$0xff] }
 0x2f5   : > { %2341 = vadd.xlane.f32.xlu1 %v2309_v16 }
 0x2f6   : > { %8024 = vst [vmem:[#allocation18_spill] sm:$0xff] %v6714_v3  ;;  %v2325_v50 = vmul.f32 %v6663_v42, %v6714_v3  ;;  %8027 = vst [vmem:[#allocation19_spill] sm:$0xff] %v6726_v34  ;;  %v2318_v12 = vmul.f32 %v6663_v42, %v6726_v34 }
 0x2f8   : > { %2373 = vadd.xlane.f32.xlu0 %v2325_v50  ;;  %v4695_v50 = vld [vmem:[#allocation2 + $0xe0] sm:$0xff] }
 0x2f9   : > { %2347 = vadd.xlane.f32.xlu1 %v2312_v9  ;;  %v4694_v9 = vld [vmem:[#allocation2 + $0xb8] sm:$0xff] }
 0x2fa   : > { %v6730_v6 = vmul.f32 %v4694_v9, %v2167_v55  ;;  %v2217_v55 = vpop.permute.xlu0 %2216  ;;  %v4698_v9 = vld [vmem:[#allocation2 + $0x58] sm:$0xff] }
 0x2fc   : > { %8028 = vst [vmem:[#allocation20_spill] sm:$0xff] %v6730_v6 }
 0x2fd   : > { %v2202_v57 = vpop.permute.xlu1 %2201  ;;  %2351 = vadd.xlane.f32.xlu1 %v2314_v44 }
 0x2fe   : > { %v6724_v16 = vmul.f32 %v4692_v40, %v2202_v57  ;;  %v4696_v57 = vld [vmem:[#allocation2 + $0xf0] sm:$0xff] }
 0x2ff   : > { %v6738_v40 = vmul.f32 %v4696_v57, %v2177_v11  ;;  %v4699_v57 = vld [vmem:[#allocation2 + $0xc8] sm:$0xff] }
 0x300   : > { %8026 = vst [vmem:[#allocation45_spill] sm:$0xff] %v6724_v16  ;;  %v2327_v45 = vmul.f32 %v6663_v42, %v6724_v16 }
 0x301   : > { %2355 = vadd.xlane.f32.xlu1 %v2316_v31  ;;  %8030 = vst [vmem:[#allocation23_spill] sm:$0xff] %v6738_v40  ;;  %v2320_v31 = vmul.f32 %v6663_v42, %v6730_v6 }
 0x302   : > { %2377 = vadd.xlane.f32.xlu0 %v2327_v45  ;;  %v2212_v41 = vpop.permute.xlu1 %2211  ;;  %v6742_v45 = vmul.f32 %v4697_v58, %v2187_v2 }
 0x303   : > { %v6734_v44 = vmul.f32 %v4695_v50, %v2212_v41  ;;  %v2322_v41 = vmul.f32 %v6663_v42, %v6738_v40  ;;  %v2227_v50 = vpop.permute.xlu0 %2226 }
 0x304   : > { %8031 = vst [vmem:[#allocation41_spill] sm:$0xff] %v6742_v45  ;;  %v2324_v11 = vmul.f32 %v6663_v42, %v6742_v45 }
 0x305   : > { %8029 = vst [vmem:[#allocation22_spill] sm:$0xff] %v6734_v44  ;;  %2359 = vadd.xlane.f32.xlu1 %v2318_v12  ;;  %v2329_v19 = vmul.f32 %v6663_v42, %v6734_v44  ;;  %v6746_v12 = vmul.f32 %v4698_v9, %v2197_v18  ;;  %v6750_v44 = vmul.f32 %v4699_v57, %v2207_v49  ;;  %v4702_v57 = vld [vmem:[#allocation2 + $0xd0] sm:$0xff] }
 0x307   : > { %2381 = vadd.xlane.f32.xlu0 %v2329_v19  ;;  %8032 = vst [vmem:[#allocation43_spill] sm:$0xff] %v6746_v12  ;;  %8033 = vst [vmem:[#allocation44_spill] sm:$0xff] %v6750_v44  ;;  %v2326_v19 = vmul.f32 %v6663_v42, %v6746_v12  ;;  %v2237_v2 = vpop.permute.xlu0 %2236  ;;  %v2328_v18 = vmul.f32 %v6663_v42, %v6750_v44 }
 0x308   : > { %v6762_v16 = vmul.f32 %v4702_v57, %v2237_v2 }
 0x309   : > { %2363 = vadd.xlane.f32.xlu1 %v2320_v31  ;;  %v4700_v31 = vld [vmem:[#allocation2 + $0x90] sm:$0xff] }
 0x30a   : > { %v6754_v58 = vmul.f32 %v4700_v31, %v2217_v55  ;;  %8036 = vst [vmem:[#allocation24_spill] sm:$0xff] %v6762_v16  ;;  %v4703_v31 = vld [vmem:[#allocation2 + $0x28] sm:$0xff] }
 0x30b   : > { %v2247_v49 = vpop.permute.xlu0 %2246 }
 0x30c   : > { %8034 = vst [vmem:[#allocation33_spill] sm:$0xff] %v6754_v58  ;;  %v6766_v3 = vmul.f32 %v4703_v31, %v2247_v49  ;;  %v4706_v31 = vld [vmem:[#allocation2 + $0x70] sm:$0xff] }
 0x30d   : > { %2367 = vadd.xlane.f32.xlu1 %v2322_v41  ;;  %v4701_v41 = vld [vmem:[#allocation2 + $0xc0] sm:$0xff] }
 0x30e   : > { %v6758_v9 = vmul.f32 %v4701_v41, %v2227_v50  ;;  %8037 = vst [vmem:[#allocation25_spill] sm:$0xff] %v6766_v3  ;;  %v2334_v50 = vmul.f32 %v6663_v42, %v6762_v16 }
 0x30f   : > { %v2257_v55 = vpop.permute.xlu0 %2256 }
 0x310   : > { %8035 = vst [vmem:[#allocation39_spill] sm:$0xff] %v6758_v9 }
 0x311   : > { %2371 = vadd.xlane.f32.xlu1 %v2324_v11  ;;  %v2330_v11 = vmul.f32 %v6663_v42, %v6754_v58 }
 0x315   : > { %2375 = vadd.xlane.f32.xlu1 %v2326_v19  ;;  %v2332_v19 = vmul.f32 %v6663_v42, %v6758_v9  ;;  %v2267_v2 = vpop.permute.xlu0 %2266 }
 0x319   : > { %2379 = vadd.xlane.f32.xlu1 %v2328_v18  ;;  %v4704_v18 = vld [vmem:[#allocation2 + $0xf8] sm:$0xff] }
 0x31a   : > { %v6770_v41 = vmul.f32 %v4704_v18, %v2257_v55 }
 0x31c   : > { %8038 = vst [vmem:[#allocation21_spill] sm:$0xff] %v6770_v41  ;;  %v2338_v57 = vmul.f32 %v6663_v42, %v6770_v41  ;;  %v4709_v41 = vld [vmem:[#allocation2 + $0xa0] sm:$0xff] }
 0x31d   : > { %2383 = vadd.xlane.f32.xlu1 %v2330_v11  ;;  %v2336_v11 = vmul.f32 %v6663_v42, %v6766_v3  ;;  %v4707_v3 = vld [vmem:[#allocation2 + $0xa8] sm:$0xff] }
 0x321   : > { %2387 = vadd.xlane.f32.xlu1 %v2332_v19  ;;  %v4705_v19 = vld [vmem:[#allocation2 + $0x98] sm:$0xff] }
 0x322   : > { %v6776_v9 = vmul.f32 %v4705_v19, %v2267_v2 }
 0x324   : > { %8039 = vst [vmem:[#allocation27_spill] sm:$0xff] %v6776_v9  ;;  %v2340_v55 = vmul.f32 %v6663_v42, %v6776_v9 }
 0x325   : > { %2391 = vadd.xlane.f32.xlu1 %v2334_v50 }
 0x329   : > { %2395 = vadd.xlane.f32.xlu1 %v2336_v11 }
 0x32d   : > { %v2222_v49 = vpop.permute.xlu1 %2221  ;;  %2399 = vadd.xlane.f32.xlu1 %v2338_v57 }
 0x32e   : > { %v6778_v58 = vmul.f32 %v4706_v31, %v2222_v49  ;;  %v4708_v49 = vld [vmem:[#allocation2 + $0x10] sm:$0xff] }
 0x330   : > { %8040 = vst [vmem:[#allocation40_spill] sm:$0xff] %v6778_v58  ;;  %v2331_v50 = vmul.f32 %v6663_v42, %v6778_v58 }
 0x331   : > { %v2232_v18 = vpop.permute.xlu1 %2231  ;;  %2403 = vadd.xlane.f32.xlu1 %v2340_v55  ;;  %v2438_v55 = vmul.f32 %v6125_v47, %v6125_v47  ;;  %v4710_v47 = vld [vmem:[#allocation2 + $0x20] sm:$0xff] }
 0x332   : > { %v6784_v11 = vmul.f32 %v4707_v3, %v2232_v18  ;;  %2385 = vadd.xlane.f32.xlu0 %v2331_v50 }
 0x334   : > { %8041 = vst [vmem:[#allocation42_spill] sm:$0xff] %v6784_v11  ;;  %v2333_v2 = vmul.f32 %v6663_v42, %v6784_v11 }
 0x335   : > { %v2242_v19 = vpop.permute.xlu1 %2241 }
 0x336   : > { %2389 = vadd.xlane.f32.xlu0 %v2333_v2  ;;  %v6788_v31 = vmul.f32 %v4708_v49, %v2242_v19  ;;  %v6798_v2 = vstv %s2302_s30  ;;  %v2439_v19 = vmul.f32 %v6142_v13, %v6142_v13 }
 0x337   : > { %v2503_v49 = vmul.f32 %v6798_v2, %v2438_v55 }
 0x338   : > { %8042 = vst [vmem:[#allocation28_spill] sm:$0xff] %v6788_v31  ;;  %v2335_v57 = vmul.f32 %v6663_v42, %v6788_v31 }
 0x339   : > { %v2252_v9 = vpop.permute.xlu1 %2251 }
 0x33a   : > { %v6792_v16 = vmul.f32 %v4709_v41, %v2252_v9  ;;  %2393 = vadd.xlane.f32.xlu0 %v2335_v57 }
 0x33c   : > { %8043 = vst [vmem:[#allocation31_spill] sm:$0xff] %v6792_v16  ;;  %v2337_v3 = vmul.f32 %v6663_v42, %v6792_v16  ;;  %v2504_v16 = vmul.f32 %v6798_v2, %v2439_v19 }
 0x33e   : > { %2397 = vadd.xlane.f32.xlu0 %v2337_v3 }
 0x342   : > { %v2344_v50 = vpop.xlane.xlu0 %2343 }
 0x343   : > { %v2406_v18 = vmul.f32 2.0, %v2344_v50 }
 0x345   : > { %v2470_v9 = vadd.f32 1.0, %v2406_v18  ;;  %v2855_v18 = vsub.f32 1.0, %v2438_v55 }
 0x346   : > { %v2346_v41 = vpop.xlane.xlu0 %2345 }
 0x347   : > { %v2535_v57 = vadd.f32 %v2503_v49, %v2470_v9  ;;  %v2407_v31 = vmul.f32 2.0, %v2346_v41  ;;  %v2599_v13 = vadd.f32 %v6798_v2, %v2470_v9 }
 0x349   : > { %4484 = vrcp.f32 %v2535_v57  ;;  %v2471_v3 = vadd.f32 1.0, %v2407_v31 }
 0x34b   : > { %v2536_v11 = vadd.f32 %v2504_v16, %v2471_v3  ;;  %v2600_v57 = vadd.f32 %v6798_v2, %v2471_v3  ;;  %v2856_v16 = vsub.f32 1.0, %v2439_v19 }
 0x34c   : > { %v2262_v58 = vpop.permute.xlu1 %2261 }
 0x34d   : > { %4486 = vrcp.f32 %v2536_v11  ;;  %v6804_v50 = vmul.f32 %v4710_v47, %v2262_v58  ;;  %v2441_v58 = vmul.f32 %v6310_v46, %v6310_v46 }
 0x34f   : > { %8044 = vst [vmem:[#allocation17_spill] sm:$0xff] %v6804_v50  ;;  %v2339_v44 = vmul.f32 %v6663_v42, %v6804_v50  ;;  %v2506_v55 = vmul.f32 %v6798_v2, %v2441_v58 }
 0x351   : > { %2401 = vadd.xlane.f32.xlu0 %v2339_v44 }
 0x356   : > { %v4485_v12 = vpop.eup %4484  ;;  %v2350_v42 = vpop.xlane.xlu0 %2349 }
 0x357   : > { %v2631_v49 = vmul.f32 %v4485_v12, %v2599_v13  ;;  %v6809_v41 = vmul.f32 %v4485_v12, %v2855_v18  ;;  %v2409_v44 = vmul.f32 2.0, %v2350_v42  ;;  %v2443_v12 = vmul.f32 %v6356_v51, %v6356_v51 }
 0x358   : > { %v6827_v51 = vmul.f32 %v6449_v35, %v6449_v35 }
 0x359   : > { %2669 = vperm.xlu1 %4035, %v2631_v49   ;;  %v2473_v9 = vadd.f32 1.0, %v2409_v44  ;;  %v2508_v18 = vmul.f32 %v6798_v2, %v2443_v12  ;;  %v2860_v35 = vsub.f32 1.0, %v2443_v12  ;;  %v6847_v12 = vmul.f32 %v6504_v62, %v6504_v62 }
 0x35a   : > { %v4487_v31 = vpop.eup %4486 }
 0x35b   : > { %v2632_v11 = vmul.f32 %v4487_v31, %v2600_v57  ;;  %v6814_v47 = vmul.f32 %v4487_v31, %v2856_v16  ;;  %v2538_v13 = vadd.f32 %v2506_v55, %v2473_v9  ;;  %v2445_v57 = vmul.f32 %v6422_v48, %v6422_v48 }
 0x35c   : > { %v2602_v16 = vadd.f32 %v6798_v2, %v2473_v9  ;;  %v2858_v31 = vsub.f32 1.0, %v2441_v58  ;;  %v2512_v58 = vmul.f32 %v6798_v2, %v6827_v51  ;;  %v2516_v62 = vmul.f32 %v6798_v2, %v6847_v12 }
 0x35d   : > { %2674 = vperm.xlu1 %4035, %v2632_v11   ;;  %4488 = vrcp.f32 %v2538_v13 }
 0x361   : > { %v2354_v3 = vpop.xlane.xlu0 %2353 }
 0x362   : > { %v2411_v19 = vmul.f32 2.0, %v2354_v3  ;;  %v2510_v3 = vmul.f32 %v6798_v2, %v2445_v57 }
 0x364   : > { %v2475_v49 = vadd.f32 1.0, %v2411_v19 }
 0x366   : > { %v2540_v46 = vadd.f32 %v2508_v18, %v2475_v49 }
 0x368   : > { %4490 = vrcp.f32 %v2540_v46 }
 0x36a   : > { %v4489_v11 = vpop.eup %4488 }
 0x36b   : > { %v2634_v44 = vmul.f32 %v4489_v11, %v2602_v16  ;;  %v6823_v13 = vmul.f32 %v4489_v11, %v2858_v31  ;;  %v6834_v16 = vmul.f32 %v6483_v56, %v6483_v56  ;;  %v2604_v31 = vadd.f32 %v6798_v2, %v2475_v49 }
 0x36d   : > { %v2358_v42 = vpop.xlane.xlu0 %2357  ;;  %2684 = vperm.xlu1 %4035, %v2634_v44  }
 0x36e   : > { %v2413_v55 = vmul.f32 2.0, %v2358_v42 }
 0x370   : > { %v2477_v19 = vadd.f32 1.0, %v2413_v55 }
 0x372   : > { %v2362_v18 = vpop.xlane.xlu0 %2361  ;;  %v2542_v46 = vadd.f32 %v2510_v3, %v2477_v19  ;;  %v2514_v3 = vmul.f32 %v6798_v2, %v6834_v16 }
 0x373   : > { %v2415_v48 = vmul.f32 2.0, %v2362_v18 }
 0x374   : > { %4492 = vrcp.f32 %v2542_v46  ;;  %v8045_v46 = vld [vmem:[#allocation46_spill] sm:$0xff] }
 0x375   : > { %v2479_v9 = vadd.f32 1.0, %v2415_v48  ;;  %v4491_v11 = vpop.eup %4490  ;;  %v6843_v56 = vmul.f32 %v8045_v46, %v8045_v46  ;;  %v2606_v46 = vadd.f32 %v6798_v2, %v2477_v19 }
 0x376   : > { %v2636_v55 = vmul.f32 %v4491_v11, %v2604_v31  ;;  %v6837_v8 = vmul.f32 %v4491_v11, %v2860_v35  ;;  %v6851_v35 = vmul.f32 %v6237_v33, %v6237_v33  ;;  %v6855_v11 = vmul.f32 %v6523_v5, %v6523_v5 }
 0x377   : > { %v2544_v42 = vadd.f32 %v2512_v58, %v2479_v9  ;;  %v2366_v50 = vpop.xlane.xlu0 %2365  ;;  %v2862_v33 = vsub.f32 1.0, %v2445_v57 }
 0x378   : > { %v2417_v44 = vmul.f32 2.0, %v2366_v50  ;;  %2694 = vperm.xlu1 %4035, %v2636_v55   ;;  %v2505_v19 = vmul.f32 %v6798_v2, %v6851_v35  ;;  %v2518_v57 = vmul.f32 %v6798_v2, %v6855_v11 }
 0x379   : > { %4494 = vrcp.f32 %v2544_v42  ;;  %v2502_v42 = vmul.f32 %v6798_v2, %v6843_v56 }
 0x37a   : > { %v2481_v18 = vadd.f32 1.0, %v2417_v44 }
 0x37c   : > { %v2546_v49 = vadd.f32 %v2514_v3, %v2481_v18 }
 0x37d   : > { %v2370_v58 = vpop.xlane.xlu0 %2369 }
 0x37e   : > { %v2342_v48 = vpop.xlane.xlu1 %2341  ;;  %4496 = vrcp.f32 %v2546_v49  ;;  %v2419_v31 = vmul.f32 2.0, %v2370_v58 }
 0x37f   : > { %v2405_v50 = vmul.f32 2.0, %v2342_v48 }
 0x380   : > { %v6863_v44 = vadd.f32 1.0, %v2419_v31 }
 0x381   : > { %v6859_v55 = vadd.f32 1.0, %v2405_v50  ;;  %v2374_v49 = vpop.xlane.xlu0 %2373  ;;  %v4493_v48 = vpop.eup %4492  ;;  %v6870_v50 = vmul.f32 %v6340_v32, %v6340_v32  ;;  %v2864_v32 = vsub.f32 1.0, %v6827_v51 }
 0x382   : > { %v2348_v3 = vpop.xlane.xlu1 %2347  ;;  %v2548_v1 = vadd.f32 %v2516_v62, %v6863_v44  ;;  %v2638_v45 = vmul.f32 %v4493_v48, %v2606_v46  ;;  %v2421_v40 = vmul.f32 2.0, %v2374_v49  ;;  %v6872_v15 = vmul.f32 %v4493_v48, %v2862_v33 }
 0x383   : > { %v2534_v58 = vadd.f32 %v2502_v42, %v6859_v55  ;;  %v2408_v5 = vmul.f32 2.0, %v2348_v3  ;;  %v2608_v62 = vadd.f32 %v6798_v2, %v2479_v9  ;;  %v6886_v49 = vmul.f32 %v6411_v25, %v6411_v25 }
 0x384   : > { %v6881_v3 = vadd.f32 1.0, %v2421_v40  ;;  %2704 = vperm.xlu1 %4035, %v2638_v45   ;;  %v2507_v45 = vmul.f32 %v6798_v2, %v6870_v50 }
 0x385   : > { %4498 = vrcp.f32 %v2534_v58  ;;  %v6876_v31 = vadd.f32 1.0, %v2408_v5  ;;  %v6891_v58 = vmul.f32 %v6576_v38, %v6576_v38  ;;  %v2610_v38 = vadd.f32 %v6798_v2, %v2481_v18 }
 0x386   : > { %v2352_v42 = vpop.xlane.xlu1 %2351  ;;  %4500 = vrcp.f32 %v2548_v1  ;;  %v4495_v46 = vpop.eup %4494  ;;  %v2550_v1 = vadd.f32 %v2518_v57, %v6881_v3  ;;  %v6904_v57 = vmul.f32 %v6289_v29, %v6289_v29  ;;  %v6919_v29 = vmul.f32 %v6595_v21, %v6595_v21 }
 0x387   : > { %v2537_v33 = vadd.f32 %v2505_v19, %v6876_v31  ;;  %v2410_v48 = vmul.f32 2.0, %v2352_v42  ;;  %v2640_v5 = vmul.f32 %v4495_v46, %v2608_v62  ;;  %v6894_v40 = vmul.f32 %v4495_v46, %v2864_v32 }
 0x388   : > { %v2509_v32 = vmul.f32 %v6798_v2, %v6886_v49  ;;  %v2520_v46 = vmul.f32 %v6798_v2, %v6891_v58  ;;  %v2598_v21 = vadd.f32 %v6798_v2, %v6859_v55  ;;  %v2522_v55 = vmul.f32 %v6798_v2, %v6919_v29 }
 0x389   : > { %4502 = vrcp.f32 %v2537_v33  ;;  %v6898_v51 = vadd.f32 1.0, %v2410_v48  ;;  %2714 = vperm.xlu1 %4035, %v2640_v5   ;;  %v2866_v33 = vsub.f32 1.0, %v6834_v16  ;;  %v6925_v16 = vmul.f32 %v6337_v39, %v6337_v39 }
 0x38a   : > { %v2356_v25 = vpop.xlane.xlu1 %2355  ;;  %4504 = vrcp.f32 %v2550_v1  ;;  %v2612_v39 = vadd.f32 %v6798_v2, %v6863_v44 }
 0x38b   : > { %v2378_v9 = vpop.xlane.xlu0 %2377  ;;  %v2539_v19 = vadd.f32 %v2507_v45, %v6898_v51  ;;  %v2412_v42 = vmul.f32 2.0, %v2356_v25  ;;  %v4497_v6 = vpop.eup %4496 }
 0x38c   : > { %v2423_v62 = vmul.f32 2.0, %v2378_v9  ;;  %v2642_v5 = vmul.f32 %v4497_v6, %v2610_v38  ;;  %v6915_v45 = vmul.f32 %v4497_v6, %v2866_v33  ;;  %v2511_v6 = vmul.f32 %v6798_v2, %v6904_v57 }
 0x38d   : > { %4506 = vrcp.f32 %v2539_v19  ;;  %v6911_v48 = vadd.f32 1.0, %v2412_v42  ;;  %v6929_v19 = vmul.f32 %v6345_v61, %v6345_v61  ;;  %v2854_v61 = vsub.f32 1.0, %v6843_v56 }
 0x38e   : > { %v6913_v1 = vadd.f32 1.0, %v2423_v62  ;;  %v2360_v18 = vpop.xlane.xlu1 %2359  ;;  %2724 = vperm.xlu1 %4035, %v2642_v5   ;;  %v2868_v33 = vsub.f32 1.0, %v6847_v12  ;;  %v2513_v56 = vmul.f32 %v6798_v2, %v6925_v16 }
 0x38f   : > { %v2541_v25 = vadd.f32 %v2509_v32, %v6911_v48  ;;  %v2414_v9 = vmul.f32 2.0, %v2360_v18 }
 0x390   : > { %v2552_v37 = vadd.f32 %v2520_v46, %v6913_v1  ;;  %v2382_v42 = vpop.xlane.xlu0 %2381 }
 0x391   : > { %4508 = vrcp.f32 %v2541_v25  ;;  %v6935_v38 = vadd.f32 1.0, %v2414_v9  ;;  %v2425_v62 = vmul.f32 2.0, %v2382_v42 }
 0x392   : > { %v4499_v32 = vpop.eup %4498  ;;  %v2364_v46 = vpop.xlane.xlu1 %2363  ;;  %4510 = vrcp.f32 %v2552_v37  ;;  %v2601_v37 = vadd.f32 %v6798_v2, %v6876_v31 }
 0x393   : > { %v4501_v5 = vpop.eup %4500  ;;  %v2630_v18 = vmul.f32 %v4499_v32, %v2598_v21  ;;  %v2543_v30 = vadd.f32 %v2511_v6, %v6935_v38  ;;  %v2416_v34 = vmul.f32 2.0, %v2364_v46  ;;  %v6944_v9 = vadd.f32 1.0, %v2425_v62 }
 0x394   : > { %v2644_v25 = vmul.f32 %v4501_v5, %v2612_v39  ;;  %v6946_v42 = vmul.f32 %v4499_v32, %v2854_v61  ;;  %v6948_v28 = vmul.f32 %v4501_v5, %v2868_v33  ;;  %v2614_v21 = vadd.f32 %v6798_v2, %v6881_v3 }
 0x395   : > { %2664 = vperm.xlu0 %4034, %v2630_v18   ;;  %4512 = vrcp.f32 %v2543_v30  ;;  %v6954_v12 = vadd.f32 1.0, %v2416_v34  ;;  %v2554_v62 = vadd.f32 %v2522_v55, %v6944_v9  ;;  %v2857_v32 = vsub.f32 1.0, %v6851_v35 }
 0x396   : > { %v4503_v44 = vpop.eup %4502  ;;  %v2368_v6 = vpop.xlane.xlu1 %2367  ;;  %2734 = vperm.xlu1 %4035, %v2644_v25   ;;  %v2870_v46 = vsub.f32 1.0, %v6855_v11  ;;  %v6963_v30 = vmul.f32 %v6392_v23, %v6392_v23  ;;  %v2603_v35 = vadd.f32 %v6798_v2, %v6898_v51  ;;  %v2515_v11 = vmul.f32 %v6798_v2, %v6929_v19 }
 0x397   : > { %v4505_v31 = vpop.eup %4504  ;;  %v2633_v39 = vmul.f32 %v4503_v44, %v2601_v37  ;;  %v2545_v34 = vadd.f32 %v2513_v56, %v6954_v12  ;;  %v2418_v61 = vmul.f32 2.0, %v2368_v6  ;;  %4514 = vrcp.f32 %v2554_v62 }
 0x398   : > { %v2646_v33 = vmul.f32 %v4505_v31, %v2614_v21  ;;  %v6966_v5 = vmul.f32 %v4503_v44, %v2857_v32  ;;  %v6968_v3 = vmul.f32 %v4505_v31, %v2870_v46  ;;  %v2859_v25 = vsub.f32 1.0, %v6870_v50 }
 0x399   : > { %2679 = vperm.xlu0 %4034, %v2633_v39   ;;  %4516 = vrcp.f32 %v2545_v34  ;;  %v2482_v23 = vadd.f32 1.0, %v2418_v61  ;;  %v6977_v6 = vmul.f32 %v6416_v54, %v6416_v54  ;;  %v2605_v51 = vadd.f32 %v6798_v2, %v6911_v48 }
 0x39a   : > { %v4507_v18 = vpop.eup %4506  ;;  %v2372_v55 = vpop.xlane.xlu1 %2371  ;;  %2744 = vperm.xlu1 %4035, %v2646_v33   ;;  %v2517_v62 = vmul.f32 %v6798_v2, %v6963_v30  ;;  %v2616_v31 = vadd.f32 %v6798_v2, %v6913_v1  ;;  %v2861_v39 = vsub.f32 1.0, %v6886_v49  ;;  %v2872_v54 = vsub.f32 1.0, %v6891_v58 }
 0x39b   : > { %v2547_v37 = vadd.f32 %v2515_v11, %v2482_v23  ;;  %v2635_v56 = vmul.f32 %v4507_v18, %v2603_v35  ;;  %v2420_v44 = vmul.f32 2.0, %v2372_v55  ;;  %v6979_v21 = vmul.f32 %v4507_v18, %v2859_v25 }
 0x39c   : > { %v6991_v48 = vmul.f32 %v6429_v4, %v6429_v4  ;;  %v2607_v1 = vadd.f32 %v6798_v2, %v6935_v38  ;;  %v2519_v49 = vmul.f32 %v6798_v2, %v6977_v6  ;;  %v2863_v4 = vsub.f32 1.0, %v6904_v57 }
 0x39d   : > { %4518 = vrcp.f32 %v2547_v37  ;;  %2689 = vperm.xlu0 %4034, %v2635_v56   ;;  %v2484_v32 = vadd.f32 1.0, %v2420_v44  ;;  %v2618_v38 = vadd.f32 %v6798_v2, %v6944_v9 }
 0x39e   : > { %v4509_v46 = vpop.eup %4508  ;;  %v2376_v50 = vpop.xlane.xlu1 %2375  ;;  %v2521_v57 = vmul.f32 %v6798_v2, %v6991_v48 }
 0x39f   : > { %v4511_v34 = vpop.eup %4510  ;;  %v2549_v61 = vadd.f32 %v2517_v62, %v2484_v32  ;;  %v2422_v33 = vmul.f32 2.0, %v2376_v50  ;;  %v2637_v35 = vmul.f32 %v4509_v46, %v2605_v51  ;;  %v6993_v18 = vmul.f32 %v4509_v46, %v2861_v39 }
 0x3a0   : > { %v2648_v11 = vmul.f32 %v4511_v34, %v2616_v31  ;;  %v6995_v55 = vmul.f32 %v4511_v34, %v2872_v54  ;;  %v7004_v62 = vmul.f32 %v6458_v0, %v6458_v0  ;;  %v2874_v50 = vsub.f32 1.0, %v6919_v29 }
 0x3a1   : > { %4520 = vrcp.f32 %v2549_v61  ;;  %v2486_v58 = vadd.f32 1.0, %v2422_v33  ;;  %2699 = vperm.xlu0 %4034, %v2637_v35   ;;  %v2609_v39 = vadd.f32 %v6798_v2, %v6954_v12  ;;  %v2865_v33 = vsub.f32 1.0, %v6925_v16 }
 0x3a2   : > { %v4513_v25 = vpop.eup %4512  ;;  %v2380_v37 = vpop.xlane.xlu1 %2379  ;;  %2754 = vperm.xlu1 %4035, %v2648_v11  }
 0x3a3   : > { %v2639_v56 = vmul.f32 %v4513_v25, %v2607_v1  ;;  %v2551_v44 = vadd.f32 %v2519_v49, %v2486_v58  ;;  %v2424_v51 = vmul.f32 2.0, %v2380_v37  ;;  %v7008_v46 = vmul.f32 %v4513_v25, %v2863_v4 }
 0x3a4   : > { %v4515_v31 = vpop.eup %4514  ;;  %v7020_v1 = vmul.f32 %v6502_v17, %v6502_v17  ;;  %v2611_v49 = vadd.f32 %v6798_v2, %v2482_v23  ;;  %v2523_v25 = vmul.f32 %v6798_v2, %v7004_v62  ;;  %v7030_v17 = vmul.f32 %v6516_v43, %v6516_v43 }
 0x3a5   : > { %4522 = vrcp.f32 %v2551_v44  ;;  %v2488_v54 = vadd.f32 1.0, %v2424_v51  ;;  %2709 = vperm.xlu0 %4034, %v2639_v56   ;;  %v2650_v61 = vmul.f32 %v4515_v31, %v2618_v38  ;;  %v7016_v9 = vmul.f32 %v4515_v31, %v2874_v50 }
 0x3a6   : > { %v4517_v34 = vpop.eup %4516  ;;  %v2384_v0 = vpop.xlane.xlu1 %2383  ;;  %v2867_v56 = vsub.f32 1.0, %v6929_v19  ;;  %v2613_v23 = vadd.f32 %v6798_v2, %v2484_v32  ;;  %v2525_v31 = vmul.f32 %v6798_v2, %v7020_v1  ;;  %v2869_v19 = vsub.f32 1.0, %v6963_v30 }
 0x3a7   : > { %v2641_v35 = vmul.f32 %v4517_v34, %v2609_v39  ;;  %v2553_v11 = vadd.f32 %v2521_v57, %v2488_v54  ;;  %v2426_v29 = vmul.f32 2.0, %v2384_v0  ;;  %2764 = vperm.xlu1 %4035, %v2650_v61   ;;  %v7022_v12 = vmul.f32 %v4517_v34, %v2865_v33 }
 0x3a8   : > { %v7040_v43 = vmul.f32 %v6557_v22, %v6557_v22  ;;  %v2615_v32 = vadd.f32 %v6798_v2, %v2486_v58  ;;  %v2871_v30 = vsub.f32 1.0, %v6977_v6  ;;  %v7050_v22 = vmul.f32 %v6587_v20, %v6587_v20 }
 0x3a9   : > { %4524 = vrcp.f32 %v2553_v11  ;;  %v2490_v37 = vadd.f32 1.0, %v2426_v29  ;;  %2719 = vperm.xlu0 %4034, %v2641_v35   ;;  %v2527_v11 = vmul.f32 %v6798_v2, %v7030_v17  ;;  %v2617_v58 = vadd.f32 %v6798_v2, %v2488_v54 }
 0x3aa   : > { %v4519_v16 = vpop.eup %4518  ;;  %v2388_v4 = vpop.xlane.xlu1 %2387  ;;  %v2873_v6 = vsub.f32 1.0, %v6991_v48  ;;  %v7060_v20 = vmul.f32 %v6652_v63, %v6652_v63  ;;  %v7069_v48 = vmul.f32 %v6634_v14, %v6634_v14  ;;  %v2875_v63 = vsub.f32 1.0, %v7004_v62 }
 0x3ab   : > { %v2643_v44 = vmul.f32 %v4519_v16, %v2611_v49  ;;  %v2555_v51 = vadd.f32 %v2523_v25, %v2490_v37  ;;  %v2428_v38 = vmul.f32 2.0, %v2388_v4  ;;  %v7032_v50 = vmul.f32 %v4519_v16, %v2867_v56 }
 0x3ac   : > { %v2619_v54 = vadd.f32 %v6798_v2, %v2490_v37  ;;  %v2524_v37 = vmul.f32 %v6798_v2, %v7060_v20 }
 0x3ad   : > { %4526 = vrcp.f32 %v2555_v51  ;;  %v2492_v39 = vadd.f32 1.0, %v2428_v38  ;;  %2729 = vperm.xlu0 %4034, %v2643_v44   ;;  %v2529_v51 = vmul.f32 %v6798_v2, %v7040_v43 }
 0x3ae   : > { %v4521_v57 = vpop.eup %4520  ;;  %v2392_v34 = vpop.xlane.xlu1 %2391 }
 0x3af   : > { %v2645_v0 = vmul.f32 %v4521_v57, %v2613_v23  ;;  %v2557_v61 = vadd.f32 %v2525_v31, %v2492_v39  ;;  %v2430_v33 = vmul.f32 2.0, %v2392_v34  ;;  %v7042_v35 = vmul.f32 %v4521_v57, %v2869_v19 }
 0x3b1   : > { %4528 = vrcp.f32 %v2557_v61  ;;  %v2494_v29 = vadd.f32 1.0, %v2430_v33  ;;  %2739 = vperm.xlu0 %4034, %v2645_v0   ;;  %v2531_v61 = vmul.f32 %v6798_v2, %v7050_v22 }
 0x3b2   : > { %v4523_v49 = vpop.eup %4522  ;;  %v2396_v25 = vpop.xlane.xlu1 %2395 }
 0x3b3   : > { %v2647_v16 = vmul.f32 %v4523_v49, %v2615_v32  ;;  %v2559_v4 = vadd.f32 %v2527_v11, %v2494_v29  ;;  %v2432_v56 = vmul.f32 2.0, %v2396_v25  ;;  %v7052_v44 = vmul.f32 %v4523_v49, %v2871_v30 }
 0x3b5   : > { %4530 = vrcp.f32 %v2559_v4  ;;  %v2496_v38 = vadd.f32 1.0, %v2432_v56  ;;  %2749 = vperm.xlu0 %4034, %v2647_v16  }
 0x3b6   : > { %v4525_v23 = vpop.eup %4524  ;;  %v2400_v31 = vpop.xlane.xlu1 %2399 }
 0x3b7   : > { %v2649_v57 = vmul.f32 %v4525_v23, %v2617_v58  ;;  %v2561_v34 = vadd.f32 %v2529_v51, %v2496_v38  ;;  %v2434_v19 = vmul.f32 2.0, %v2400_v31  ;;  %v7062_v0 = vmul.f32 %v4525_v23, %v2873_v6 }
 0x3b8   : > { %v7078_v58 = vmul.f32 %v6655_v26, %v6655_v26  ;;  %v2621_v51 = vadd.f32 %v6798_v2, %v2492_v39  ;;  %v2533_v31 = vmul.f32 %v6798_v2, %v7069_v48  ;;  %v2879_v26 = vsub.f32 1.0, %v7030_v17 }
 0x3b9   : > { %4532 = vrcp.f32 %v2561_v34  ;;  %v2498_v33 = vadd.f32 1.0, %v2434_v19  ;;  %2759 = vperm.xlu0 %4034, %v2649_v57   ;;  %v2877_v57 = vsub.f32 1.0, %v7020_v1  ;;  %v2623_v39 = vadd.f32 %v6798_v2, %v2494_v29 }
 0x3ba   : > { %v4527_v32 = vpop.eup %4526  ;;  %v2404_v49 = vpop.xlane.xlu1 %2403  ;;  %v2463_v1 = vmul.f32 %v6667_v10, %v6667_v10  ;;  %v2625_v17 = vadd.f32 %v6798_v2, %v2496_v38  ;;  %v2881_v29 = vsub.f32 1.0, %v7040_v43  ;;  %v2883_v38 = vsub.f32 1.0, %v7050_v22 }
 0x3bb   : > { %v2386_v11 = vpop.xlane.xlu0 %2385  ;;  %v2651_v25 = vmul.f32 %v4527_v32, %v2619_v54  ;;  %v2563_v16 = vadd.f32 %v2531_v61, %v2498_v33  ;;  %v2436_v4 = vmul.f32 2.0, %v2404_v49  ;;  %v7074_v56 = vmul.f32 %v4527_v32, %v2875_v63 }
 0x3bc   : > { %v2427_v30 = vmul.f32 2.0, %v2386_v11  ;;  %v2526_v11 = vmul.f32 %v6798_v2, %v7078_v58 }
 0x3bd   : > { %4534 = vrcp.f32 %v2563_v16  ;;  %2769 = vperm.xlu0 %4034, %v2651_v25   ;;  %v2500_v6 = vadd.f32 1.0, %v2436_v4 }
 0x3be   : > { %v2491_v14 = vadd.f32 1.0, %v2427_v30  ;;  %v4529_v23 = vpop.eup %4528 }
 0x3bf   : > { %v2390_v62 = vpop.xlane.xlu0 %2389  ;;  %v2653_v34 = vmul.f32 %v4529_v23, %v2621_v51  ;;  %v2565_v61 = vadd.f32 %v2533_v31, %v2500_v6  ;;  %v7084_v32 = vmul.f32 %v4529_v23, %v2877_v57  ;;  %v2465_v23 = vmul.f32 %v6674_v52, %v6674_v52 }
 0x3c0   : > { %v2556_v19 = vadd.f32 %v2524_v37, %v2491_v14  ;;  %v2429_v54 = vmul.f32 2.0, %v2390_v62  ;;  %v2528_v62 = vmul.f32 %v6798_v2, %v2463_v1  ;;  %v2629_v22 = vadd.f32 %v6798_v2, %v2500_v6 }
 0x3c1   : > { %2779 = vperm.xlu0 %4034, %v2653_v34   ;;  %v2530_v43 = vmul.f32 %v6798_v2, %v2465_v23  ;;  %v2880_v6 = vsub.f32 1.0, %v2463_v1 }
 0x3c2   : > { %4536 = vrcp.f32 %v2556_v19  ;;  %v2493_v49 = vadd.f32 1.0, %v2429_v54  ;;  %v4531_v63 = vpop.eup %4530 }
 0x3c3   : > { %4538 = vrcp.f32 %v2565_v61  ;;  %v2655_v25 = vmul.f32 %v4531_v63, %v2623_v39  ;;  %v2394_v16 = vpop.xlane.xlu0 %2393  ;;  %v7092_v37 = vmul.f32 %v4531_v63, %v2879_v26  ;;  %v2627_v61 = vadd.f32 %v6798_v2, %v2498_v33 }
 0x3c4   : > { %v2558_v30 = vadd.f32 %v2526_v11, %v2493_v49  ;;  %v2431_v4 = vmul.f32 2.0, %v2394_v16  ;;  %v2885_v33 = vsub.f32 1.0, %v7069_v48 }
 0x3c5   : > { %2789 = vperm.xlu0 %4034, %v2655_v25   ;;  %v2620_v25 = vadd.f32 %v6798_v2, %v2491_v14  ;;  %v2878_v14 = vsub.f32 1.0, %v7078_v58 }
 0x3c6   : > { %4540 = vrcp.f32 %v2558_v30  ;;  %v4533_v51 = vpop.eup %4532  ;;  %v2495_v10 = vadd.f32 1.0, %v2431_v4  ;;  %v2876_v30 = vsub.f32 1.0, %v7060_v20 }
 0x3c7   : > { %v2657_v31 = vmul.f32 %v4533_v51, %v2625_v17  ;;  %v2398_v57 = vpop.xlane.xlu0 %2397  ;;  %v7099_v34 = vmul.f32 %v4533_v51, %v2881_v29 }
 0x3c8   : > { %v2560_v19 = vadd.f32 %v2528_v62, %v2495_v10  ;;  %v2433_v54 = vmul.f32 2.0, %v2398_v57  ;;  %v2624_v48 = vadd.f32 %v6798_v2, %v2495_v10 }
 0x3c9   : > { %2799 = vperm.xlu0 %4034, %v2657_v31   ;;  %v2622_v31 = vadd.f32 %v6798_v2, %v2493_v49  ;;  %v2467_v49 = vmul.f32 %v6677_v24, %v6677_v24 }
 0x3ca   : > { %v4535_v26 = vpop.eup %4534  ;;  %4542 = vrcp.f32 %v2560_v19  ;;  %v2497_v39 = vadd.f32 1.0, %v2433_v54 }
 0x3cb   : > { %v2659_v52 = vmul.f32 %v4535_v26, %v2627_v61  ;;  %v7104_v11 = vmul.f32 %v4535_v26, %v2883_v38  ;;  %v2884_v24 = vsub.f32 1.0, %v2467_v49 }
 0x3cc   : > { %v2562_v63 = vadd.f32 %v2530_v43, %v2497_v39  ;;  %v2626_v26 = vadd.f32 %v6798_v2, %v2497_v39  ;;  %v2882_v43 = vsub.f32 1.0, %v2465_v23 }
 0x3cd   : > { %2809 = vperm.xlu0 %4034, %v2659_v52  }
 0x3ce   : > { %4544 = vrcp.f32 %v2562_v63 }
 0x3cf   : > { %v4537_v16 = vpop.eup %4536 }
 0x3d0   : > { %v4539_v4 = vpop.eup %4538  ;;  %v2652_v17 = vmul.f32 %v4537_v16, %v2620_v25  ;;  %v7110_v29 = vmul.f32 %v4537_v16, %v2876_v30 }
 0x3d1   : > { %v2661_v51 = vmul.f32 %v4539_v4, %v2629_v22  ;;  %v2917_v62 = vmul.f32 %v4539_v4, %v2885_v33 }
 0x3d2   : > { %2774 = vperm.xlu1 %4035, %v2652_v17  }
 0x3d3   : > { %v4541_v57 = vpop.eup %4540  ;;  %2819 = vperm.xlu0 %4034, %v2661_v51  }
 0x3d4   : > { %v2654_v20 = vmul.f32 %v4541_v57, %v2622_v31  ;;  %v7114_v19 = vmul.f32 %v4541_v57, %v2878_v14 }
 0x3d6   : > { %2784 = vperm.xlu1 %4035, %v2654_v20  }
 0x3d7   : > { %2925 = vperm.xlu0 %4034, %v6809_v41   ;;  %v4543_v54 = vpop.eup %4542  ;;  %v2532_v41 = vmul.f32 %v6798_v2, %v2467_v49 }
 0x3d8   : > { %v2656_v61 = vmul.f32 %v4543_v54, %v2624_v48  ;;  %v2912_v38 = vmul.f32 %v4543_v54, %v2880_v6 }
 0x3da   : > { %v2402_v58 = vpop.xlane.xlu0 %2401  ;;  %2794 = vperm.xlu1 %4035, %v2656_v61  }
 0x3db   : > { %2935 = vperm.xlu0 %4034, %v6966_v5   ;;  %v4545_v52 = vpop.eup %4544  ;;  %v2435_v63 = vmul.f32 2.0, %v2402_v58 }
 0x3dc   : > { %v2658_v25 = vmul.f32 %v4545_v52, %v2626_v26  ;;  %v2914_v10 = vmul.f32 %v4545_v52, %v2882_v43 }
 0x3dd   : > { %v2499_v1 = vadd.f32 1.0, %v2435_v63 }
 0x3de   : > { %2804 = vperm.xlu1 %4035, %v2658_v25  }
 0x3df   : > { %2945 = vperm.xlu0 %4034, %v6979_v21   ;;  %v2564_v30 = vadd.f32 %v2532_v41, %v2499_v1  ;;  %v2628_v5 = vadd.f32 %v6798_v2, %v2499_v1 }
 0x3e1   : > { %4546 = vrcp.f32 %v2564_v30 }
 0x3e3   : > { %2955 = vperm.xlu0 %4034, %v6993_v18  }
 0x3e7   : > { %2965 = vperm.xlu0 %4034, %v7008_v46  }
 0x3eb   : > { %2975 = vperm.xlu0 %4034, %v7022_v12  }
 0x3ee   : > { %v4547_v23 = vpop.eup %4546 }
 0x3ef   : > { %2985 = vperm.xlu0 %4034, %v7032_v50   ;;  %v2660_v39 = vmul.f32 %v4547_v23, %v2628_v5  ;;  %v2916_v16 = vmul.f32 %v4547_v23, %v2884_v24 }
 0x3f1   : > { %2814 = vperm.xlu1 %4035, %v2660_v39  }
 0x3f3   : > { %2995 = vperm.xlu0 %4034, %v7042_v35  }
 0x3f5   : > { %2920 = vperm.xlu1 %4035, %v6946_v42  }
 0x3f7   : > { %3005 = vperm.xlu0 %4034, %v7052_v44  }
 0x3f9   : > { %2930 = vperm.xlu1 %4035, %v6814_v47  }
 0x3fb   : > { %3015 = vperm.xlu0 %4034, %v7062_v0  }
 0x3fd   : > { %2940 = vperm.xlu1 %4035, %v6823_v13  }
 0x3ff   : > { %3025 = vperm.xlu0 %4034, %v7074_v56  }
 0x401   : > { %2950 = vperm.xlu1 %4035, %v6837_v8   ;;  %v2670_v8 = vpop.permute.xlu1 %2669 }
 0x402   : > { %v2823_v17 = vmul.f32 %v2670_v8, %v6658_v53  ;;  %v8046_v8 = vld [vmem:[#allocation38_spill] sm:$0xff] }
 0x403   : > { %3035 = vperm.xlu0 %4034, %v7084_v32  }
 0x405   : > { %2960 = vperm.xlu1 %4035, %v6872_v15  }
 0x407   : > { %3045 = vperm.xlu0 %4034, %v7092_v37  }
 0x409   : > { %2970 = vperm.xlu1 %4035, %v6894_v40   ;;  %v2675_v40 = vpop.permute.xlu1 %2674 }
 0x40a   : > { %v2824_v24 = vmul.f32 %v2675_v40, %v6669_v36 }
 0x40b   : > { %3055 = vperm.xlu0 %4034, %v7099_v34  }
 0x40d   : > { %2980 = vperm.xlu1 %4035, %v6915_v45   ;;  %v2685_v45 = vpop.permute.xlu1 %2684 }
 0x40e   : > { %v2826_v36 = vmul.f32 %v2685_v45, %v6679_v60  ;;  %v8047_v45 = vld [vmem:[#allocation19_spill] sm:$0xff] }
 0x40f   : > { %3065 = vperm.xlu0 %4034, %v7104_v11  }
 0x410   : > { %v2665_v2 = vpop.permute.xlu0 %2664 }
 0x411   : > { %2990 = vperm.xlu1 %4035, %v6948_v28   ;;  %v7156_v28 = vpop.permute.xlu1 %2694  ;;  %v2822_v43 = vmul.f32 %v2665_v2, %v6698_v7 }
 0x413   : > { %3075 = vperm.xlu0 %4034, %v2917_v62  }
 0x414   : > { %v2680_v47 = vpop.permute.xlu0 %2679 }
 0x415   : > { %3000 = vperm.xlu1 %4035, %v6968_v3   ;;  %v7160_v18 = vpop.permute.xlu1 %2704  ;;  %v2825_v52 = vmul.f32 %v2680_v47, %v6704_v59 }
 0x418   : > { %v2690_v13 = vpop.permute.xlu0 %2689 }
 0x419   : > { %3010 = vperm.xlu1 %4035, %v6995_v55   ;;  %v7164_v46 = vpop.permute.xlu1 %2714  ;;  %v2827_v5 = vmul.f32 %v2690_v13, %v6712_v27 }
 0x41c   : > { %v7147_v15 = vpop.permute.xlu0 %2699 }
 0x41d   : > { %3020 = vperm.xlu1 %4035, %v7016_v9   ;;  %v7170_v50 = vpop.permute.xlu1 %2724  ;;  %v2829_v27 = vmul.f32 %v7147_v15, %v8046_v8  ;;  %v8052_v8 = vld [vmem:[#allocation23_spill] sm:$0xff] }
 0x420   : > { %v7150_v42 = vpop.permute.xlu0 %2709 }
 0x421   : > { %3030 = vperm.xlu1 %4035, %v7110_v29   ;;  %v7174_v44 = vpop.permute.xlu1 %2734  ;;  %v7196_v29 = vld [vmem:[%s7878_s2] ss:$0 sm:$0xff]  ;;  %v2831_v15 = vmul.f32 %v7150_v42, %v8047_v45 }
 0x424   : > { %v7153_v21 = vpop.permute.xlu0 %2719 }
 0x425   : > { %3040 = vperm.xlu1 %4035, %v7114_v19   ;;  %v7180_v32 = vpop.permute.xlu1 %2744 }
 0x428   : > { %v7158_v3 = vpop.permute.xlu0 %2729 }
 0x429   : > { %3050 = vperm.xlu1 %4035, %v2912_v38   ;;  %v7184_v34 = vpop.permute.xlu1 %2754 }
 0x42c   : > { %v7162_v55 = vpop.permute.xlu0 %2739 }
 0x42d   : > { %3060 = vperm.xlu1 %4035, %v2914_v10   ;;  %v7190_v22 = vpop.permute.xlu1 %2764 }
 0x430   : > { %v7166_v9 = vpop.permute.xlu0 %2749 }
 0x431   : > { %3070 = vperm.xlu1 %4035, %v2916_v16  }
 0x434   : > { %v7168_v12 = vpop.permute.xlu0 %2759 }
 0x438   : > { %v7172_v35 = vpop.permute.xlu0 %2769 }
 0x43c   : > { %v7176_v0 = vpop.permute.xlu0 %2779 }
 0x440   : > { %v7178_v56 = vpop.permute.xlu0 %2789 }
 0x444   : > { %v7182_v37 = vpop.permute.xlu0 %2799 }
 0x448   : > { %v7186_v11 = vpop.permute.xlu0 %2809 }
 0x44d   : > { %v7199_v62 = vpop.permute.xlu1 %2774 }
 0x44e   : > { %v7188_v33 = vpop.permute.xlu0 %2819 }
 0x451   : > { %v7205_v19 = vpop.permute.xlu1 %2784 }
 0x452   : > { %v2926_v4 = vpop.permute.xlu0 %2925 }
 0x453   : > { %v3079_v51 = vmul.f32 %v7196_v29, %v2926_v4 }
 0x455   : > { %v7201_v31 = vadd.f32 %v3079_v51, %v2823_v17  ;;  %v7207_v48 = vpop.permute.xlu1 %2794 }
 0x456   : > { %v2936_v14 = vpop.permute.xlu0 %2935 }
 0x457   : > { %v3143_v57 = vmul.f32 %v7201_v31, %v7201_v31  ;;  %v3081_v26 = vmul.f32 %v7196_v29, %v2936_v14 }
 0x459   : > { %3176 = vadd.xlane.f32.xlu0 %v3143_v57  ;;  %v7209_v54 = vpop.permute.xlu1 %2804  ;;  %v7219_v10 = vadd.f32 %v3081_v26, %v2825_v52 }
 0x45a   : > { %v2946_v20 = vpop.permute.xlu0 %2945 }
 0x45b   : > { %v3083_v41 = vmul.f32 %v7196_v29, %v2946_v20  ;;  %v3145_v16 = vmul.f32 %v7219_v10, %v7219_v10  ;;  %v8048_v20 = vld [vmem:[#allocation36_spill] sm:$0xff] }
 0x45d   : > { %v7229_v39 = vadd.f32 %v3083_v41, %v2827_v5 }
 0x45e   : > { %v2956_v53 = vpop.permute.xlu0 %2955 }
 0x45f   : > { %v3085_v2 = vmul.f32 %v7196_v29, %v2956_v53  ;;  %v3147_v60 = vmul.f32 %v7229_v39, %v7229_v39  ;;  %v2828_v53 = vmul.f32 %v7156_v28, %v8048_v20  ;;  %v8054_v20 = vld [vmem:[#allocation35_spill] sm:$0xff] }
 0x461   : > { %v7243_v14 = vadd.f32 %v3085_v2, %v2829_v27  ;;  %v2835_v27 = vmul.f32 %v7158_v3, %v8052_v8 }
 0x462   : > { %v2966_v6 = vpop.permute.xlu0 %2965 }
 0x463   : > { %v3087_v4 = vmul.f32 %v7196_v29, %v2966_v6  ;;  %v3149_v52 = vmul.f32 %v7243_v14, %v7243_v14 }
 0x466   : > { %v2976_v61 = vpop.permute.xlu0 %2975 }
 0x467   : > { %v3089_v42 = vmul.f32 %v7196_v29, %v2976_v61 }
 0x46a   : > { %v2986_v49 = vpop.permute.xlu0 %2985 }
 0x46c   : > { %v7211_v38 = vpop.permute.xlu1 %2814 }
 0x46e   : > { %v2996_v30 = vpop.permute.xlu0 %2995 }
 0x470   : > { %v2921_v58 = vpop.permute.xlu1 %2920 }
 0x471   : > { %v3078_v63 = vmul.f32 %v7196_v29, %v2921_v58  ;;  %v7254_v58 = vadd.f32 %v3087_v4, %v2831_v15  ;;  %v3093_v4 = vmul.f32 %v7196_v29, %v2996_v30  ;;  %v8053_v15 = vld [vmem:[#allocation41_spill] sm:$0xff] }
 0x472   : > { %v3006_v17 = vpop.permute.xlu0 %3005  ;;  %v2837_v3 = vmul.f32 %v7162_v55, %v8053_v15  ;;  %v8059_v15 = vld [vmem:[#allocation33_spill] sm:$0xff] }
 0x473   : > { %v7217_v25 = vadd.f32 %v3078_v63, %v2822_v43  ;;  %v3095_v55 = vmul.f32 %v7196_v29, %v3006_v17 }
 0x474   : > { %v2931_v1 = vpop.permute.xlu1 %2930 }
 0x475   : > { %v3080_v23 = vmul.f32 %v7196_v29, %v2931_v1  ;;  %v3142_v7 = vmul.f32 %v7217_v25, %v7217_v25  ;;  %v8049_v1 = vld [vmem:[#allocation15_spill] sm:$0xff] }
 0x476   : > { %v3016_v41 = vpop.permute.xlu0 %3015  ;;  %v2830_v28 = vmul.f32 %v7160_v18, %v8049_v1 }
 0x477   : > { %v7227_v59 = vadd.f32 %v3080_v23, %v2824_v24  ;;  %3174 = vadd.xlane.f32.xlu1 %v3142_v7  ;;  %v8050_v24 = vld [vmem:[#allocation20_spill] sm:$0xff] }
 0x478   : > { %v2941_v47 = vpop.permute.xlu1 %2940  ;;  %v2833_v5 = vmul.f32 %v7153_v21, %v8050_v24  ;;  %v8056_v24 = vld [vmem:[#allocation43_spill] sm:$0xff] }
 0x479   : > { %v3082_v13 = vmul.f32 %v7196_v29, %v2941_v47  ;;  %v3144_v40 = vmul.f32 %v7227_v59, %v7227_v59  ;;  %v3091_v47 = vmul.f32 %v7196_v29, %v2986_v49 }
 0x47a   : > { %v7272_v61 = vadd.f32 %v3089_v42, %v2833_v5  ;;  %v2839_v5 = vmul.f32 %v7166_v9, %v8056_v24 }
 0x47b   : > { %v7241_v51 = vadd.f32 %v3082_v13, %v2826_v36  ;;  %3178 = vadd.xlane.f32.xlu0 %v3144_v40  ;;  %3180 = vadd.xlane.f32.xlu1 %v3145_v16  ;;  %v3151_v16 = vmul.f32 %v7254_v58, %v7254_v58  ;;  %v8051_v36 = vld [vmem:[#allocation16_spill] sm:$0xff]  ;;  %v7285_v49 = vadd.f32 %v3091_v47, %v2835_v27 }
 0x47c   : > { %v2951_v57 = vpop.permute.xlu1 %2950  ;;  %v2832_v21 = vmul.f32 %v7164_v46, %v8051_v36  ;;  %v3153_v46 = vmul.f32 %v7272_v61, %v7272_v61  ;;  %v7314_v17 = vadd.f32 %v3095_v55, %v2839_v5  ;;  %v8057_v36 = vld [vmem:[#allocation18_spill] sm:$0xff] }
 0x47d   : > { %v3084_v26 = vmul.f32 %v7196_v29, %v2951_v57  ;;  %v3146_v6 = vmul.f32 %v7241_v51, %v7241_v51  ;;  %v3155_v42 = vmul.f32 %v7285_v49, %v7285_v49  ;;  %v2838_v9 = vmul.f32 %v7180_v32, %v8057_v36  ;;  %v8064_v36 = vld [vmem:[#allocation24_spill] sm:$0xff] }
 0x47e   : > { %v3159_v32 = vmul.f32 %v7314_v17, %v7314_v17 }
 0x47f   : > { %v7256_v43 = vadd.f32 %v3084_v26, %v2828_v53  ;;  %3182 = vadd.xlane.f32.xlu0 %v3146_v6  ;;  %3184 = vadd.xlane.f32.xlu1 %v3147_v60  ;;  %v3026_v60 = vpop.permute.xlu0 %3025  ;;  %v2834_v53 = vmul.f32 %v7170_v50, %v8054_v20  ;;  %v7296_v6 = vadd.f32 %v3093_v4, %v2837_v3 }
 0x480   : > { %v2961_v63 = vpop.permute.xlu1 %2960 }
 0x481   : > { %v3086_v23 = vmul.f32 %v7196_v29, %v2961_v63  ;;  %v3148_v7 = vmul.f32 %v7256_v43, %v7256_v43 }
 0x483   : > { %v7270_v2 = vadd.f32 %v3086_v23, %v2830_v28  ;;  %3186 = vadd.xlane.f32.xlu0 %v3148_v7  ;;  %3188 = vadd.xlane.f32.xlu1 %v3149_v52  ;;  %v3036_v1 = vpop.permute.xlu0 %3035  ;;  %v8055_v28 = vld [vmem:[#allocation37_spill] sm:$0xff] }
 0x484   : > { %v2971_v18 = vpop.permute.xlu1 %2970  ;;  %v2836_v50 = vmul.f32 %v7174_v44, %v8055_v28  ;;  %v8061_v28 = vld [vmem:[#allocation22_spill] sm:$0xff] }
 0x485   : > { %v3088_v13 = vmul.f32 %v7196_v29, %v2971_v18  ;;  %v3150_v40 = vmul.f32 %v7270_v2, %v7270_v2  ;;  %v3097_v18 = vmul.f32 %v7196_v29, %v3016_v41 }
 0x487   : > { %v7283_v45 = vadd.f32 %v3088_v13, %v2832_v21  ;;  %3190 = vadd.xlane.f32.xlu0 %v3150_v40  ;;  %3192 = vadd.xlane.f32.xlu1 %v3151_v16  ;;  %v3157_v16 = vmul.f32 %v7296_v6, %v7296_v6  ;;  %v8058_v21 = vld [vmem:[#allocation44_spill] sm:$0xff]  ;;  %v3099_v40 = vmul.f32 %v7196_v29, %v3026_v60  ;;  %v3046_v4 = vpop.permute.xlu0 %3045 }
 0x488   : > { %v2981_v57 = vpop.permute.xlu1 %2980  ;;  %v2841_v8 = vmul.f32 %v7168_v12, %v8058_v21  ;;  %v2843_v12 = vmul.f32 %v7172_v35, %v8059_v15  ;;  %v3101_v35 = vmul.f32 %v7196_v29, %v3036_v1 }
 0x489   : > { %v3090_v26 = vmul.f32 %v7196_v29, %v2981_v57  ;;  %v3152_v30 = vmul.f32 %v7283_v45, %v7283_v45  ;;  %v8060_v57 = vld [vmem:[#allocation45_spill] sm:$0xff] }
 0x48a   : > { %v7327_v41 = vadd.f32 %v3097_v18, %v2841_v8  ;;  %v2840_v20 = vmul.f32 %v7184_v34, %v8060_v57  ;;  %v2842_v34 = vmul.f32 %v7190_v22, %v8061_v28  ;;  %v3103_v18 = vmul.f32 %v7196_v29, %v3046_v4  ;;  %v8068_v28 = vld [vmem:[#allocation21_spill] sm:$0xff] }
 0x48b   : > { %v7298_v52 = vadd.f32 %v3090_v26, %v2834_v53  ;;  %3194 = vadd.xlane.f32.xlu0 %v3152_v30  ;;  %3196 = vadd.xlane.f32.xlu1 %v3153_v46  ;;  %v7338_v26 = vadd.f32 %v3099_v40, %v2843_v12  ;;  %v8066_v12 = vld [vmem:[#allocation42_spill] sm:$0xff] }
 0x48c   : > { %v2991_v63 = vpop.permute.xlu1 %2990 }
 0x48d   : > { %v3092_v23 = vmul.f32 %v7196_v29, %v2991_v63  ;;  %v3154_v7 = vmul.f32 %v7298_v52, %v7298_v52  ;;  %v3056_v63 = vpop.permute.xlu0 %3055 }
 0x48f   : > { %v7312_v47 = vadd.f32 %v3092_v23, %v2836_v50  ;;  %3198 = vadd.xlane.f32.xlu0 %v3154_v7  ;;  %3200 = vadd.xlane.f32.xlu1 %v3155_v42  ;;  %v3161_v42 = vmul.f32 %v7327_v41, %v7327_v41  ;;  %v8062_v50 = vld [vmem:[#allocation39_spill] sm:$0xff]  ;;  %v3163_v7 = vmul.f32 %v7338_v26, %v7338_v26 }
 0x490   : > { %v3001_v44 = vpop.permute.xlu1 %3000  ;;  %v2845_v24 = vmul.f32 %v7176_v0, %v8062_v50 }
 0x491   : > { %v3094_v27 = vmul.f32 %v7196_v29, %v3001_v44  ;;  %v3156_v13 = vmul.f32 %v7312_v47, %v7312_v47  ;;  %v8063_v44 = vld [vmem:[#allocation40_spill] sm:$0xff] }
 0x492   : > { %v7356_v1 = vadd.f32 %v3101_v35, %v2845_v24  ;;  %v2844_v0 = vmul.f32 %v7199_v62, %v8063_v44  ;;  %v8070_v44 = vld [vmem:[#allocation27_spill] sm:$0xff] }
 0x493   : > { %v7325_v46 = vadd.f32 %v3094_v27, %v2838_v9  ;;  %3202 = vadd.xlane.f32.xlu0 %v3156_v13  ;;  %3204 = vadd.xlane.f32.xlu1 %v3157_v16  ;;  %v2847_v9 = vmul.f32 %v7178_v56, %v8064_v36  ;;  %v3105_v27 = vmul.f32 %v7196_v29, %v3056_v63  ;;  %v3066_v13 = vpop.permute.xlu0 %3065  ;;  %v8067_v63 = vld [vmem:[#allocation28_spill] sm:$0xff] }
 0x494   : > { %v3011_v3 = vpop.permute.xlu1 %3010  ;;  %v3165_v62 = vmul.f32 %v7356_v1, %v7356_v1 }
 0x495   : > { %v3096_v53 = vmul.f32 %v7196_v29, %v3011_v3  ;;  %v3158_v60 = vmul.f32 %v7325_v46, %v7325_v46  ;;  %v7369_v4 = vadd.f32 %v3103_v18, %v2847_v9  ;;  %v2846_v3 = vmul.f32 %v7205_v19, %v8066_v12 }
 0x496   : > { %v2848_v19 = vmul.f32 %v7207_v48, %v8067_v63 }
 0x497   : > { %v7340_v30 = vadd.f32 %v3096_v53, %v2840_v20  ;;  %3206 = vadd.xlane.f32.xlu0 %v3158_v60  ;;  %3208 = vadd.xlane.f32.xlu1 %v3159_v32  ;;  %v8065_v32 = vld [vmem:[#allocation25_spill] sm:$0xff] }
 0x498   : > { %v3021_v55 = vpop.permute.xlu1 %3020  ;;  %v2849_v56 = vmul.f32 %v7182_v37, %v8065_v32  ;;  %v3107_v37 = vmul.f32 %v7196_v29, %v3066_v13 }
 0x499   : > { %v3098_v5 = vmul.f32 %v7196_v29, %v3021_v55  ;;  %v3160_v23 = vmul.f32 %v7340_v30, %v7340_v30  ;;  %v3076_v55 = vpop.permute.xlu0 %3075 }
 0x49a   : > { %v7380_v53 = vadd.f32 %v3105_v27, %v2849_v56  ;;  %v3109_v18 = vmul.f32 %v7196_v29, %v3076_v55 }
 0x49b   : > { %v7354_v16 = vadd.f32 %v3098_v5, %v2842_v34  ;;  %3210 = vadd.xlane.f32.xlu0 %v3160_v23  ;;  %3212 = vadd.xlane.f32.xlu1 %v3161_v42  ;;  %v3167_v42 = vmul.f32 %v7369_v4, %v7369_v4  ;;  %v2851_v34 = vmul.f32 %v7186_v11, %v8068_v28 }
 0x49c   : > { %v3031_v22 = vpop.permute.xlu1 %3030  ;;  %v3169_v5 = vmul.f32 %v7380_v53, %v7380_v53 }
 0x49d   : > { %v3100_v21 = vmul.f32 %v7196_v29, %v3031_v22  ;;  %v3162_v8 = vmul.f32 %v7354_v16, %v7354_v16  ;;  %v8069_v22 = vld [vmem:[#allocation31_spill] sm:$0xff] }
 0x49e   : > { %v2850_v11 = vmul.f32 %v7209_v54, %v8069_v22 }
 0x49f   : > { %v7367_v40 = vadd.f32 %v3100_v21, %v2844_v0  ;;  %3214 = vadd.xlane.f32.xlu0 %v3162_v8  ;;  %3216 = vadd.xlane.f32.xlu1 %v3163_v7  ;;  %v7398_v7 = vadd.f32 %v3107_v37, %v2851_v34  ;;  %v2853_v0 = vmul.f32 %v7188_v33, %v8070_v44 }
 0x4a0   : > { %v3041_v15 = vpop.permute.xlu1 %3040 }
 0x4a1   : > { %v3102_v57 = vmul.f32 %v7196_v29, %v3041_v15  ;;  %v3164_v20 = vmul.f32 %v7367_v40, %v7367_v40  ;;  %v7410_v8 = vadd.f32 %v3109_v18, %v2853_v0  ;;  %v3171_v27 = vmul.f32 %v7398_v7, %v7398_v7 }
 0x4a3   : > { %v7382_v60 = vadd.f32 %v3102_v57, %v2846_v3  ;;  %3218 = vadd.xlane.f32.xlu0 %v3164_v20  ;;  %3220 = vadd.xlane.f32.xlu1 %v3165_v62  ;;  %v8071_v62 = vld [vmem:[#allocation17_spill] sm:$0xff]  ;;  %v3173_v15 = vmul.f32 %v7410_v8, %v7410_v8 }
 0x4a4   : > { %v3051_v35 = vpop.permute.xlu1 %3050  ;;  %v2852_v54 = vmul.f32 %v7211_v38, %v8071_v62 }
 0x4a5   : > { %v3104_v50 = vmul.f32 %v7196_v29, %v3051_v35  ;;  %v3166_v24 = vmul.f32 %v7382_v60, %v7382_v60 }
 0x4a7   : > { %v7396_v23 = vadd.f32 %v3104_v50, %v2848_v19  ;;  %3222 = vadd.xlane.f32.xlu0 %v3166_v24  ;;  %3224 = vadd.xlane.f32.xlu1 %v3167_v42 }
 0x4a8   : > { %v3061_v48 = vpop.permute.xlu1 %3060 }
 0x4a9   : > { %v3106_v36 = vmul.f32 %v7196_v29, %v3061_v48  ;;  %v3168_v9 = vmul.f32 %v7396_v23, %v7396_v23 }
 0x4ab   : > { %v7408_v21 = vadd.f32 %v3106_v36, %v2850_v11  ;;  %3226 = vadd.xlane.f32.xlu0 %v3168_v9  ;;  %3228 = vadd.xlane.f32.xlu1 %v3169_v5 }
 0x4ac   : > { %v3071_v13 = vpop.permute.xlu1 %3070 }
 0x4ad   : > { %v3108_v33 = vmul.f32 %v7196_v29, %v3071_v13  ;;  %v3170_v32 = vmul.f32 %v7408_v21, %v7408_v21 }
 0x4af   : > { %v7419_v56 = vadd.f32 %v3108_v33, %v2852_v54  ;;  %3230 = vadd.xlane.f32.xlu0 %v3170_v32  ;;  %3232 = vadd.xlane.f32.xlu1 %v3171_v27 }
 0x4b1   : > { %v3172_v12 = vmul.f32 %v7419_v56, %v7419_v56 }
 0x4b3   : > { %3234 = vadd.xlane.f32.xlu0 %v3172_v12  ;;  %3236 = vadd.xlane.f32.xlu1 %v3173_v15 }
 0x4e2   : > { %v3177_v3 = vpop.xlane.xlu0 %3176 }
 0x4e3   : > { %4548 = vrsqrt.f32 %v3177_v3  ;;  %vm3247_vm2 = vcmp.eq.f32.partialorder %v3177_v3, inf  ;;  %v3250_v29 = vand.u32 2147483648, %v3177_v3  ;;  %vm3249_vm3 = vcmp.eq.f32.partialorder %v3177_v3, 0.0 }
 0x4f0   : > { %v4549_v38 = vpop.eup %4548 }
 0x4f1   : > { %v3246_v57 = vmul.f32 %v4549_v38, %v3177_v3 }
 0x4f3   : > { %v3248_v20 = vsel %vm3247_vm2, %v3177_v3, %v3246_v57 }
 0x4f4   : > { %v3251_v42 = vsel %vm3249_vm3, %v3250_v29, %v3248_v20 }
 0x4f5   : > { %v3463_v37 = vmax.f32 %v3251_v42, 1e-07 }
 0x4f7   : > { %4550 = vrcp.f32 %v3463_v37 }
 0x500   : > { %v3175_v35 = vpop.xlane.xlu1 %3174 }
 0x501   : > { %4552 = vrsqrt.f32 %v3175_v35  ;;  %vm3240_vm4 = vcmp.eq.f32.partialorder %v3175_v35, inf  ;;  %vm3242_vm5 = vcmp.eq.f32.partialorder %v3175_v35, 0.0 }
 0x504   : > { %v4551_v55 = vpop.eup %4550  ;;  %v3181_v19 = vpop.xlane.xlu1 %3180 }
 0x505   : > { %v3527_v63 = vmul.f32 0.99999, %v4551_v55  ;;  %v3179_v28 = vpop.xlane.xlu0 %3178  ;;  %4554 = vrsqrt.f32 %v3181_v19  ;;  %vm3261_vm6 = vcmp.eq.f32.partialorder %v3181_v19, inf  ;;  %vm3263_vm7 = vcmp.eq.f32.partialorder %v3181_v19, 0.0 }
 0x506   : > { %4556 = vrsqrt.f32 %v3179_v28  ;;  %v3264_v44 = vand.u32 2147483648, %v3181_v19  ;;  %vm3254_vm8 = vcmp.eq.f32.partialorder %v3179_v28, inf  ;;  %vm3256_vm9 = vcmp.eq.f32.partialorder %v3179_v28, 0.0 }
 0x507   : > { %v3559_v34 = vmin.f32 %v3527_v63, 1.0  ;;  %v3257_v27 = vand.u32 2147483648, %v3179_v28 }
 0x508   : > { %v7426_v24 = vpop.xlane.xlu1 %3184 }
 0x509   : > { %v3591_v50 = vmul.f32 %v3559_v34, %v7201_v31  ;;  %v7428_v5 = vpop.xlane.xlu0 %3182  ;;  %4558 = vrsqrt.f32 %v7426_v24  ;;  %v3243_v31 = vand.u32 2147483648, %v3175_v35  ;;  %vm3275_vm10 = vcmp.eq.f32.partialorder %v7426_v24, inf }
 0x50a   : > { %4560 = vrsqrt.f32 %v7428_v5  ;;  %vm3277_vm11 = vcmp.eq.f32.partialorder %v7426_v24, 0.0  ;;  %v3278_v15 = vand.u32 2147483648, %v7426_v24  ;;  %vm3268_vm12 = vcmp.eq.f32.partialorder %v7428_v5, inf }
 0x50b   : > { %3623 = vst [vmem:[%s5032_s29 + $0x8] sm:$0xff] %v3591_v50  ;;  %vm3270_vm13 = vcmp.eq.f32.partialorder %v7428_v5, 0.0  ;;  %v3271_v3 = vand.u32 2147483648, %v7428_v5 }
 0x50c   : > { %v7433_v18 = vpop.xlane.xlu1 %3188 }
 0x50d   : > { %v7435_v48 = vpop.xlane.xlu0 %3186  ;;  %4562 = vrsqrt.f32 %v7433_v18  ;;  %vm3289_vm14 = vcmp.eq.f32.partialorder %v7433_v18, inf  ;;  %vm3291_vm15 = vcmp.eq.f32.partialorder %v7433_v18, 0.0  ;;  %v3292_v20 = vand.u32 2147483648, %v7433_v18 }
 0x50e   : > { %v4553_v22 = vpop.eup %4552  ;;  %4564 = vrsqrt.f32 %v7435_v48  ;;  %vm3282_vm0 = vcmp.eq.f32.partialorder %v7435_v48, inf  ;;  %vm3284_vm1 = vcmp.eq.f32.partialorder %v7435_v48, 0.0 }
 0x50f   : > { %v3239_v11 = vmul.f32 %v4553_v22, %v3175_v35 }
 0x510   : > { %v7439_v0 = vpop.xlane.xlu1 %3192 }
 0x511   : > { %v7441_v36 = vpop.xlane.xlu0 %3190  ;;  %v3241_v9 = vsel %vm3240_vm4, %v3175_v35, %v3239_v11  ;;  %4566 = vrsqrt.f32 %v7439_v0  ;;  %vm3303_vm2 = vcmp.eq.f32.partialorder %v7439_v0, inf  ;;  %vm3305_vm3 = vcmp.eq.f32.partialorder %v7439_v0, 0.0 }
 0x512   : > { %v4555_v13 = vpop.eup %4554  ;;  %v3244_v62 = vsel %vm3242_vm5, %v3243_v31, %v3241_v9  ;;  %4568 = vrsqrt.f32 %v7441_v36  ;;  %vm3296_vm4 = vcmp.eq.f32.partialorder %v7441_v36, inf  ;;  %vm3298_vm5 = vcmp.eq.f32.partialorder %v7441_v36, 0.0 }
 0x513   : > { %v4557_v54 = vpop.eup %4556  ;;  %v3462_v33 = vmax.f32 %v3244_v62, 1e-07  ;;  %v3260_v32 = vmul.f32 %v4555_v13, %v3181_v19 }
 0x514   : > { %v3253_v12 = vmul.f32 %v4557_v54, %v3179_v28  ;;  %v7452_v38 = vpop.xlane.xlu1 %3196 }
 0x515   : > { %v7454_v57 = vpop.xlane.xlu0 %3194  ;;  %4570 = vrcp.f32 %v3462_v33  ;;  %v3262_v29 = vsel %vm3261_vm6, %v3181_v19, %v3260_v32  ;;  %v3285_v19 = vand.u32 2147483648, %v7435_v48  ;;  %vm3317_vm6 = vcmp.eq.f32.partialorder %v7452_v38, inf }
 0x516   : > { %v4559_v42 = vpop.eup %4558  ;;  %v3265_v37 = vsel %vm3263_vm7, %v3264_v44, %v3262_v29  ;;  %v3255_v35 = vsel %vm3254_vm8, %v3179_v28, %v3253_v12  ;;  %4572 = vrsqrt.f32 %v7452_v38  ;;  %v3306_v28 = vand.u32 2147483648, %v7439_v0 }
 0x517   : > { %v4561_v55 = vpop.eup %4560  ;;  %v3465_v63 = vmax.f32 %v3265_v37, 1e-07  ;;  %v3258_v34 = vsel %vm3256_vm9, %v3257_v27, %v3255_v35  ;;  %v3274_v50 = vmul.f32 %v4559_v42, %v7426_v24  ;;  %4574 = vrsqrt.f32 %v7454_v57 }
 0x518   : > { %v3464_v22 = vmax.f32 %v3258_v34, 1e-07  ;;  %v3267_v11 = vmul.f32 %v4561_v55, %v7428_v5  ;;  %v7470_v31 = vpop.xlane.xlu1 %3200  ;;  %vm3319_vm7 = vcmp.eq.f32.partialorder %v7452_v38, 0.0  ;;  %vm3310_vm8 = vcmp.eq.f32.partialorder %v7454_v57, inf }
 0x519   : > { %4576 = vrcp.f32 %v3465_v63  ;;  %v3276_v44 = vsel %vm3275_vm10, %v7426_v24, %v3274_v50  ;;  %v7477_v9 = vpop.xlane.xlu0 %3198  ;;  %vm3312_vm9 = vcmp.eq.f32.partialorder %v7454_v57, 0.0  ;;  %vm3331_vm10 = vcmp.eq.f32.partialorder %v7470_v31, inf }
 0x51a   : > { %v4563_v27 = vpop.eup %4562  ;;  %4578 = vrcp.f32 %v3464_v22  ;;  %v3279_v13 = vsel %vm3277_vm11, %v3278_v15, %v3276_v44  ;;  %v3269_v62 = vsel %vm3268_vm12, %v7428_v5, %v3267_v11  ;;  %v3299_v5 = vand.u32 2147483648, %v7441_v36 }
 0x51b   : > { %v4565_v54 = vpop.eup %4564  ;;  %v3467_v33 = vmax.f32 %v3279_v13, 1e-07  ;;  %v3272_v32 = vsel %vm3270_vm13, %v3271_v3, %v3269_v62  ;;  %v3288_v12 = vmul.f32 %v4563_v27, %v7433_v18  ;;  %4580 = vrsqrt.f32 %v7470_v31 }
 0x51c   : > { %v3466_v29 = vmax.f32 %v3272_v32, 1e-07  ;;  %v3281_v42 = vmul.f32 %v4565_v54, %v7435_v48  ;;  %4582 = vrsqrt.f32 %v7477_v9  ;;  %v7492_v24 = vpop.xlane.xlu1 %3204  ;;  %v3334_v54 = vand.u32 2147483648, %v7470_v31 }
 0x51d   : > { %4584 = vrcp.f32 %v3467_v33  ;;  %v3290_v15 = vsel %vm3289_vm14, %v7433_v18, %v3288_v12  ;;  %v7509_v22 = vpop.xlane.xlu0 %3202  ;;  %vm3333_vm11 = vcmp.eq.f32.partialorder %v7470_v31, 0.0  ;;  %vm3324_vm12 = vcmp.eq.f32.partialorder %v7477_v9, inf }
 0x51e   : > { %v4567_v3 = vpop.eup %4566  ;;  %4586 = vrcp.f32 %v3466_v29  ;;  %v3293_v37 = vsel %vm3291_vm15, %v3292_v20, %v3290_v15  ;;  %v3283_v35 = vsel %vm3282_vm0, %v7435_v48, %v3281_v42  ;;  %v3320_v20 = vand.u32 2147483648, %v7452_v38 }
 0x51f   : > { %v4569_v55 = vpop.eup %4568  ;;  %v3469_v63 = vmax.f32 %v3293_v37, 1e-07  ;;  %v3286_v34 = vsel %vm3284_vm1, %v3285_v19, %v3283_v35  ;;  %v3302_v50 = vmul.f32 %v4567_v3, %v7439_v0  ;;  %4588 = vrsqrt.f32 %v7492_v24 }
 0x520   : > { %v3468_v11 = vmax.f32 %v3286_v34, 1e-07  ;;  %v3295_v18 = vmul.f32 %v4569_v55, %v7441_v36  ;;  %v3313_v48 = vand.u32 2147483648, %v7454_v57  ;;  %v7519_v19 = vpop.xlane.xlu1 %3208  ;;  %vm3326_vm13 = vcmp.eq.f32.partialorder %v7477_v9, 0.0 }
 0x521   : > { %4590 = vrcp.f32 %v3469_v63  ;;  %v3304_v44 = vsel %vm3303_vm2, %v7439_v0, %v3302_v50  ;;  %v3327_v35 = vand.u32 2147483648, %v7477_v9  ;;  %vm3345_vm14 = vcmp.eq.f32.partialorder %v7492_v24, inf }
 0x522   : > { %v4571_v27 = vpop.eup %4570  ;;  %4592 = vrcp.f32 %v3468_v11  ;;  %v3307_v13 = vsel %vm3305_vm3, %v3306_v28, %v3304_v44  ;;  %v3297_v62 = vsel %vm3296_vm4, %v7441_v36, %v3295_v18  ;;  %v7537_v36 = vpop.xlane.xlu0 %3206  ;;  %vm3347_vm15 = vcmp.eq.f32.partialorder %v7492_v24, 0.0 }
 0x523   : > { %v4573_v33 = vpop.eup %4572  ;;  %v3526_v32 = vmul.f32 0.99999, %v4571_v27  ;;  %v3471_v12 = vmax.f32 %v3307_v13, 1e-07  ;;  %v3300_v29 = vsel %vm3298_vm5, %v3299_v5, %v3297_v62  ;;  %4594 = vrsqrt.f32 %v7509_v22 }
 0x524   : > { %v4575_v0 = vpop.eup %4574  ;;  %v3470_v28 = vmax.f32 %v3300_v29, 1e-07  ;;  %v3316_v42 = vmul.f32 %v4573_v33, %v7452_v38  ;;  %4596 = vrsqrt.f32 %v7519_v19  ;;  %v7551_v18 = vpop.xlane.xlu1 %3212  ;;  %vm3338_vm0 = vcmp.eq.f32.partialorder %v7509_v22, inf }
 0x525   : > { %v3558_v15 = vmin.f32 %v3526_v32, 1.0  ;;  %4598 = vrcp.f32 %v3471_v12  ;;  %v3309_v3 = vmul.f32 %v4575_v0, %v7454_v57  ;;  %v3348_v32 = vand.u32 2147483648, %v7492_v24 }
 0x526   : > { %v4577_v5 = vpop.eup %4576  ;;  %4600 = vrcp.f32 %v3470_v28  ;;  %v3318_v37 = vsel %vm3317_vm6, %v7452_v38, %v3316_v42  ;;  %vm3340_vm1 = vcmp.eq.f32.partialorder %v7509_v22, 0.0  ;;  %vm3359_vm2 = vcmp.eq.f32.partialorder %v7519_v19, inf }
 0x527   : > { %v4579_v55 = vpop.eup %4578  ;;  %v3590_v63 = vmul.f32 %v3558_v15, %v7217_v25  ;;  %v3529_v34 = vmul.f32 0.99999, %v4577_v5  ;;  %v3321_v50 = vsel %vm3319_vm7, %v3320_v20, %v3318_v37  ;;  %v3311_v11 = vsel %vm3310_vm8, %v7454_v57, %v3309_v3  ;;  %v7566_v15 = vpop.xlane.xlu0 %3210 }
 0x528   : > { %v4581_v44 = vpop.eup %4580  ;;  %v3528_v27 = vmul.f32 0.99999, %v4579_v55  ;;  %v3473_v13 = vmax.f32 %v3321_v50, 1e-07  ;;  %v3314_v62 = vsel %vm3312_vm9, %v3313_v48, %v3311_v11  ;;  %4602 = vrsqrt.f32 %v7537_v36 }
 0x529   : > { %v4583_v25 = vpop.eup %4582  ;;  %3622 = vst [vmem:[%s5032_s29] sm:$0xff] %v3590_v63  ;;  %v3561_v38 = vmin.f32 %v3529_v34, 1.0  ;;  %v3472_v20 = vmax.f32 %v3314_v62, 1e-07  ;;  %v3330_v33 = vmul.f32 %v4581_v44, %v7470_v31  ;;  %v7578_v44 = vpop.xlane.xlu1 %3216  ;;  %vm3361_vm3 = vcmp.eq.f32.partialorder %v7519_v19, 0.0 }
 0x52a   : > { %v4585_v12 = vpop.eup %4584  ;;  %v3560_v29 = vmin.f32 %v3528_v27, 1.0  ;;  %4604 = vrcp.f32 %v3473_v13  ;;  %v3323_v0 = vmul.f32 %v4583_v25, %v7477_v9  ;;  %vm3352_vm4 = vcmp.eq.f32.partialorder %v7537_v36, inf }
 0x52b   : > { %v4587_v57 = vpop.eup %4586  ;;  %v3593_v48 = vmul.f32 %v3561_v38, %v7219_v10  ;;  %v3531_v28 = vmul.f32 0.99999, %v4585_v12  ;;  %4606 = vrcp.f32 %v3472_v20  ;;  %v3332_v42 = vsel %vm3331_vm10, %v7470_v31, %v3330_v33 }
 0x52c   : > { %v4589_v3 = vpop.eup %4588  ;;  %v3592_v5 = vmul.f32 %v3560_v29, %v7227_v59  ;;  %v3530_v37 = vmul.f32 0.99999, %v4587_v57  ;;  %v3335_v55 = vsel %vm3333_vm11, %v3334_v54, %v3332_v42  ;;  %v3325_v10 = vsel %vm3324_vm12, %v7477_v9, %v3323_v0  ;;  %v7593_v57 = vpop.xlane.xlu0 %3214 }
 0x52d   : > { %3625 = vst [vmem:[%s5032_s29 + $0x18] sm:$0xff] %v3593_v48  ;;  %v3563_v63 = vmin.f32 %v3531_v28, 1.0  ;;  %v3475_v34 = vmax.f32 %v3335_v55, 1e-07  ;;  %v3328_v50 = vsel %vm3326_vm13, %v3327_v35, %v3325_v10  ;;  %v3344_v11 = vmul.f32 %v4589_v3, %v7492_v24 }
 0x52e   : > { %v4591_v27 = vpop.eup %4590  ;;  %3624 = vst [vmem:[%s5032_s29 + $0x10] sm:$0xff] %v3592_v5  ;;  %v3562_v59 = vmin.f32 %v3530_v37, 1.0  ;;  %v3474_v31 = vmax.f32 %v3328_v50, 1e-07  ;;  %v3341_v54 = vand.u32 2147483648, %v7509_v22  ;;  %4608 = vrsqrt.f32 %v7551_v18  ;;  %v7603_v37 = vpop.xlane.xlu1 %3220 }
 0x52f   : > { %v4593_v13 = vpop.eup %4592  ;;  %v3595_v62 = vmul.f32 %v3563_v63, %v7229_v39  ;;  %v3533_v25 = vmul.f32 0.99999, %v4591_v27  ;;  %4610 = vrcp.f32 %v3475_v34  ;;  %v3346_v9 = vsel %vm3345_vm14, %v7492_v24, %v3344_v11 }
 0x530   : > { %v4595_v35 = vpop.eup %4594  ;;  %v3594_v38 = vmul.f32 %v3562_v59, %v7241_v51  ;;  %v3532_v20 = vmul.f32 0.99999, %v4593_v13  ;;  %4612 = vrcp.f32 %v3474_v31  ;;  %v3349_v33 = vsel %vm3347_vm15, %v3348_v32, %v3346_v9  ;;  %v7621_v13 = vpop.xlane.xlu0 %3218 }
 0x531   : > { %v4597_v12 = vpop.eup %4596  ;;  %3627 = vst [vmem:[%s5032_s29 + $0x28] sm:$0xff] %v3595_v62  ;;  %v3565_v29 = vmin.f32 %v3533_v25, 1.0  ;;  %v3477_v0 = vmax.f32 %v3349_v33, 1e-07  ;;  %v3337_v39 = vmul.f32 %v4595_v35, %v7509_v22  ;;  %v3362_v24 = vand.u32 2147483648, %v7519_v19 }
 0x532   : > { %v4599_v48 = vpop.eup %4598  ;;  %3626 = vst [vmem:[%s5032_s29 + $0x20] sm:$0xff] %v3594_v38  ;;  %v3564_v28 = vmin.f32 %v3532_v20, 1.0  ;;  %v3358_v51 = vmul.f32 %v4597_v12, %v7519_v19  ;;  %vm3354_vm5 = vcmp.eq.f32.partialorder %v7537_v36, 0.0  ;;  %vm3373_vm6 = vcmp.eq.f32.partialorder %v7551_v18, inf }
 0x533   : > { %v4601_v32 = vpop.eup %4600  ;;  %v3597_v42 = vmul.f32 %v3565_v29, %v7243_v14  ;;  %v3535_v3 = vmul.f32 0.99999, %v4599_v48  ;;  %4614 = vrcp.f32 %v3477_v0  ;;  %v3339_v5 = vsel %vm3338_vm0, %v7509_v22, %v3337_v39 }
 0x534   : > { %v3596_v55 = vmul.f32 %v3564_v28, %v7256_v43  ;;  %v3534_v10 = vmul.f32 0.99999, %v4601_v32  ;;  %v3342_v63 = vsel %vm3340_vm1, %v3341_v54, %v3339_v5  ;;  %v3360_v34 = vsel %vm3359_vm2, %v7519_v19, %v3358_v51  ;;  %v7637_v32 = vpop.xlane.xlu0 %3222 }
 0x535   : > { %v4603_v50 = vpop.eup %4602  ;;  %3629 = vst [vmem:[%s5032_s29 + $0x38] sm:$0xff] %v3597_v42  ;;  %v3567_v14 = vmin.f32 %v3535_v3, 1.0  ;;  %v3476_v11 = vmax.f32 %v3342_v63, 1e-07  ;;  %v3363_v27 = vsel %vm3361_vm3, %v3362_v24, %v3360_v34  ;;  %4616 = vrsqrt.f32 %v7566_v15 }
 0x536   : > { %3628 = vst [vmem:[%s5032_s29 + $0x30] sm:$0xff] %v3596_v55  ;;  %v3566_v43 = vmin.f32 %v3534_v10, 1.0  ;;  %v3479_v59 = vmax.f32 %v3363_v27, 1e-07  ;;  %v3351_v22 = vmul.f32 %v4603_v50, %v7537_v36  ;;  %v3355_v19 = vand.u32 2147483648, %v7537_v36 }
 0x537   : > { %v4605_v31 = vpop.eup %4604  ;;  %v3599_v54 = vmul.f32 %v3567_v14, %v7254_v58  ;;  %4618 = vrcp.f32 %v3476_v11  ;;  %v7627_v58 = vpop.xlane.xlu1 %3224  ;;  %v3376_v24 = vand.u32 2147483648, %v7551_v18  ;;  %vm3375_vm7 = vcmp.eq.f32.partialorder %v7551_v18, 0.0 }
 0x538   : > { %v4607_v62 = vpop.eup %4606  ;;  %v3598_v25 = vmul.f32 %v3566_v43, %v7270_v2  ;;  %v3537_v9 = vmul.f32 0.99999, %v4605_v31  ;;  %4620 = vrcp.f32 %v3479_v59  ;;  %v3353_v35 = vsel %vm3352_vm4, %v7537_v36, %v3351_v22 }
 0x539   : > { %3631 = vst [vmem:[%s5032_s29 + $0x48] sm:$0xff] %v3599_v54  ;;  %v3536_v38 = vmul.f32 0.99999, %v4607_v62  ;;  %v3356_v20 = vsel %vm3354_vm5, %v3355_v19, %v3353_v35  ;;  %4622 = vrsqrt.f32 %v7578_v44  ;;  %vm3366_vm8 = vcmp.eq.f32.partialorder %v7566_v15, inf }
 0x53a   : > { %3630 = vst [vmem:[%s5032_s29 + $0x40] sm:$0xff] %v3598_v25  ;;  %v3569_v33 = vmin.f32 %v3537_v9, 1.0  ;;  %v3478_v12 = vmax.f32 %v3356_v20, 1e-07  ;;  %4624 = vrsqrt.f32 %v7593_v57  ;;  %vm3368_vm9 = vcmp.eq.f32.partialorder %v7566_v15, 0.0 }
 0x53b   : > { %v4609_v29 = vpop.eup %4608  ;;  %v3568_v0 = vmin.f32 %v3536_v38, 1.0  ;;  %v3369_v34 = vand.u32 2147483648, %v7566_v15  ;;  %vm3387_vm10 = vcmp.eq.f32.partialorder %v7578_v44, inf  ;;  %vm3389_vm11 = vcmp.eq.f32.partialorder %v7578_v44, 0.0 }
 0x53c   : > { %v4611_v2 = vpop.eup %4610  ;;  %v3601_v39 = vmul.f32 %v3569_v33, %v7272_v61  ;;  %4626 = vrcp.f32 %v3478_v12  ;;  %v3372_v36 = vmul.f32 %v4609_v29, %v7551_v18  ;;  %v3390_v27 = vand.u32 2147483648, %v7578_v44 }
 0x53d   : > { %v4613_v48 = vpop.eup %4612  ;;  %v3600_v28 = vmul.f32 %v3568_v0, %v7283_v45  ;;  %v3539_v51 = vmul.f32 0.99999, %v4611_v2  ;;  %4628 = vrsqrt.f32 %v7603_v37  ;;  %v7645_v45 = vpop.xlane.xlu1 %3228  ;;  %vm3380_vm12 = vcmp.eq.f32.partialorder %v7593_v57, inf }
 0x53e   : > { %3633 = vst [vmem:[%s5032_s29 + $0x58] sm:$0xff] %v3601_v39  ;;  %v3538_v42 = vmul.f32 0.99999, %v4613_v48  ;;  %v3374_v3 = vsel %vm3373_vm6, %v7551_v18, %v3372_v36  ;;  %4630 = vrsqrt.f32 %v7621_v13  ;;  %vm3382_vm13 = vcmp.eq.f32.partialorder %v7593_v57, 0.0 }
 0x53f   : > { %3632 = vst [vmem:[%s5032_s29 + $0x50] sm:$0xff] %v3600_v28  ;;  %v3571_v61 = vmin.f32 %v3539_v51, 1.0  ;;  %v3377_v5 = vsel %vm3375_vm7, %v3376_v24, %v3374_v3  ;;  %4632 = vrsqrt.f32 %v7627_v58  ;;  %vm3401_vm14 = vcmp.eq.f32.partialorder %v7603_v37, inf }
 0x540   : > { %v4615_v55 = vpop.eup %4614  ;;  %v3570_v10 = vmin.f32 %v3538_v42, 1.0  ;;  %v3481_v63 = vmax.f32 %v3377_v5, 1e-07  ;;  %vm3403_vm15 = vcmp.eq.f32.partialorder %v7603_v37, 0.0  ;;  %v3404_v25 = vand.u32 2147483648, %v7603_v37 }
 0x541   : > { %v3603_v50 = vmul.f32 %v3571_v61, %v7285_v49  ;;  %v3541_v18 = vmul.f32 0.99999, %v4615_v55  ;;  %v7659_v49 = vpop.xlane.xlu0 %3226  ;;  %v7672_v9 = vpop.xlane.xlu1 %3232  ;;  %vm3394_vm0 = vcmp.eq.f32.partialorder %v7621_v13, inf  ;;  %vm3396_vm1 = vcmp.eq.f32.partialorder %v7621_v13, 0.0 }
 0x542   : > { %v4617_v14 = vpop.eup %4616  ;;  %v3602_v11 = vmul.f32 %v3570_v10, %v7298_v52  ;;  %4634 = vrcp.f32 %v3481_v63  ;;  %v3383_v52 = vand.u32 2147483648, %v7593_v57  ;;  %v3397_v29 = vand.u32 2147483648, %v7621_v13 }
 0x543   : > { %3635 = vst [vmem:[%s5032_s29 + $0x68] sm:$0xff] %v3603_v50  ;;  %v3573_v43 = vmin.f32 %v3541_v18, 1.0  ;;  %v3365_v59 = vmul.f32 %v4617_v14, %v7566_v15  ;;  %4636 = vrsqrt.f32 %v7637_v32  ;;  %vm3415_vm2 = vcmp.eq.f32.partialorder %v7627_v58, inf }
 0x544   : > { %v4619_v22 = vpop.eup %4618  ;;  %3634 = vst [vmem:[%s5032_s29 + $0x60] sm:$0xff] %v3602_v11  ;;  %4638 = vrsqrt.f32 %v7645_v45  ;;  %vm3417_vm3 = vcmp.eq.f32.partialorder %v7627_v58, 0.0  ;;  %vm3408_vm4 = vcmp.eq.f32.partialorder %v7637_v32, inf  ;;  %vm3410_vm5 = vcmp.eq.f32.partialorder %v7637_v32, 0.0 }
 0x545   : > { %v4621_v31 = vpop.eup %4620  ;;  %v3605_v54 = vmul.f32 %v3573_v43, %v7296_v6  ;;  %v3540_v19 = vmul.f32 0.99999, %v4619_v22  ;;  %v3367_v62 = vsel %vm3366_vm8, %v7566_v15, %v3365_v59  ;;  %4640 = vrsqrt.f32 %v7659_v49  ;;  %v7691_v51 = vpop.xlane.xlu0 %3230 }
 0x546   : > { %v4623_v35 = vpop.eup %4622  ;;  %v3543_v38 = vmul.f32 0.99999, %v4621_v31  ;;  %v3370_v20 = vsel %vm3368_vm9, %v3369_v34, %v3367_v62  ;;  %v3418_v15 = vand.u32 2147483648, %v7627_v58  ;;  %4642 = vrsqrt.f32 %v7672_v9  ;;  %v7713_v14 = vpop.xlane.xlu1 %3236 }
 0x547   : > { %3637 = vst [vmem:[%s5032_s29 + $0x78] sm:$0xff] %v3605_v54  ;;  %v3572_v6 = vmin.f32 %v3540_v19, 1.0  ;;  %v3480_v33 = vmax.f32 %v3370_v20, 1e-07  ;;  %v3386_v12 = vmul.f32 %v4623_v35, %v7578_v44  ;;  %v4625_v0 = vpop.eup %4624  ;;  %v3411_v10 = vand.u32 2147483648, %v7637_v32 }
 0x548   : > { %v3575_v2 = vmin.f32 %v3543_v38, 1.0  ;;  %v3379_v28 = vmul.f32 %v4625_v0, %v7593_v57  ;;  %vm3429_vm6 = vcmp.eq.f32.partialorder %v7645_v45, inf  ;;  %vm3431_vm7 = vcmp.eq.f32.partialorder %v7645_v45, 0.0 }
 0x549   : > { %v4627_v39 = vpop.eup %4626  ;;  %v3604_v36 = vmul.f32 %v3572_v6, %v7312_v47  ;;  %4644 = vrcp.f32 %v3480_v33  ;;  %v3388_v48 = vsel %vm3387_vm10, %v7578_v44, %v3386_v12  ;;  %v3432_v43 = vand.u32 2147483648, %v7645_v45  ;;  %v7741_v0 = vpop.xlane.xlu0 %3234 }
 0x54a   : > { %v4629_v24 = vpop.eup %4628  ;;  %v3607_v42 = vmul.f32 %v3575_v2, %v7314_v17  ;;  %v3542_v3 = vmul.f32 0.99999, %v4627_v39  ;;  %v3391_v61 = vsel %vm3389_vm11, %v3390_v27, %v3388_v48  ;;  %v3381_v5 = vsel %vm3380_vm12, %v7593_v57, %v3379_v28 }
 0x54b   : > { %3636 = vst [vmem:[%s5032_s29 + $0x70] sm:$0xff] %v3604_v36  ;;  %v3483_v47 = vmax.f32 %v3391_v61, 1e-07  ;;  %v3400_v55 = vmul.f32 %v4629_v24, %v7603_v37  ;;  %v4631_v63 = vpop.eup %4630  ;;  %v3384_v44 = vsel %vm3382_vm13, %v3383_v52, %v3381_v5  ;;  %4646 = vrsqrt.f32 %v7691_v51 }
 0x54c   : > { %3639 = vst [vmem:[%s5032_s29 + $0x88] sm:$0xff] %v3607_v42  ;;  %v3574_v17 = vmin.f32 %v3542_v3, 1.0  ;;  %v3482_v34 = vmax.f32 %v3384_v44, 1e-07  ;;  %v3393_v18 = vmul.f32 %v4631_v63, %v7621_v13  ;;  %v4633_v11 = vpop.eup %4632  ;;  %vm3422_vm8 = vcmp.eq.f32.partialorder %v7659_v49, inf }
 0x54d   : > { %4648 = vrcp.f32 %v3483_v47  ;;  %v3402_v50 = vsel %vm3401_vm14, %v7603_v37, %v3400_v55  ;;  %v3414_v31 = vmul.f32 %v4633_v11, %v7627_v58  ;;  %vm3424_vm9 = vcmp.eq.f32.partialorder %v7659_v49, 0.0 }
 0x54e   : > { %v3606_v27 = vmul.f32 %v3574_v17, %v7325_v46  ;;  %v3405_v57 = vsel %vm3403_vm15, %v3404_v25, %v3402_v50  ;;  %4650 = vrcp.f32 %v3482_v34  ;;  %v3395_v52 = vsel %vm3394_vm0, %v7621_v13, %v3393_v18 }
 0x54f   : > { %v4635_v59 = vpop.eup %4634  ;;  %v3485_v22 = vmax.f32 %v3405_v57, 1e-07  ;;  %v3398_v46 = vsel %vm3396_vm1, %v3397_v29, %v3395_v52  ;;  %4652 = vrsqrt.f32 %v7713_v14  ;;  %v3416_v25 = vsel %vm3415_vm2, %v7627_v58, %v3414_v31 }
 0x550   : > { %v4637_v54 = vpop.eup %4636  ;;  %3638 = vst [vmem:[%s5032_s29 + $0x80] sm:$0xff] %v3606_v27  ;;  %v3545_v19 = vmul.f32 0.99999, %v4635_v59  ;;  %v3484_v62 = vmax.f32 %v3398_v46, 1e-07  ;;  %v3419_v20 = vsel %vm3417_vm3, %v3418_v15, %v3416_v25  ;;  %v3425_v29 = vand.u32 2147483648, %v7659_v49 }
 0x551   : > { %v4639_v37 = vpop.eup %4638  ;;  %4654 = vrcp.f32 %v3485_v22  ;;  %v3407_v35 = vmul.f32 %v4637_v54, %v7637_v32  ;;  %v3487_v33 = vmax.f32 %v3419_v20, 1e-07  ;;  %vm3443_vm10 = vcmp.eq.f32.partialorder %v7672_v9, inf }
 0x552   : > { %v3577_v38 = vmin.f32 %v3545_v19, 1.0  ;;  %v3428_v13 = vmul.f32 %v4639_v37, %v7645_v45  ;;  %v4641_v6 = vpop.eup %4640  ;;  %4656 = vrcp.f32 %v3484_v62  ;;  %vm3445_vm11 = vcmp.eq.f32.partialorder %v7672_v9, 0.0 }
 0x553   : > { %v3409_v12 = vsel %vm3408_vm4, %v7637_v32, %v3407_v35  ;;  %v3421_v39 = vmul.f32 %v4641_v6, %v7659_v49  ;;  %v4643_v36 = vpop.eup %4642  ;;  %4658 = vrcp.f32 %v3487_v33  ;;  %vm3436_vm12 = vcmp.eq.f32.partialorder %v7691_v51, inf }
 0x554   : > { %v3609_v2 = vmul.f32 %v3577_v38, %v7327_v41  ;;  %v3412_v58 = vsel %vm3410_vm5, %v3411_v10, %v3409_v12  ;;  %v3430_v15 = vsel %vm3429_vm6, %v7645_v45, %v3428_v13  ;;  %v3442_v42 = vmul.f32 %v4643_v36, %v7672_v9 }
 0x555   : > { %v3486_v48 = vmax.f32 %v3412_v58, 1e-07  ;;  %v3433_v28 = vsel %vm3431_vm7, %v3432_v43, %v3430_v15  ;;  %v3423_v32 = vsel %vm3422_vm8, %v7659_v49, %v3421_v39  ;;  %4660 = vrsqrt.f32 %v7741_v0 }
 0x556   : > { %v4645_v24 = vpop.eup %4644  ;;  %3641 = vst [vmem:[%s5032_s29 + $0x98] sm:$0xff] %v3609_v2  ;;  %v3489_v41 = vmax.f32 %v3433_v28, 1e-07  ;;  %v3426_v61 = vsel %vm3424_vm9, %v3425_v29, %v3423_v32  ;;  %v3446_v45 = vand.u32 2147483648, %v7672_v9  ;;  %v3444_v5 = vsel %vm3443_vm10, %v7672_v9, %v3442_v42 }
 0x557   : > { %v3544_v3 = vmul.f32 0.99999, %v4645_v24  ;;  %4662 = vrcp.f32 %v3486_v48  ;;  %v3488_v47 = vmax.f32 %v3426_v61, 1e-07  ;;  %v3439_v18 = vand.u32 2147483648, %v7691_v51 }
 0x558   : > { %4664 = vrcp.f32 %v3489_v41  ;;  %v4647_v55 = vpop.eup %4646  ;;  %v3447_v63 = vsel %vm3445_vm11, %v3446_v45, %v3444_v5  ;;  %vm3438_vm13 = vcmp.eq.f32.partialorder %v7691_v51, 0.0  ;;  %vm3457_vm14 = vcmp.eq.f32.partialorder %v7713_v14, inf }
 0x559   : > { %v3576_v10 = vmin.f32 %v3544_v3, 1.0  ;;  %4666 = vrcp.f32 %v3488_v47  ;;  %v3491_v44 = vmax.f32 %v3447_v63, 1e-07  ;;  %v3435_v34 = vmul.f32 %v4647_v55, %v7691_v51 }
 0x55a   : > { %v4649_v17 = vpop.eup %4648  ;;  %v3460_v46 = vand.u32 2147483648, %v7713_v14  ;;  %vm3459_vm15 = vcmp.eq.f32.partialorder %v7713_v14, 0.0  ;;  %vm3450_vm0 = vcmp.eq.f32.partialorder %v7741_v0, inf  ;;  %v3453_v39 = vand.u32 2147483648, %v7741_v0 }
 0x55b   : > { %v3608_v49 = vmul.f32 %v3576_v10, %v7340_v30  ;;  %v3547_v50 = vmul.f32 0.99999, %v4649_v17  ;;  %v4651_v11 = vpop.eup %4650  ;;  %4668 = vrcp.f32 %v3491_v44  ;;  %v3437_v9 = vsel %vm3436_vm12, %v7691_v51, %v3435_v34 }
 0x55c   : > { %v4653_v27 = vpop.eup %4652  ;;  %v3546_v43 = vmul.f32 0.99999, %v4651_v11  ;;  %v3440_v59 = vsel %vm3438_vm13, %v3439_v18, %v3437_v9  ;;  %vm3452_vm1 = vcmp.eq.f32.partialorder %v7741_v0, 0.0 }
 0x55d   : > { %3640 = vst [vmem:[%s5032_s29 + $0x90] sm:$0xff] %v3608_v49  ;;  %v3579_v57 = vmin.f32 %v3547_v50, 1.0  ;;  %v3490_v52 = vmax.f32 %v3440_v59, 1e-07  ;;  %v3456_v30 = vmul.f32 %v4653_v27, %v7713_v14 }
 0x55e   : > { %v4655_v22 = vpop.eup %4654  ;;  %v3578_v54 = vmin.f32 %v3546_v43, 1.0 }
 0x55f   : > { %v3611_v31 = vmul.f32 %v3579_v57, %v7338_v26  ;;  %v3549_v19 = vmul.f32 0.99999, %v4655_v22  ;;  %v4657_v51 = vpop.eup %4656  ;;  %4670 = vrcp.f32 %v3490_v52  ;;  %v3458_v37 = vsel %vm3457_vm14, %v7713_v14, %v3456_v30 }
 0x560   : > { %v3610_v62 = vmul.f32 %v3578_v54, %v7354_v16  ;;  %v3548_v35 = vmul.f32 0.99999, %v4657_v51  ;;  %v3461_v38 = vsel %vm3459_vm15, %v3460_v46, %v3458_v37  ;;  %v4659_v20 = vpop.eup %4658 }
 0x561   : > { %3643 = vst [vmem:[%s5032_s29 + $0xa8] sm:$0xff] %v3611_v31  ;;  %v3581_v25 = vmin.f32 %v3549_v19, 1.0  ;;  %v3493_v26 = vmax.f32 %v3461_v38, 1e-07  ;;  %v3551_v12 = vmul.f32 0.99999, %v4659_v20 }
 0x562   : > { %v4661_v13 = vpop.eup %4660  ;;  %3642 = vst [vmem:[%s5032_s29 + $0xa0] sm:$0xff] %v3610_v62  ;;  %v3580_v33 = vmin.f32 %v3548_v35, 1.0 }
 0x563   : > { %v3613_v6 = vmul.f32 %v3581_v25, %v7356_v1  ;;  %4672 = vrcp.f32 %v3493_v26  ;;  %v3449_v14 = vmul.f32 %v4661_v13, %v7741_v0  ;;  %v3583_v58 = vmin.f32 %v3551_v12, 1.0 }
 0x564   : > { %v4663_v29 = vpop.eup %4662  ;;  %v3612_v2 = vmul.f32 %v3580_v33, %v7367_v40 }
 0x565   : > { %v4665_v16 = vpop.eup %4664  ;;  %3645 = vst [vmem:[%s5032_s29 + $0xb8] sm:$0xff] %v3613_v6  ;;  %v3550_v15 = vmul.f32 0.99999, %v4663_v29  ;;  %v3451_v1 = vsel %vm3450_vm0, %v7741_v0, %v3449_v14  ;;  %v3615_v28 = vmul.f32 %v3583_v58, %v7369_v4 }
 0x566   : > { %v3553_v36 = vmul.f32 0.99999, %v4665_v16  ;;  %v4667_v48 = vpop.eup %4666  ;;  %3644 = vst [vmem:[%s5032_s29 + $0xb0] sm:$0xff] %v3612_v2  ;;  %v3454_v41 = vsel %vm3452_vm1, %v3453_v39, %v3451_v1 }
 0x567   : > { %v3582_v24 = vmin.f32 %v3550_v15, 1.0  ;;  %v3552_v32 = vmul.f32 0.99999, %v4667_v48  ;;  %v3492_v42 = vmax.f32 %v3454_v41, 1e-07  ;;  %3647 = vst [vmem:[%s5032_s29 + $0xc8] sm:$0xff] %v3615_v28 }
 0x568   : > { %v3585_v40 = vmin.f32 %v3553_v36, 1.0  ;;  %v4669_v3 = vpop.eup %4668 }
 0x569   : > { %v3614_v61 = vmul.f32 %v3582_v24, %v7382_v60  ;;  %v3584_v0 = vmin.f32 %v3552_v32, 1.0  ;;  %v3555_v47 = vmul.f32 0.99999, %v4669_v3  ;;  %4674 = vrcp.f32 %v3492_v42 }
 0x56a   : > { %v3617_v45 = vmul.f32 %v3585_v40, %v7380_v53 }
 0x56b   : > { %3646 = vst [vmem:[%s5032_s29 + $0xc0] sm:$0xff] %v3614_v61  ;;  %v3616_v4 = vmul.f32 %v3584_v0, %v7396_v23  ;;  %v3587_v5 = vmin.f32 %v3555_v47, 1.0 }
 0x56c   : > { %3649 = vst [vmem:[%s5032_s29 + $0xd8] sm:$0xff] %v3617_v45  ;;  %v4671_v55 = vpop.eup %4670 }
 0x56d   : > { %3648 = vst [vmem:[%s5032_s29 + $0xd0] sm:$0xff] %v3616_v4  ;;  %v3619_v10 = vmul.f32 %v3587_v5, %v7398_v7  ;;  %v3554_v63 = vmul.f32 0.99999, %v4671_v55 }
 0x56f   : > { %3651 = vst [vmem:[%s5032_s29 + $0xe8] sm:$0xff] %v3619_v10  ;;  %v3586_v60 = vmin.f32 %v3554_v63, 1.0 }
 0x570   : > { %v4673_v17 = vpop.eup %4672 }
 0x571   : > { %v3618_v53 = vmul.f32 %v3586_v60, %v7408_v21  ;;  %v3557_v44 = vmul.f32 0.99999, %v4673_v17 }
 0x573   : > { %3650 = vst [vmem:[%s5032_s29 + $0xe0] sm:$0xff] %v3618_v53  ;;  %v3589_v34 = vmin.f32 %v3557_v44, 1.0 }
 0x575   : > { %v3621_v49 = vmul.f32 %v3589_v34, %v7410_v8 }
 0x576   : > { %v4675_v50 = vpop.eup %4674 }
 0x577   : > { %3653 = vst [vmem:[%s5032_s29 + $0xf8] sm:$0xff] %v3621_v49  ;;  %v3556_v23 = vmul.f32 0.99999, %v4675_v50 }
 0x579   : > { %v3588_v18 = vmin.f32 %v3556_v23, 1.0 }
 0x57b   : > { %v3620_v11 = vmul.f32 %v3588_v18, %v7419_v56 }
 0x57d   : > { %3652 = vst [vmem:[%s5032_s29 + $0xf0] sm:$0xff] %v3620_v11 }
 0x57e PF: > { %s3828_s10 = sshll.u32 %s4848_s24, 12  ;;  %s3668_s5 = sshll.u32 %s5032_s29, 4  ;;  %s7812_s5 = int_to_ptr.vmem [resolvable:$true] %s3668_s5 }
 0x57f   : > { %s7809_s11 = scalar_lea.hbm %s7880_s4, %s3828_s10  ;;  %s7816_s28 = scalar_lea.sflag [#allocation7], %s246_s14 }
 0x580   : > { %s4740_s20 = scalar_lea.vmem %s7812_s5, 4096  ;;  %s4868_s24 = smov [#allocation8]  }
 0x581   : > { %p4741_p8 = scmp.ne.s32.totalorder %s7812_s5, %s4740_s20  ;;  %s4744_s27 = sshll.u32 %s4868_s24, 4  ;;  %s4745_s27 = int_to_ptr.vmem [resolvable:$false] %s4744_s27 }
 0x582   : > { %s4746_s6 = scalar_lea.vmem %s4745_s27, 8192  ;;  %p4747_p11 = scmp.lt.s32.totalorder %s7812_s5, %s4745_s27 }
 0x583   : > { %p4742_p9 = pnand %p4741_p8, %p4981_p12  ;;  %p4748_p13 = scmp.lt.s32.totalorder %s4746_s6, %s4740_s20 }
 0x585   : > { %p4743_p10 = pneg %p4742_p9  ;;  %p4749_p0 = por %p4748_p13, %p4747_p11 }
 0x587   : > { %p4750_p3 = pnand %p4749_p0, %p4743_p10 }
 0x589   : > { %4753 = shalt.err (!%p4750_p3)
}
 0x58a   : > { %s4754_s14 = scalar_lea.hbm %s7809_s11, 4096  ;;  %s4758_s9 = scalar_lea.hbm %s7880_s4, 8192 }
 0x58b   : > { %p4755_p1 = scmp.ne.s32.totalorder %s7809_s11, %s4754_s14  ;;  %p4759_p6 = scmp.lt.s32.totalorder %s7809_s11, %s7880_s4 }
 0x58c   : > { %p4760_p7 = scmp.lt.s32.totalorder %s4758_s9, %s4754_s14 }
 0x58d   : > { %p4756_p5 = pnand %p4755_p1, %p4981_p12 }
 0x58e   : > { %p4761_p8 = por %p4760_p7, %p4759_p6 }
 0x58f   : > { %p4757_p4 = pneg %p4756_p5 }
 0x591   : > { %p4762_p9 = pnand %p4761_p8, %p4757_p4 }
 0x593   : > { %4765 = shalt.err (!%p4762_p9)
}
 0x594   : > { %s4869_s16 = smov 128   ;;  %s4870_s10 = smov 8  }
 0x595   : > { %3919 = dma.vmem_to_hbm [thread:$0]  (%p4981_p12), %s7812_s5, 4096, %s7809_s11, %s7816_s28, %s4869_s16, %s4869_s16, %s4870_s10  }
 0x596 PF: > { %p3930_p10 = scmp.ge.s32.totalorder %s4860_s26, 2  ;;  %s3683_s22 = sand.u32 1, %s4820_s17  }
 0x597   : > { %s3684_s8 = scalar_lea.sflag [#allocation7], %s3683_s22 }
 0x598   : > { %p3926_p11 = pnand %p3930_p10, %p4994_p2 }
 0x59a   : > { %p3927_p13 = pneg %p3926_p11 }
 0x59c   : > { %4815 = dma.done.wait (%p3927_p13), %s3684_s8, 4096  }
 0x59d   : > { %4817 = vsyncadd (%p3927_p13), %s3684_s8, 4294963200  ;;  %s21_s26 = sadd.s32 1, %s4860_s26   ;;  %s8072_s12 = sld [smem:[#allocation11_spill]] }
 0x59e   : > { %p18_p0 = scmp.ge.s32.totalorder %s21_s26, 6   ;;  %s8073_s22 = sld [smem:[#allocation14_spill]] }
 0x59f   : > { %s8074_s11 = sld [smem:[#allocation12_spill]]  ;;  %s8076_s17 = smov %s4824_s18 }
 0x5a0   : > { %s8075_s5 = sld [smem:[#allocation13_spill]]  ;;  %s8077_s18 = smov %s4828_s19 }
 0x5a1   : > { %s8078_s19 = smov %s4986_s13  ;;  %s8079_s20 = smov %s4836_s21 }
 0x5a2   : > { %s8081_s23 = smov %s4852_s3  ;;  %s8082_s24 = smov %s4856_s25 }
 0x5a3   : > { %s8080_s21 = smov %s8072_s12  ;;  %20 = sbr.rel (!%p18_p0) target bundleno = 11 (0xb), region = 92 }
 0x5a5   : > { %s8083_s3 = smov %s8074_s11 }
 0x5a6   : > { %s8084_s25 = smov %s8075_s5 }
 0x5a8   :  { %3689 = vsyncpa [#allocation6], 1 }
 0x5a9   :  { %3691 = vsyncpa [#allocation6 + $0x1], 1 }
 0x5aa   :  { %3692 = vsyncpa [#allocation7], 1 }
 0x5ab   :  { %3694 = vsyncpa [#allocation7 + $0x1], 1 }

// kernel: _mobius_linear_impl.1
= control target key start
LH: loop header
LB: loop body
LE: loop exit
PB: predicated region body
PF: predicated region fallthrough
CT: control target
= control target key end

     0   :  { %s7876_s0 = inlined_call_operand.hbm [shape: f32[512,256], index: 0, kind: input, shape index: {}]   ;;  %s7877_s1 = inlined_call_operand.vmem [shape: bf16[256,128], index: 1, kind: input, shape index: {}]   ;;  %s7878_s2 = inlined_call_operand.vmem [shape: f32[1,128], index: 2, kind: input, shape index: {}]   ;;  %s7879_s3 = inlined_call_operand.<no memory space> [shape: f32[1], index: 3, kind: input, shape index: {}]   ;;  %s7880_s4 = inlined_call_operand.hbm [shape: f32[512,128], index: 4, kind: output, shape index: {}]  }
   0x1   :  { %9 = sst [smem:[#allocation4]] %s7879_s3 }
   0x2   :  { %10 = vsyncpa [#allocation6], 0 }
   0x3   :  { %12 = vsyncpa [#allocation6 + $0x1], 0 }
   0x4   :  { %13 = vsyncpa [#allocation7], 0 }
   0x5   :  { %15 = vsyncpa [#allocation7 + $0x1], 0  ;;  %s4899_s17 = smov 0   ;;  %s4901_s18 = smov 0  }
   0x6   :  { %s4903_s19 = smov 0   ;;  %s4905_s20 = smov 0  }
   0x7   :  { %s4907_s21 = smov 0   ;;  %s4909_s22 = smov 0  }
   0x8   :  { %s4911_s23 = smov 0   ;;  %s4913_s24 = smov 0  }
   0x9   :  { %s4915_s3 = smov 0   ;;  %s4917_s25 = smov 0  }
   0xa   :  { %s4919_s26 = smov 0  }
   0xb LB: > { %7918 = sst [smem:[#allocation11_spill]] %s4840_s22  ;;  %s3766_s27 = sadd.s32 4294967295, %s4860_s26   ;;  %s4860_s26 = sphi %s4919_s26, %s21_s26   ;;  %s4856_s25 = sphi %s4917_s25, %s8084_s25   ;;  %s4852_s3 = sphi %s4915_s3, %s8083_s3   ;;  %s4848_s24 = sphi %s4913_s24, %s8082_s24   ;;  %s4844_s23 = sphi %s4911_s23, %s8081_s23   ;;  %s4840_s22 = sphi %s4909_s22, %s8073_s22   ;;  %s4836_s21 = sphi %s4907_s21, %s8080_s21   ;;  %s4832_s20 = sphi %s4905_s20, %s8079_s20   ;;  %s4828_s19 = sphi %s4903_s19, %s8078_s19   ;;  %s4824_s18 = sphi %s4901_s18, %s8077_s18   ;;  %s4820_s17 = sphi %s4899_s17, %s8076_s17  }
   0xc   : > { %s3767_s28 = sadd.s32 4294967294, %s4860_s26   ;;  %s30_s29 = sadd.s32 1, %s4852_s3 }
   0xd   : > { %s33_s30 = sadd.s32 1, %s4856_s25  ;;  %p31_p0 = scmp.ge.s32.totalorder %s30_s29, 2 }
   0xe   : > { %s42_s5 = sadd.s32 1, %s4840_s22  ;;  %p49_p1 = scmp.ne.s32.totalorder %s4840_s22, %s4836_s21 }
   0xf   : > { %p50_p2 = scmp.eq.s32.totalorder %s4860_s26, 0  ;;  %s8086_s29 = smov (%p31_p0, %s30_s29), 0 }
  0x10   : > { %7919 = sst [smem:[#allocation12_spill]] %s8086_s29  ;;  %s8088_s30 = smov (!%p31_p0, %s33_s30), %s4856_s25 }
  0x11   : > { %s38_s6 = ssub.s32 %s4852_s3, %s8086_s29  ;;  %p4965_p3 = por %p50_p2, %p49_p1 }
  0x12   : > { %p35_p4 = scmp.ge.s32.totalorder %s8088_s30, 2  ;;  %p55_p5 = scmp.ne.s32.totalorder %s4836_s21, %s4832_s20 }
  0x13   : > { %p56_p6 = scmp.eq.s32.totalorder %s3766_s27, 0  ;;  %s136_s8 = sadd.s32 1, %s4828_s19 }
  0x14   : > { %s8090_s30 = smov (%p35_p4, %s8088_s30), 0  ;;  %p146_p8 = scmp.ne.s32.totalorder %s4828_s19, %s4824_s18 }
  0x15   : > { %7921 = sst [smem:[#allocation13_spill]] %s8090_s30  ;;  %p4973_p7 = por %p56_p6, %p55_p5 }
  0x16   : > { %s37_s10 = ssub.s32 %s4856_s25, %s8090_s30  ;;  %p147_p9 = scmp.eq.s32.totalorder %s3766_s27, 3 }
  0x17   : > { %s39_s11 = sor.u32 %s38_s6, %s37_s10  ;;  %p134_p10 = scmp.eq.s32.totalorder %s37_s10, 0 }
  0x18   : > { %p40_p11 = scmp.eq.s32.totalorder %s39_s11, 0  ;;  %p4981_p12 = por %p147_p9, %p146_p8 }
  0x19   : > { %s4986_s13 = scalar_select %p134_p10, %s4828_s19, %s136_s8  }
  0x1a   : > { %s4989_s14 = scalar_select %p40_p11, %s4840_s22, %s42_s5  }
  0x1b   : > { %p152_p13 = scmp.ne.s32.totalorder %s4824_s18, %s4820_s17  ;;  %p153_p0 = scmp.eq.s32.totalorder %s3767_s28, 3 }
  0x1c   : > { %7924 = sst [smem:[#allocation14_spill]] %s4989_s14  ;;  %p3929_p1 = scmp.lt.s32.totalorder %s4860_s26, 4 }
  0x1d   : > { %p4994_p2 = por %p153_p0, %p152_p13  ;;  %s179_s16 = sand.u32 1, %s4840_s22  }
  0x1e   : > { %s3770_s20 = sshll.u32 %s179_s16, 8  ;;  %s3827_s27 = sshll.u32 %s4856_s25, 6 }
  0x1f   : > { %s189_s6 = sadd.s32 %s4852_s3, %s3827_s27  ;;  %s183_s10 = scalar_lea.vmem [#allocation5], %s3770_s20 }
  0x20   : > { %s192_s11 = sshll.u32 %s183_s10, 4  ;;  %s3773_s30 = sshll.u32 %s189_s6, 7  ;;  %s193_s11 = int_to_ptr.vmem [resolvable:$true] %s192_s11 }
  0x21   : > { %s191_s5 = scalar_lea.hbm %s7876_s0, %s3773_s30  ;;  %p5006_p4 = pnand %p3929_p1, %p4965_p3 }
  0x22   : > { %s180_s14 = scalar_lea.sflag [#allocation6], %s179_s16  ;;  %s4725_s22 = scalar_lea.vmem %s193_s11, 4096 }
  0x23   : > { %p4714_p5 = pneg %p5006_p4  ;;  %p4726_p6 = scmp.ne.s32.totalorder %s193_s11, %s4725_s22 }
  0x24   : > { %s4862_s20 = smov [#allocation5]  }
  0x25   : > { %p4728_p8 = pnand %p4726_p6, %p4714_p5  ;;  %s4730_s27 = sshll.u32 %s4862_s20, 4  ;;  %s4731_s27 = int_to_ptr.vmem [resolvable:$false] %s4730_s27 }
  0x26   : > { %s4732_s6 = scalar_lea.vmem %s4731_s27, 8192  ;;  %p4733_p10 = scmp.lt.s32.totalorder %s193_s11, %s4731_s27 }
  0x27   : > { %p4729_p9 = pneg %p4728_p8  ;;  %p4734_p11 = scmp.lt.s32.totalorder %s4732_s6, %s4725_s22 }
  0x29   : > { %p4735_p13 = por %p4734_p11, %p4733_p10 }
  0x2b   : > { %p4736_p0 = pnand %p4735_p13, %p4729_p9 }
  0x2d   : > { %4739 = shalt.err (!%p4736_p0)
}
  0x2e   : > { %s4863_s29 = smov 256   ;;  %s4864_s30 = smov 128  }
  0x2f   : > { %s4865_s7 = smov 8   ;;  %p3774_p3 = scmp.ge.s32.totalorder %s4860_s26, 1 }
  0x30   : > { %3924 = dma.hbm_to_vmem [thread:$0]  (!%p5006_p4), %s191_s5, 4096, %s193_s11, %s180_s14, %s4863_s29, %s4864_s30, %s4865_s7  }
  0x31   : > { %p209_p1 = scmp.lt.s32.totalorder %s4860_s26, 5 }
  0x33   : > { %p210_p5 = pnand %p3774_p3, %p209_p1 }
  0x34   : > { %s215_s16 = sand.u32 (!%p210_p5), 1, %s4836_s21  }
  0x35   : > { %213 = sbr.rel (%p210_p5) target bundleno = 1430 (0x596), region = 36  ;;  %s3775_s10 = sshll.u32 (!%p210_p5), %s215_s16, 8 }
  0x36   : > { %s216_s22 = scalar_lea.sflag (!%p210_p5), [#allocation6], %s215_s16  ;;  %s5017_s8 = scalar_lea.vmem (!%p210_p5), [#allocation5], %s3775_s10 }
  0x3a   : > { %4811 = dma.done.wait (%p4973_p7), %s216_s22, 4096  }
  0x3b   : > { %4813 = vsyncadd (%p4973_p7), %s216_s22, 4294963200  ;;  %s246_s14 = sand.u32 1, %s4824_s18   ;;  %s3777_s11 = sshll.u32 %s4844_s23, 4 }
  0x3c   : > { %s3776_s5 = sshll.u32 %s246_s14, 8  ;;  %p251_p4 = scmp.lt.s32.totalorder %s3777_s11, 31 }
  0x3d   : > { %s5032_s29 = scalar_lea.vmem [#allocation8], %s3776_s5  ;;  %p3779_p6 = scmp.ne.s32.totalorder %s4844_s23, 0 }
  0x3e   : > { %s8092_s11 = smov (!%p251_p4, %s3777_s11), 31 }
  0x3f   : > { %s3778_s28 = sshll.u32 %s8092_s11, 2  ;;  %261 = sbr.rel (%p3779_p6) target bundleno = 101 (0x65), region = 44 }
  0x40   : > { %s5030_s6 = scalar_lea.vmem %s7877_s1, %s3778_s28 }
  0x44   : > { %vm294_vm0 = vcmask 7168   ;;  %v4866_v0 = vmov 0.0  }
  0x45   : > { %262 = vst [vmem:[#allocation2 + $0xb0] sm:$0xff] %v4866_v0  ;;  %263 = vst [vmem:[#allocation2] sm:$0xff] %v4866_v0 }
  0x46   : > { %264 = vst [vmem:[#allocation2 + $0xd8] sm:$0xff] %v4866_v0  ;;  %265 = vst [vmem:[#allocation2 + $0x18] sm:$0xff] %v4866_v0 }
  0x47   : > { %266 = vst [vmem:[#allocation2 + $0x50] sm:$0xff] %v4866_v0  ;;  %267 = vst [vmem:[#allocation2 + $0x68] sm:$0xff] %v4866_v0 }
  0x48   : > { %268 = vst [vmem:[#allocation2 + $0x30] sm:$0xff] %v4866_v0  ;;  %269 = vst [vmem:[#allocation2 + $0x48] sm:$0xff] %v4866_v0 }
  0x49   : > { %270 = vst [vmem:[#allocation2 + $0x80] sm:$0xff] %v4866_v0  ;;  %271 = vst [vmem:[#allocation2 + $0x88] sm:$0xff] %v4866_v0 }
  0x4a   : > { %272 = vst [vmem:[#allocation2 + $0xe8] sm:$0xff] %v4866_v0  ;;  %273 = vst [vmem:[#allocation2 + $0xb8] sm:$0xff] %v4866_v0 }
  0x4b   : > { %274 = vst [vmem:[#allocation2 + $0x60] sm:$0xff] %v4866_v0  ;;  %275 = vst [vmem:[#allocation2 + $0xf0] sm:$0xff] %v4866_v0 }
  0x4c   : > { %276 = vst [vmem:[#allocation2 + $0x8] sm:$0xff] %v4866_v0  ;;  %277 = vst [vmem:[#allocation2 + $0x78] sm:$0xff] %v4866_v0 }
  0x4d   : > { %278 = vst [vmem:[#allocation2 + $0x38] sm:$0xff] %v4866_v0  ;;  %279 = vst [vmem:[#allocation2 + $0x58] sm:$0xff] %v4866_v0 }
  0x4e   : > { %280 = vst [vmem:[#allocation2 + $0x40] sm:$0xff] %v4866_v0  ;;  %281 = vst [vmem:[#allocation2 + $0xc8] sm:$0xff] %v4866_v0 }
  0x4f   : > { %282 = vst [vmem:[#allocation2 + $0xe0] sm:$0xff] %v4866_v0  ;;  %283 = vst [vmem:[#allocation2 + $0x90] sm:$0xff] %v4866_v0 }
  0x50   : > { %284 = vst [vmem:[#allocation2 + $0x70] sm:$0xff] %v4866_v0  ;;  %285 = vst [vmem:[#allocation2 + $0xc0] sm:$0xff] %v4866_v0 }
  0x51   : > { %286 = vst [vmem:[#allocation2 + $0xa8] sm:$0xff] %v4866_v0  ;;  %287 = vst [vmem:[#allocation2 + $0xd0] sm:$0xff] %v4866_v0 }
  0x52   : > { %288 = vst [vmem:[#allocation2 + $0x10] sm:$0xff] %v4866_v0  ;;  %289 = vst [vmem:[#allocation2 + $0x28] sm:$0xff] %v4866_v0 }
  0x53   : > { %290 = vst [vmem:[#allocation2 + $0xa0] sm:$0xff] %v4866_v0  ;;  %291 = vst [vmem:[#allocation2 + $0xf8] sm:$0xff] %v4866_v0 }
  0x54   : > { %292 = vst [vmem:[#allocation2 + $0x20] sm:$0xff] %v4866_v0  ;;  %293 = vst [vmem:[#allocation2 + $0x98] sm:$0xff] %v4866_v0 }
  0x55   : > { %295 = vst.msk [vmem:[#allocation3] sm:$0xff] %vm294_vm0, %v4866_v0  ;;  %296 = vst.msk [vmem:[#allocation3 + $0x8] sm:$0xff] %vm294_vm0, %v4866_v0 }
  0x56   : > { %297 = vst.msk [vmem:[#allocation3 + $0x10] sm:$0xff] %vm294_vm0, %v4866_v0  ;;  %298 = vst.msk [vmem:[#allocation3 + $0x18] sm:$0xff] %vm294_vm0, %v4866_v0 }
  0x57   : > { %299 = vst.msk [vmem:[#allocation3 + $0x20] sm:$0xff] %vm294_vm0, %v4866_v0  ;;  %300 = vst.msk [vmem:[#allocation3 + $0x28] sm:$0xff] %vm294_vm0, %v4866_v0 }
  0x58   : > { %301 = vst.msk [vmem:[#allocation3 + $0x30] sm:$0xff] %vm294_vm0, %v4866_v0  ;;  %302 = vst.msk [vmem:[#allocation3 + $0x38] sm:$0xff] %vm294_vm0, %v4866_v0 }
  0x59   : > { %303 = vst.msk [vmem:[#allocation3 + $0x40] sm:$0xff] %vm294_vm0, %v4866_v0  ;;  %304 = vst.msk [vmem:[#allocation3 + $0x48] sm:$0xff] %vm294_vm0, %v4866_v0 }
  0x5a   : > { %305 = vst.msk [vmem:[#allocation3 + $0x50] sm:$0xff] %vm294_vm0, %v4866_v0  ;;  %306 = vst.msk [vmem:[#allocation3 + $0x58] sm:$0xff] %vm294_vm0, %v4866_v0 }
  0x5b   : > { %307 = vst.msk [vmem:[#allocation3 + $0x60] sm:$0xff] %vm294_vm0, %v4866_v0  ;;  %308 = vst.msk [vmem:[#allocation3 + $0x68] sm:$0xff] %vm294_vm0, %v4866_v0 }
  0x5c   : > { %309 = vst.msk [vmem:[#allocation3 + $0x70] sm:$0xff] %vm294_vm0, %v4866_v0  ;;  %310 = vst.msk [vmem:[#allocation3 + $0x78] sm:$0xff] %vm294_vm0, %v4866_v0 }
  0x5d   : > { %311 = vst.msk [vmem:[#allocation3 + $0x80] sm:$0xff] %vm294_vm0, %v4866_v0  ;;  %312 = vst.msk [vmem:[#allocation3 + $0x88] sm:$0xff] %vm294_vm0, %v4866_v0 }
  0x5e   : > { %313 = vst.msk [vmem:[#allocation3 + $0x90] sm:$0xff] %vm294_vm0, %v4866_v0  ;;  %314 = vst.msk [vmem:[#allocation3 + $0x98] sm:$0xff] %vm294_vm0, %v4866_v0 }
  0x5f   : > { %315 = vst.msk [vmem:[#allocation3 + $0xa0] sm:$0xff] %vm294_vm0, %v4866_v0  ;;  %316 = vst.msk [vmem:[#allocation3 + $0xa8] sm:$0xff] %vm294_vm0, %v4866_v0 }
  0x60   : > { %317 = vst.msk [vmem:[#allocation3 + $0xb0] sm:$0xff] %vm294_vm0, %v4866_v0  ;;  %318 = vst.msk [vmem:[#allocation3 + $0xb8] sm:$0xff] %vm294_vm0, %v4866_v0 }
  0x61   : > { %319 = vst.msk [vmem:[#allocation3 + $0xc0] sm:$0xff] %vm294_vm0, %v4866_v0  ;;  %320 = vst.msk [vmem:[#allocation3 + $0xc8] sm:$0xff] %vm294_vm0, %v4866_v0 }
  0x62   : > { %321 = vst.msk [vmem:[#allocation3 + $0xd0] sm:$0xff] %vm294_vm0, %v4866_v0  ;;  %322 = vst.msk [vmem:[#allocation3 + $0xd8] sm:$0xff] %vm294_vm0, %v4866_v0 }
  0x63   : > { %323 = vst.msk [vmem:[#allocation3 + $0xe0] sm:$0xff] %vm294_vm0, %v4866_v0  ;;  %324 = vst.msk [vmem:[#allocation3 + $0xe8] sm:$0xff] %vm294_vm0, %v4866_v0 }
  0x64   : > { %325 = vst.msk [vmem:[#allocation3 + $0xf0] sm:$0xff] %vm294_vm0, %v4866_v0  ;;  %326 = vst.msk [vmem:[#allocation3 + $0xf8] sm:$0xff] %vm294_vm0, %v4866_v0 }
  0x65 PF: > { %v4026_v1 = vld [vmem:[%s5030_s6 + $0x38] sm:$0xff]   ;;  %v4027_v2 = vld [vmem:[%s5030_s6 + $0x30] sm:$0xff]   ;;  %v4028_v3 = vld [vmem:[%s5030_s6 + $0x28] sm:$0xff]   ;;  %vm856_vm1 = vcmask 7168   ;;  %p3788_p7 = scmp.ne.s32.totalorder %s4844_s23, 1 }
  0x66   : > { %3853 = vmatprep.subr.bf16.mxu0 %v4026_v1  ;;  %3901 = vmatprep.subr.bf16.mxu1 %v4026_v1  ;;  %v4029_v4 = vld [vmem:[%s5030_s6 + $0x20] sm:$0xff]   ;;  %v328_v6 = vld [vmem:[%s5017_s8 + $0x8] sm:$0xff]  ;;  %v5144_v10 = vld [vmem:[%s5017_s8 + $0x10] sm:$0xff] }
  0x67   : > { %3854 = vmatpush3.bf16.msra.mxu0 %v4026_v1  ;;  %3909 = vmatpush3.bf16.msra.mxu1 %v4026_v1  ;;  %v327_v5 = vld [vmem:[%s5017_s8] sm:$0xff]  ;;  %v5141_v9 = vld [vmem:[%s5017_s8 + $0x88] sm:$0xff]  ;;  %v730_v12 = vmul.f32 %v5144_v10, %v5144_v10  ;;  %v4030_v14 = vld [vmem:[%s5030_s6 + $0x18] sm:$0xff]   ;;  %v729_v17 = vmul.f32 %v328_v6, %v328_v6 }
  0x68   : > { %3855 = vmatprep.subr.bf16.mxu0 %v4027_v2  ;;  %3902 = vmatprep.subr.bf16.mxu1 %v4027_v2  ;;  %v5138_v7 = vld [vmem:[%s5017_s8 + $0x80] sm:$0xff]  ;;  %v391_v8 = vpack.c.bf16 %v328_v6, %v327_v5  ;;  %v728_v13 = vmul.f32 %v327_v5, %v327_v5  ;;  %v330_v15 = vld [vmem:[%s5017_s8 + $0x18] sm:$0xff]  ;;  %v4031_v18 = vld [vmem:[%s5030_s6 + $0x10] sm:$0xff]   ;;  %v745_v1 = vmul.f32 %v5141_v9, %v5141_v9 }
  0x69   : > { %v399_v11 = vpack.c.bf16 %v5141_v9, %v5138_v7  ;;  %764 = vadd.xlane.f32.xlu1 %v730_v12  ;;  %v731_v16 = vmul.f32 %v330_v15, %v330_v15  ;;  %v331_v19 = vld [vmem:[%s5017_s8 + $0x20] sm:$0xff]  ;;  %v332_v20 = vld [vmem:[%s5017_s8 + $0x28] sm:$0xff]  ;;  %v333_v24 = vld [vmem:[%s5017_s8 + $0x30] sm:$0xff]  ;;  %v392_v37 = vpack.c.bf16 %v330_v15, %v5144_v10 }
  0x6a   : > { %3869 = vmatprep.mubr.bf16.mxu0 %v391_v8  ;;  %760 = vadd.xlane.f32.xlu0 %v728_v13  ;;  %v733_v21 = vmul.f32 %v332_v20, %v332_v20  ;;  %v732_v22 = vmul.f32 %v331_v19, %v331_v19  ;;  %v4032_v23 = vld [vmem:[%s5030_s6 + $0x8] sm:$0xff]   ;;  %v334_v25 = vld [vmem:[%s5017_s8 + $0x38] sm:$0xff]  ;;  %v734_v27 = vmul.f32 %v333_v24, %v333_v24  ;;  %v4033_v28 = vld [vmem:[%s5030_s6] sm:$0xff]  }
  0x6b   : > { %3856 = vmatpush3.bf16.msra.mxu0 %v4027_v2  ;;  %3910 = vmatpush3.bf16.msra.mxu1 %v4027_v2  ;;  %v735_v26 = vmul.f32 %v334_v25, %v334_v25  ;;  %v335_v29 = vld [vmem:[%s5017_s8 + $0x40] sm:$0xff]  ;;  %v336_v30 = vld [vmem:[%s5017_s8 + $0x48] sm:$0xff]  ;;  %v345_v33 = vld [vmem:[%s5017_s8 + $0x90] sm:$0xff]  ;;  %v393_v39 = vpack.c.bf16 %v332_v20, %v331_v19  ;;  %v394_v53 = vpack.c.bf16 %v334_v25, %v333_v24 }
  0x6c   : > { %3857 = vmatprep.subr.bf16.mxu0 %v4028_v3  ;;  %3903 = vmatprep.subr.bf16.mxu1 %v4028_v3  ;;  %v737_v31 = vmul.f32 %v336_v30, %v336_v30  ;;  %v736_v32 = vmul.f32 %v335_v29, %v335_v29  ;;  %v346_v34 = vld [vmem:[%s5017_s8 + $0x98] sm:$0xff]  ;;  %v5164_v35 = vld [vmem:[%s5017_s8 + $0xa0] sm:$0xff]  ;;  %v5167_v36 = vld [vmem:[%s5017_s8 + $0xa8] sm:$0xff]  ;;  %v395_v55 = vpack.c.bf16 %v336_v30, %v335_v29 }
  0x6d   : > { %3885 = vmatprep.mubr.bf16.mxu1 %v399_v11  ;;  %766 = vadd.xlane.f32.xlu1 %v731_v16  ;;  %v400_v38 = vpack.c.bf16 %v346_v34, %v345_v33  ;;  %v401_v40 = vpack.c.bf16 %v5167_v36, %v5164_v35  ;;  %v337_v41 = vld [vmem:[%s5017_s8 + $0x50] sm:$0xff]  ;;  %v338_v42 = vld [vmem:[%s5017_s8 + $0x58] sm:$0xff]  ;;  %v339_v47 = vld [vmem:[%s5017_s8 + $0x60] sm:$0xff]  ;;  %v744_v2 = vmul.f32 %v5138_v7, %v5138_v7 }
  0x6e   : > { %762 = vadd.xlane.f32.xlu0 %v729_v17  ;;  %v739_v43 = vmul.f32 %v338_v42, %v338_v42  ;;  %v738_v44 = vmul.f32 %v337_v41, %v337_v41  ;;  %v349_v45 = vld [vmem:[%s5017_s8 + $0xb0] sm:$0xff]  ;;  %v350_v46 = vld [vmem:[%s5017_s8 + $0xb8] sm:$0xff]  ;;  %v340_v48 = vld [vmem:[%s5017_s8 + $0x68] sm:$0xff]  ;;  %v740_v52 = vmul.f32 %v339_v47, %v339_v47  ;;  %v747_v8 = vmul.f32 %v346_v34, %v346_v34 }
  0x6f   : > { %3858 = vmatpush3.bf16.msra.mxu0 %v4028_v3  ;;  %3911 = vmatpush3.bf16.msra.mxu1 %v4028_v3  ;;  %v351_v49 = vld [vmem:[%s5017_s8 + $0xc0] sm:$0xff]  ;;  %v352_v50 = vld [vmem:[%s5017_s8 + $0xc8] sm:$0xff]  ;;  %v741_v51 = vmul.f32 %v340_v48, %v340_v48  ;;  %v402_v54 = vpack.c.bf16 %v350_v46, %v349_v45  ;;  %v341_v57 = vld [vmem:[%s5017_s8 + $0x70] sm:$0xff]  ;;  %v396_v3 = vpack.c.bf16 %v338_v42, %v337_v41 }
  0x70   : > { %3859 = vmatprep.subr.bf16.mxu0 %v4029_v4  ;;  %3904 = vmatprep.subr.bf16.mxu1 %v4029_v4  ;;  %v403_v56 = vpack.c.bf16 %v352_v50, %v351_v49  ;;  %v342_v58 = vld [vmem:[%s5017_s8 + $0x78] sm:$0xff]  ;;  %v742_v60 = vmul.f32 %v341_v57, %v341_v57  ;;  %v353_v61 = vld [vmem:[%s5017_s8 + $0xd0] sm:$0xff]  ;;  %v355_v63 = vld [vmem:[%s5017_s8 + $0xe0] sm:$0xff]  ;;  %v397_v5 = vpack.c.bf16 %v340_v48, %v339_v47 }
  0x71   : > { %770 = vadd.xlane.f32.xlu1 %v733_v21  ;;  %v743_v59 = vmul.f32 %v342_v58, %v342_v58  ;;  %v354_v62 = vld [vmem:[%s5017_s8 + $0xd8] sm:$0xff]  ;;  %v356_v0 = vld [vmem:[%s5017_s8 + $0xe8] sm:$0xff]  ;;  %v746_v10 = vmul.f32 %v345_v33, %v345_v33  ;;  %v357_v11 = vld [vmem:[%s5017_s8 + $0xf0] sm:$0xff]  ;;  %v749_v9 = vmul.f32 %v5167_v36, %v5167_v36  ;;  %v748_v7 = vmul.f32 %v5164_v35, %v5164_v35 }
  0x72   : > { %768 = vadd.xlane.f32.xlu0 %v732_v22  ;;  %v405_v6 = vpack.c.bf16 %v356_v0, %v355_v63  ;;  %v358_v12 = vld [vmem:[%s5017_s8 + $0xf8] sm:$0xff]  ;;  %v398_v13 = vpack.c.bf16 %v342_v58, %v341_v57  ;;  %v751_v15 = vmul.f32 %v350_v46, %v350_v46  ;;  %v750_v16 = vmul.f32 %v349_v45, %v349_v45  ;;  %v698_v25 = vld [vmem:[#allocation3 + $0x10] sm:$0xff] }
  0x73   : > { %3860 = vmatpush3.bf16.msra.mxu0 %v4029_v4  ;;  %3912 = vmatpush3.bf16.msra.mxu1 %v4029_v4  ;;  %v404_v4 = vpack.c.bf16 %v354_v62, %v353_v61  ;;  %v753_v17 = vmul.f32 %v352_v50, %v352_v50  ;;  %v755_v19 = vmul.f32 %v354_v62, %v354_v62  ;;  %v704_v50 = vld [vmem:[#allocation3 + $0x40] sm:$0xff] }
  0x74   : > { %3861 = vmatprep.subr.bf16.mxu0 %v4030_v14  ;;  %3905 = vmatprep.subr.bf16.mxu1 %v4030_v14  ;;  %v754_v20 = vmul.f32 %v353_v61, %v353_v61  ;;  %v757_v21 = vmul.f32 %v356_v0, %v356_v0  ;;  %v756_v22 = vmul.f32 %v355_v63, %v355_v63  ;;  %v709_v61 = vld [vmem:[#allocation3 + $0x68] sm:$0xff]  ;;  %v708_v62 = vld [vmem:[#allocation3 + $0x60] sm:$0xff] }
  0x75   : > { %774 = vadd.xlane.f32.xlu1 %v735_v26  ;;  %v758_v24 = vmul.f32 %v357_v11, %v357_v11  ;;  %v696_v26 = vld [vmem:[#allocation3] sm:$0xff] }
  0x76   : > { %772 = vadd.xlane.f32.xlu0 %v734_v27 }
  0x77   : > { %3862 = vmatpush3.bf16.msra.mxu0 %v4030_v14  ;;  %3913 = vmatpush3.bf16.msra.mxu1 %v4030_v14  ;;  %v406_v14 = vpack.c.bf16 %v358_v12, %v357_v11  ;;  %v713_v11 = vld [vmem:[#allocation3 + $0x88] sm:$0xff] }
  0x78   : > { %3863 = vmatprep.subr.bf16.mxu0 %v4031_v18  ;;  %3906 = vmatprep.subr.bf16.mxu1 %v4031_v18 }
  0x79   : > { %778 = vadd.xlane.f32.xlu1 %v737_v31  ;;  %v699_v31 = vld [vmem:[#allocation3 + $0x18] sm:$0xff] }
  0x7a   : > { %776 = vadd.xlane.f32.xlu0 %v736_v32  ;;  %v697_v32 = vld [vmem:[#allocation3 + $0x8] sm:$0xff] }
  0x7b   : > { %3864 = vmatpush3.bf16.msra.mxu0 %v4031_v18  ;;  %3914 = vmatpush3.bf16.msra.mxu1 %v4031_v18  ;;  %v752_v18 = vmul.f32 %v351_v49, %v351_v49  ;;  %v705_v49 = vld [vmem:[#allocation3 + $0x48] sm:$0xff] }
  0x7c   : > { %3865 = vmatprep.subr.bf16.mxu0 %v4032_v23  ;;  %3907 = vmatprep.subr.bf16.mxu1 %v4032_v23 }
  0x7d   : > { %782 = vadd.xlane.f32.xlu1 %v739_v43  ;;  %v703_v43 = vld [vmem:[#allocation3 + $0x38] sm:$0xff] }
  0x7e   : > { %780 = vadd.xlane.f32.xlu0 %v738_v44  ;;  %v702_v44 = vld [vmem:[#allocation3 + $0x30] sm:$0xff] }
  0x7f   : > { %3866 = vmatpush3.bf16.msra.mxu0 %v4032_v23  ;;  %3915 = vmatpush3.bf16.msra.mxu1 %v4032_v23  ;;  %v759_v23 = vmul.f32 %v358_v12, %v358_v12  ;;  %v712_v12 = vld [vmem:[#allocation3 + $0x80] sm:$0xff] }
  0x80   : > { %3867 = vmatprep.subr.bf16.mxu0 %v4033_v28  ;;  %3908 = vmatprep.subr.bf16.mxu1 %v4033_v28 }
  0x81   : > { %786 = vadd.xlane.f32.xlu1 %v741_v51 }
  0x82   : > { %784 = vadd.xlane.f32.xlu0 %v740_v52 }
  0x83   : > { %3868 = vmatpush3.bf16.msra.mxu0 %v4033_v28  ;;  %3916 = vmatpush3.bf16.msra.mxu1 %v4033_v28 }
  0x85   : > { %790 = vadd.xlane.f32.xlu1 %v743_v59 }
  0x86   : > { %3870 = vmatmul.mubr.bf16.vlgmr.msra.gmra.mxu0 %v392_v37  ;;  %3886 = vmatmul.mubr.bf16.vlgmr.msra.gmra.mxu1 %v400_v38  ;;  %v701_v37 = vld [vmem:[#allocation3 + $0x28] sm:$0xff]  ;;  %v700_v38 = vld [vmem:[#allocation3 + $0x20] sm:$0xff] }
  0x87   : > { %3873 = vmatprep.mubr.bf16.mxu0 %v393_v39  ;;  %3889 = vmatprep.mubr.bf16.mxu1 %v401_v40 }
  0x88   : > { %788 = vadd.xlane.f32.xlu0 %v742_v60 }
  0x89   : > { %794 = vadd.xlane.f32.xlu1 %v745_v1 }
  0x8c   : > { %792 = vadd.xlane.f32.xlu0 %v744_v2 }
  0x8d   : > { %798 = vadd.xlane.f32.xlu1 %v747_v8 }
  0x8e   : > { %3874 = vmatmul.mubr.bf16.gmra.mxu0 %v394_v53  ;;  %3890 = vmatmul.mubr.bf16.gmra.mxu1 %v402_v54 }
  0x8f   : > { %3877 = vmatprep.mubr.bf16.mxu0 %v395_v55  ;;  %3893 = vmatprep.mubr.bf16.mxu1 %v403_v56  ;;  %v707_v55 = vld [vmem:[#allocation3 + $0x58] sm:$0xff]  ;;  %v706_v56 = vld [vmem:[#allocation3 + $0x50] sm:$0xff] }
  0x90   : > { %796 = vadd.xlane.f32.xlu0 %v746_v10 }
  0x91   : > { %802 = vadd.xlane.f32.xlu1 %v749_v9 }
  0x94   : > { %800 = vadd.xlane.f32.xlu0 %v748_v7 }
  0x95   : > { %806 = vadd.xlane.f32.xlu1 %v751_v15  ;;  %v715_v15 = vld [vmem:[#allocation3 + $0x98] sm:$0xff] }
  0x96   : > { %3878 = vmatmul.mubr.bf16.gmra.mxu0 %v396_v3  ;;  %3894 = vmatmul.mubr.bf16.gmra.mxu1 %v404_v4  ;;  %v711_v3 = vld [vmem:[#allocation3 + $0x78] sm:$0xff]  ;;  %v710_v4 = vld [vmem:[#allocation3 + $0x70] sm:$0xff] }
  0x97   : > { %3881 = vmatprep.mubr.bf16.mxu0 %v397_v5  ;;  %3897 = vmatprep.mubr.bf16.mxu1 %v405_v6 }
  0x98   : > { %804 = vadd.xlane.f32.xlu0 %v750_v16  ;;  %v714_v16 = vld [vmem:[#allocation3 + $0x90] sm:$0xff] }
  0x99   : > { %810 = vadd.xlane.f32.xlu1 %v753_v17 }
  0x9c   : > { %808 = vadd.xlane.f32.xlu0 %v752_v18 }
  0x9d   : > { %814 = vadd.xlane.f32.xlu1 %v755_v19 }
  0x9e   : > { %3882 = vmatmul.mubr.bf16.gmra.mxu0 %v398_v13  ;;  %3898 = vmatmul.mubr.bf16.gmra.mxu1 %v406_v14 }
  0xa0   : > { %812 = vadd.xlane.f32.xlu0 %v754_v20 }
  0xa1   : > { %818 = vadd.xlane.f32.xlu1 %v757_v21  ;;  %v717_v21 = vld [vmem:[#allocation3 + $0xa8] sm:$0xff] }
  0xa4   : > { %816 = vadd.xlane.f32.xlu0 %v756_v22  ;;  %v716_v22 = vld [vmem:[#allocation3 + $0xa0] sm:$0xff] }
  0xa5   : > { %822 = vadd.xlane.f32.xlu1 %v759_v23 }
  0xa8   : > { %820 = vadd.xlane.f32.xlu0 %v758_v24 }
  0xf2   : > { %v765_v27 = vpop.xlane.xlu1 %764 }
  0xf3   : > { %v761_v28 = vpop.xlane.xlu0 %760  ;;  %v826_v29 = vadd.f32 %v765_v27, %v698_v25  ;;  %v719_v27 = vld [vmem:[#allocation3 + $0xb8] sm:$0xff] }
  0xf4   : > { %v824_v30 = vadd.f32 %v761_v28, %v696_v26  ;;  %v718_v28 = vld [vmem:[#allocation3 + $0xb0] sm:$0xff] }
  0xf5   : > { %859 = vst.msk [vmem:[#allocation3 + $0x10] sm:$0xff] %vm856_vm1, %v826_v29 }
  0xf6   : > { %857 = vst.msk [vmem:[#allocation3] sm:$0xff] %vm856_vm1, %v824_v30  ;;  %v767_v33 = vpop.xlane.xlu1 %766 }
  0xf7   : > { %v763_v34 = vpop.xlane.xlu0 %762  ;;  %v827_v35 = vadd.f32 %v767_v33, %v699_v31  ;;  %v721_v33 = vld [vmem:[#allocation3 + $0xc8] sm:$0xff] }
  0xf8   : > { %v825_v36 = vadd.f32 %v763_v34, %v697_v32  ;;  %v720_v34 = vld [vmem:[#allocation3 + $0xc0] sm:$0xff] }
  0xf9   : > { %860 = vst.msk [vmem:[#allocation3 + $0x18] sm:$0xff] %vm856_vm1, %v827_v35 }
  0xfa   : > { %858 = vst.msk [vmem:[#allocation3 + $0x8] sm:$0xff] %vm856_vm1, %v825_v36  ;;  %v771_v39 = vpop.xlane.xlu1 %770 }
  0xfb   : > { %v769_v40 = vpop.xlane.xlu0 %768  ;;  %v829_v41 = vadd.f32 %v771_v39, %v701_v37  ;;  %v723_v39 = vld [vmem:[#allocation3 + $0xd8] sm:$0xff] }
  0xfc   : > { %v828_v42 = vadd.f32 %v769_v40, %v700_v38  ;;  %v722_v40 = vld [vmem:[#allocation3 + $0xd0] sm:$0xff] }
  0xfd   : > { %862 = vst.msk [vmem:[#allocation3 + $0x28] sm:$0xff] %vm856_vm1, %v829_v41 }
  0xfe   : > { %861 = vst.msk [vmem:[#allocation3 + $0x20] sm:$0xff] %vm856_vm1, %v828_v42  ;;  %v775_v45 = vpop.xlane.xlu1 %774 }
  0xff   : > { %v773_v46 = vpop.xlane.xlu0 %772  ;;  %v831_v47 = vadd.f32 %v775_v45, %v703_v43  ;;  %v725_v45 = vld [vmem:[#allocation3 + $0xe8] sm:$0xff] }
 0x100   : > { %v830_v48 = vadd.f32 %v773_v46, %v702_v44  ;;  %v724_v46 = vld [vmem:[#allocation3 + $0xe0] sm:$0xff] }
 0x101   : > { %864 = vst.msk [vmem:[#allocation3 + $0x38] sm:$0xff] %vm856_vm1, %v831_v47 }
 0x102   : > { %863 = vst.msk [vmem:[#allocation3 + $0x30] sm:$0xff] %vm856_vm1, %v830_v48  ;;  %v779_v51 = vpop.xlane.xlu1 %778 }
 0x103   : > { %v777_v52 = vpop.xlane.xlu0 %776  ;;  %v833_v53 = vadd.f32 %v779_v51, %v705_v49  ;;  %v727_v51 = vld [vmem:[#allocation3 + $0xf8] sm:$0xff] }
 0x104   : > { %v832_v54 = vadd.f32 %v777_v52, %v704_v50  ;;  %v726_v52 = vld [vmem:[#allocation3 + $0xf0] sm:$0xff] }
 0x105   : > { %866 = vst.msk [vmem:[#allocation3 + $0x48] sm:$0xff] %vm856_vm1, %v833_v53 }
 0x106   : > { %865 = vst.msk [vmem:[#allocation3 + $0x40] sm:$0xff] %vm856_vm1, %v832_v54  ;;  %v783_v57 = vpop.xlane.xlu1 %782 }
 0x107   : > { %v781_v58 = vpop.xlane.xlu0 %780  ;;  %v835_v59 = vadd.f32 %v783_v57, %v707_v55  ;;  %v361_v57 = vld [vmem:[#allocation2 + $0xd8] sm:$0xff] }
 0x108   : > { %v834_v60 = vadd.f32 %v781_v58, %v706_v56  ;;  %v377_v58 = vld [vmem:[#allocation2 + $0x40] sm:$0xff] }
 0x109   : > { %868 = vst.msk [vmem:[#allocation3 + $0x58] sm:$0xff] %vm856_vm1, %v835_v59 }
 0x10a   : > { %867 = vst.msk [vmem:[#allocation3 + $0x50] sm:$0xff] %vm856_vm1, %v834_v60  ;;  %v787_v63 = vpop.xlane.xlu1 %786 }
 0x10b   : > { %v785_v0 = vpop.xlane.xlu0 %784  ;;  %v837_v1 = vadd.f32 %v787_v63, %v709_v61  ;;  %v375_v61 = vld [vmem:[#allocation2 + $0x38] sm:$0xff] }
 0x10c   : > { %v836_v2 = vadd.f32 %v785_v0, %v708_v62  ;;  %v359_v62 = vld [vmem:[#allocation2 + $0xb0] sm:$0xff] }
 0x10d   : > { %870 = vst.msk [vmem:[#allocation3 + $0x68] sm:$0xff] %vm856_vm1, %v837_v1 }
 0x10e   : > { %869 = vst.msk [vmem:[#allocation3 + $0x60] sm:$0xff] %vm856_vm1, %v836_v2  ;;  %v791_v5 = vpop.xlane.xlu1 %790 }
 0x10f   : > { %v839_v8 = vadd.f32 %v791_v5, %v711_v3  ;;  %v362_v3 = vld [vmem:[#allocation2 + $0x18] sm:$0xff] }
 0x111   : > { %v789_v6 = vpop.xlane.xlu0 %788  ;;  %872 = vst.msk [vmem:[#allocation3 + $0x78] sm:$0xff] %vm856_vm1, %v839_v8 }
 0x112   : > { %v838_v10 = vadd.f32 %v789_v6, %v710_v4  ;;  %v795_v9 = vpop.xlane.xlu1 %794  ;;  %v378_v4 = vld [vmem:[#allocation2 + $0xc8] sm:$0xff] }
 0x113   : > { %v841_v13 = vadd.f32 %v795_v9, %v713_v11  ;;  %v376_v11 = vld [vmem:[#allocation2 + $0x58] sm:$0xff] }
 0x114   : > { %871 = vst.msk [vmem:[#allocation3 + $0x70] sm:$0xff] %vm856_vm1, %v838_v10 }
 0x115   : > { %v793_v7 = vpop.xlane.xlu0 %792  ;;  %874 = vst.msk [vmem:[#allocation3 + $0x88] sm:$0xff] %vm856_vm1, %v841_v13 }
 0x116   : > { %v840_v14 = vadd.f32 %v793_v7, %v712_v12  ;;  %v799_v17 = vpop.xlane.xlu1 %798  ;;  %v360_v12 = vld [vmem:[#allocation2] sm:$0xff] }
 0x117   : > { %v843_v19 = vadd.f32 %v799_v17, %v715_v15  ;;  %v365_v15 = vld [vmem:[#allocation2 + $0x30] sm:$0xff] }
 0x118   : > { %873 = vst.msk [vmem:[#allocation3 + $0x80] sm:$0xff] %vm856_vm1, %v840_v14 }
 0x119   : > { %v797_v18 = vpop.xlane.xlu0 %796  ;;  %876 = vst.msk [vmem:[#allocation3 + $0x98] sm:$0xff] %vm856_vm1, %v843_v19 }
 0x11a   : > { %v842_v20 = vadd.f32 %v797_v18, %v714_v16  ;;  %v803_v23 = vpop.xlane.xlu1 %802  ;;  %v381_v16 = vld [vmem:[#allocation2 + $0x70] sm:$0xff] }
 0x11b   : > { %v845_v25 = vadd.f32 %v803_v23, %v717_v21  ;;  %v379_v21 = vld [vmem:[#allocation2 + $0xe0] sm:$0xff] }
 0x11c   : > { %875 = vst.msk [vmem:[#allocation3 + $0x90] sm:$0xff] %vm856_vm1, %v842_v20 }
 0x11d   : > { %v801_v24 = vpop.xlane.xlu0 %800  ;;  %878 = vst.msk [vmem:[#allocation3 + $0xa8] sm:$0xff] %vm856_vm1, %v845_v25 }
 0x11e   : > { %v844_v26 = vadd.f32 %v801_v24, %v716_v22  ;;  %v807_v29 = vpop.xlane.xlu1 %806  ;;  %v363_v22 = vld [vmem:[#allocation2 + $0x50] sm:$0xff] }
 0x11f   : > { %v847_v31 = vadd.f32 %v807_v29, %v719_v27  ;;  %v366_v27 = vld [vmem:[#allocation2 + $0x48] sm:$0xff] }
 0x120   : > { %877 = vst.msk [vmem:[#allocation3 + $0xa0] sm:$0xff] %vm856_vm1, %v844_v26 }
 0x121   : > { %v805_v30 = vpop.xlane.xlu0 %804  ;;  %880 = vst.msk [vmem:[#allocation3 + $0xb8] sm:$0xff] %vm856_vm1, %v847_v31 }
 0x122   : > { %v846_v32 = vadd.f32 %v805_v30, %v718_v28  ;;  %v811_v35 = vpop.xlane.xlu1 %810  ;;  %v382_v28 = vld [vmem:[#allocation2 + $0xc0] sm:$0xff] }
 0x123   : > { %v849_v37 = vadd.f32 %v811_v35, %v721_v33  ;;  %v380_v33 = vld [vmem:[#allocation2 + $0x90] sm:$0xff] }
 0x124   : > { %879 = vst.msk [vmem:[#allocation3 + $0xb0] sm:$0xff] %vm856_vm1, %v846_v32 }
 0x125   : > { %v809_v36 = vpop.xlane.xlu0 %808  ;;  %882 = vst.msk [vmem:[#allocation3 + $0xc8] sm:$0xff] %vm856_vm1, %v849_v37 }
 0x126   : > { %v848_v38 = vadd.f32 %v809_v36, %v720_v34  ;;  %v815_v41 = vpop.xlane.xlu1 %814  ;;  %v364_v34 = vld [vmem:[#allocation2 + $0x68] sm:$0xff] }
 0x127   : > { %v851_v43 = vadd.f32 %v815_v41, %v723_v39  ;;  %v369_v39 = vld [vmem:[#allocation2 + $0xe8] sm:$0xff] }
 0x128   : > { %881 = vst.msk [vmem:[#allocation3 + $0xc0] sm:$0xff] %vm856_vm1, %v848_v38 }
 0x129   : > { %v813_v42 = vpop.xlane.xlu0 %812  ;;  %884 = vst.msk [vmem:[#allocation3 + $0xd8] sm:$0xff] %vm856_vm1, %v851_v43 }
 0x12a   : > { %v850_v44 = vadd.f32 %v813_v42, %v722_v40  ;;  %v819_v47 = vpop.xlane.xlu1 %818  ;;  %v385_v40 = vld [vmem:[#allocation2 + $0x10] sm:$0xff] }
 0x12b   : > { %v853_v49 = vadd.f32 %v819_v47, %v725_v45  ;;  %v383_v45 = vld [vmem:[#allocation2 + $0xa8] sm:$0xff] }
 0x12c   : > { %883 = vst.msk [vmem:[#allocation3 + $0xd0] sm:$0xff] %vm856_vm1, %v850_v44 }
 0x12d   : > { %v817_v48 = vpop.xlane.xlu0 %816  ;;  %886 = vst.msk [vmem:[#allocation3 + $0xe8] sm:$0xff] %vm856_vm1, %v853_v49 }
 0x12e   : > { %v852_v50 = vadd.f32 %v817_v48, %v724_v46  ;;  %v823_v53 = vpop.xlane.xlu1 %822  ;;  %v367_v46 = vld [vmem:[#allocation2 + $0x80] sm:$0xff] }
 0x12f   : > { %v855_v55 = vadd.f32 %v823_v53, %v727_v51  ;;  %v370_v51 = vld [vmem:[#allocation2 + $0xb8] sm:$0xff] }
 0x130   : > { %885 = vst.msk [vmem:[#allocation3 + $0xe0] sm:$0xff] %vm856_vm1, %v852_v50 }
 0x131   : > { %v821_v54 = vpop.xlane.xlu0 %820  ;;  %888 = vst.msk [vmem:[#allocation3 + $0xf8] sm:$0xff] %vm856_vm1, %v855_v55 }
 0x132   : > { %v854_v56 = vadd.f32 %v821_v54, %v726_v52  ;;  %v386_v52 = vld [vmem:[#allocation2 + $0x28] sm:$0xff] }
 0x134   : > { %887 = vst.msk [vmem:[#allocation3 + $0xf0] sm:$0xff] %vm856_vm1, %v854_v56 }
 0x146   : > { %v3871_v59 = vpop.f32.mrf.mxu0  ;;  %v3887_v60 = vpop.f32.mrf.mxu1 }
 0x147   : > { %v634_v63 = vadd.f32 %v3871_v59, %v361_v57  ;;  %v650_v0 = vadd.f32 %v3887_v60, %v377_v58  ;;  %v384_v57 = vld [vmem:[#allocation2 + $0xd0] sm:$0xff]  ;;  %v368_v58 = vld [vmem:[#allocation2 + $0x88] sm:$0xff] }
 0x148   : > { %v569_v1 = vpop.f32.mrf.mxu1  ;;  %v505_v2 = vpop.f32.mrf.mxu0 }
 0x149   : > { %666 = vst [vmem:[#allocation2 + $0xd8] sm:$0xff] %v634_v63  ;;  %682 = vst [vmem:[#allocation2 + $0x40] sm:$0xff] %v650_v0  ;;  %v648_v5 = vadd.f32 %v569_v1, %v375_v61  ;;  %v632_v6 = vadd.f32 %v505_v2, %v359_v62  ;;  %v373_v63 = vld [vmem:[#allocation2 + $0x8] sm:$0xff]  ;;  %v389_v0 = vld [vmem:[#allocation2 + $0x20] sm:$0xff] }
 0x14a   : > { %v3872_v8 = vpop.f32.mrf.mxu0  ;;  %v3888_v10 = vpop.f32.mrf.mxu1 }
 0x14b   : > { %680 = vst [vmem:[#allocation2 + $0x38] sm:$0xff] %v648_v5  ;;  %664 = vst [vmem:[#allocation2 + $0xb0] sm:$0xff] %v632_v6  ;;  %v635_v9 = vadd.f32 %v3872_v8, %v362_v3  ;;  %v651_v7 = vadd.f32 %v3888_v10, %v378_v4  ;;  %v387_v5 = vld [vmem:[#allocation2 + $0xa0] sm:$0xff] }
 0x14c   : > { %v572_v13 = vpop.f32.mrf.mxu1  ;;  %v508_v14 = vpop.f32.mrf.mxu0  ;;  %v371_v6 = vld [vmem:[#allocation2 + $0x60] sm:$0xff] }
 0x14d   : > { %667 = vst [vmem:[#allocation2 + $0x18] sm:$0xff] %v635_v9  ;;  %683 = vst [vmem:[#allocation2 + $0xc8] sm:$0xff] %v651_v7  ;;  %v649_v17 = vadd.f32 %v572_v13, %v376_v11  ;;  %v633_v18 = vadd.f32 %v508_v14, %v360_v12  ;;  %v374_v9 = vld [vmem:[#allocation2 + $0x78] sm:$0xff] }
 0x14e   : > { %v3875_v19 = vpop.f32.mrf.mxu0  ;;  %v3891_v20 = vpop.f32.mrf.mxu1  ;;  %v390_v7 = vld [vmem:[#allocation2 + $0x98] sm:$0xff] }
 0x14f   : > { %681 = vst [vmem:[#allocation2 + $0x58] sm:$0xff] %v649_v17  ;;  %665 = vst [vmem:[#allocation2] sm:$0xff] %v633_v18  ;;  %v638_v23 = vadd.f32 %v3875_v19, %v365_v15  ;;  %v654_v24 = vadd.f32 %v3891_v20, %v381_v16  ;;  %v388_v17 = vld [vmem:[#allocation2 + $0xf8] sm:$0xff]  ;;  %v372_v18 = vld [vmem:[#allocation2 + $0xf0] sm:$0xff] }
 0x150   : > { %v585_v25 = vpop.f32.mrf.mxu1  ;;  %v521_v26 = vpop.f32.mrf.mxu0 }
 0x151   : > { %670 = vst [vmem:[#allocation2 + $0x30] sm:$0xff] %v638_v23  ;;  %686 = vst [vmem:[#allocation2 + $0x70] sm:$0xff] %v654_v24  ;;  %v652_v29 = vadd.f32 %v585_v25, %v379_v21  ;;  %v636_v30 = vadd.f32 %v521_v26, %v363_v22 }
 0x152   : > { %v3876_v31 = vpop.f32.mrf.mxu0  ;;  %v3892_v32 = vpop.f32.mrf.mxu1 }
 0x153   : > { %684 = vst [vmem:[#allocation2 + $0xe0] sm:$0xff] %v652_v29  ;;  %668 = vst [vmem:[#allocation2 + $0x50] sm:$0xff] %v636_v30  ;;  %v639_v35 = vadd.f32 %v3876_v31, %v366_v27  ;;  %v655_v36 = vadd.f32 %v3892_v32, %v382_v28 }
 0x154   : > { %v588_v37 = vpop.f32.mrf.mxu1  ;;  %v524_v38 = vpop.f32.mrf.mxu0 }
 0x155   : > { %671 = vst [vmem:[#allocation2 + $0x48] sm:$0xff] %v639_v35  ;;  %687 = vst [vmem:[#allocation2 + $0xc0] sm:$0xff] %v655_v36  ;;  %v653_v41 = vadd.f32 %v588_v37, %v380_v33  ;;  %v637_v42 = vadd.f32 %v524_v38, %v364_v34 }
 0x156   : > { %v3879_v43 = vpop.f32.mrf.mxu0  ;;  %v3895_v44 = vpop.f32.mrf.mxu1 }
 0x157   : > { %685 = vst [vmem:[#allocation2 + $0x90] sm:$0xff] %v653_v41  ;;  %669 = vst [vmem:[#allocation2 + $0x68] sm:$0xff] %v637_v42  ;;  %v642_v47 = vadd.f32 %v3879_v43, %v369_v39  ;;  %v658_v48 = vadd.f32 %v3895_v44, %v385_v40 }
 0x158   : > { %v601_v49 = vpop.f32.mrf.mxu1  ;;  %v537_v50 = vpop.f32.mrf.mxu0 }
 0x159   : > { %674 = vst [vmem:[#allocation2 + $0xe8] sm:$0xff] %v642_v47  ;;  %690 = vst [vmem:[#allocation2 + $0x10] sm:$0xff] %v658_v48  ;;  %v656_v53 = vadd.f32 %v601_v49, %v383_v45  ;;  %v640_v54 = vadd.f32 %v537_v50, %v367_v46 }
 0x15a   : > { %v3880_v55 = vpop.f32.mrf.mxu0  ;;  %v3896_v56 = vpop.f32.mrf.mxu1 }
 0x15b   : > { %688 = vst [vmem:[#allocation2 + $0xa8] sm:$0xff] %v656_v53  ;;  %672 = vst [vmem:[#allocation2 + $0x80] sm:$0xff] %v640_v54  ;;  %v643_v59 = vadd.f32 %v3880_v55, %v370_v51  ;;  %v659_v60 = vadd.f32 %v3896_v56, %v386_v52 }
 0x15c   : > { %v604_v61 = vpop.f32.mrf.mxu1  ;;  %v540_v62 = vpop.f32.mrf.mxu0 }
 0x15d   : > { %675 = vst [vmem:[#allocation2 + $0xb8] sm:$0xff] %v643_v59  ;;  %691 = vst [vmem:[#allocation2 + $0x28] sm:$0xff] %v659_v60  ;;  %v657_v1 = vadd.f32 %v604_v61, %v384_v57  ;;  %v641_v2 = vadd.f32 %v540_v62, %v368_v58 }
 0x15e   : > { %v3883_v3 = vpop.f32.mrf.mxu0  ;;  %v3899_v4 = vpop.f32.mrf.mxu1 }
 0x15f   : > { %689 = vst [vmem:[#allocation2 + $0xd0] sm:$0xff] %v657_v1  ;;  %673 = vst [vmem:[#allocation2 + $0x88] sm:$0xff] %v641_v2  ;;  %v646_v8 = vadd.f32 %v3883_v3, %v373_v63  ;;  %v662_v10 = vadd.f32 %v3899_v4, %v389_v0 }
 0x160   : > { %v617_v11 = vpop.f32.mrf.mxu1  ;;  %v553_v12 = vpop.f32.mrf.mxu0 }
 0x161   : > { %678 = vst [vmem:[#allocation2 + $0x8] sm:$0xff] %v646_v8  ;;  %694 = vst [vmem:[#allocation2 + $0x20] sm:$0xff] %v662_v10  ;;  %v660_v13 = vadd.f32 %v617_v11, %v387_v5  ;;  %v644_v14 = vadd.f32 %v553_v12, %v371_v6 }
 0x162   : > { %v3884_v15 = vpop.f32.mrf.mxu0  ;;  %v3900_v16 = vpop.f32.mrf.mxu1 }
 0x163   : > { %692 = vst [vmem:[#allocation2 + $0xa0] sm:$0xff] %v660_v13  ;;  %676 = vst [vmem:[#allocation2 + $0x60] sm:$0xff] %v644_v14  ;;  %v647_v19 = vadd.f32 %v3884_v15, %v374_v9  ;;  %v663_v20 = vadd.f32 %v3900_v16, %v390_v7  ;;  %892 = sbr.rel (%p3788_p7) target bundleno = 1406 (0x57e), region = 48 }
 0x164   : > { %v620_v21 = vpop.f32.mrf.mxu1  ;;  %v556_v22 = vpop.f32.mrf.mxu0 }
 0x165   : > { %679 = vst [vmem:[#allocation2 + $0x78] sm:$0xff] %v647_v19  ;;  %695 = vst [vmem:[#allocation2 + $0x98] sm:$0xff] %v663_v20  ;;  %v661_v23 = vadd.f32 %v620_v21, %v388_v17  ;;  %v645_v24 = vadd.f32 %v556_v22, %v372_v18 }
 0x167   : > { %693 = vst [vmem:[#allocation2 + $0xf8] sm:$0xff] %v661_v23  ;;  %677 = vst [vmem:[#allocation2 + $0xf0] sm:$0xff] %v645_v24 }
 0x168   : > { %v895_v25 = vld [vmem:[#allocation2 + $0xd8] sm:$0xff]  ;;  %v893_v26 = vld [vmem:[#allocation2 + $0xb0] sm:$0xff]  ;;  %v894_v30 = vld [vmem:[#allocation2] sm:$0xff]  ;;  %s2302_s30 = sld [smem:[#allocation4]] }
 0x169   : > { %v896_v27 = vld [vmem:[#allocation2 + $0x18] sm:$0xff]  ;;  %v1215_v28 = vmul.f32 %v895_v25, %v895_v25  ;;  %v1213_v29 = vmul.f32 %v893_v26, %v893_v26  ;;  %v1214_v32 = vmul.f32 %v894_v30, %v894_v30  ;;  %v898_v33 = vld [vmem:[#allocation2 + $0x68] sm:$0xff]  ;;  %v897_v34 = vld [vmem:[#allocation2 + $0x50] sm:$0xff] }
 0x16a   : > { %v1216_v31 = vmul.f32 %v896_v27, %v896_v27  ;;  %v1218_v35 = vmul.f32 %v898_v33, %v898_v33  ;;  %v1217_v36 = vmul.f32 %v897_v34, %v897_v34  ;;  %v900_v37 = vld [vmem:[#allocation2 + $0x48] sm:$0xff]  ;;  %v899_v38 = vld [vmem:[#allocation2 + $0x30] sm:$0xff]  ;;  %v5229_v41 = vld [vmem:[#allocation3] sm:$0xff] }
 0x16b   : > { %1249 = vadd.xlane.f32.xlu1 %v1215_v28  ;;  %1245 = vadd.xlane.f32.xlu0 %v1213_v29  ;;  %v1220_v39 = vmul.f32 %v900_v37, %v900_v37  ;;  %v1219_v40 = vmul.f32 %v899_v38, %v899_v38  ;;  %v902_v42 = vld [vmem:[#allocation2 + $0x88] sm:$0xff]  ;;  %v901_v43 = vld [vmem:[#allocation2 + $0x80] sm:$0xff]  ;;  %v5233_v45 = vld [vmem:[#allocation3 + $0x10] sm:$0xff]  ;;  %4036 = vrsqrt.f32 %v5229_v41  ;;  %vm959_vm2 = vcmp.eq.f32.partialorder %v5229_v41, inf }
 0x16c   : > { %v5231_v44 = vld [vmem:[#allocation3 + $0x8] sm:$0xff]  ;;  %v1222_v46 = vmul.f32 %v902_v42, %v902_v42  ;;  %v1221_v47 = vmul.f32 %v901_v43, %v901_v43  ;;  %v904_v48 = vld [vmem:[#allocation2 + $0xb8] sm:$0xff]  ;;  %v905_v54 = vld [vmem:[#allocation2 + $0x60] sm:$0xff]  ;;  %v962_v14 = vand.u32 2147483648, %v5229_v41  ;;  %vm973_vm4 = vcmp.eq.f32.partialorder %v5233_v45, inf }
 0x16d   : > { %4038 = vrsqrt.f32 %v5231_v44  ;;  %v903_v49 = vld [vmem:[#allocation2 + $0xe8] sm:$0xff]  ;;  %v5238_v50 = vld [vmem:[#allocation3 + $0x18] sm:$0xff]  ;;  %v1224_v51 = vmul.f32 %v904_v48, %v904_v48  ;;  %v5241_v55 = vld [vmem:[#allocation3 + $0x20] sm:$0xff]  ;;  %v1225_v57 = vmul.f32 %v905_v54, %v905_v54  ;;  %vm966_vm3 = vcmp.eq.f32.partialorder %v5231_v44, inf }
 0x16e   : > { %4040 = vrsqrt.f32 %v5233_v45  ;;  %v1223_v52 = vmul.f32 %v903_v49, %v903_v49  ;;  %v906_v53 = vld [vmem:[#allocation2 + $0xf0] sm:$0xff]  ;;  %v908_v58 = vld [vmem:[#allocation2 + $0x78] sm:$0xff]  ;;  %v907_v59 = vld [vmem:[#allocation2 + $0x8] sm:$0xff]  ;;  %vm961_vm5 = vcmp.eq.f32.partialorder %v5229_v41, 0.0  ;;  %vm968_vm6 = vcmp.eq.f32.partialorder %v5231_v44, 0.0 }
 0x16f   : > { %1251 = vadd.xlane.f32.xlu1 %v1216_v31  ;;  %1247 = vadd.xlane.f32.xlu0 %v1214_v32  ;;  %4042 = vrsqrt.f32 %v5238_v50  ;;  %v1226_v56 = vmul.f32 %v906_v53, %v906_v53  ;;  %v5243_v60 = vld [vmem:[#allocation3 + $0x48] sm:$0xff]  ;;  %v1228_v63 = vmul.f32 %v908_v58, %v908_v58  ;;  %v1227_v0 = vmul.f32 %v907_v59, %v907_v59  ;;  %v910_v2 = vld [vmem:[#allocation2 + $0x58] sm:$0xff]  ;;  %v5251_v6 = vld [vmem:[#allocation3 + $0x30] sm:$0xff] }
 0x170   : > { %4044 = vrsqrt.f32 %v5241_v55  ;;  %v5246_v61 = vld [vmem:[#allocation3 + $0x28] sm:$0xff]  ;;  %v909_v3 = vld [vmem:[#allocation2 + $0x38] sm:$0xff]  ;;  %v1230_v8 = vmul.f32 %v910_v2, %v910_v2  ;;  %v911_v12 = vld [vmem:[#allocation2 + $0x40] sm:$0xff]  ;;  %v969_v20 = vand.u32 2147483648, %v5231_v44  ;;  %v976_v21 = vand.u32 2147483648, %v5233_v45 }
 0x171   : > { %4046 = vrsqrt.f32 %v5243_v60  ;;  %v1229_v10 = vmul.f32 %v909_v3, %v909_v3  ;;  %v912_v11 = vld [vmem:[#allocation2 + $0xc8] sm:$0xff]  ;;  %v1231_v16 = vmul.f32 %v911_v12, %v911_v12  ;;  %v914_v18 = vld [vmem:[#allocation2 + $0x90] sm:$0xff]  ;;  %v913_v19 = vld [vmem:[#allocation2 + $0xe0] sm:$0xff]  ;;  %vm975_vm7 = vcmp.eq.f32.partialorder %v5233_v45, 0.0 }
 0x172   : > { %4048 = vrsqrt.f32 %v5246_v61  ;;  %v1232_v15 = vmul.f32 %v912_v11, %v912_v11  ;;  %vm980_vm8 = vcmp.eq.f32.partialorder %v5238_v50, inf  ;;  %v1234_v27 = vmul.f32 %v914_v18, %v914_v18  ;;  %v916_v29 = vld [vmem:[#allocation2 + $0xc0] sm:$0xff]  ;;  %v915_v31 = vld [vmem:[#allocation2 + $0x70] sm:$0xff]  ;;  %v917_v42 = vld [vmem:[#allocation2 + $0xa8] sm:$0xff] }
 0x173   : > { %1255 = vadd.xlane.f32.xlu1 %v1218_v35  ;;  %1253 = vadd.xlane.f32.xlu0 %v1217_v36  ;;  %4050 = vrsqrt.f32 %v5251_v6  ;;  %v1233_v28 = vmul.f32 %v913_v19, %v913_v19  ;;  %v983_v30 = vand.u32 2147483648, %v5238_v50  ;;  %vm982_vm9 = vcmp.eq.f32.partialorder %v5238_v50, 0.0  ;;  %v918_v36 = vld [vmem:[#allocation2 + $0xd0] sm:$0xff]  ;;  %v920_v2 = vld [vmem:[#allocation2 + $0x28] sm:$0xff]  ;;  %v5345_v19 = vld [vmem:[#allocation3 + $0x78] sm:$0xff] }
 0x174   : > { %vm987_vm10 = vcmp.eq.f32.partialorder %v5241_v55, inf  ;;  %vm989_vm11 = vcmp.eq.f32.partialorder %v5241_v55, 0.0  ;;  %v990_v49 = vand.u32 2147483648, %v5241_v55  ;;  %vm1022_vm12 = vcmp.eq.f32.partialorder %v5243_v60, inf  ;;  %v919_v3 = vld [vmem:[#allocation2 + $0x10] sm:$0xff] }
 0x175   : > { %v1237_v54 = vmul.f32 %v917_v42, %v917_v42  ;;  %vm994_vm13 = vcmp.eq.f32.partialorder %v5246_v61, inf  ;;  %vm1024_vm14 = vcmp.eq.f32.partialorder %v5243_v60, 0.0  ;;  %vm996_vm15 = vcmp.eq.f32.partialorder %v5246_v61, 0.0 }
 0x176   : > { %vm1001_vm0 = vcmp.eq.f32.partialorder %v5251_v6, inf  ;;  %v1240_v12 = vmul.f32 %v920_v2, %v920_v2  ;;  %vm1003_vm1 = vcmp.eq.f32.partialorder %v5251_v6, 0.0 }
 0x177   : > { %1259 = vadd.xlane.f32.xlu1 %v1220_v39  ;;  %1257 = vadd.xlane.f32.xlu0 %v1219_v40  ;;  %v1236_v40 = vmul.f32 %v916_v29, %v916_v29  ;;  %v4867_v29 = vmov 0  }
 0x178   : > { %v4037_v62 = vpop.eup %4036  ;;  %4034 = vset.pattern.permute.xlu0 %v4867_v29  ;;  %4035 = vset.pattern.permute.xlu1 %v4867_v29 }
 0x179   : > { %v958_v5 = vmul.f32 %v4037_v62, %v5229_v41  ;;  %v1025_v62 = vand.u32 2147483648, %v5243_v60 }
 0x17a   : > { %v4039_v1 = vpop.eup %4038 }
 0x17b   : > { %1263 = vadd.xlane.f32.xlu1 %v1222_v46  ;;  %1261 = vadd.xlane.f32.xlu0 %v1221_v47  ;;  %v4041_v4 = vpop.eup %4040  ;;  %v965_v7 = vmul.f32 %v4039_v1, %v5231_v44  ;;  %v960_v17 = vsel %vm959_vm2, %v5229_v41, %v958_v5  ;;  %v1235_v41 = vmul.f32 %v915_v31, %v915_v31  ;;  %v5288_v46 = vld [vmem:[#allocation3 + $0x58] sm:$0xff]  ;;  %v997_v1 = vand.u32 2147483648, %v5246_v61 }
 0x17c   : > { %v4043_v9 = vpop.eup %4042  ;;  %v972_v13 = vmul.f32 %v4041_v4, %v5233_v45  ;;  %v5270_v26 = vsel %vm961_vm5, %v962_v14, %v960_v17  ;;  %v1238_v47 = vmul.f32 %v918_v36, %v918_v36  ;;  %4052 = vrsqrt.f32 %v5288_v46  ;;  %v921_v14 = vld [vmem:[#allocation2 + $0xa0] sm:$0xff] }
 0x17d   : > { %v979_v22 = vmul.f32 %v4043_v9, %v5238_v50  ;;  %v967_v23 = vsel %vm966_vm3, %v5231_v44, %v965_v7  ;;  %v4045_v25 = vpop.eup %4044  ;;  %v1181_v37 = vmax.f32 %v5270_v26, 1e-07  ;;  %v1239_v9 = vmul.f32 %v919_v3, %v919_v3 }
 0x17e   : > { %v974_v24 = vsel %vm973_vm4, %v5233_v45, %v972_v13  ;;  %v5275_v32 = vsel %vm968_vm6, %v969_v20, %v967_v23  ;;  %v4047_v35 = vpop.eup %4046  ;;  %v986_v38 = vmul.f32 %v4045_v25, %v5241_v55  ;;  %v922_v13 = vld [vmem:[#allocation2 + $0xf8] sm:$0xff]  ;;  %v1241_v23 = vmul.f32 %v921_v14, %v921_v14 }
 0x17f   : > { %1267 = vadd.xlane.f32.xlu1 %v1224_v51  ;;  %1265 = vadd.xlane.f32.xlu0 %v1223_v52  ;;  %v5277_v33 = vsel %vm975_vm7, %v976_v21, %v974_v24  ;;  %v981_v34 = vsel %vm980_vm8, %v5238_v50, %v979_v22  ;;  %v4049_v39 = vpop.eup %4048  ;;  %v1182_v43 = vmax.f32 %v5275_v32, 1e-07  ;;  %v1021_v48 = vmul.f32 %v4047_v35, %v5243_v60  ;;  %v5293_v50 = vld [vmem:[#allocation3 + $0x68] sm:$0xff]  ;;  %v5352_v24 = vld [vmem:[#allocation3 + $0x38] sm:$0xff] }
 0x180   : > { %v1183_v44 = vmax.f32 %v5277_v33, 1e-07  ;;  %v5286_v45 = vsel %vm982_vm9, %v983_v30, %v981_v34  ;;  %v5297_v51 = vmin.f32 %v1181_v37, 0.999999  ;;  %v988_v52 = vsel %vm987_vm10, %v5241_v55, %v986_v38  ;;  %v924_v25 = vld [vmem:[#allocation2 + $0x98] sm:$0xff] }
 0x181   : > { %v993_v53 = vmul.f32 %v4049_v39, %v5246_v61  ;;  %v5309_v58 = vmin.f32 %v1182_v43, 0.999999  ;;  %4054 = vrsqrt.f32 %v5293_v50  ;;  %v1242_v22 = vmul.f32 %v922_v13, %v922_v13 }
 0x182   : > { %v5313_v59 = vmin.f32 %v1183_v44, 0.999999  ;;  %v1725_v4 = vsub.f32 1.0, %v5297_v51  ;;  %v1244_v38 = vmul.f32 %v924_v25, %v924_v25  ;;  %vm1036_vm2 = vcmp.eq.f32.partialorder %v5288_v46, inf }
 0x183   : > { %1271 = vadd.xlane.f32.xlu1 %v1226_v56  ;;  %1269 = vadd.xlane.f32.xlu0 %v1225_v57  ;;  %v1184_v56 = vmax.f32 %v5286_v45, 1e-07  ;;  %v4051_v57 = vpop.eup %4050  ;;  %v995_v5 = vsel %vm994_vm13, %v5246_v61, %v993_v53  ;;  %v1726_v55 = vsub.f32 1.0, %v5309_v58  ;;  %vm1050_vm3 = vcmp.eq.f32.partialorder %v5293_v50, inf }
 0x184   : > { %v1727_v61 = vsub.f32 1.0, %v5313_v59  ;;  %v5338_v7 = vsel %vm996_vm15, %v997_v1, %v995_v5  ;;  %4056 = vrcp.f32 %v1725_v4  ;;  %v1039_v53 = vand.u32 2147483648, %v5288_v46  ;;  %v5408_v4 = vld [vmem:[#allocation3 + $0x98] sm:$0xff] }
 0x185   : > { %4058 = vrcp.f32 %v1726_v55  ;;  %v1186_v21 = vmax.f32 %v5338_v7, 1e-07  ;;  %vm1038_vm4 = vcmp.eq.f32.partialorder %v5288_v46, 0.0  ;;  %vm1052_vm5 = vcmp.eq.f32.partialorder %v5293_v50, 0.0  ;;  %v5509_v7 = vld [vmem:[#allocation3 + $0x60] sm:$0xff] }
 0x186   : > { %4060 = vrcp.f32 %v1727_v61  ;;  %v1695_v3 = vadd.f32 1.0, %v5313_v59  ;;  %vm1064_vm6 = vcmp.eq.f32.partialorder %v5345_v19, inf  ;;  %vm1008_vm7 = vcmp.eq.f32.partialorder %v5352_v24, inf }
 0x187   : > { %1275 = vadd.xlane.f32.xlu1 %v1228_v63  ;;  %1273 = vadd.xlane.f32.xlu0 %v1227_v0  ;;  %v1023_v63 = vsel %vm1022_vm12, %v5243_v60, %v1021_v48  ;;  %v5321_v0 = vsel %vm989_vm11, %v990_v49, %v988_v52  ;;  %v1000_v60 = vmul.f32 %v4051_v57, %v5251_v6  ;;  %4062 = vrsqrt.f32 %v5345_v19 }
 0x188   : > { %v1185_v11 = vmax.f32 %v5321_v0, 1e-07  ;;  %v5366_v35 = vmin.f32 %v1186_v21, 0.999999  ;;  %v1693_v52 = vadd.f32 1.0, %v5297_v51  ;;  %vm1066_vm8 = vcmp.eq.f32.partialorder %v5345_v19, 0.0 }
 0x189   : > { %v1002_v18 = vsel %vm1001_vm0, %v5251_v6, %v1000_v60  ;;  %v4053_v31 = vpop.eup %4052  ;;  %vm1010_vm10 = vcmp.eq.f32.partialorder %v5352_v24, 0.0  ;;  %vm1092_vm15 = vcmp.eq.f32.partialorder %v5408_v4, inf }
 0x18a   : > { %v5349_v20 = vmin.f32 %v1185_v11, 0.999999  ;;  %v1035_v42 = vmul.f32 %v4053_v31, %v5288_v46 }
 0x18b   : > { %1279 = vadd.xlane.f32.xlu1 %v1230_v8  ;;  %1277 = vadd.xlane.f32.xlu0 %v1229_v10  ;;  %v5329_v8 = vmin.f32 %v1184_v56, 0.999999  ;;  %v5333_v10 = vsel %vm1024_vm14, %v1025_v62, %v1023_v63  ;;  %v1694_v62 = vadd.f32 1.0, %v5309_v58  ;;  %v5397_v63 = vld [vmem:[#allocation3 + $0x50] sm:$0xff] }
 0x18c   : > { %v1190_v17 = vmax.f32 %v5333_v10, 1e-07  ;;  %v1729_v34 = vsub.f32 1.0, %v5349_v20  ;;  %v1037_v26 = vsel %vm1036_vm2, %v5288_v46, %v1035_v42  ;;  %vm1029_vm14 = vcmp.eq.f32.partialorder %v5397_v63, inf }
 0x18d   : > { %v5401_v46 = vsel %vm1038_vm4, %v1039_v53, %v1037_v26  ;;  %v1696_v33 = vadd.f32 1.0, %v5329_v8  ;;  %vm1031_vm0 = vcmp.eq.f32.partialorder %v5397_v63, 0.0  ;;  %vm1043_vm4 = vcmp.eq.f32.partialorder %v5509_v7, inf }
 0x18e   : > { %v5361_v30 = vmin.f32 %v1190_v17, 0.999999  ;;  %v4055_v36 = vpop.eup %4054 }
 0x18f   : > { %1283 = vadd.xlane.f32.xlu1 %v1232_v15  ;;  %1281 = vadd.xlane.f32.xlu0 %v1231_v16  ;;  %v1004_v15 = vand.u32 2147483648, %v5251_v6  ;;  %v1728_v16 = vsub.f32 1.0, %v5329_v8  ;;  %v5357_v6 = vld [vmem:[#allocation3 + $0x40] sm:$0xff]  ;;  %v1049_v48 = vmul.f32 %v4055_v36, %v5293_v50 }
 0x190   : > { %vm1015_vm9 = vcmp.eq.f32.partialorder %v5357_v6, inf  ;;  %v1702_v25 = vadd.f32 1.0, %v5361_v30  ;;  %vm1017_vm11 = vcmp.eq.f32.partialorder %v5357_v6, 0.0 }
 0x191   : > { %4064 = vrcp.f32 %v1728_v16  ;;  %v4057_v57 = vpop.eup %4056  ;;  %v1051_v51 = vsel %vm1050_vm3, %v5293_v50, %v1049_v48 }
 0x192   : > { %4066 = vrsqrt.f32 %v5352_v24  ;;  %v4059_v32 = vpop.eup %4058  ;;  %v1758_v58 = vmul.f32 %v4057_v57, %v1693_v52 }
 0x193   : > { %1287 = vadd.xlane.f32.xlu1 %v1234_v27  ;;  %1285 = vadd.xlane.f32.xlu0 %v1233_v28  ;;  %v923_v27 = vld [vmem:[#allocation2 + $0x20] sm:$0xff]  ;;  %v5354_v28 = vsel %vm1003_vm1, %v1004_v15, %v1002_v18  ;;  %4068 = vrsqrt.f32 %v5357_v6  ;;  %v4061_v1 = vpop.eup %4060  ;;  %v1760_v60 = vmul.f32 %v4059_v32, %v1694_v62  ;;  %v1067_v15 = vand.u32 2147483648, %v5345_v19 }
 0x194   : > { %v1243_v39 = vmul.f32 %v923_v27, %v923_v27  ;;  %4070 = vrcp.f32 %v1729_v34  ;;  %v4063_v2 = vpop.eup %4062  ;;  %v1011_v27 = vand.u32 2147483648, %v5352_v24  ;;  %vm1094_vm1 = vcmp.eq.f32.partialorder %v5408_v4, 0.0 }
 0x195   : > { %4072 = vrcp.f32 %v1181_v37  ;;  %v1053_v37 = vand.u32 2147483648, %v5293_v50  ;;  %v1063_v45 = vmul.f32 %v4063_v2, %v5345_v19 }
 0x196   : > { %4074 = vrcp.f32 %v1182_v43 }
 0x197   : > { %1291 = vadd.xlane.f32.xlu1 %v1236_v40  ;;  %1289 = vadd.xlane.f32.xlu0 %v1235_v41  ;;  %v1187_v40 = vmax.f32 %v5354_v28, 1e-07  ;;  %v1734_v41 = vsub.f32 1.0, %v5361_v30  ;;  %v5406_v50 = vsel %vm1052_vm5, %v1053_v37, %v1051_v51  ;;  %v5466_v37 = vld [vmem:[#allocation3 + $0xa8] sm:$0xff]  ;;  %vm1045_vm5 = vcmp.eq.f32.partialorder %v5509_v7, 0.0 }
 0x198   : > { %v1194_v59 = vmax.f32 %v5406_v50, 1e-07  ;;  %vm1106_vm2 = vcmp.eq.f32.partialorder %v5466_v37, inf  ;;  %vm1108_vm3 = vcmp.eq.f32.partialorder %v5466_v37, 0.0 }
 0x199   : > { %v5381_v49 = vmin.f32 %v1187_v40, 0.999999  ;;  %4076 = vrcp.f32 %v1734_v41 }
 0x19b   : > { %1295 = vadd.xlane.f32.xlu1 %v1238_v47  ;;  %1293 = vadd.xlane.f32.xlu0 %v1237_v54  ;;  %v1730_v47 = vsub.f32 1.0, %v5366_v35  ;;  %v5387_v54 = vld [vmem:[#allocation3 + $0x88] sm:$0xff]  ;;  %v1731_v43 = vsub.f32 1.0, %v5381_v49  ;;  %v1699_v51 = vadd.f32 1.0, %v5381_v49 }
 0x19c   : > { %vm1078_vm12 = vcmp.eq.f32.partialorder %v5387_v54, inf  ;;  %vm1080_vm13 = vcmp.eq.f32.partialorder %v5387_v54, 0.0 }
 0x19d   : > { %4078 = vrcp.f32 %v1730_v47 }
 0x19e   : > { %4080 = vrsqrt.f32 %v5387_v54  ;;  %v4065_v5 = vpop.eup %4064 }
 0x19f   : > { %1299 = vadd.xlane.f32.xlu1 %v1240_v12  ;;  %1297 = vadd.xlane.f32.xlu0 %v1239_v9  ;;  %4082 = vrcp.f32 %v1183_v44  ;;  %v4067_v55 = vpop.eup %4066  ;;  %v1192_v44 = vmax.f32 %v5401_v46, 1e-07  ;;  %v1697_v9 = vadd.f32 1.0, %v5349_v20  ;;  %v1764_v13 = vmul.f32 %v4065_v5, %v1696_v33  ;;  %v5543_v46 = vld [vmem:[#allocation3 + $0xc8] sm:$0xff] }
 0x1a0   : > { %4084 = vrcp.f32 %v1184_v56  ;;  %v4069_v12 = vpop.eup %4068  ;;  %v1762_v56 = vmul.f32 %v4061_v1, %v1695_v3  ;;  %v1007_v61 = vmul.f32 %v4067_v55, %v5352_v24  ;;  %v1065_v20 = vsel %vm1064_vm6, %v5345_v19, %v1063_v45 }
 0x1a1   : > { %4086 = vrsqrt.f32 %v5397_v63  ;;  %v4071_v8 = vpop.eup %4070  ;;  %v5422_v14 = vmin.f32 %v1192_v44, 0.999999  ;;  %v1014_v16 = vmul.f32 %v4069_v12, %v5357_v6  ;;  %v1018_v19 = vand.u32 2147483648, %v5357_v6 }
 0x1a2   : > { %4088 = vrcp.f32 %v1731_v43  ;;  %v5426_v18 = vpop.eup %4072  ;;  %v1766_v31 = vmul.f32 %v4071_v8, %v1697_v9  ;;  %v1009_v34 = vsel %vm1008_vm7, %v5352_v24, %v1007_v61  ;;  %v5447_v30 = vsel %vm1066_vm8, %v1067_v15, %v1065_v20  ;;  %v5533_v20 = vld [vmem:[#allocation3 + $0xb8] sm:$0xff] }
 0x1a3   : > { %1303 = vadd.xlane.f32.xlu1 %v1242_v22  ;;  %1301 = vadd.xlane.f32.xlu0 %v1241_v23  ;;  %4090 = vrsqrt.f32 %v5408_v4  ;;  %v5430_v22 = vmin.f32 %v1194_v59, 0.999999  ;;  %v5435_v23 = vpop.eup %4074  ;;  %v1016_v41 = vsel %vm1015_vm9, %v5357_v6, %v1014_v16  ;;  %v5457_v52 = vsel %vm1010_vm10, %v1011_v27, %v1009_v34 }
 0x1a4   : > { %4092 = vlog2.f32 %v1758_v58  ;;  %v1196_v57 = vmax.f32 %v5447_v30, 1e-07  ;;  %v5464_v26 = vsel %vm1017_vm11, %v1018_v19, %v1016_v41  ;;  %v1188_v32 = vmax.f32 %v5457_v52, 1e-07 }
 0x1a5   : > { %4094 = vlog2.f32 %v1760_v60  ;;  %v1738_v47 = vsub.f32 1.0, %v5430_v22  ;;  %v1189_v6 = vmax.f32 %v5464_v26, 1e-07  ;;  %v1081_v58 = vand.u32 2147483648, %v5387_v54 }
 0x1a6   : > { %4096 = vlog2.f32 %v1762_v56  ;;  %v4077_v29 = vpop.eup %4076  ;;  %v5478_v2 = vmin.f32 %v1196_v57, 0.999999  ;;  %v5491_v55 = vmin.f32 %v1188_v32, 0.999999  ;;  %v1706_v27 = vadd.f32 1.0, %v5430_v22 }
 0x1a7   : > { %1307 = vadd.xlane.f32.xlu1 %v1244_v38  ;;  %1305 = vadd.xlane.f32.xlu0 %v1243_v39  ;;  %v1736_v38 = vsub.f32 1.0, %v5422_v14  ;;  %v1698_v39 = vadd.f32 1.0, %v5366_v35  ;;  %4098 = vlog2.f32 %v1764_v13  ;;  %v1776_v35 = vmul.f32 %v4077_v29, %v1702_v25 }
 0x1a8   : > { %4100 = vrcp.f32 %v1190_v17  ;;  %v5498_v0 = vmin.f32 %v1189_v6, 0.999999  ;;  %v1740_v12 = vsub.f32 1.0, %v5478_v2  ;;  %v1732_v9 = vsub.f32 1.0, %v5491_v55 }
 0x1a9   : > { %4102 = vlog2.f32 %v1766_v31  ;;  %v5537_v31 = vld [vmem:[#allocation3 + $0x70] sm:$0xff]  ;;  %v1700_v50 = vadd.f32 1.0, %v5491_v55  ;;  %v1046_v26 = vand.u32 2147483648, %v5509_v7  ;;  %v5608_v55 = vld [vmem:[#allocation3 + $0xa0] sm:$0xff]  ;;  %vm1120_vm8 = vcmp.eq.f32.partialorder %v5533_v20, inf }
 0x1aa   : > { %v4079_v36 = vpop.eup %4078  ;;  %4104 = vrcp.f32 %v1736_v38  ;;  %v5550_v38 = vld [vmem:[#allocation3 + $0x80] sm:$0xff]  ;;  %vm1057_vm6 = vcmp.eq.f32.partialorder %v5537_v31, inf  ;;  %vm1059_vm7 = vcmp.eq.f32.partialorder %v5537_v31, 0.0  ;;  %vm1122_vm9 = vcmp.eq.f32.partialorder %v5533_v20, 0.0 }
 0x1ab   : > { %v4081_v42 = vpop.eup %4080  ;;  %v1768_v10 = vmul.f32 %v4079_v36, %v1698_v39  ;;  %4106 = vrcp.f32 %v1738_v47  ;;  %vm1134_vm10 = vcmp.eq.f32.partialorder %v5543_v46, inf  ;;  %vm1071_vm11 = vcmp.eq.f32.partialorder %v5550_v38, inf }
 0x1ac   : > { %v5451_v48 = vpop.eup %4082  ;;  %v1077_v17 = vmul.f32 %v4081_v42, %v5387_v54  ;;  %4108 = vrsqrt.f32 %v5466_v37 }
 0x1ad   : > { %v5459_v53 = vpop.eup %4084  ;;  %4110 = vlog2.f32 %v1776_v35 }
 0x1ae   : > { %v4087_v62 = vpop.eup %4086  ;;  %4112 = vrcp.f32 %v1185_v11  ;;  %v1079_v5 = vsel %vm1078_vm12, %v5387_v54, %v1077_v17  ;;  %v1032_v11 = vand.u32 2147483648, %v5397_v63  ;;  %vm1073_vm12 = vcmp.eq.f32.partialorder %v5550_v38, 0.0 }
 0x1af   : > { %v4089_v24 = vpop.eup %4088  ;;  %v1028_v49 = vmul.f32 %v4087_v62, %v5397_v63  ;;  %4114 = vlog2.f32 %v1768_v10  ;;  %v5505_v45 = vsel %vm1080_vm13, %v1081_v58, %v1079_v5  ;;  %vm1136_vm13 = vcmp.eq.f32.partialorder %v5543_v46, 0.0 }
 0x1b0   : > { %v4091_v43 = vpop.eup %4090  ;;  %v1770_v60 = vmul.f32 %v4089_v24, %v1699_v51  ;;  %4116 = vrcp.f32 %v1186_v21  ;;  %v1095_v21 = vand.u32 2147483648, %v5408_v4  ;;  %v1198_v13 = vmax.f32 %v5505_v45, 1e-07  ;;  %v5571_v24 = vld [vmem:[#allocation3 + $0xd8] sm:$0xff] }
 0x1b1   : > { %v5474_v1 = vpop.eup %4092  ;;  %v1091_v33 = vmul.f32 %v4091_v43, %v5408_v4  ;;  %v1030_v56 = vsel %vm1029_vm14, %v5397_v63, %v1028_v49  ;;  %4118 = vrcp.f32 %v1187_v40  ;;  %v1733_v63 = vsub.f32 1.0, %v5498_v0 }
 0x1b2   : > { %v5482_v3 = vpop.eup %4094  ;;  %4120 = vlog2.f32 %v1770_v60  ;;  %v5521_v15 = vsel %vm1031_vm0, %v1032_v11, %v1030_v56  ;;  %v5541_v19 = vmin.f32 %v1198_v13, 0.999999 }
 0x1b3   : > { %v5502_v54 = vpop.eup %4096  ;;  %v1093_v61 = vsel %vm1092_vm15, %v5408_v4, %v1091_v33  ;;  %4122 = vrsqrt.f32 %v5509_v7  ;;  %v1704_v4 = vadd.f32 1.0, %v5422_v14  ;;  %v1191_v29 = vmax.f32 %v5521_v15, 1e-07 }
 0x1b4   : > { %v5517_v8 = vpop.eup %4098  ;;  %4124 = vrcp.f32 %v1740_v12  ;;  %v5531_v16 = vsel %vm1094_vm1, %v1095_v21, %v1093_v61  ;;  %v1742_v35 = vsub.f32 1.0, %v5541_v19  ;;  %v5588_v12 = vld [vmem:[#allocation3 + $0x90] sm:$0xff]  ;;  %v1708_v21 = vadd.f32 1.0, %v5478_v2 }
 0x1b5   : > { %v5524_v28 = vpop.eup %4100  ;;  %4126 = vrcp.f32 %v1192_v44  ;;  %v1200_v14 = vmax.f32 %v5531_v16, 1e-07  ;;  %v1671_v42 = vmin.f32 %v1191_v29, 0.999999  ;;  %v1710_v15 = vadd.f32 1.0, %v5541_v19 }
 0x1b6   : > { %v5526_v40 = vpop.eup %4102  ;;  %4128 = vrcp.f32 %v1732_v9  ;;  %v5594_v9 = vld [vmem:[#allocation3 + $0xe8] sm:$0xff]  ;;  %vm1085_vm14 = vcmp.eq.f32.partialorder %v5588_v12, inf  ;;  %vm1148_vm15 = vcmp.eq.f32.partialorder %v5571_v24, inf  ;;  %vm1087_vm0 = vcmp.eq.f32.partialorder %v5588_v12, 0.0 }
 0x1b7   : > { %v4105_v25 = vpop.eup %4104  ;;  %4130 = vrcp.f32 %v1733_v63  ;;  %v5567_v17 = vmin.f32 %v1200_v14, 0.999999  ;;  %v1735_v52 = vsub.f32 1.0, %v1671_v42  ;;  %v5603_v2 = vadd.f32 1.0, %v1671_v42 }
 0x1b8   : > { %v4107_v34 = vpop.eup %4106  ;;  %4132 = vrsqrt.f32 %v5533_v20  ;;  %v1780_v22 = vmul.f32 %v4105_v25, %v1704_v4  ;;  %vm1150_vm1 = vcmp.eq.f32.partialorder %v5571_v24, 0.0 }
 0x1b9   : > { %v4109_v44 = vpop.eup %4108  ;;  %4134 = vrsqrt.f32 %v5537_v31  ;;  %v1784_v41 = vmul.f32 %v4107_v34, %v1706_v27  ;;  %v1744_v5 = vsub.f32 1.0, %v5567_v17 }
 0x1ba   : > { %v5547_v36 = vpop.eup %4110  ;;  %4136 = vrsqrt.f32 %v5543_v46  ;;  %v1105_v62 = vmul.f32 %v4109_v44, %v5466_v37 }
 0x1bb   : > { %v5552_v39 = vpop.eup %4112  ;;  %4138 = vrcp.f32 %v1188_v32  ;;  %v1109_v32 = vand.u32 2147483648, %v5466_v37 }
 0x1bc   : > { %v5557_v47 = vpop.eup %4114  ;;  %4140 = vrsqrt.f32 %v5550_v38  ;;  %v1107_v58 = vsel %vm1106_vm2, %v5466_v37, %v1105_v62  ;;  %vm1162_vm2 = vcmp.eq.f32.partialorder %v5594_v9, inf }
 0x1bd   : > { %v5563_v10 = vpop.eup %4116  ;;  %4142 = vlog2.f32 %v1780_v22  ;;  %v5586_v11 = vsel %vm1108_vm3, %v1109_v32, %v1107_v58  ;;  %vm1099_vm3 = vcmp.eq.f32.partialorder %v5608_v55, inf }
 0x1be   : > { %v5573_v51 = vpop.eup %4118  ;;  %4144 = vlog2.f32 %v1784_v41  ;;  %v1202_v4 = vmax.f32 %v5586_v11, 1e-07  ;;  %v1123_v41 = vand.u32 2147483648, %v5533_v20 }
 0x1bf   : > { %v5576_v43 = vpop.eup %4120  ;;  %4146 = vrcp.f32 %v1742_v35 }
 0x1c0   : > { %v4123_v49 = vpop.eup %4122  ;;  %4148 = vrsqrt.f32 %v5571_v24  ;;  %v5621_v35 = vmin.f32 %v1202_v4, 0.999999 }
 0x1c1   : > { %v4125_v60 = vpop.eup %4124  ;;  %4150 = vrcp.f32 %v1194_v59  ;;  %v1042_v37 = vmul.f32 %v4123_v49, %v5509_v7  ;;  %v1701_v59 = vadd.f32 1.0, %v5498_v0 }
 0x1c2   : > { %v5584_v33 = vpop.eup %4126  ;;  %4152 = vrcp.f32 %v1735_v52  ;;  %v1788_v25 = vmul.f32 %v4125_v60, %v1708_v21  ;;  %v1060_v52 = vand.u32 2147483648, %v5537_v31  ;;  %v5645_v60 = vld [vmem:[#allocation3 + $0xf8] sm:$0xff]  ;;  %v1746_v21 = vsub.f32 1.0, %v5621_v35 }
 0x1c3   : > { %v4129_v56 = vpop.eup %4128  ;;  %4154 = vrcp.f32 %v1189_v6  ;;  %v1044_v27 = vsel %vm1043_vm4, %v5509_v7, %v1042_v37  ;;  %vm1164_vm4 = vcmp.eq.f32.partialorder %v5594_v9, 0.0 }
 0x1c4   : > { %v4131_v61 = vpop.eup %4130  ;;  %4156 = vrcp.f32 %v1744_v5  ;;  %v1772_v44 = vmul.f32 %v4129_v56, %v1700_v50  ;;  %v1137_v50 = vand.u32 2147483648, %v5543_v46 }
 0x1c5   : > { %v4133_v63 = vpop.eup %4132  ;;  %4158 = vrsqrt.f32 %v5588_v12  ;;  %v1774_v30 = vmul.f32 %v4131_v61, %v1701_v59 }
 0x1c6   : > { %v4135_v6 = vpop.eup %4134  ;;  %4160 = vrsqrt.f32 %v5594_v9  ;;  %v1119_v22 = vmul.f32 %v4133_v63, %v5533_v20  ;;  %v1074_v63 = vand.u32 2147483648, %v5550_v38 }
 0x1c7   : > { %v4137_v0 = vpop.eup %4136  ;;  %4162 = vrcp.f32 %v1196_v57  ;;  %v1056_v62 = vmul.f32 %v4135_v6, %v5537_v31  ;;  %v5632_v57 = vsel %vm1045_vm5, %v1046_v26, %v1044_v27  ;;  %v1712_v6 = vadd.f32 1.0, %v5567_v17 }
 0x1c8   : > { %v5613_v34 = vpop.eup %4138  ;;  %4164 = vrsqrt.f32 %v5608_v55  ;;  %v1133_v58 = vmul.f32 %v4137_v0, %v5543_v46  ;;  %v1121_v7 = vsel %vm1120_vm8, %v5533_v20, %v1119_v22  ;;  %v1193_v37 = vmax.f32 %v5632_v57, 1e-07 }
 0x1c9   : > { %v4141_v42 = vpop.eup %4140  ;;  %4166 = vrcp.f32 %v1191_v29  ;;  %v1058_v61 = vsel %vm1057_vm6, %v5537_v31, %v1056_v62  ;;  %v1124_v0 = vsel %vm1122_vm9, %v1123_v41, %v1121_v7  ;;  %vm1101_vm5 = vcmp.eq.f32.partialorder %v5608_v55, 0.0 }
 0x1ca   : > { %v5626_v32 = vpop.eup %4142  ;;  %4168 = vlog2.f32 %v1788_v25  ;;  %v1070_v29 = vmul.f32 %v4141_v42, %v5550_v38  ;;  %v1135_v59 = vsel %vm1134_vm10, %v5543_v46, %v1133_v58  ;;  %v5675_v20 = vmin.f32 %v1193_v37, 0.999999 }
 0x1cb   : > { %v5635_v49 = vpop.eup %4144  ;;  %4170 = vlog2.f32 %v1772_v44  ;;  %v1061_v44 = vsel %vm1059_vm7, %v1060_v52, %v1058_v61  ;;  %v5677_v41 = vsel %vm1136_vm13, %v1137_v50, %v1135_v59  ;;  %v1204_v62 = vmax.f32 %v1124_v0, 1e-07 }
 0x1cc   : > { %v4147_v5 = vpop.eup %4146  ;;  %4172 = vlog2.f32 %v1774_v30  ;;  %v1072_v46 = vsel %vm1071_vm11, %v5550_v38, %v1070_v29  ;;  %v1195_v30 = vmax.f32 %v1061_v44, 1e-07  ;;  %v1206_v45 = vmax.f32 %v5677_v41, 1e-07 }
 0x1cd   : > { %v4149_v56 = vpop.eup %4148  ;;  %4174 = vrsqrt.f32 %v5645_v60  ;;  %v1792_v27 = vmul.f32 %v4147_v5, %v1710_v15  ;;  %v5686_v58 = vsel %vm1073_vm12, %v1074_v63, %v1072_v46  ;;  %v1151_v5 = vand.u32 2147483648, %v5571_v24 }
 0x1ce   : > { %v5653_v19 = vpop.eup %4150  ;;  %v1147_v22 = vmul.f32 %v4149_v56, %v5571_v24  ;;  %4176 = vrcp.f32 %v1746_v21  ;;  %v1737_v7 = vsub.f32 1.0, %v5675_v20  ;;  %v1088_v29 = vand.u32 2147483648, %v5588_v12 }
 0x1cf   : > { %v4153_v26 = vpop.eup %4152  ;;  %4178 = vrcp.f32 %v1198_v13  ;;  %v5699_v21 = vmin.f32 %v1204_v62, 0.999999  ;;  %v1197_v61 = vmax.f32 %v5686_v58, 1e-07  ;;  %v5707_v16 = vmin.f32 %v1195_v30, 0.999999 }
 0x1d0   : > { %v5665_v25 = vpop.eup %4154  ;;  %v1778_v31 = vmul.f32 %v4153_v26, %v5603_v2  ;;  %4180 = vlog2.f32 %v1792_v27  ;;  %v1149_v13 = vsel %vm1148_vm15, %v5571_v24, %v1147_v22  ;;  %v5716_v26 = vmin.f32 %v1206_v45, 0.999999 }
 0x1d1   : > { %v4157_v17 = vpop.eup %4156  ;;  %4182 = vrcp.f32 %v1200_v14  ;;  %v5711_v14 = vsel %vm1150_vm1, %v1151_v5, %v1149_v13  ;;  %v5730_v27 = vmin.f32 %v1197_v61, 0.999999  ;;  %v1714_v5 = vadd.f32 1.0, %v5621_v35 }
 0x1d2   : > { %v4159_v42 = vpop.eup %4158  ;;  %v1796_v15 = vmul.f32 %v4157_v17, %v1712_v6  ;;  %4184 = vlog2.f32 %v1778_v31  ;;  %v1165_v6 = vand.u32 2147483648, %v5594_v9  ;;  %v1208_v44 = vmax.f32 %v5711_v14, 1e-07 }
 0x1d3   : > { %v4161_v52 = vpop.eup %4160  ;;  %v1084_v38 = vmul.f32 %v4159_v42, %v5588_v12  ;;  %4186 = vrcp.f32 %v1202_v4  ;;  %v1748_v4 = vsub.f32 1.0, %v5699_v21  ;;  %v1739_v17 = vsub.f32 1.0, %v5707_v16 }
 0x1d4   : > { %v5692_v2 = vpop.eup %4162  ;;  %v1161_v50 = vmul.f32 %v4161_v52, %v5594_v9  ;;  %4188 = vlog2.f32 %v1796_v15  ;;  %v1750_v42 = vsub.f32 1.0, %v5716_v26  ;;  %v1102_v52 = vand.u32 2147483648, %v5608_v55 }
 0x1d5   : > { %v4165_v56 = vpop.eup %4164  ;;  %4190 = vrcp.f32 %v1737_v7  ;;  %v1086_v24 = vsel %vm1085_vm14, %v5588_v12, %v1084_v38  ;;  %v5753_v13 = vmin.f32 %v1208_v44, 0.999999  ;;  %vm1176_vm6 = vcmp.eq.f32.partialorder %v5645_v60, inf }
 0x1d6   : > { %v5703_v59 = vpop.eup %4166  ;;  %v1098_v11 = vmul.f32 %v4165_v56, %v5608_v55  ;;  %v1163_v46 = vsel %vm1162_vm2, %v5594_v9, %v1161_v50  ;;  %4192 = vrcp.f32 %v1193_v37  ;;  %v1089_v31 = vsel %vm1087_vm0, %v1088_v29, %v1086_v24 }
 0x1d7   : > { %7927 = vst [vmem:[#allocation15_spill] sm:$0xff] %v5703_v59  ;;  %v5714_v63 = vpop.eup %4168  ;;  %4194 = vrcp.f32 %v1204_v62  ;;  %v5747_v57 = vsel %vm1164_vm4, %v1165_v6, %v1163_v46  ;;  %v1741_v62 = vsub.f32 1.0, %v5730_v27  ;;  %v1199_v7 = vmax.f32 %v1089_v31, 1e-07 }
 0x1d8   : > { %v5720_v0 = vpop.eup %4170  ;;  %4196 = vrcp.f32 %v1195_v30  ;;  %v1100_v37 = vsel %vm1099_vm3, %v5608_v55, %v1098_v11  ;;  %v1210_v9 = vmax.f32 %v5747_v57, 1e-07  ;;  %v1752_v6 = vsub.f32 1.0, %v5753_v13 }
 0x1d9   : > { %v5734_v22 = vpop.eup %4172  ;;  %4198 = vrcp.f32 %v1748_v4  ;;  %v5761_v30 = vsel %vm1101_vm5, %v1102_v52, %v1100_v37  ;;  %vm1178_vm7 = vcmp.eq.f32.partialorder %v5645_v60, 0.0  ;;  %v1179_v55 = vand.u32 2147483648, %v5645_v60 }
 0x1da   : > { %v4175_v41 = vpop.eup %4174  ;;  %4200 = vrcp.f32 %v1739_v17  ;;  %v5778_v11 = vmin.f32 %v1199_v7, 0.999999  ;;  %v5785_v17 = vmin.f32 %v1210_v9, 0.999999 }
 0x1db   : > { %v4177_v15 = vpop.eup %4176  ;;  %v1175_v35 = vmul.f32 %v4175_v41, %v5645_v60  ;;  %4202 = vrcp.f32 %v1750_v42 }
 0x1dc   : > { %v5755_v12 = vpop.eup %4178  ;;  %v1800_v29 = vmul.f32 %v4177_v15, %v1714_v5  ;;  %4204 = vrcp.f32 %v1206_v45  ;;  %v1201_v45 = vmax.f32 %v5761_v30, 1e-07  ;;  %v1705_v5 = vadd.f32 1.0, %v5675_v20 }
 0x1dd   : > { %v5764_v38 = vpop.eup %4180  ;;  %4206 = vrcp.f32 %v1741_v62  ;;  %v1177_v4 = vsel %vm1176_vm6, %v5645_v60, %v1175_v35  ;;  %v1743_v37 = vsub.f32 1.0, %v5778_v11  ;;  %v1754_v35 = vsub.f32 1.0, %v5785_v17 }
 0x1de   : > { %v5766_v56 = vpop.eup %4182  ;;  %v5796_v57 = vsel %vm1178_vm7, %v1179_v55, %v1177_v4  ;;  %v5801_v15 = vmin.f32 %v1201_v45, 0.999999  ;;  %v1707_v4 = vadd.f32 1.0, %v5707_v16  ;;  %v1718_v60 = vadd.f32 1.0, %v5716_v26 }
 0x1df   : > { %v5775_v24 = vpop.eup %4184  ;;  %7929 = vst [vmem:[#allocation17_spill] sm:$0xff] %v5796_v57  ;;  %v1828_v26 = vmul.f32 0.6931472, %v5517_v8 }
 0x1e0   : > { %v5782_v46 = vpop.eup %4186 }
 0x1e1   : > { %7928 = vst [vmem:[#allocation16_spill] sm:$0xff] %v5782_v46  ;;  %v5787_v41 = vpop.eup %4188  ;;  %v1824_v46 = vmul.f32 0.6931472, %v5482_v3 }
 0x1e2   : > { %v4191_v42 = vpop.eup %4190 }
 0x1e3   : > { %v5803_v62 = vpop.eup %4192 }
 0x1e4   : > { %7930 = vst [vmem:[#allocation18_spill] sm:$0xff] %v5803_v62  ;;  %v5807_v30 = vpop.eup %4194  ;;  %v1745_v62 = vsub.f32 1.0, %v5801_v15 }
 0x1e5   : > { %7931 = vst [vmem:[#allocation19_spill] sm:$0xff] %v5807_v30  ;;  %v5810_v20 = vpop.eup %4196 }
 0x1e6   : > { %7932 = vst [vmem:[#allocation20_spill] sm:$0xff] %v5810_v20  ;;  %v4199_v55 = vpop.eup %4198 }
 0x1e7   : > { %v4201_v30 = vpop.eup %4200 }
 0x1e8   : > { %v4203_v20 = vpop.eup %4202 }
 0x1e9   : > { %v5827_v16 = vpop.eup %4204 }
 0x1ea   : > { %7935 = vst [vmem:[#allocation22_spill] sm:$0xff] %v5827_v16  ;;  %v5838_v16 = vmul.f32 0.5, %v1824_v46 }
 0x1f4   : > { %v5768_v50 = vpop.xlane.xlu1 %1249  ;;  %v5770_v14 = vpop.xlane.xlu0 %1245 }
 0x1f5   : > { %4208 = vrsqrt.f32 %v5768_v50  ;;  %vm1311_vm8 = vcmp.eq.f32.partialorder %v5770_v14, inf  ;;  %v1314_v46 = vand.u32 2147483648, %v5770_v14  ;;  %vm1313_vm9 = vcmp.eq.f32.partialorder %v5770_v14, 0.0 }
 0x1f6   : > { %4210 = vrsqrt.f32 %v5770_v14  ;;  %vm1325_vm10 = vcmp.eq.f32.partialorder %v5768_v50, inf  ;;  %vm1327_vm12 = vcmp.eq.f32.partialorder %v5768_v50, 0.0 }
 0x1f7   : > { %4212 = vlog2.f32 %v1800_v29 }
 0x1f8   : > { %v5789_v31 = vpop.xlane.xlu1 %1251  ;;  %v5791_v52 = vpop.xlane.xlu0 %1247  ;;  %4214 = vrcp.f32 %v1752_v6  ;;  %v1716_v6 = vadd.f32 1.0, %v5699_v21  ;;  %v7933_v21 = vmax.f32 %v5796_v57, 1e-07 }
 0x1f9   : > { %4216 = vrcp.f32 %v1197_v61  ;;  %v1782_v61 = vmul.f32 %v4191_v42, %v1705_v5  ;;  %v1826_v42 = vmul.f32 0.6931472, %v5502_v54  ;;  %vm1318_vm11 = vcmp.eq.f32.partialorder %v5791_v52, inf }
 0x1fa   : > { %4218 = vrsqrt.f32 %v5791_v52  ;;  %vm1320_vm13 = vcmp.eq.f32.partialorder %v5791_v52, 0.0  ;;  %vm1332_vm14 = vcmp.eq.f32.partialorder %v5789_v31, inf  ;;  %vm1334_vm15 = vcmp.eq.f32.partialorder %v5789_v31, 0.0 }
 0x1fb   : > { %4220 = vrcp.f32 %v1208_v44  ;;  %v1822_v44 = vmul.f32 0.6931472, %v5474_v1  ;;  %v4207_v1 = vpop.eup %4206 }
 0x1fc   : > { %v5812_v29 = vpop.xlane.xlu1 %1255  ;;  %v5814_v58 = vpop.xlane.xlu0 %1253  ;;  %4222 = vrcp.f32 %v1199_v7  ;;  %v5825_v7 = vmin.f32 %v7933_v21, 0.999999  ;;  %v1709_v21 = vadd.f32 1.0, %v5730_v27 }
 0x1fd   : > { %4224 = vrcp.f32 %v1743_v37  ;;  %v1804_v37 = vmul.f32 %v4199_v55, %v1716_v6  ;;  %v5835_v54 = vmul.f32 0.5, %v1822_v44  ;;  %vm1346_vm0 = vcmp.eq.f32.partialorder %v5812_v29, inf }
 0x1fe   : > { %4226 = vrcp.f32 %v1754_v35  ;;  %7934 = vst [vmem:[#allocation21_spill] sm:$0xff] %v5825_v7  ;;  %v1786_v35 = vmul.f32 %v4201_v30, %v1707_v4  ;;  %v1756_v8 = vsub.f32 1.0, %v5825_v7  ;;  %v1840_v7 = vmul.f32 0.6931472, %v5547_v36 }
 0x1ff   : > { %4228 = vrcp.f32 %v1210_v9  ;;  %v1808_v9 = vmul.f32 %v4203_v20, %v1718_v60  ;;  %v1720_v60 = vadd.f32 1.0, %v5753_v13  ;;  %v5852_v20 = vmul.f32 0.5, %v1828_v26 }
 0x200   : > { %v5829_v5 = vpop.xlane.xlu1 %1259  ;;  %4230 = vlog2.f32 %v1782_v61  ;;  %v5833_v3 = vpop.xlane.xlu0 %1257  ;;  %v5840_v61 = vmul.f32 0.5, %v1826_v42  ;;  %v1830_v42 = vmul.f32 0.6931472, %v5526_v40  ;;  %v1328_v40 = vand.u32 2147483648, %v5768_v50 }
 0x201   : > { %4232 = vrcp.f32 %v1745_v62  ;;  %vm1339_vm1 = vcmp.eq.f32.partialorder %v5814_v58, inf  ;;  %vm1360_vm3 = vcmp.eq.f32.partialorder %v5829_v5, inf  ;;  %vm1353_vm4 = vcmp.eq.f32.partialorder %v5833_v3, inf }
 0x202   : > { %v4209_v59 = vpop.eup %4208  ;;  %4234 = vrsqrt.f32 %v5789_v31  ;;  %vm1341_vm6 = vcmp.eq.f32.partialorder %v5814_v58, 0.0 }
 0x203   : > { %v4211_v57 = vpop.eup %4210  ;;  %4236 = vrcp.f32 %v1201_v45  ;;  %v1324_v62 = vmul.f32 %v4209_v59, %v5768_v50  ;;  %v1790_v59 = vmul.f32 %v4207_v1, %v1709_v21  ;;  %v5873_v21 = vld [vmem:[#allocation3 + $0xc0] sm:$0xff]  ;;  %v1321_v1 = vand.u32 2147483648, %v5791_v52 }
 0x204   : > { %v5843_v30 = vpop.eup %4212  ;;  %v1310_v6 = vmul.f32 %v4211_v57, %v5770_v14  ;;  %v5847_v55 = vpop.xlane.xlu1 %1263  ;;  %4238 = vlog2.f32 %v1804_v37  ;;  %v5858_v57 = vld [vmem:[#allocation3 + $0xb0] sm:$0xff]  ;;  %7939 = vst [vmem:[#allocation26_spill] sm:$0xff] %v5873_v21 }
 0x205   : > { %v4215_v27 = vpop.eup %4214  ;;  %4240 = vlog2.f32 %v1786_v35  ;;  %7937 = vst [vmem:[#allocation24_spill] sm:$0xff] %v5858_v57  ;;  %v1326_v26 = vsel %vm1325_vm10, %v5768_v50, %v1324_v62  ;;  %vm1374_vm2 = vcmp.eq.f32.partialorder %v5847_v55, inf  ;;  %vm1376_vm5 = vcmp.eq.f32.partialorder %v5847_v55, 0.0 }
 0x206   : > { %v5854_v45 = vpop.eup %4216  ;;  %v1312_v4 = vsel %vm1311_vm8, %v5770_v14, %v1310_v6  ;;  %4242 = vlog2.f32 %v1808_v9  ;;  %v5868_v6 = vpop.xlane.xlu0 %1261  ;;  %v1812_v9 = vmul.f32 %v4215_v27, %v1720_v60  ;;  %v1722_v60 = vadd.f32 1.0, %v5785_v17  ;;  %v951_v27 = vld [vmem:[#allocation3 + $0xd0] sm:$0xff] }
 0x207   : > { %7936 = vst [vmem:[#allocation23_spill] sm:$0xff] %v5854_v45  ;;  %v4219_v44 = vpop.eup %4218  ;;  %v5861_v13 = vsel %vm1313_vm9, %v1314_v46, %v1312_v4  ;;  %4244 = vrcp.f32 %v1756_v8  ;;  %v1711_v8 = vadd.f32 1.0, %v5778_v11  ;;  %vm1367_vm7 = vcmp.eq.f32.partialorder %v5868_v6, inf }
 0x208   : > { %v5864_v37 = vpop.eup %4220  ;;  %v1317_v35 = vmul.f32 %v4219_v44, %v5791_v52  ;;  %v5870_v14 = vpop.xlane.xlu1 %1267  ;;  %4246 = vrsqrt.f32 %v5858_v57 }
 0x209   : > { %7938 = vst [vmem:[#allocation25_spill] sm:$0xff] %v5864_v37  ;;  %v5875_v46 = vpop.eup %4222  ;;  %4248 = vlog2.f32 %v1790_v59  ;;  %v7942_v59 = vmax.f32 %v5861_v13, 1e-07  ;;  %vm1388_vm8 = vcmp.eq.f32.partialorder %v5870_v14, inf }
 0x20a   : > { %7940 = vst [vmem:[#allocation27_spill] sm:$0xff] %v5875_v46  ;;  %v4225_v62 = vpop.eup %4224  ;;  %v1319_v4 = vsel %vm1318_vm11, %v5791_v52, %v1317_v35  ;;  %v5885_v46 = vsel %vm1327_vm12, %v1328_v40, %v1326_v26  ;;  %4250 = vrsqrt.f32 %v5873_v21  ;;  %v1832_v35 = vmul.f32 0.6931472, %v5557_v47  ;;  %v5904_v52 = vpop.xlane.xlu0 %1265 }
 0x20b   : > { %v4227_v44 = vpop.eup %4226  ;;  %v1629_v17 = vmul.f32 %v5426_v18, %v7942_v59  ;;  %4252 = vlog2.f32 %v1812_v9  ;;  %v5900_v26 = vsel %vm1320_vm13, %v1321_v1, %v1319_v4  ;;  %v1794_v36 = vmul.f32 %v4225_v62, %v1711_v8 }
 0x20c   : > { %v5889_v11 = vpop.eup %4228  ;;  %v5892_v50 = vpop.xlane.xlu1 %1271  ;;  %v1713_v40 = vadd.f32 1.0, %v5801_v15  ;;  %4254 = vrsqrt.f32 %v951_v27  ;;  %v7886_v45 = vmax.f32 %v5885_v46, 1e-07  ;;  %v1834_v18 = vmul.f32 0.6931472, %v5576_v43 }
 0x20d   : > { %7941 = vst [vmem:[#allocation28_spill] sm:$0xff] %v5889_v11  ;;  %v5898_v37 = vpop.eup %4230  ;;  %4256 = vrsqrt.f32 %v5847_v55  ;;  %v1816_v59 = vmul.f32 %v4227_v44, %v1722_v60  ;;  %v1917_v1 = vmul.f32 %v5835_v54, %v1629_v17  ;;  %v5910_v9 = vmul.f32 0.5, %v1830_v42 }
 0x20e   : > { %v4233_v11 = vpop.eup %4232  ;;  %4258 = vrsqrt.f32 %v5812_v29  ;;  %v1844_v15 = vmul.f32 0.6931472, %v5626_v32  ;;  %v5919_v27 = vmul.f32 0.5, %v1840_v7  ;;  %v1848_v43 = vmul.f32 0.6931472, %v5635_v49 }
 0x20f   : > { %v4235_v47 = vpop.eup %4234  ;;  %4260 = vrsqrt.f32 %v5814_v58  ;;  %v5922_v44 = vmul.f32 0.5, %v1832_v35  ;;  %v1852_v54 = vmul.f32 0.6931472, %v5714_v63  ;;  %v1798_v42 = vmul.f32 %v4233_v11, %v1713_v40 }
 0x210   : > { %v5913_v8 = vpop.eup %4236  ;;  %v5916_v62 = vpop.xlane.xlu1 %1275  ;;  %4262 = vlog2.f32 %v1794_v36  ;;  %v1331_v17 = vmul.f32 %v4235_v47, %v5789_v31  ;;  %v5931_v4 = vmul.f32 0.5, %v1834_v18  ;;  %v3789_v49 = vclamps-f32 %v1917_v1, 15.0 }
 0x211   : > { %7943 = vst [vmem:[#allocation29_spill] sm:$0xff] %v5913_v8  ;;  %v4239_v60 = vpop.eup %4238  ;;  %v1631_v8 = vmul.f32 %v5451_v48, %v7886_v45  ;;  %4264 = vlog2.f32 %v1816_v59  ;;  %v5936_v35 = vmul.f32 0.5, %v1844_v15  ;;  %v1836_v63 = vmul.f32 0.6931472, %v5720_v0  ;;  %v5942_v36 = vpop.xlane.xlu0 %1269 }
 0x212   : > { %v5925_v32 = vpop.eup %4240  ;;  %4266 = vrsqrt.f32 %v5829_v5  ;;  %v7945_v48 = vmax.f32 %v5900_v26, 1e-07  ;;  %v5949_v59 = vmul.f32 0.5, %v1848_v43  ;;  %v1838_v47 = vmul.f32 0.6931472, %v5734_v22 }
 0x213   : > { %v5933_v7 = vpop.eup %4242  ;;  %4268 = vrsqrt.f32 %v5833_v3  ;;  %v5953_v1 = vmul.f32 0.5, %v1852_v54  ;;  %v1856_v0 = vmul.f32 0.6931472, %v5764_v38  ;;  %v1333_v45 = vsel %vm1332_vm14, %v5789_v31, %v1331_v17 }
 0x214   : > { %v5939_v11 = vpop.eup %4244  ;;  %v5944_v40 = vpop.xlane.xlu1 %1279  ;;  %v1630_v18 = vmul.f32 %v5435_v23, %v7945_v48  ;;  %4270 = vlog2.f32 %v1798_v42  ;;  %v1842_v23 = vmul.f32 0.6931472, %v5775_v24  ;;  %v1335_v22 = vand.u32 2147483648, %v5789_v31 }
 0x215   : > { %7944 = vst [vmem:[#allocation30_spill] sm:$0xff] %v5939_v11  ;;  %v5956_v15 = vpop.eup %4246  ;;  %4272 = vrsqrt.f32 %v5868_v6  ;;  %v1919_v11 = vmul.f32 %v5840_v61, %v1631_v8  ;;  %v5965_v54 = vmul.f32 0.5, %v1836_v63  ;;  %v1860_v38 = vmul.f32 0.6931472, %v5787_v41 }
 0x216   : > { %7946 = vst [vmem:[#allocation31_spill] sm:$0xff] %v5956_v15  ;;  %v5962_v43 = vpop.eup %4248  ;;  %4274 = vtanh.f32 %v3789_v49  ;;  %v1918_v61 = vmul.f32 %v5838_v16, %v1630_v18  ;;  %v5975_v24 = vmul.f32 0.5, %v1838_v47  ;;  %v7949_v49 = vmax.f32 %v5861_v13, 1e-07 }
 0x217   : > { %v5968_v42 = vpop.eup %4250  ;;  %4276 = vrsqrt.f32 %v5870_v14  ;;  %v5981_v63 = vsel %vm1334_vm15, %v1335_v22, %v1333_v45  ;;  %v1864_v41 = vmul.f32 0.6931472, %v5843_v30  ;;  %v1846_v48 = vmul.f32 0.6931472, %v5898_v37 }
 0x218   : > { %7947 = vst [vmem:[#allocation32_spill] sm:$0xff] %v5968_v42  ;;  %v5972_v17 = vpop.xlane.xlu1 %1283  ;;  %v5977_v8 = vpop.eup %4252  ;;  %4278 = vrcp.f32 %v7949_v49  ;;  %v3791_v16 = vclamps-f32 %v1919_v11, 15.0  ;;  %v5990_v18 = vmul.f32 0.5, %v1856_v0  ;;  %v5992_v47 = vmul.f32 0.5, %v1842_v23 }
 0x219   : > { %7948 = vst [vmem:[#allocation33_spill] sm:$0xff] %v5977_v8  ;;  %v5985_v31 = vpop.eup %4254  ;;  %4280 = vrsqrt.f32 %v5904_v52  ;;  %v5988_v42 = vpop.xlane.xlu0 %1273  ;;  %v3790_v45 = vclamps-f32 %v1918_v61, 15.0  ;;  %v5995_v13 = vmul.f32 0.5, %v1860_v38  ;;  %v1868_v30 = vmul.f32 0.6931472, %v4239_v60 }
 0x21a   : > { %7950 = vst [vmem:[#allocation34_spill] sm:$0xff] %v5985_v31  ;;  %7951 = vst [vmem:[#allocation35_spill] sm:$0xff] %v5992_v47  ;;  %v4257_v15 = vpop.eup %4256  ;;  %4282 = vrsqrt.f32 %v5892_v50  ;;  %v6003_v31 = vmul.f32 0.5, %v1864_v41  ;;  %v6005_v61 = vmul.f32 0.5, %v1846_v48  ;;  %v1850_v23 = vmul.f32 0.6931472, %v5925_v32 }
 0x21b   : > { %7952 = vst [vmem:[#allocation36_spill] sm:$0xff] %v5995_v13  ;;  %v4259_v22 = vpop.eup %4258  ;;  %4284 = vrsqrt.f32 %v5942_v36  ;;  %v1373_v49 = vmul.f32 %v4257_v15, %v5847_v55  ;;  %v6019_v41 = vmul.f32 0.5, %v1868_v30  ;;  %v1872_v48 = vmul.f32 0.6931472, %v5933_v7 }
 0x21c   : > { %v4261_v0 = vpop.eup %4260  ;;  %4286 = vrsqrt.f32 %v5916_v62  ;;  %7953 = vst [vmem:[#allocation37_spill] sm:$0xff] %v6003_v31  ;;  %7954 = vst [vmem:[#allocation38_spill] sm:$0xff] %v6005_v61  ;;  %v6013_v11 = vpop.xlane.xlu1 %1287  ;;  %v7958_v32 = vmax.f32 %v5981_v63, 1e-07  ;;  %v1377_v7 = vand.u32 2147483648, %v5847_v55  ;;  %vm1381_vm9 = vcmp.eq.f32.partialorder %v5904_v52, inf }
 0x21d   : > { %v6007_v38 = vpop.eup %4262  ;;  %4288 = vtanh.f32 %v3791_v16  ;;  %7957 = vst [vmem:[#allocation41_spill] sm:$0xff] %v6019_v41  ;;  %v6025_v15 = vpop.xlane.xlu0 %1277  ;;  %v7959_v30 = vmax.f32 %v5900_v26, 1e-07  ;;  %v1375_v60 = vsel %vm1374_vm2, %v5847_v55, %v1373_v49  ;;  %v6047_v26 = vmul.f32 0.5, %v1872_v48 }
 0x21e   : > { %7955 = vst [vmem:[#allocation39_spill] sm:$0xff] %v6007_v38  ;;  %v6016_v37 = vpop.eup %4264  ;;  %4290 = vtanh.f32 %v3790_v45  ;;  %v1632_v16 = vmul.f32 %v5459_v53, %v7958_v32  ;;  %v6042_v53 = vmul.f32 0.5, %v1850_v23  ;;  %v1345_v45 = vmul.f32 %v4259_v22, %v5812_v29 }
 0x21f   : > { %7956 = vst [vmem:[#allocation40_spill] sm:$0xff] %v6016_v37  ;;  %v4267_v21 = vpop.eup %4266  ;;  %4292 = vrsqrt.f32 %v5988_v42  ;;  %v1338_v38 = vmul.f32 %v4261_v0, %v5814_v58  ;;  %7962 = vst [vmem:[#allocation44_spill] sm:$0xff] %v6047_v26  ;;  %v6056_v8 = vmul.f32 0.6931472, %v5962_v43  ;;  %v7965_v48 = vmax.f32 %v5885_v46, 1e-07 }
 0x220   : > { %v4269_v37 = vpop.eup %4268  ;;  %4294 = vrcp.f32 %v7959_v30  ;;  %7961 = vst [vmem:[#allocation43_spill] sm:$0xff] %v6042_v53  ;;  %v1920_v23 = vmul.f32 %v5852_v20, %v1632_v16  ;;  %v1359_v0 = vmul.f32 %v4267_v21, %v5829_v5  ;;  %v6065_v26 = vsel %vm1376_vm5, %v1377_v7, %v1375_v60 }
 0x221   : > { %v6035_v57 = vpop.eup %4270  ;;  %4296 = vrsqrt.f32 %v5944_v40  ;;  %7963 = vst [vmem:[#allocation45_spill] sm:$0xff] %v6056_v8  ;;  %v1352_v41 = vmul.f32 %v4269_v37, %v5833_v3  ;;  %v6075_v46 = vsel %vm1346_vm0, %v5812_v29, %v1345_v45  ;;  %v1340_v55 = vsel %vm1339_vm1, %v5814_v58, %v1338_v38  ;;  %v6081_v37 = vpop.xlane.xlu0 %1281 }
 0x222   : > { %7960 = vst [vmem:[#allocation42_spill] sm:$0xff] %v6035_v57  ;;  %v4273_v32 = vpop.eup %4272  ;;  %4298 = vrsqrt.f32 %v6025_v15  ;;  %v6052_v57 = vpop.xlane.xlu1 %1291  ;;  %vm1402_vm10 = vcmp.eq.f32.partialorder %v5892_v50, inf  ;;  %v7891_v21 = vmax.f32 %v6065_v26, 1e-07  ;;  %v6090_v20 = vsel %vm1360_vm3, %v5829_v5, %v1359_v0 }
 0x223   : > { %v4275_v30 = vpop.eup %4274  ;;  %4300 = vrcp.f32 %v7965_v48  ;;  %v1366_v7 = vmul.f32 %v4273_v32, %v5868_v6  ;;  %v3792_v48 = vclamps-f32 %v1920_v23, 15.0  ;;  %vm1395_vm11 = vcmp.eq.f32.partialorder %v5942_v36, inf }
 0x224   : > { %v4277_v22 = vpop.eup %4276  ;;  %v6059_v53 = vmin.f32 %v4275_v30, 0.99999  ;;  %4302 = vrsqrt.f32 %v5972_v17  ;;  %v6098_v32 = vsel %vm1353_vm4, %v5833_v3, %v1352_v41  ;;  %vm1390_vm12 = vcmp.eq.f32.partialorder %v5870_v14, 0.0 }
 0x225   : > { %v4279_v49 = vpop.eup %4278  ;;  %vm1404_vm13 = vcmp.eq.f32.partialorder %v5892_v50, 0.0  ;;  %vm1416_vm14 = vcmp.eq.f32.partialorder %v5916_v62, inf  ;;  %4304 = vrsqrt.f32 %v6081_v37  ;;  %vm1409_vm15 = vcmp.eq.f32.partialorder %v5988_v42, inf  ;;  %v6123_v31 = vpop.xlane.xlu0 %1285 }
 0x226   : > { %7964 = vst [vmem:[#allocation46_spill] sm:$0xff] %v6059_v53  ;;  %v4281_v43 = vpop.eup %4280  ;;  %v2077_v60 = vmul.f32 %v4279_v49, %v6059_v53  ;;  %v6105_v0 = vpop.xlane.xlu1 %1295  ;;  %vm1430_vm0 = vcmp.eq.f32.partialorder %v5944_v40, inf  ;;  %4306 = vrsqrt.f32 %v6013_v11  ;;  %vm1348_vm1 = vcmp.eq.f32.partialorder %v5812_v29, 0.0 }
 0x227   : > { %v4283_v16 = vpop.eup %4282  ;;  %v6115_v23 = vsel %vm1367_vm7, %v5868_v6, %v1366_v7  ;;  %4308 = vtanh.f32 %v3792_v48  ;;  %v1638_v53 = vmul.f32 %v5524_v28, %v7891_v21  ;;  %v1387_v8 = vmul.f32 %v4277_v22, %v5870_v14 }
 0x228   : > { %v4285_v45 = vpop.eup %4284  ;;  %2111 = vperm.xlu0 %4034, %v2077_v60   ;;  %v1380_v61 = vmul.f32 %v4281_v43, %v5904_v52  ;;  %v7966_v13 = vand.u32 2147483648, %v5814_v58  ;;  %v1401_v30 = vmul.f32 %v4283_v16, %v5892_v50  ;;  %vm1423_vm2 = vcmp.eq.f32.partialorder %v6025_v15, inf }
 0x229   : > { %v4287_v49 = vpop.eup %4286  ;;  %v1394_v28 = vmul.f32 %v4285_v45, %v5942_v36  ;;  %v7967_v22 = vmax.f32 %v5981_v63, 1e-07  ;;  %vm1355_vm3 = vcmp.eq.f32.partialorder %v5833_v3, 0.0  ;;  %v1926_v63 = vmul.f32 %v5919_v27, %v1638_v53 }
 0x22a   : > { %v4289_v38 = vpop.eup %4288  ;;  %v6131_v7 = vsel %vm1341_vm6, %v7966_v13, %v1340_v55  ;;  %v6146_v45 = vpop.xlane.xlu1 %1299  ;;  %v1403_v27 = vsel %vm1402_vm10, %v5892_v50, %v1401_v30  ;;  %vm1418_vm4 = vcmp.eq.f32.partialorder %v5916_v62, 0.0  ;;  %vm1444_vm5 = vcmp.eq.f32.partialorder %v5972_v17, inf }
 0x22b   : > { %v4291_v41 = vpop.eup %4290  ;;  %4310 = vrcp.f32 %v7967_v22  ;;  %v6142_v13 = vmin.f32 %v4289_v38, 0.99999  ;;  %v1537_v22 = vmax.f32 %v6131_v7, 1e-07  ;;  %v6156_v38 = vsel %vm1381_vm9, %v5904_v52, %v1380_v61 }
 0x22c   : > { %v4293_v60 = vpop.eup %4292  ;;  %v6125_v47 = vmin.f32 %v4291_v41, 0.99999  ;;  %v1415_v41 = vmul.f32 %v4287_v49, %v5916_v62  ;;  %4312 = vrsqrt.f32 %v6123_v31  ;;  %v1389_v49 = vsel %vm1388_vm8, %v5870_v14, %v1387_v8 }
 0x22d   : > { %v4295_v48 = vpop.eup %4294  ;;  %v1408_v16 = vmul.f32 %v4293_v60, %v5988_v42  ;;  %v6166_v53 = vsel %vm1395_vm11, %v5942_v36, %v1394_v28  ;;  %4314 = vrsqrt.f32 %v6052_v57  ;;  %vm1437_vm6 = vcmp.eq.f32.partialorder %v6081_v37, inf }
 0x22e   : > { %v4297_v43 = vpop.eup %4296  ;;  %v2078_v58 = vmul.f32 %v4295_v48, %v6125_v47  ;;  %v6173_v7 = vsel %vm1416_vm14, %v5916_v62, %v1415_v41  ;;  %v3798_v41 = vclamps-f32 %v1926_v63, 15.0  ;;  %v1633_v60 = vmul.f32 %v5552_v39, %v1537_v22 }
 0x22f   : > { %v4299_v55 = vpop.eup %4298  ;;  %v1429_v8 = vmul.f32 %v4297_v43, %v5944_v40  ;;  %v6183_v28 = vsel %vm1409_vm15, %v5988_v42, %v1408_v16  ;;  %vm1362_vm7 = vcmp.eq.f32.partialorder %v5829_v5, 0.0  ;;  %v7970_v16 = vand.u32 2147483648, %v5812_v29 }
 0x230   : > { %2116 = vperm.xlu1 %4035, %v2078_v58   ;;  %v4301_v21 = vpop.eup %4300  ;;  %v1422_v58 = vmul.f32 %v4299_v55, %v6025_v15  ;;  %v7968_v55 = vmax.f32 %v6065_v26, 1e-07  ;;  %v7971_v63 = vand.u32 2147483648, %v5892_v50  ;;  %vm1458_vm8 = vcmp.eq.f32.partialorder %v6013_v11, inf }
 0x231   : > { %v2079_v30 = vmul.f32 %v4301_v21, %v6142_v13  ;;  %v7969_v21 = vand.u32 2147483648, %v5870_v14  ;;  %v1350_v43 = vsel %vm1348_vm1, %v7970_v16, %v6075_v46  ;;  %v6209_v26 = vsel %vm1430_vm0, %v5944_v40, %v1429_v8  ;;  %v6212_v14 = vpop.xlane.xlu1 %1303 }
 0x232   : > { %4316 = vrcp.f32 %v7968_v55  ;;  %v6204_v39 = vsel %vm1404_vm13, %v7971_v63, %v1403_v27  ;;  %v1921_v29 = vmul.f32 %v5910_v9, %v1633_v60  ;;  %vm1369_vm9 = vcmp.eq.f32.partialorder %v5868_v6, 0.0 }
 0x233   : > { %v1392_v61 = vsel %vm1390_vm12, %v7969_v21, %v1389_v49  ;;  %4318 = vtanh.f32 %v3798_v41  ;;  %vm1432_vm10 = vcmp.eq.f32.partialorder %v5944_v40, 0.0  ;;  %v6220_v50 = vsel %vm1423_vm2, %v6025_v15, %v1422_v58 }
 0x234   : > { %2121 = vperm.xlu1 %4035, %v2079_v30   ;;  %v4303_v30 = vpop.eup %4302  ;;  %v1544_v46 = vmax.f32 %v1392_v61, 1e-07  ;;  %4320 = vrsqrt.f32 %v6105_v0  ;;  %v1538_v27 = vmax.f32 %v1350_v43, 1e-07  ;;  %v1546_v8 = vmax.f32 %v6204_v39, 1e-07 }
 0x235   : > { %v4305_v49 = vpop.eup %4304  ;;  %4322 = vrsqrt.f32 %v6146_v45  ;;  %v3793_v9 = vclamps-f32 %v1921_v29, 15.0  ;;  %v7972_v61 = vand.u32 2147483648, %v5833_v3  ;;  %v1443_v58 = vmul.f32 %v4303_v30, %v5972_v17 }
 0x236   : > { %v4307_v55 = vpop.eup %4306  ;;  %v1640_v60 = vmul.f32 %v5584_v33, %v1544_v46  ;;  %vm1446_vm11 = vcmp.eq.f32.partialorder %v5972_v17, 0.0  ;;  %4324 = vrsqrt.f32 %v6212_v14  ;;  %v1634_v43 = vmul.f32 %v5563_v10, %v1538_v27 }
 0x237   : > { %v1357_v41 = vsel %vm1355_vm3, %v7972_v61, %v6098_v32  ;;  %v4309_v21 = vpop.eup %4308  ;;  %v1642_v16 = vmul.f32 %v5653_v19, %v1546_v8  ;;  %v1436_v63 = vmul.f32 %v4305_v49, %v6081_v37  ;;  %4326 = vtanh.f32 %v3793_v9 }
 0x238   : > { %v6237_v33 = vmin.f32 %v4309_v21, 0.99999  ;;  %v1928_v39 = vmul.f32 %v5936_v35, %v1640_v60  ;;  %v4311_v3 = vpop.eup %4310  ;;  %4328 = vrcp.f32 %v1537_v22  ;;  %v1922_v32 = vmul.f32 %v5922_v44, %v1634_v43 }
 0x239   : > { %v1930_v30 = vmul.f32 %v5949_v59, %v1642_v16  ;;  %v1539_v29 = vmax.f32 %v1357_v41, 1e-07  ;;  %v1457_v61 = vmul.f32 %v4307_v55, %v6013_v11  ;;  %4330 = vrcp.f32 %v1544_v46  ;;  %v4313_v48 = vpop.eup %4312 }
 0x23a   : > { %v2080_v10 = vmul.f32 %v4311_v3, %v6237_v33  ;;  %v3800_v19 = vclamps-f32 %v1928_v39, 15.0  ;;  %vm1383_vm12 = vcmp.eq.f32.partialorder %v5904_v52, 0.0  ;;  %vm1460_vm13 = vcmp.eq.f32.partialorder %v6013_v11, 0.0  ;;  %v4315_v60 = vpop.eup %4314 }
 0x23b   : > { %4332 = vrcp.f32 %v1538_v27  ;;  %v3794_v35 = vclamps-f32 %v1922_v32, 15.0  ;;  %v3802_v49 = vclamps-f32 %v1930_v30, 15.0  ;;  %v1635_v22 = vmul.f32 %v5573_v51, %v1539_v29 }
 0x23c   : > { %v1445_v44 = vsel %vm1444_vm5, %v5972_v17, %v1443_v58  ;;  %v1489_v59 = vand.u32 2147483648, %v6105_v0  ;;  %2126 = vperm.xlu1 %4035, %v2080_v10   ;;  %4334 = vtanh.f32 %v3800_v19  ;;  %v7973_v46 = vand.u32 2147483648, %v5916_v62 }
 0x23d   : > { %v6259_v27 = vsel %vm1437_vm6, %v6081_v37, %v1436_v63  ;;  %4336 = vtanh.f32 %v3794_v35  ;;  %v1923_v51 = vmul.f32 %v5931_v4, %v1635_v22  ;;  %vm1397_vm14 = vcmp.eq.f32.partialorder %v5942_v36, 0.0 }
 0x23e   : > { %v1420_v55 = vsel %vm1418_vm4, %v7973_v46, %v6173_v7  ;;  %v6264_v41 = vmul.f32 %v4313_v48, %v6123_v31  ;;  %v1503_v21 = vand.u32 2147483648, %v6146_v45  ;;  %4338 = vtanh.f32 %v3802_v49 }
 0x23f   : > { %v1548_v9 = vmax.f32 %v1420_v55, 1e-07  ;;  %v7974_v62 = vand.u32 2147483648, %v5829_v5  ;;  %v1459_v4 = vsel %vm1458_vm8, %v6013_v11, %v1457_v61  ;;  %vm1472_vm15 = vcmp.eq.f32.partialorder %v6052_v57, inf  ;;  %v4317_v43 = vpop.eup %4316 }
 0x240   : > { %4340 = vrcp.f32 %v1546_v8  ;;  %v3795_v58 = vclamps-f32 %v1923_v51, 15.0  ;;  %v7975_v63 = vand.u32 2147483648, %v5944_v40  ;;  %v4319_v3 = vpop.eup %4318  ;;  %vm1486_vm0 = vcmp.eq.f32.partialorder %v6105_v0, inf }
 0x241   : > { %v1364_v7 = vsel %vm1362_vm7, %v7974_v62, %v6090_v20  ;;  %v1644_v48 = vmul.f32 %v5692_v2, %v1548_v9  ;;  %4342 = vrcp.f32 %v1539_v29  ;;  %v7976_v20 = vand.u32 2147483648, %v5868_v6  ;;  %v4321_v30 = vpop.eup %4320 }
 0x242   : > { %v1540_v16 = vmax.f32 %v1364_v7, 1e-07  ;;  %v1434_v5 = vsel %vm1432_vm10, %v7975_v63, %v6209_v26  ;;  %4344 = vtanh.f32 %v3795_v58  ;;  %v6289_v29 = vmin.f32 %v4319_v3, 0.99999  ;;  %v7982_v3 = vld [vmem:[#allocation15_spill] sm:$0xff] }
 0x243   : > { %v1371_v39 = vsel %vm1369_vm9, %v7976_v20, %v6115_v23  ;;  %v1932_v8 = vmul.f32 %v5953_v1, %v1644_v48  ;;  %v1550_v2 = vmax.f32 %v1434_v5, 1e-07  ;;  %4346 = vrcp.f32 %v1548_v9  ;;  %v6296_v23 = vpop.eup %4322 }
 0x244   : > { %v1541_v32 = vmax.f32 %v1371_v39, 1e-07  ;;  %v1636_v40 = vmul.f32 %v5613_v34, %v1540_v16  ;;  %v7977_v26 = vand.u32 2147483648, %v5972_v17  ;;  %4348 = vrcp.f32 %v1540_v16  ;;  %v6300_v19 = vpop.eup %4324  ;;  %v7980_v16 = vld [vmem:[#allocation36_spill] sm:$0xff] }
 0x245   : > { %v3804_v61 = vclamps-f32 %v1932_v8, 15.0  ;;  %v1646_v1 = vmul.f32 %v5755_v12, %v1550_v2  ;;  %v1471_v35 = vmul.f32 %v4315_v60, %v6052_v57  ;;  %v2086_v49 = vmul.f32 %v4317_v43, %v6289_v29  ;;  %v4327_v22 = vpop.eup %4326 }
 0x246   : > { %v1448_v6 = vsel %vm1446_vm11, %v7977_v26, %v1445_v44  ;;  %v1637_v10 = vmul.f32 %v5665_v25, %v1541_v32  ;;  %v1924_v34 = vmul.f32 %v5965_v54, %v1636_v40  ;;  %4350 = vrcp.f32 %v1550_v2  ;;  %v4329_v44 = vpop.eup %4328 }
 0x247   : > { %vm1411_vm1 = vcmp.eq.f32.partialorder %v5988_v42, 0.0  ;;  %vm1474_vm2 = vcmp.eq.f32.partialorder %v6052_v57, 0.0  ;;  %vm1488_vm3 = vcmp.eq.f32.partialorder %v6105_v0, 0.0  ;;  %4352 = vtanh.f32 %v3804_v61  ;;  %2156 = vperm.xlu0 %4034, %v2086_v49  }
 0x248   : > { %v1934_v12 = vmul.f32 %v5990_v18, %v1646_v1  ;;  %v1925_v25 = vmul.f32 %v5975_v24, %v1637_v10  ;;  %v1552_v17 = vmax.f32 %v1448_v6, 1e-07  ;;  %v6310_v46 = vmin.f32 %v4327_v22, 0.99999  ;;  %v4331_v18 = vpop.eup %4330  ;;  %v7984_v1 = vld [vmem:[#allocation35_spill] sm:$0xff]  ;;  %v7985_v22 = vld [vmem:[#allocation37_spill] sm:$0xff] }
 0x249   : > { %v3796_v55 = vclamps-f32 %v1924_v34, 15.0  ;;  %v7978_v54 = vand.u32 2147483648, %v5904_v52  ;;  %v7979_v9 = vand.u32 2147483648, %v6013_v11  ;;  %vm1425_vm4 = vcmp.eq.f32.partialorder %v6025_v15, 0.0  ;;  %v4333_v58 = vpop.eup %4332 }
 0x24a   : > { %v3806_v24 = vclamps-f32 %v1934_v12, 15.0  ;;  %4354 = vrcp.f32 %v1541_v32  ;;  %v3797_v62 = vclamps-f32 %v1925_v25, 15.0  ;;  %v1648_v7 = vmul.f32 %v5766_v56, %v1552_v17 }
 0x24b   : > { %v1385_v51 = vsel %vm1383_vm12, %v7978_v54, %v6156_v38  ;;  %v1462_v60 = vsel %vm1460_vm13, %v7979_v9, %v1459_v4  ;;  %v1485_v48 = vmul.f32 %v4321_v30, %v6105_v0  ;;  %v2081_v43 = vmul.f32 %v4329_v44, %v6310_v46  ;;  %v4335_v38 = vpop.eup %4334 }
 0x24c   : > { %4356 = vtanh.f32 %v3796_v55  ;;  %v1543_v52 = vmax.f32 %v1385_v51, 1e-07  ;;  %v1936_v11 = vmul.f32 %v7980_v16, %v1648_v7  ;;  %v1554_v4 = vmax.f32 %v1462_v60, 1e-07  ;;  %v4337_v56 = vpop.eup %4336  ;;  %v7986_v60 = vld [vmem:[#allocation18_spill] sm:$0xff] }
 0x24d   : > { %4358 = vtanh.f32 %v3806_v24  ;;  %v7981_v63 = vand.u32 2147483648, %v5942_v36  ;;  %v1473_v20 = vsel %vm1472_vm15, %v6052_v57, %v1471_v35  ;;  %vm1500_vm5 = vcmp.eq.f32.partialorder %v6146_v45, inf  ;;  %2131 = vperm.xlu1 %4035, %v2081_v43   ;;  %v4339_v2 = vpop.eup %4338  ;;  %v7983_v36 = vld [vmem:[#allocation16_spill] sm:$0xff] }
 0x24e   : > { %v6337_v39 = vmin.f32 %v4335_v38, 0.99999  ;;  %4360 = vtanh.f32 %v3797_v62  ;;  %v1639_v8 = vmul.f32 %v7982_v3, %v1543_v52  ;;  %v6340_v32 = vmin.f32 %v4337_v56, 0.99999  ;;  %v4341_v26 = vpop.eup %4340 }
 0x24f   : > { %v6331_v5 = vsel %vm1397_vm14, %v7981_v63, %v6166_v53  ;;  %v3808_v30 = vclamps-f32 %v1936_v11, 15.0  ;;  %v1650_v53 = vmul.f32 %v7983_v36, %v1554_v4  ;;  %v6345_v61 = vmin.f32 %v4339_v2, 0.99999  ;;  %v4343_v35 = vpop.eup %4342  ;;  %v7989_v11 = vld [vmem:[#allocation38_spill] sm:$0xff]  ;;  %v7992_v36 = vld [vmem:[#allocation19_spill] sm:$0xff] }
 0x250   : > { %v1545_v40 = vmax.f32 %v6331_v5, 1e-07  ;;  %v2088_v6 = vmul.f32 %v4331_v18, %v6337_v39  ;;  %4362 = vrcp.f32 %v1552_v17  ;;  %v1927_v10 = vmul.f32 %v7984_v1, %v1639_v8  ;;  %v4345_v25 = vpop.eup %4344  ;;  %v7991_v8 = vld [vmem:[#allocation45_spill] sm:$0xff] }
 0x251   : > { %v1487_v49 = vsel %vm1486_vm0, %v6105_v0, %v1485_v48  ;;  %v2082_v34 = vmul.f32 %v4333_v58, %v6340_v32  ;;  %4364 = vtanh.f32 %v3808_v30  ;;  %v1938_v12 = vmul.f32 %v7985_v22, %v1650_v53  ;;  %v4347_v54 = vpop.eup %4346 }
 0x252   : > { %v1517_v44 = vand.u32 2147483648, %v6212_v14  ;;  %2166 = vperm.xlu0 %4034, %v2088_v6   ;;  %v2090_v55 = vmul.f32 %v4341_v26, %v6345_v61  ;;  %4366 = vrcp.f32 %v1543_v52  ;;  %v3799_v17 = vclamps-f32 %v1927_v10, 15.0  ;;  %v4349_v24 = vpop.eup %4348  ;;  %v7994_v26 = vld [vmem:[#allocation22_spill] sm:$0xff] }
 0x253   : > { %vm1514_vm6 = vcmp.eq.f32.partialorder %v6212_v14, inf  ;;  %2136 = vperm.xlu1 %4035, %v2082_v34   ;;  %v6356_v51 = vmin.f32 %v4345_v25, 0.99999  ;;  %4368 = vrcp.f32 %v1554_v4  ;;  %v3810_v9 = vclamps-f32 %v1938_v12, 15.0  ;;  %v4351_v52 = vpop.eup %4350 }
 0x254   : > { %v1641_v18 = vmul.f32 %v7986_v60, %v1545_v40  ;;  %vm1502_vm7 = vcmp.eq.f32.partialorder %v6146_v45, 0.0  ;;  %4370 = vtanh.f32 %v3799_v17  ;;  %v7987_v62 = vand.u32 2147483648, %v6052_v57  ;;  %v6380_v57 = vpop.xlane.xlu1 %1307 }
 0x255   : > { %v7988_v58 = vand.u32 2147483648, %v5988_v42  ;;  %v6375_v43 = vsel %vm1488_vm3, %v1489_v59, %v1487_v49  ;;  %vm1439_vm8 = vcmp.eq.f32.partialorder %v6081_v37, 0.0  ;;  %v1499_v38 = vmul.f32 %v6296_v23, %v6146_v45  ;;  %v7995_v49 = vld [vmem:[#allocation23_spill] sm:$0xff] }
 0x256   : > { %v1476_v7 = vsel %vm1474_vm2, %v7987_v62, %v1473_v20  ;;  %v2083_v16 = vmul.f32 %v4343_v35, %v6356_v51  ;;  %4372 = vtanh.f32 %v3810_v9  ;;  %v1929_v42 = vmul.f32 %v7989_v11, %v1641_v18  ;;  %2176 = vperm.xlu0 %4034, %v2090_v55   ;;  %v7996_v55 = vld [vmem:[#allocation41_spill] sm:$0xff]  ;;  %v7997_v9 = vld [vmem:[#allocation43_spill] sm:$0xff]  ;;  %v7998_v62 = vld [vmem:[#allocation44_spill] sm:$0xff] }
 0x257   : > { %v1413_v48 = vsel %vm1411_vm1, %v7988_v58, %v6183_v28  ;;  %v4353_v28 = vpop.eup %4352  ;;  %v1556_v4 = vmax.f32 %v1476_v7, 1e-07  ;;  %v1558_v0 = vmax.f32 %v6375_v43, 1e-07  ;;  %v7990_v59 = vand.u32 2147483648, %v6025_v15  ;;  %v7993_v15 = vld [vmem:[#allocation20_spill] sm:$0xff] }
 0x258   : > { %v1547_v63 = vmax.f32 %v1413_v48, 1e-07  ;;  %2141 = vperm.xlu1 %4035, %v2083_v16   ;;  %v6392_v23 = vmin.f32 %v4353_v28, 0.99999  ;;  %v3801_v20 = vclamps-f32 %v1929_v42, 15.0  ;;  %v1901_v2 = vmul.f32 0.5, %v7991_v8  ;;  %v4355_v30 = vpop.eup %4354 }
 0x259   : > { %v6390_v56 = vsel %vm1425_vm4, %v7990_v59, %v6220_v50  ;;  %vm1451_vm9 = vcmp.eq.f32.partialorder %v6123_v31, inf  ;;  %vm1516_vm10 = vcmp.eq.f32.partialorder %v6212_v14, 0.0  ;;  %4374 = vrsqrt.f32 %v6380_v57  ;;  %v4357_v1 = vpop.eup %4356 }
 0x25a   : > { %v1549_v3 = vmax.f32 %v6390_v56, 1e-07  ;;  %v1652_v53 = vmul.f32 %v7992_v36, %v1556_v4  ;;  %v1643_v50 = vmul.f32 %v7993_v15, %v1547_v63  ;;  %v1654_v6 = vmul.f32 %v7994_v26, %v1558_v0  ;;  %v4359_v22 = vpop.eup %4358 }
 0x25b   : > { %v1501_v10 = vsel %vm1500_vm5, %v6146_v45, %v1499_v38  ;;  %v2092_v35 = vmul.f32 %v4347_v54, %v6392_v23  ;;  %4376 = vtanh.f32 %v3801_v20  ;;  %v1513_v12 = vmul.f32 %v6300_v19, %v6212_v14  ;;  %v4361_v18 = vpop.eup %4360 }
 0x25c   : > { %v1645_v34 = vmul.f32 %v7995_v49, %v1549_v3  ;;  %v6411_v25 = vmin.f32 %v4357_v1, 0.99999  ;;  %v1940_v17 = vmul.f32 %v7996_v55, %v1652_v53  ;;  %v1931_v60 = vmul.f32 %v7997_v9, %v1643_v50  ;;  %v8001_v53 = vld [vmem:[#allocation39_spill] sm:$0xff]  ;;  %v8002_v50 = vld [vmem:[#allocation24_spill] sm:$0xff]  ;;  %v8004_v9 = vld [vmem:[#allocation21_spill] sm:$0xff] }
 0x25d   : > { %vm1453_vm11 = vcmp.eq.f32.partialorder %v6123_v31, 0.0  ;;  %2186 = vperm.xlu0 %4034, %v2092_v35   ;;  %v6416_v54 = vmin.f32 %v4359_v22, 0.99999  ;;  %4378 = vrcp.f32 %v1545_v40  ;;  %v1942_v7 = vmul.f32 %v7998_v62, %v1654_v6  ;;  %v4363_v38 = vpop.eup %4362  ;;  %v6447_v1 = vld [vmem:[#allocation3 + $0xe0] sm:$0xff] }
 0x25e   : > { %v1933_v58 = vmul.f32 %v1901_v2, %v1645_v34  ;;  %v2084_v19 = vmul.f32 %v4349_v24, %v6411_v25  ;;  %v6422_v48 = vmin.f32 %v4361_v18, 0.99999  ;;  %4380 = vrcp.f32 %v1556_v4  ;;  %v4365_v28 = vpop.eup %4364  ;;  %v8005_v62 = vld [vmem:[#allocation27_spill] sm:$0xff] }
 0x25f   : > { %v3812_v43 = vclamps-f32 %v1940_v17, 15.0  ;;  %v2094_v16 = vmul.f32 %v4351_v52, %v6416_v54  ;;  %4382 = vrcp.f32 %v1547_v63  ;;  %v3803_v11 = vclamps-f32 %v1931_v60, 15.0  ;;  %v4367_v59 = vpop.eup %4366  ;;  %v7999_v63 = vld [vmem:[#allocation33_spill] sm:$0xff] }
 0x260   : > { %v3814_v42 = vclamps-f32 %v1942_v7, 15.0  ;;  %v1515_v5 = vsel %vm1514_vm6, %v6212_v14, %v1513_v12  ;;  %2146 = vperm.xlu1 %4035, %v2084_v19   ;;  %v2085_v40 = vmul.f32 %v4355_v30, %v6422_v48  ;;  %v3805_v24 = vclamps-f32 %v1933_v58, 15.0  ;;  %v4369_v8 = vpop.eup %4368  ;;  %v8006_v19 = vld [vmem:[#allocation40_spill] sm:$0xff] }
 0x261   : > { %4384 = vtanh.f32 %v3812_v43  ;;  %2196 = vperm.xlu0 %4034, %v2094_v16   ;;  %v6429_v4 = vmin.f32 %v4365_v28, 0.99999  ;;  %v1504_v52 = vsel %vm1502_vm7, %v1503_v21, %v1501_v10  ;;  %v1876_v20 = vmul.f32 0.6931472, %v7999_v63  ;;  %v4371_v26 = vpop.eup %4370  ;;  %v8007_v16 = vld [vmem:[#allocation42_spill] sm:$0xff]  ;;  %v8008_v28 = vld [vmem:[#allocation28_spill] sm:$0xff] }
 0x262   : > { %4386 = vtanh.f32 %v3803_v11  ;;  %v1560_v2 = vmax.f32 %v1504_v52, 1e-07  ;;  %v8000_v30 = vand.u32 2147483648, %v6081_v37  ;;  %v1858_v15 = vmul.f32 0.6931472, %v8001_v53  ;;  %v8003_v37 = vld [vmem:[#allocation25_spill] sm:$0xff] }
 0x263   : > { %4388 = vtanh.f32 %v3814_v42  ;;  %vm1113_vm12 = vcmp.eq.f32.partialorder %v8002_v50, inf  ;;  %v1454_v45 = vand.u32 2147483648, %v6123_v31  ;;  %v2096_v21 = vmul.f32 %v4363_v38, %v6429_v4  ;;  %v4373_v10 = vpop.eup %4372  ;;  %v6480_v42 = vld [vmem:[#allocation3 + $0xc0] sm:$0xff]  ;;  %v8010_v53 = vld [vmem:[#allocation17_spill] sm:$0xff] }
 0x264   : > { %v6441_v36 = vsel %vm1439_vm8, %v8000_v30, %v6259_v27  ;;  %4390 = vrcp.f32 %v1558_v0  ;;  %v1912_v6 = vmul.f32 0.5, %v1876_v20  ;;  %2151 = vperm.xlu1 %4035, %v2085_v40   ;;  %v6449_v35 = vmin.f32 %v4371_v26, 0.99999  ;;  %v4677_v40 = vld [vmem:[#allocation3 + $0xb0] sm:$0xff]  ;;  %v8012_v26 = vld [vmem:[#allocation30_spill] sm:$0xff] }
 0x265   : > { %4392 = vtanh.f32 %v3805_v24  ;;  %v1656_v27 = vmul.f32 %v8003_v37, %v1560_v2  ;;  %v1551_v49 = vmax.f32 %v6441_v36, 1e-07  ;;  %vm1115_vm13 = vcmp.eq.f32.partialorder %v8002_v50, 0.0  ;;  %2206 = vperm.xlu0 %4034, %v2096_v21   ;;  %v8009_v24 = vld [vmem:[#allocation31_spill] sm:$0xff] }
 0x266   : > { %v1452_v34 = vsel %vm1451_vm9, %v6123_v31, %v6264_v41  ;;  %v6458_v0 = vmin.f32 %v4373_v10, 0.99999  ;;  %v1903_v22 = vmul.f32 0.5, %v1858_v15  ;;  %v6464_v12 = vsel %vm1516_vm10, %v1517_v44, %v1515_v5  ;;  %v4375_v18 = vpop.eup %4374  ;;  %v8013_v10 = vld [vmem:[#allocation29_spill] sm:$0xff] }
 0x267   : > { %v2087_v55 = vmul.f32 %v4367_v59, %v6449_v35  ;;  %v1944_v17 = vmul.f32 %v1912_v6, %v1656_v27  ;;  %v1724_v60 = vadd.f32 1.0, %v8004_v9  ;;  %4394 = vrsqrt.f32 %v6447_v1 }
 0x268   : > { %v2098_v41 = vmul.f32 %v4369_v8, %v6458_v0  ;;  %4396 = vrcp.f32 %v1549_v3  ;;  %v1647_v7 = vmul.f32 %v8005_v62, %v1551_v49  ;;  %v1562_v58 = vmax.f32 %v6464_v12, 1e-07  ;;  %v4377_v14 = vpop.eup %4376 }
 0x269   : > { %2161 = vperm.xlu1 %4035, %v2087_v55   ;;  %v3816_v44 = vclamps-f32 %v1944_v17, 15.0  ;;  %v1880_v43 = vmul.f32 0.6931472, %v8006_v19  ;;  %v6477_v38 = vsel %vm1453_vm11, %v1454_v45, %v1452_v34  ;;  %v1862_v11 = vmul.f32 0.6931472, %v8007_v16  ;;  %v6494_v34 = vpop.xlane.xlu0 %1289  ;;  %v6499_v55 = vld [vmem:[#allocation3 + $0xd0] sm:$0xff] }
 0x26a   : > { %vm1127_vm14 = vcmp.eq.f32.partialorder %v6480_v42, inf  ;;  %2216 = vperm.xlu0 %4034, %v2098_v41   ;;  %v6483_v56 = vmin.f32 %v4377_v14, 0.99999  ;;  %v1935_v3 = vmul.f32 %v1903_v22, %v1647_v7  ;;  %v1658_v5 = vmul.f32 %v8008_v28, %v1562_v58  ;;  %v4379_v52 = vpop.eup %4378  ;;  %v8015_v14 = vld [vmem:[#allocation32_spill] sm:$0xff] }
 0x26b   : > { %v1112_v59 = vmul.f32 %v4677_v40, %v8009_v24  ;;  %4398 = vtanh.f32 %v3816_v44  ;;  %v1914_v31 = vmul.f32 0.5, %v1880_v43  ;;  %v1553_v63 = vmax.f32 %v6477_v38, 1e-07  ;;  %v4381_v8 = vpop.eup %4380 }
 0x26c   : > { %v1905_v20 = vmul.f32 0.5, %v1862_v11  ;;  %v2089_v30 = vmul.f32 %v4379_v52, %v6483_v56  ;;  %v3807_v36 = vclamps-f32 %v1935_v3, 15.0  ;;  %v8011_v15 = vmax.f32 %v8010_v53, 1e-07  ;;  %v4383_v21 = vpop.eup %4382 }
 0x26d   : > { %v1820_v45 = vmul.f32 %v8012_v26, %v1724_v60  ;;  %v1946_v6 = vmul.f32 %v1914_v31, %v1658_v5  ;;  %v1649_v37 = vmul.f32 %v8013_v10, %v1553_v63  ;;  %vm1129_vm15 = vcmp.eq.f32.partialorder %v6480_v42, 0.0  ;;  %v6525_v24 = vpop.xlane.xlu0 %1293 }
 0x26e   : > { %4400 = vrcp.f32 %v8011_v15  ;;  %v4385_v27 = vpop.eup %4384  ;;  %v1527_v22 = vmul.f32 %v4375_v18, %v6380_v57  ;;  %2171 = vperm.xlu1 %4035, %v2089_v30   ;;  %v1114_v12 = vsel %vm1113_vm12, %v4677_v40, %v1112_v59  ;;  %vm1141_vm0 = vcmp.eq.f32.partialorder %v6499_v55, inf }
 0x26f   : > { %4402 = vrcp.f32 %v1560_v2  ;;  %v4387_v2 = vpop.eup %4386  ;;  %v6502_v17 = vmin.f32 %v4385_v27, 0.99999  ;;  %v3818_v9 = vclamps-f32 %v1946_v6, 15.0  ;;  %v1937_v60 = vmul.f32 %v1905_v20, %v1649_v37 }
 0x270   : > { %4404 = vtanh.f32 %v3807_v36  ;;  %v4389_v41 = vpop.eup %4388  ;;  %v6504_v62 = vmin.f32 %v4387_v2, 0.99999  ;;  %v8014_v18 = vand.u32 2147483648, %v8002_v50  ;;  %v1126_v44 = vmul.f32 %v6480_v42, %v8015_v14 }
 0x271   : > { %4406 = vrcp.f32 %v1551_v49  ;;  %v4391_v19 = vpop.eup %4390  ;;  %vm1528_vm1 = vcmp.eq.f32.partialorder %v6380_v57, inf  ;;  %v2100_v49 = vmul.f32 %v4381_v8, %v6502_v17  ;;  %v6516_v43 = vmin.f32 %v4389_v41, 0.99999  ;;  %v8016_v8 = vld [vmem:[#allocation26_spill] sm:$0xff] }
 0x272   : > { %4408 = vlog2.f32 %v1820_v45  ;;  %v6510_v7 = vsel %vm1115_vm13, %v8014_v18, %v1114_v12  ;;  %v4393_v38 = vpop.eup %4392  ;;  %vm1530_vm2 = vcmp.eq.f32.partialorder %v6380_v57, 0.0  ;;  %v2091_v16 = vmul.f32 %v4383_v21, %v6504_v62  ;;  %v8018_v45 = vld [vmem:[#allocation34_spill] sm:$0xff] }
 0x273   : > { %4410 = vtanh.f32 %v3818_v9  ;;  %v3809_v11 = vclamps-f32 %v1937_v60, 15.0  ;;  %v1203_v50 = vmax.f32 %v6510_v7, 1e-07  ;;  %v1531_v3 = vand.u32 2147483648, %v6380_v57  ;;  %2226 = vperm.xlu0 %4034, %v2100_v49   ;;  %v6567_v9 = vpop.xlane.xlu0 %1297 }
 0x274   : > { %v2102_v28 = vmul.f32 %v4391_v19, %v6516_v43  ;;  %v6523_v5 = vmin.f32 %v4393_v38, 0.99999  ;;  %4412 = vrcp.f32 %v1562_v58  ;;  %v4395_v40 = vpop.eup %4394  ;;  %v1529_v59 = vsel %vm1528_vm1, %v6380_v57, %v1527_v22  ;;  %2181 = vperm.xlu1 %4035, %v2091_v16  }
 0x275   : > { %4414 = vtanh.f32 %v3809_v11  ;;  %v1683_v52 = vmin.f32 %v1203_v50, 0.999999  ;;  %v1128_v31 = vsel %vm1127_vm14, %v6480_v42, %v1126_v44  ;;  %v4397_v20 = vpop.eup %4396  ;;  %v8017_v30 = vand.u32 2147483648, %v8016_v8 }
 0x276   : > { %vm1143_vm3 = vcmp.eq.f32.partialorder %v6499_v55, 0.0  ;;  %v1144_v36 = vand.u32 2147483648, %v6499_v55  ;;  %vm1155_vm4 = vcmp.eq.f32.partialorder %v6447_v1, inf  ;;  %v2093_v53 = vmul.f32 %v4397_v20, %v6523_v5 }
 0x277   : > { %v6539_v58 = vsel %vm1129_vm15, %v8017_v30, %v1128_v31  ;;  %4416 = vrcp.f32 %v1553_v63  ;;  %v1747_v15 = vsub.f32 1.0, %v1683_v52  ;;  %2236 = vperm.xlu0 %4034, %v2102_v28   ;;  %v6549_v42 = vsel %vm1530_vm2, %v1531_v3, %v1529_v59  ;;  %v6583_v3 = vld [vmem:[#allocation3 + $0xf0] sm:$0xff] }
 0x278   : > { %v1205_v26 = vmax.f32 %v6539_v58, 1e-07  ;;  %4418 = vrsqrt.f32 %v6494_v34  ;;  %v1140_v21 = vmul.f32 %v6499_v55, %v8018_v45  ;;  %v1154_v6 = vmul.f32 %v4395_v40, %v6447_v1  ;;  %v4399_v10 = vpop.eup %4398  ;;  %2191 = vperm.xlu1 %4035, %v2093_v53  }
 0x279   : > { %4420 = vrcp.f32 %v1747_v15  ;;  %v1158_v37 = vand.u32 2147483648, %v6447_v1  ;;  %v6557_v22 = vmin.f32 %v4399_v10, 0.99999  ;;  %vm1157_vm5 = vcmp.eq.f32.partialorder %v6447_v1, 0.0 }
 0x27a   : > { %v1685_v63 = vmin.f32 %v1205_v26, 0.999999  ;;  %v1142_v57 = vsel %vm1141_vm0, %v6499_v55, %v1140_v21  ;;  %v1156_v12 = vsel %vm1155_vm4, %v6447_v1, %v1154_v6  ;;  %4422 = vrsqrt.f32 %v6525_v24 }
 0x27b   : > { %v4401_v27 = vpop.eup %4400  ;;  %v1564_v60 = vmax.f32 %v6549_v42, 1e-07  ;;  %v6572_v18 = vsel %vm1143_vm3, %v1144_v36, %v1142_v57  ;;  %v6578_v1 = vsel %vm1157_vm5, %v1158_v37, %v1156_v12  ;;  %v6589_v36 = vpop.xlane.xlu0 %1301  ;;  %v1715_v10 = vadd.f32 1.0, %v1683_v52 }
 0x27c   : > { %v4403_v2 = vpop.eup %4402  ;;  %v1749_v41 = vsub.f32 1.0, %v1685_v63  ;;  %v1207_v19 = vmax.f32 %v6572_v18, 1e-07  ;;  %v1209_v55 = vmax.f32 %v6578_v1, 1e-07  ;;  %vm1465_vm6 = vcmp.eq.f32.partialorder %v6494_v34, inf }
 0x27d   : > { %v4405_v14 = vpop.eup %4404  ;;  %v2104_v44 = vmul.f32 %v4403_v2, %v6557_v22  ;;  %v1660_v59 = vmul.f32 %v4401_v27, %v1564_v60  ;;  %vm1479_vm7 = vcmp.eq.f32.partialorder %v6525_v24, inf  ;;  %vm1467_vm8 = vcmp.eq.f32.partialorder %v6494_v34, 0.0 }
 0x27e   : > { %v4407_v49 = vpop.eup %4406  ;;  %v6576_v38 = vmin.f32 %v4405_v14, 0.99999  ;;  %4424 = vrcp.f32 %v1749_v41  ;;  %v1687_v11 = vmin.f32 %v1207_v19, 0.999999  ;;  %v1689_v15 = vmin.f32 %v1209_v55, 0.999999 }
 0x27f   : > { %v4409_v16 = vpop.eup %4408  ;;  %2246 = vperm.xlu0 %4034, %v2104_v44   ;;  %4426 = vrsqrt.f32 %v6567_v9  ;;  %v1717_v44 = vadd.f32 1.0, %v1685_v63  ;;  %vm1481_vm9 = vcmp.eq.f32.partialorder %v6525_v24, 0.0  ;;  %vm1169_vm10 = vcmp.eq.f32.partialorder %v6583_v3, inf }
 0x280   : > { %v4411_v28 = vpop.eup %4410  ;;  %v2095_v40 = vmul.f32 %v4407_v49, %v6576_v38  ;;  %v1884_v31 = vmul.f32 0.6931472, %v4409_v16  ;;  %v1751_v8 = vsub.f32 1.0, %v1687_v11  ;;  %4428 = vrsqrt.f32 %v6583_v3 }
 0x281   : > { %v6587_v20 = vmin.f32 %v4411_v28, 0.99999  ;;  %v4413_v30 = vpop.eup %4412  ;;  %v1753_v37 = vsub.f32 1.0, %v1689_v15  ;;  %v1172_v58 = vand.u32 2147483648, %v6583_v3  ;;  %vm1171_vm11 = vcmp.eq.f32.partialorder %v6583_v3, 0.0 }
 0x282   : > { %2201 = vperm.xlu1 %4035, %v2095_v40   ;;  %v1916_v53 = vmul.f32 0.5, %v1884_v31  ;;  %v4415_v42 = vpop.eup %4414  ;;  %4430 = vrcp.f32 %v1751_v8  ;;  %v1719_v40 = vadd.f32 1.0, %v1687_v11  ;;  %v1482_v8 = vand.u32 2147483648, %v6525_v24 }
 0x283   : > { %v2106_v45 = vmul.f32 %v4413_v30, %v6587_v20  ;;  %v6595_v21 = vmin.f32 %v4415_v42, 0.99999  ;;  %4432 = vrsqrt.f32 %v6589_v36  ;;  %vm1493_vm12 = vcmp.eq.f32.partialorder %v6567_v9, inf }
 0x284   : > { %v1948_v6 = vmul.f32 %v1916_v53, %v1660_v59  ;;  %v4417_v27 = vpop.eup %4416  ;;  %4434 = vrcp.f32 %v1203_v50  ;;  %v1468_v50 = vand.u32 2147483648, %v6494_v34  ;;  %v1721_v53 = vadd.f32 1.0, %v1689_v15 }
 0x285   : > { %2256 = vperm.xlu0 %4034, %v2106_v45   ;;  %v4419_v57 = vpop.eup %4418  ;;  %v2097_v12 = vmul.f32 %v4417_v27, %v6595_v21  ;;  %4436 = vrcp.f32 %v1753_v37  ;;  %vm1495_vm13 = vcmp.eq.f32.partialorder %v6567_v9, 0.0  ;;  %vm1507_vm14 = vcmp.eq.f32.partialorder %v6589_v36, inf }
 0x286   : > { %v3820_v2 = vclamps-f32 %v1948_v6, 15.0  ;;  %v4421_v41 = vpop.eup %4420  ;;  %v1464_v52 = vmul.f32 %v4419_v57, %v6494_v34  ;;  %vm1509_vm15 = vcmp.eq.f32.partialorder %v6589_v36, 0.0 }
 0x287   : > { %2211 = vperm.xlu1 %4035, %v2097_v12   ;;  %v1802_v14 = vmul.f32 %v4421_v41, %v1715_v10  ;;  %v4423_v49 = vpop.eup %4422  ;;  %v6632_v41 = vpop.xlane.xlu0 %1305 }
 0x288   : > { %4438 = vtanh.f32 %v3820_v2  ;;  %v1478_v28 = vmul.f32 %v4423_v49, %v6525_v24  ;;  %v1496_v2 = vand.u32 2147483648, %v6567_v9  ;;  %vm1521_vm0 = vcmp.eq.f32.partialorder %v6632_v41, inf }
 0x289   : > { %4440 = vrcp.f32 %v1564_v60  ;;  %v1466_v60 = vsel %vm1465_vm6, %v6494_v34, %v1464_v52  ;;  %vm1523_vm1 = vcmp.eq.f32.partialorder %v6632_v41, 0.0 }
 0x28a   : > { %4442 = vlog2.f32 %v1802_v14  ;;  %v1480_v31 = vsel %vm1479_vm7, %v6525_v24, %v1478_v28  ;;  %v1469_v30 = vsel %vm1467_vm8, %v1468_v50, %v1466_v60 }
 0x28b   : > { %v4425_v16 = vpop.eup %4424  ;;  %4444 = vrcp.f32 %v1205_v26  ;;  %v1555_v57 = vmax.f32 %v1469_v30, 1e-07  ;;  %v1483_v12 = vsel %vm1481_vm9, %v1482_v8, %v1480_v31 }
 0x28c   : > { %v1806_v7 = vmul.f32 %v4425_v16, %v1717_v44  ;;  %v4427_v63 = vpop.eup %4426  ;;  %v1557_v16 = vmax.f32 %v1483_v12, 1e-07 }
 0x28d   : > { %v4429_v59 = vpop.eup %4428  ;;  %v1492_v10 = vmul.f32 %v4427_v63, %v6567_v9 }
 0x28e   : > { %4446 = vlog2.f32 %v1806_v7  ;;  %v1168_v11 = vmul.f32 %v4429_v59, %v6583_v3 }
 0x28f   : > { %v4431_v26 = vpop.eup %4430  ;;  %4448 = vrcp.f32 %v1207_v19  ;;  %v1494_v49 = vsel %vm1493_vm12, %v6567_v9, %v1492_v10 }
 0x290   : > { %v1810_v34 = vmul.f32 %v4431_v26, %v1719_v40  ;;  %v4433_v42 = vpop.eup %4432  ;;  %v1170_v45 = vsel %vm1169_vm10, %v6583_v3, %v1168_v11  ;;  %v1510_v40 = vand.u32 2147483648, %v6589_v36  ;;  %v1497_v60 = vsel %vm1495_vm13, %v1496_v2, %v1494_v49 }
 0x291   : > { %v4435_v6 = vpop.eup %4434  ;;  %v6621_v37 = vsel %vm1171_vm11, %v1172_v58, %v1170_v45  ;;  %v1506_v52 = vmul.f32 %v4433_v42, %v6589_v36  ;;  %v1559_v11 = vmax.f32 %v1497_v60, 1e-07 }
 0x292   : > { %4450 = vlog2.f32 %v1810_v34  ;;  %v4437_v27 = vpop.eup %4436  ;;  %v1211_v18 = vmax.f32 %v6621_v37, 1e-07 }
 0x293   : > { %4452 = vrcp.f32 %v1209_v55  ;;  %v1814_v3 = vmul.f32 %v4437_v27, %v1721_v53  ;;  %v1651_v55 = vmul.f32 %v4435_v6, %v1555_v57  ;;  %v1508_v58 = vsel %vm1507_vm14, %v6589_v36, %v1506_v52 }
 0x294   : > { %v1691_v24 = vmin.f32 %v1211_v18, 0.999999  ;;  %v1511_v42 = vsel %vm1509_vm15, %v1510_v40, %v1508_v58  ;;  %v1524_v40 = vand.u32 2147483648, %v6632_v41 }
 0x295   : > { %v4439_v19 = vpop.eup %4438  ;;  %4454 = vlog2.f32 %v1814_v3  ;;  %v1561_v37 = vmax.f32 %v1511_v42, 1e-07  ;;  %v6663_v42 = vld [vmem:[%s7878_s2] ss:$0 sm:$0xff] }
 0x296   : > { %v4441_v15 = vpop.eup %4440  ;;  %v6634_v14 = vmin.f32 %v4439_v19, 0.99999  ;;  %v1755_v7 = vsub.f32 1.0, %v1691_v24  ;;  %4456 = vrsqrt.f32 %v6632_v41  ;;  %v1723_v36 = vadd.f32 1.0, %v1691_v24 }
 0x297   : > { %v4443_v44 = vpop.eup %4442 }
 0x298   : > { %v2108_v1 = vmul.f32 %v4441_v15, %v6634_v14  ;;  %v1866_v28 = vmul.f32 0.6931472, %v4443_v44  ;;  %v4445_v50 = vpop.eup %4444  ;;  %4458 = vrcp.f32 %v1755_v7 }
 0x299   : > { %v1653_v31 = vmul.f32 %v4445_v50, %v1557_v16 }
 0x29a   : > { %2266 = vperm.xlu0 %4034, %v2108_v1   ;;  %v1907_v63 = vmul.f32 0.5, %v1866_v28 }
 0x29b   : > { %v4447_v59 = vpop.eup %4446 }
 0x29c   : > { %v1939_v26 = vmul.f32 %v1907_v63, %v1651_v55  ;;  %v1870_v8 = vmul.f32 0.6931472, %v4447_v59  ;;  %v4449_v30 = vpop.eup %4448 }
 0x29d   : > { %v1655_v6 = vmul.f32 %v4449_v30, %v1559_v11 }
 0x29e   : > { %v3811_v34 = vclamps-f32 %v1939_v26, 15.0  ;;  %v1909_v53 = vmul.f32 0.5, %v1870_v8 }
 0x29f   : > { %v4451_v45 = vpop.eup %4450 }
 0x2a0   : > { %4460 = vtanh.f32 %v3811_v34  ;;  %v1941_v9 = vmul.f32 %v1909_v53, %v1653_v31  ;;  %v1874_v10 = vmul.f32 0.6931472, %v4451_v45  ;;  %v4453_v27 = vpop.eup %4452  ;;  %v4679_v34 = vld [vmem:[#allocation2] sm:$0xff] }
 0x2a1   : > { %4462 = vrcp.f32 %v1555_v57  ;;  %v1657_v2 = vmul.f32 %v4453_v27, %v1561_v37 }
 0x2a2   : > { %v3813_v12 = vclamps-f32 %v1941_v9, 15.0  ;;  %v1911_v19 = vmul.f32 0.5, %v1874_v10  ;;  %v4455_v3 = vpop.eup %4454 }
 0x2a3   : > { %v1878_v44 = vmul.f32 0.6931472, %v4455_v3  ;;  %v4457_v49 = vpop.eup %4456  ;;  %v4680_v3 = vld [vmem:[#allocation2 + $0xd8] sm:$0xff] }
 0x2a4   : > { %4464 = vtanh.f32 %v3813_v12  ;;  %v1943_v15 = vmul.f32 %v1911_v19, %v1655_v6  ;;  %v1520_v50 = vmul.f32 %v4457_v49, %v6632_v41 }
 0x2a5   : > { %4466 = vrcp.f32 %v1557_v16  ;;  %v4459_v52 = vpop.eup %4458  ;;  %v1913_v55 = vmul.f32 0.5, %v1878_v44 }
 0x2a6   : > { %v3815_v1 = vclamps-f32 %v1943_v15, 15.0  ;;  %4468 = vrcp.f32 %v1211_v18  ;;  %v1818_v28 = vmul.f32 %v4459_v52, %v1723_v36  ;;  %v1522_v16 = vsel %vm1521_vm0, %v6632_v41, %v1520_v50 }
 0x2a7   : > { %v1945_v7 = vmul.f32 %v1913_v55, %v1657_v2  ;;  %v1525_v58 = vsel %vm1523_vm1, %v1524_v40, %v1522_v16 }
 0x2a8   : > { %4470 = vtanh.f32 %v3815_v1  ;;  %v1563_v30 = vmax.f32 %v1525_v58, 1e-07 }
 0x2a9   : > { %4472 = vlog2.f32 %v1818_v28  ;;  %v3817_v57 = vclamps-f32 %v1945_v7, 15.0 }
 0x2aa   : > { %4474 = vrcp.f32 %v1559_v11 }
 0x2ab   : > { %4476 = vtanh.f32 %v3817_v57  ;;  %v2117_v8 = vpop.permute.xlu1 %2116 }
 0x2ac   : > { %4478 = vrcp.f32 %v1561_v37  ;;  %v6658_v53 = vmul.f32 %v4679_v34, %v2117_v8 }
 0x2ad   : > { %v4461_v24 = vpop.eup %4460 }
 0x2ae   : > { %v6652_v63 = vmin.f32 %v4461_v24, 0.99999  ;;  %v4463_v18 = vpop.eup %4462  ;;  %v2310_v9 = vmul.f32 %v6663_v42, %v6658_v53 }
 0x2af   : > { %v2122_v37 = vpop.permute.xlu1 %2121 }
 0x2b0   : > { %v2099_v60 = vmul.f32 %v4463_v18, %v6652_v63  ;;  %v6669_v36 = vmul.f32 %v4680_v3, %v2122_v37  ;;  %v4681_v18 = vld [vmem:[#allocation2 + $0x50] sm:$0xff]  ;;  %v4684_v3 = vld [vmem:[#allocation2 + $0xe8] sm:$0xff] }
 0x2b1   : > { %v4465_v59 = vpop.eup %4464 }
 0x2b2   : > { %2221 = vperm.xlu1 %4035, %v2099_v60   ;;  %v6655_v26 = vmin.f32 %v4465_v59, 0.99999  ;;  %v4467_v31 = vpop.eup %4466  ;;  %v2311_v49 = vmul.f32 %v6663_v42, %v6669_v36 }
 0x2b3   : > { %v4469_v41 = vpop.eup %4468 }
 0x2b4   : > { %v2101_v11 = vmul.f32 %v4467_v31, %v6655_v26  ;;  %v1659_v12 = vmul.f32 %v4469_v41, %v1563_v30 }
 0x2b5   : > { %v4471_v45 = vpop.eup %4470 }
 0x2b6   : > { %2231 = vperm.xlu1 %4035, %v2101_v11   ;;  %v4473_v6 = vpop.eup %4472  ;;  %v6667_v10 = vmin.f32 %v4471_v45, 0.99999  ;;  %v4682_v11 = vld [vmem:[#allocation2 + $0x30] sm:$0xff] }
 0x2b7   : > { %v4475_v27 = vpop.eup %4474  ;;  %v1882_v19 = vmul.f32 0.6931472, %v4473_v6  ;;  %v2127_v50 = vpop.permute.xlu1 %2126  ;;  %v4683_v6 = vld [vmem:[#allocation2 + $0x80] sm:$0xff] }
 0x2b8   : > { %v2103_v15 = vmul.f32 %v4475_v27, %v6667_v10  ;;  %v4477_v2 = vpop.eup %4476 }
 0x2b9   : > { %2343 = vadd.xlane.f32.xlu0 %v2310_v9  ;;  %v1915_v44 = vmul.f32 0.5, %v1882_v19  ;;  %v6674_v52 = vmin.f32 %v4477_v2, 0.99999  ;;  %v4479_v1 = vpop.eup %4478  ;;  %v2112_v9 = vpop.permute.xlu0 %2111 }
 0x2ba   : > { %2241 = vperm.xlu1 %4035, %v2103_v15  }
 0x2bb   : > { %v1947_v55 = vmul.f32 %v1915_v44, %v1659_v12  ;;  %v2105_v28 = vmul.f32 %v4479_v1, %v6674_v52 }
 0x2bd   : > { %2345 = vadd.xlane.f32.xlu0 %v2311_v49  ;;  %v3819_v7 = vclamps-f32 %v1947_v55, 15.0  ;;  %v4685_v49 = vld [vmem:[#allocation2 + $0x60] sm:$0xff] }
 0x2be   : > { %2251 = vperm.xlu1 %4035, %v2105_v28   ;;  %v4686_v28 = vld [vmem:[#allocation2 + $0xb0] sm:$0xff] }
 0x2bf   : > { %4480 = vtanh.f32 %v3819_v7  ;;  %v6698_v7 = vmul.f32 %v4686_v28, %v2112_v9 }
 0x2c0   : > { %4482 = vrcp.f32 %v1563_v30 }
 0x2c2   : > { %v2157_v19 = vpop.permute.xlu0 %2156 }
 0x2c8   : > { %v2132_v40 = vpop.permute.xlu1 %2131 }
 0x2c9   : > { %v6679_v60 = vmul.f32 %v4681_v18, %v2132_v40  ;;  %v4687_v18 = vld [vmem:[#allocation2 + $0x18] sm:$0xff] }
 0x2cb   : > { %v2313_v58 = vmul.f32 %v6663_v42, %v6679_v60 }
 0x2cc   : > { %v4481_v57 = vpop.eup %4480 }
 0x2cd   : > { %v6677_v24 = vmin.f32 %v4481_v57, 0.99999  ;;  %v4483_v16 = vpop.eup %4482  ;;  %2349 = vadd.xlane.f32.xlu0 %v2313_v58  ;;  %v2167_v55 = vpop.permute.xlu0 %2166  ;;  %v4688_v58 = vld [vmem:[#allocation2 + $0x8] sm:$0xff] }
 0x2ce   : > { %v2137_v31 = vpop.permute.xlu1 %2136 }
 0x2cf   : > { %v2107_v59 = vmul.f32 %v4483_v16, %v6677_v24  ;;  %v2309_v16 = vmul.f32 %v6663_v42, %v6698_v7 }
 0x2d1   : > { %2261 = vperm.xlu1 %4035, %v2107_v59   ;;  %v6704_v59 = vmul.f32 %v4687_v18, %v2127_v50 }
 0x2d3   : > { %v2142_v8 = vpop.permute.xlu1 %2141  ;;  %v2312_v9 = vmul.f32 %v6663_v42, %v6704_v59 }
 0x2d4   : > { %v6684_v30 = vmul.f32 %v4682_v11, %v2142_v8  ;;  %v2177_v11 = vpop.permute.xlu0 %2176 }
 0x2d6   : > { %8019 = vst [vmem:[#allocation36_spill] sm:$0xff] %v6684_v30  ;;  %v2315_v34 = vmul.f32 %v6663_v42, %v6684_v30 }
 0x2d8   : > { %2353 = vadd.xlane.f32.xlu0 %v2315_v34 }
 0x2db   : > { %v2147_v41 = vpop.permute.xlu1 %2146 }
 0x2df   : > { %v2152_v45 = vpop.permute.xlu1 %2151 }
 0x2e0   : > { %v6688_v37 = vmul.f32 %v4683_v6, %v2152_v45  ;;  %v4689_v6 = vld [vmem:[#allocation2 + $0x68] sm:$0xff] }
 0x2e2   : > { %8020 = vst [vmem:[#allocation15_spill] sm:$0xff] %v6688_v37  ;;  %v2317_v27 = vmul.f32 %v6663_v42, %v6688_v37 }
 0x2e4   : > { %v2162_v12 = vpop.permute.xlu1 %2161  ;;  %2357 = vadd.xlane.f32.xlu0 %v2317_v27  ;;  %v6712_v27 = vmul.f32 %v4689_v6, %v2137_v31 }
 0x2e5   : > { %v6692_v15 = vmul.f32 %v4684_v3, %v2162_v12  ;;  %v4690_v12 = vld [vmem:[#allocation2 + $0x38] sm:$0xff] }
 0x2e7   : > { %8021 = vst [vmem:[#allocation16_spill] sm:$0xff] %v6692_v15  ;;  %v2319_v2 = vmul.f32 %v6663_v42, %v6692_v15 }
 0x2e9   : > { %v2172_v44 = vpop.permute.xlu1 %2171  ;;  %2361 = vadd.xlane.f32.xlu0 %v2319_v2  ;;  %v2187_v2 = vpop.permute.xlu0 %2186 }
 0x2ea   : > { %v6696_v1 = vmul.f32 %v4685_v49, %v2172_v44  ;;  %v2314_v44 = vmul.f32 %v6663_v42, %v6712_v27  ;;  %v4691_v49 = vld [vmem:[#allocation2 + $0x48] sm:$0xff] }
 0x2eb   : > { %v6720_v28 = vmul.f32 %v4691_v49, %v2147_v41 }
 0x2ec   : > { %8022 = vst [vmem:[#allocation35_spill] sm:$0xff] %v6696_v1  ;;  %v2321_v57 = vmul.f32 %v6663_v42, %v6696_v1 }
 0x2ed   : > { %8025 = vst [vmem:[#allocation38_spill] sm:$0xff] %v6720_v28  ;;  %v2316_v31 = vmul.f32 %v6663_v42, %v6720_v28  ;;  %v2197_v18 = vpop.permute.xlu0 %2196 }
 0x2ee   : > { %2365 = vadd.xlane.f32.xlu0 %v2321_v57 }
 0x2ef   : > { %v2182_v40 = vpop.permute.xlu1 %2181 }
 0x2f0   : > { %v6706_v8 = vmul.f32 %v4688_v58, %v2182_v40  ;;  %v4692_v40 = vld [vmem:[#allocation2 + $0x40] sm:$0xff]  ;;  %v4693_v58 = vld [vmem:[#allocation2 + $0x88] sm:$0xff] }
 0x2f1   : > { %v2207_v49 = vpop.permute.xlu0 %2206 }
 0x2f2   : > { %8023 = vst [vmem:[#allocation37_spill] sm:$0xff] %v6706_v8  ;;  %v2323_v34 = vmul.f32 %v6663_v42, %v6706_v8 }
 0x2f3   : > { %v2192_v45 = vpop.permute.xlu1 %2191 }
 0x2f4   : > { %v6714_v3 = vmul.f32 %v4690_v12, %v2192_v45  ;;  %2369 = vadd.xlane.f32.xlu0 %v2323_v34  ;;  %v6726_v34 = vmul.f32 %v4693_v58, %v2157_v19  ;;  %v4697_v58 = vld [vmem:[#allocation2 + $0x78] sm:$0xff] }
 0x2f5   : > { %2341 = vadd.xlane.f32.xlu1 %v2309_v16 }
 0x2f6   : > { %8024 = vst [vmem:[#allocation18_spill] sm:$0xff] %v6714_v3  ;;  %v2325_v50 = vmul.f32 %v6663_v42, %v6714_v3  ;;  %8027 = vst [vmem:[#allocation19_spill] sm:$0xff] %v6726_v34  ;;  %v2318_v12 = vmul.f32 %v6663_v42, %v6726_v34 }
 0x2f8   : > { %2373 = vadd.xlane.f32.xlu0 %v2325_v50  ;;  %v4695_v50 = vld [vmem:[#allocation2 + $0xe0] sm:$0xff] }
 0x2f9   : > { %2347 = vadd.xlane.f32.xlu1 %v2312_v9  ;;  %v4694_v9 = vld [vmem:[#allocation2 + $0xb8] sm:$0xff] }
 0x2fa   : > { %v6730_v6 = vmul.f32 %v4694_v9, %v2167_v55  ;;  %v2217_v55 = vpop.permute.xlu0 %2216  ;;  %v4698_v9 = vld [vmem:[#allocation2 + $0x58] sm:$0xff] }
 0x2fc   : > { %8028 = vst [vmem:[#allocation20_spill] sm:$0xff] %v6730_v6 }
 0x2fd   : > { %v2202_v57 = vpop.permute.xlu1 %2201  ;;  %2351 = vadd.xlane.f32.xlu1 %v2314_v44 }
 0x2fe   : > { %v6724_v16 = vmul.f32 %v4692_v40, %v2202_v57  ;;  %v4696_v57 = vld [vmem:[#allocation2 + $0xf0] sm:$0xff] }
 0x2ff   : > { %v6738_v40 = vmul.f32 %v4696_v57, %v2177_v11  ;;  %v4699_v57 = vld [vmem:[#allocation2 + $0xc8] sm:$0xff] }
 0x300   : > { %8026 = vst [vmem:[#allocation45_spill] sm:$0xff] %v6724_v16  ;;  %v2327_v45 = vmul.f32 %v6663_v42, %v6724_v16 }
 0x301   : > { %2355 = vadd.xlane.f32.xlu1 %v2316_v31  ;;  %8030 = vst [vmem:[#allocation23_spill] sm:$0xff] %v6738_v40  ;;  %v2320_v31 = vmul.f32 %v6663_v42, %v6730_v6 }
 0x302   : > { %2377 = vadd.xlane.f32.xlu0 %v2327_v45  ;;  %v2212_v41 = vpop.permute.xlu1 %2211  ;;  %v6742_v45 = vmul.f32 %v4697_v58, %v2187_v2 }
 0x303   : > { %v6734_v44 = vmul.f32 %v4695_v50, %v2212_v41  ;;  %v2322_v41 = vmul.f32 %v6663_v42, %v6738_v40  ;;  %v2227_v50 = vpop.permute.xlu0 %2226 }
 0x304   : > { %8031 = vst [vmem:[#allocation41_spill] sm:$0xff] %v6742_v45  ;;  %v2324_v11 = vmul.f32 %v6663_v42, %v6742_v45 }
 0x305   : > { %8029 = vst [vmem:[#allocation22_spill] sm:$0xff] %v6734_v44  ;;  %2359 = vadd.xlane.f32.xlu1 %v2318_v12  ;;  %v2329_v19 = vmul.f32 %v6663_v42, %v6734_v44  ;;  %v6746_v12 = vmul.f32 %v4698_v9, %v2197_v18  ;;  %v6750_v44 = vmul.f32 %v4699_v57, %v2207_v49  ;;  %v4702_v57 = vld [vmem:[#allocation2 + $0xd0] sm:$0xff] }
 0x307   : > { %2381 = vadd.xlane.f32.xlu0 %v2329_v19  ;;  %8032 = vst [vmem:[#allocation43_spill] sm:$0xff] %v6746_v12  ;;  %8033 = vst [vmem:[#allocation44_spill] sm:$0xff] %v6750_v44  ;;  %v2326_v19 = vmul.f32 %v6663_v42, %v6746_v12  ;;  %v2237_v2 = vpop.permute.xlu0 %2236  ;;  %v2328_v18 = vmul.f32 %v6663_v42, %v6750_v44 }
 0x308   : > { %v6762_v16 = vmul.f32 %v4702_v57, %v2237_v2 }
 0x309   : > { %2363 = vadd.xlane.f32.xlu1 %v2320_v31  ;;  %v4700_v31 = vld [vmem:[#allocation2 + $0x90] sm:$0xff] }
 0x30a   : > { %v6754_v58 = vmul.f32 %v4700_v31, %v2217_v55  ;;  %8036 = vst [vmem:[#allocation24_spill] sm:$0xff] %v6762_v16  ;;  %v4703_v31 = vld [vmem:[#allocation2 + $0x28] sm:$0xff] }
 0x30b   : > { %v2247_v49 = vpop.permute.xlu0 %2246 }
 0x30c   : > { %8034 = vst [vmem:[#allocation33_spill] sm:$0xff] %v6754_v58  ;;  %v6766_v3 = vmul.f32 %v4703_v31, %v2247_v49  ;;  %v4706_v31 = vld [vmem:[#allocation2 + $0x70] sm:$0xff] }
 0x30d   : > { %2367 = vadd.xlane.f32.xlu1 %v2322_v41  ;;  %v4701_v41 = vld [vmem:[#allocation2 + $0xc0] sm:$0xff] }
 0x30e   : > { %v6758_v9 = vmul.f32 %v4701_v41, %v2227_v50  ;;  %8037 = vst [vmem:[#allocation25_spill] sm:$0xff] %v6766_v3  ;;  %v2334_v50 = vmul.f32 %v6663_v42, %v6762_v16 }
 0x30f   : > { %v2257_v55 = vpop.permute.xlu0 %2256 }
 0x310   : > { %8035 = vst [vmem:[#allocation39_spill] sm:$0xff] %v6758_v9 }
 0x311   : > { %2371 = vadd.xlane.f32.xlu1 %v2324_v11  ;;  %v2330_v11 = vmul.f32 %v6663_v42, %v6754_v58 }
 0x315   : > { %2375 = vadd.xlane.f32.xlu1 %v2326_v19  ;;  %v2332_v19 = vmul.f32 %v6663_v42, %v6758_v9  ;;  %v2267_v2 = vpop.permute.xlu0 %2266 }
 0x319   : > { %2379 = vadd.xlane.f32.xlu1 %v2328_v18  ;;  %v4704_v18 = vld [vmem:[#allocation2 + $0xf8] sm:$0xff] }
 0x31a   : > { %v6770_v41 = vmul.f32 %v4704_v18, %v2257_v55 }
 0x31c   : > { %8038 = vst [vmem:[#allocation21_spill] sm:$0xff] %v6770_v41  ;;  %v2338_v57 = vmul.f32 %v6663_v42, %v6770_v41  ;;  %v4709_v41 = vld [vmem:[#allocation2 + $0xa0] sm:$0xff] }
 0x31d   : > { %2383 = vadd.xlane.f32.xlu1 %v2330_v11  ;;  %v2336_v11 = vmul.f32 %v6663_v42, %v6766_v3  ;;  %v4707_v3 = vld [vmem:[#allocation2 + $0xa8] sm:$0xff] }
 0x321   : > { %2387 = vadd.xlane.f32.xlu1 %v2332_v19  ;;  %v4705_v19 = vld [vmem:[#allocation2 + $0x98] sm:$0xff] }
 0x322   : > { %v6776_v9 = vmul.f32 %v4705_v19, %v2267_v2 }
 0x324   : > { %8039 = vst [vmem:[#allocation27_spill] sm:$0xff] %v6776_v9  ;;  %v2340_v55 = vmul.f32 %v6663_v42, %v6776_v9 }
 0x325   : > { %2391 = vadd.xlane.f32.xlu1 %v2334_v50 }
 0x329   : > { %2395 = vadd.xlane.f32.xlu1 %v2336_v11 }
 0x32d   : > { %v2222_v49 = vpop.permute.xlu1 %2221  ;;  %2399 = vadd.xlane.f32.xlu1 %v2338_v57 }
 0x32e   : > { %v6778_v58 = vmul.f32 %v4706_v31, %v2222_v49  ;;  %v4708_v49 = vld [vmem:[#allocation2 + $0x10] sm:$0xff] }
 0x330   : > { %8040 = vst [vmem:[#allocation40_spill] sm:$0xff] %v6778_v58  ;;  %v2331_v50 = vmul.f32 %v6663_v42, %v6778_v58 }
 0x331   : > { %v2232_v18 = vpop.permute.xlu1 %2231  ;;  %2403 = vadd.xlane.f32.xlu1 %v2340_v55  ;;  %v2438_v55 = vmul.f32 %v6125_v47, %v6125_v47  ;;  %v4710_v47 = vld [vmem:[#allocation2 + $0x20] sm:$0xff] }
 0x332   : > { %v6784_v11 = vmul.f32 %v4707_v3, %v2232_v18  ;;  %2385 = vadd.xlane.f32.xlu0 %v2331_v50 }
 0x334   : > { %8041 = vst [vmem:[#allocation42_spill] sm:$0xff] %v6784_v11  ;;  %v2333_v2 = vmul.f32 %v6663_v42, %v6784_v11 }
 0x335   : > { %v2242_v19 = vpop.permute.xlu1 %2241 }
 0x336   : > { %2389 = vadd.xlane.f32.xlu0 %v2333_v2  ;;  %v6788_v31 = vmul.f32 %v4708_v49, %v2242_v19  ;;  %v6798_v2 = vstv %s2302_s30  ;;  %v2439_v19 = vmul.f32 %v6142_v13, %v6142_v13 }
 0x337   : > { %v2503_v49 = vmul.f32 %v6798_v2, %v2438_v55 }
 0x338   : > { %8042 = vst [vmem:[#allocation28_spill] sm:$0xff] %v6788_v31  ;;  %v2335_v57 = vmul.f32 %v6663_v42, %v6788_v31 }
 0x339   : > { %v2252_v9 = vpop.permute.xlu1 %2251 }
 0x33a   : > { %v6792_v16 = vmul.f32 %v4709_v41, %v2252_v9  ;;  %2393 = vadd.xlane.f32.xlu0 %v2335_v57 }
 0x33c   : > { %8043 = vst [vmem:[#allocation31_spill] sm:$0xff] %v6792_v16  ;;  %v2337_v3 = vmul.f32 %v6663_v42, %v6792_v16  ;;  %v2504_v16 = vmul.f32 %v6798_v2, %v2439_v19 }
 0x33e   : > { %2397 = vadd.xlane.f32.xlu0 %v2337_v3 }
 0x342   : > { %v2344_v50 = vpop.xlane.xlu0 %2343 }
 0x343   : > { %v2406_v18 = vmul.f32 2.0, %v2344_v50 }
 0x345   : > { %v2470_v9 = vadd.f32 1.0, %v2406_v18  ;;  %v2855_v18 = vsub.f32 1.0, %v2438_v55 }
 0x346   : > { %v2346_v41 = vpop.xlane.xlu0 %2345 }
 0x347   : > { %v2535_v57 = vadd.f32 %v2503_v49, %v2470_v9  ;;  %v2407_v31 = vmul.f32 2.0, %v2346_v41  ;;  %v2599_v13 = vadd.f32 %v6798_v2, %v2470_v9 }
 0x349   : > { %4484 = vrcp.f32 %v2535_v57  ;;  %v2471_v3 = vadd.f32 1.0, %v2407_v31 }
 0x34b   : > { %v2536_v11 = vadd.f32 %v2504_v16, %v2471_v3  ;;  %v2600_v57 = vadd.f32 %v6798_v2, %v2471_v3  ;;  %v2856_v16 = vsub.f32 1.0, %v2439_v19 }
 0x34c   : > { %v2262_v58 = vpop.permute.xlu1 %2261 }
 0x34d   : > { %4486 = vrcp.f32 %v2536_v11  ;;  %v6804_v50 = vmul.f32 %v4710_v47, %v2262_v58  ;;  %v2441_v58 = vmul.f32 %v6310_v46, %v6310_v46 }
 0x34f   : > { %8044 = vst [vmem:[#allocation17_spill] sm:$0xff] %v6804_v50  ;;  %v2339_v44 = vmul.f32 %v6663_v42, %v6804_v50  ;;  %v2506_v55 = vmul.f32 %v6798_v2, %v2441_v58 }
 0x351   : > { %2401 = vadd.xlane.f32.xlu0 %v2339_v44 }
 0x356   : > { %v4485_v12 = vpop.eup %4484  ;;  %v2350_v42 = vpop.xlane.xlu0 %2349 }
 0x357   : > { %v2631_v49 = vmul.f32 %v4485_v12, %v2599_v13  ;;  %v6809_v41 = vmul.f32 %v4485_v12, %v2855_v18  ;;  %v2409_v44 = vmul.f32 2.0, %v2350_v42  ;;  %v2443_v12 = vmul.f32 %v6356_v51, %v6356_v51 }
 0x358   : > { %v6827_v51 = vmul.f32 %v6449_v35, %v6449_v35 }
 0x359   : > { %2669 = vperm.xlu1 %4035, %v2631_v49   ;;  %v2473_v9 = vadd.f32 1.0, %v2409_v44  ;;  %v2508_v18 = vmul.f32 %v6798_v2, %v2443_v12  ;;  %v2860_v35 = vsub.f32 1.0, %v2443_v12  ;;  %v6847_v12 = vmul.f32 %v6504_v62, %v6504_v62 }
 0x35a   : > { %v4487_v31 = vpop.eup %4486 }
 0x35b   : > { %v2632_v11 = vmul.f32 %v4487_v31, %v2600_v57  ;;  %v6814_v47 = vmul.f32 %v4487_v31, %v2856_v16  ;;  %v2538_v13 = vadd.f32 %v2506_v55, %v2473_v9  ;;  %v2445_v57 = vmul.f32 %v6422_v48, %v6422_v48 }
 0x35c   : > { %v2602_v16 = vadd.f32 %v6798_v2, %v2473_v9  ;;  %v2858_v31 = vsub.f32 1.0, %v2441_v58  ;;  %v2512_v58 = vmul.f32 %v6798_v2, %v6827_v51  ;;  %v2516_v62 = vmul.f32 %v6798_v2, %v6847_v12 }
 0x35d   : > { %2674 = vperm.xlu1 %4035, %v2632_v11   ;;  %4488 = vrcp.f32 %v2538_v13 }
 0x361   : > { %v2354_v3 = vpop.xlane.xlu0 %2353 }
 0x362   : > { %v2411_v19 = vmul.f32 2.0, %v2354_v3  ;;  %v2510_v3 = vmul.f32 %v6798_v2, %v2445_v57 }
 0x364   : > { %v2475_v49 = vadd.f32 1.0, %v2411_v19 }
 0x366   : > { %v2540_v46 = vadd.f32 %v2508_v18, %v2475_v49 }
 0x368   : > { %4490 = vrcp.f32 %v2540_v46 }
 0x36a   : > { %v4489_v11 = vpop.eup %4488 }
 0x36b   : > { %v2634_v44 = vmul.f32 %v4489_v11, %v2602_v16  ;;  %v6823_v13 = vmul.f32 %v4489_v11, %v2858_v31  ;;  %v6834_v16 = vmul.f32 %v6483_v56, %v6483_v56  ;;  %v2604_v31 = vadd.f32 %v6798_v2, %v2475_v49 }
 0x36d   : > { %v2358_v42 = vpop.xlane.xlu0 %2357  ;;  %2684 = vperm.xlu1 %4035, %v2634_v44  }
 0x36e   : > { %v2413_v55 = vmul.f32 2.0, %v2358_v42 }
 0x370   : > { %v2477_v19 = vadd.f32 1.0, %v2413_v55 }
 0x372   : > { %v2362_v18 = vpop.xlane.xlu0 %2361  ;;  %v2542_v46 = vadd.f32 %v2510_v3, %v2477_v19  ;;  %v2514_v3 = vmul.f32 %v6798_v2, %v6834_v16 }
 0x373   : > { %v2415_v48 = vmul.f32 2.0, %v2362_v18 }
 0x374   : > { %4492 = vrcp.f32 %v2542_v46  ;;  %v8045_v46 = vld [vmem:[#allocation46_spill] sm:$0xff] }
 0x375   : > { %v2479_v9 = vadd.f32 1.0, %v2415_v48  ;;  %v4491_v11 = vpop.eup %4490  ;;  %v6843_v56 = vmul.f32 %v8045_v46, %v8045_v46  ;;  %v2606_v46 = vadd.f32 %v6798_v2, %v2477_v19 }
 0x376   : > { %v2636_v55 = vmul.f32 %v4491_v11, %v2604_v31  ;;  %v6837_v8 = vmul.f32 %v4491_v11, %v2860_v35  ;;  %v6851_v35 = vmul.f32 %v6237_v33, %v6237_v33  ;;  %v6855_v11 = vmul.f32 %v6523_v5, %v6523_v5 }
 0x377   : > { %v2544_v42 = vadd.f32 %v2512_v58, %v2479_v9  ;;  %v2366_v50 = vpop.xlane.xlu0 %2365  ;;  %v2862_v33 = vsub.f32 1.0, %v2445_v57 }
 0x378   : > { %v2417_v44 = vmul.f32 2.0, %v2366_v50  ;;  %2694 = vperm.xlu1 %4035, %v2636_v55   ;;  %v2505_v19 = vmul.f32 %v6798_v2, %v6851_v35  ;;  %v2518_v57 = vmul.f32 %v6798_v2, %v6855_v11 }
 0x379   : > { %4494 = vrcp.f32 %v2544_v42  ;;  %v2502_v42 = vmul.f32 %v6798_v2, %v6843_v56 }
 0x37a   : > { %v2481_v18 = vadd.f32 1.0, %v2417_v44 }
 0x37c   : > { %v2546_v49 = vadd.f32 %v2514_v3, %v2481_v18 }
 0x37d   : > { %v2370_v58 = vpop.xlane.xlu0 %2369 }
 0x37e   : > { %v2342_v48 = vpop.xlane.xlu1 %2341  ;;  %4496 = vrcp.f32 %v2546_v49  ;;  %v2419_v31 = vmul.f32 2.0, %v2370_v58 }
 0x37f   : > { %v2405_v50 = vmul.f32 2.0, %v2342_v48 }
 0x380   : > { %v6863_v44 = vadd.f32 1.0, %v2419_v31 }
 0x381   : > { %v6859_v55 = vadd.f32 1.0, %v2405_v50  ;;  %v2374_v49 = vpop.xlane.xlu0 %2373  ;;  %v4493_v48 = vpop.eup %4492  ;;  %v6870_v50 = vmul.f32 %v6340_v32, %v6340_v32  ;;  %v2864_v32 = vsub.f32 1.0, %v6827_v51 }
 0x382   : > { %v2348_v3 = vpop.xlane.xlu1 %2347  ;;  %v2548_v1 = vadd.f32 %v2516_v62, %v6863_v44  ;;  %v2638_v45 = vmul.f32 %v4493_v48, %v2606_v46  ;;  %v2421_v40 = vmul.f32 2.0, %v2374_v49  ;;  %v6872_v15 = vmul.f32 %v4493_v48, %v2862_v33 }
 0x383   : > { %v2534_v58 = vadd.f32 %v2502_v42, %v6859_v55  ;;  %v2408_v5 = vmul.f32 2.0, %v2348_v3  ;;  %v2608_v62 = vadd.f32 %v6798_v2, %v2479_v9  ;;  %v6886_v49 = vmul.f32 %v6411_v25, %v6411_v25 }
 0x384   : > { %v6881_v3 = vadd.f32 1.0, %v2421_v40  ;;  %2704 = vperm.xlu1 %4035, %v2638_v45   ;;  %v2507_v45 = vmul.f32 %v6798_v2, %v6870_v50 }
 0x385   : > { %4498 = vrcp.f32 %v2534_v58  ;;  %v6876_v31 = vadd.f32 1.0, %v2408_v5  ;;  %v6891_v58 = vmul.f32 %v6576_v38, %v6576_v38  ;;  %v2610_v38 = vadd.f32 %v6798_v2, %v2481_v18 }
 0x386   : > { %v2352_v42 = vpop.xlane.xlu1 %2351  ;;  %4500 = vrcp.f32 %v2548_v1  ;;  %v4495_v46 = vpop.eup %4494  ;;  %v2550_v1 = vadd.f32 %v2518_v57, %v6881_v3  ;;  %v6904_v57 = vmul.f32 %v6289_v29, %v6289_v29  ;;  %v6919_v29 = vmul.f32 %v6595_v21, %v6595_v21 }
 0x387   : > { %v2537_v33 = vadd.f32 %v2505_v19, %v6876_v31  ;;  %v2410_v48 = vmul.f32 2.0, %v2352_v42  ;;  %v2640_v5 = vmul.f32 %v4495_v46, %v2608_v62  ;;  %v6894_v40 = vmul.f32 %v4495_v46, %v2864_v32 }
 0x388   : > { %v2509_v32 = vmul.f32 %v6798_v2, %v6886_v49  ;;  %v2520_v46 = vmul.f32 %v6798_v2, %v6891_v58  ;;  %v2598_v21 = vadd.f32 %v6798_v2, %v6859_v55  ;;  %v2522_v55 = vmul.f32 %v6798_v2, %v6919_v29 }
 0x389   : > { %4502 = vrcp.f32 %v2537_v33  ;;  %v6898_v51 = vadd.f32 1.0, %v2410_v48  ;;  %2714 = vperm.xlu1 %4035, %v2640_v5   ;;  %v2866_v33 = vsub.f32 1.0, %v6834_v16  ;;  %v6925_v16 = vmul.f32 %v6337_v39, %v6337_v39 }
 0x38a   : > { %v2356_v25 = vpop.xlane.xlu1 %2355  ;;  %4504 = vrcp.f32 %v2550_v1  ;;  %v2612_v39 = vadd.f32 %v6798_v2, %v6863_v44 }
 0x38b   : > { %v2378_v9 = vpop.xlane.xlu0 %2377  ;;  %v2539_v19 = vadd.f32 %v2507_v45, %v6898_v51  ;;  %v2412_v42 = vmul.f32 2.0, %v2356_v25  ;;  %v4497_v6 = vpop.eup %4496 }
 0x38c   : > { %v2423_v62 = vmul.f32 2.0, %v2378_v9  ;;  %v2642_v5 = vmul.f32 %v4497_v6, %v2610_v38  ;;  %v6915_v45 = vmul.f32 %v4497_v6, %v2866_v33  ;;  %v2511_v6 = vmul.f32 %v6798_v2, %v6904_v57 }
 0x38d   : > { %4506 = vrcp.f32 %v2539_v19  ;;  %v6911_v48 = vadd.f32 1.0, %v2412_v42  ;;  %v6929_v19 = vmul.f32 %v6345_v61, %v6345_v61  ;;  %v2854_v61 = vsub.f32 1.0, %v6843_v56 }
 0x38e   : > { %v6913_v1 = vadd.f32 1.0, %v2423_v62  ;;  %v2360_v18 = vpop.xlane.xlu1 %2359  ;;  %2724 = vperm.xlu1 %4035, %v2642_v5   ;;  %v2868_v33 = vsub.f32 1.0, %v6847_v12  ;;  %v2513_v56 = vmul.f32 %v6798_v2, %v6925_v16 }
 0x38f   : > { %v2541_v25 = vadd.f32 %v2509_v32, %v6911_v48  ;;  %v2414_v9 = vmul.f32 2.0, %v2360_v18 }
 0x390   : > { %v2552_v37 = vadd.f32 %v2520_v46, %v6913_v1  ;;  %v2382_v42 = vpop.xlane.xlu0 %2381 }
 0x391   : > { %4508 = vrcp.f32 %v2541_v25  ;;  %v6935_v38 = vadd.f32 1.0, %v2414_v9  ;;  %v2425_v62 = vmul.f32 2.0, %v2382_v42 }
 0x392   : > { %v4499_v32 = vpop.eup %4498  ;;  %v2364_v46 = vpop.xlane.xlu1 %2363  ;;  %4510 = vrcp.f32 %v2552_v37  ;;  %v2601_v37 = vadd.f32 %v6798_v2, %v6876_v31 }
 0x393   : > { %v4501_v5 = vpop.eup %4500  ;;  %v2630_v18 = vmul.f32 %v4499_v32, %v2598_v21  ;;  %v2543_v30 = vadd.f32 %v2511_v6, %v6935_v38  ;;  %v2416_v34 = vmul.f32 2.0, %v2364_v46  ;;  %v6944_v9 = vadd.f32 1.0, %v2425_v62 }
 0x394   : > { %v2644_v25 = vmul.f32 %v4501_v5, %v2612_v39  ;;  %v6946_v42 = vmul.f32 %v4499_v32, %v2854_v61  ;;  %v6948_v28 = vmul.f32 %v4501_v5, %v2868_v33  ;;  %v2614_v21 = vadd.f32 %v6798_v2, %v6881_v3 }
 0x395   : > { %2664 = vperm.xlu0 %4034, %v2630_v18   ;;  %4512 = vrcp.f32 %v2543_v30  ;;  %v6954_v12 = vadd.f32 1.0, %v2416_v34  ;;  %v2554_v62 = vadd.f32 %v2522_v55, %v6944_v9  ;;  %v2857_v32 = vsub.f32 1.0, %v6851_v35 }
 0x396   : > { %v4503_v44 = vpop.eup %4502  ;;  %v2368_v6 = vpop.xlane.xlu1 %2367  ;;  %2734 = vperm.xlu1 %4035, %v2644_v25   ;;  %v2870_v46 = vsub.f32 1.0, %v6855_v11  ;;  %v6963_v30 = vmul.f32 %v6392_v23, %v6392_v23  ;;  %v2603_v35 = vadd.f32 %v6798_v2, %v6898_v51  ;;  %v2515_v11 = vmul.f32 %v6798_v2, %v6929_v19 }
 0x397   : > { %v4505_v31 = vpop.eup %4504  ;;  %v2633_v39 = vmul.f32 %v4503_v44, %v2601_v37  ;;  %v2545_v34 = vadd.f32 %v2513_v56, %v6954_v12  ;;  %v2418_v61 = vmul.f32 2.0, %v2368_v6  ;;  %4514 = vrcp.f32 %v2554_v62 }
 0x398   : > { %v2646_v33 = vmul.f32 %v4505_v31, %v2614_v21  ;;  %v6966_v5 = vmul.f32 %v4503_v44, %v2857_v32  ;;  %v6968_v3 = vmul.f32 %v4505_v31, %v2870_v46  ;;  %v2859_v25 = vsub.f32 1.0, %v6870_v50 }
 0x399   : > { %2679 = vperm.xlu0 %4034, %v2633_v39   ;;  %4516 = vrcp.f32 %v2545_v34  ;;  %v2482_v23 = vadd.f32 1.0, %v2418_v61  ;;  %v6977_v6 = vmul.f32 %v6416_v54, %v6416_v54  ;;  %v2605_v51 = vadd.f32 %v6798_v2, %v6911_v48 }
 0x39a   : > { %v4507_v18 = vpop.eup %4506  ;;  %v2372_v55 = vpop.xlane.xlu1 %2371  ;;  %2744 = vperm.xlu1 %4035, %v2646_v33   ;;  %v2517_v62 = vmul.f32 %v6798_v2, %v6963_v30  ;;  %v2616_v31 = vadd.f32 %v6798_v2, %v6913_v1  ;;  %v2861_v39 = vsub.f32 1.0, %v6886_v49  ;;  %v2872_v54 = vsub.f32 1.0, %v6891_v58 }
 0x39b   : > { %v2547_v37 = vadd.f32 %v2515_v11, %v2482_v23  ;;  %v2635_v56 = vmul.f32 %v4507_v18, %v2603_v35  ;;  %v2420_v44 = vmul.f32 2.0, %v2372_v55  ;;  %v6979_v21 = vmul.f32 %v4507_v18, %v2859_v25 }
 0x39c   : > { %v6991_v48 = vmul.f32 %v6429_v4, %v6429_v4  ;;  %v2607_v1 = vadd.f32 %v6798_v2, %v6935_v38  ;;  %v2519_v49 = vmul.f32 %v6798_v2, %v6977_v6  ;;  %v2863_v4 = vsub.f32 1.0, %v6904_v57 }
 0x39d   : > { %4518 = vrcp.f32 %v2547_v37  ;;  %2689 = vperm.xlu0 %4034, %v2635_v56   ;;  %v2484_v32 = vadd.f32 1.0, %v2420_v44  ;;  %v2618_v38 = vadd.f32 %v6798_v2, %v6944_v9 }
 0x39e   : > { %v4509_v46 = vpop.eup %4508  ;;  %v2376_v50 = vpop.xlane.xlu1 %2375  ;;  %v2521_v57 = vmul.f32 %v6798_v2, %v6991_v48 }
 0x39f   : > { %v4511_v34 = vpop.eup %4510  ;;  %v2549_v61 = vadd.f32 %v2517_v62, %v2484_v32  ;;  %v2422_v33 = vmul.f32 2.0, %v2376_v50  ;;  %v2637_v35 = vmul.f32 %v4509_v46, %v2605_v51  ;;  %v6993_v18 = vmul.f32 %v4509_v46, %v2861_v39 }
 0x3a0   : > { %v2648_v11 = vmul.f32 %v4511_v34, %v2616_v31  ;;  %v6995_v55 = vmul.f32 %v4511_v34, %v2872_v54  ;;  %v7004_v62 = vmul.f32 %v6458_v0, %v6458_v0  ;;  %v2874_v50 = vsub.f32 1.0, %v6919_v29 }
 0x3a1   : > { %4520 = vrcp.f32 %v2549_v61  ;;  %v2486_v58 = vadd.f32 1.0, %v2422_v33  ;;  %2699 = vperm.xlu0 %4034, %v2637_v35   ;;  %v2609_v39 = vadd.f32 %v6798_v2, %v6954_v12  ;;  %v2865_v33 = vsub.f32 1.0, %v6925_v16 }
 0x3a2   : > { %v4513_v25 = vpop.eup %4512  ;;  %v2380_v37 = vpop.xlane.xlu1 %2379  ;;  %2754 = vperm.xlu1 %4035, %v2648_v11  }
 0x3a3   : > { %v2639_v56 = vmul.f32 %v4513_v25, %v2607_v1  ;;  %v2551_v44 = vadd.f32 %v2519_v49, %v2486_v58  ;;  %v2424_v51 = vmul.f32 2.0, %v2380_v37  ;;  %v7008_v46 = vmul.f32 %v4513_v25, %v2863_v4 }
 0x3a4   : > { %v4515_v31 = vpop.eup %4514  ;;  %v7020_v1 = vmul.f32 %v6502_v17, %v6502_v17  ;;  %v2611_v49 = vadd.f32 %v6798_v2, %v2482_v23  ;;  %v2523_v25 = vmul.f32 %v6798_v2, %v7004_v62  ;;  %v7030_v17 = vmul.f32 %v6516_v43, %v6516_v43 }
 0x3a5   : > { %4522 = vrcp.f32 %v2551_v44  ;;  %v2488_v54 = vadd.f32 1.0, %v2424_v51  ;;  %2709 = vperm.xlu0 %4034, %v2639_v56   ;;  %v2650_v61 = vmul.f32 %v4515_v31, %v2618_v38  ;;  %v7016_v9 = vmul.f32 %v4515_v31, %v2874_v50 }
 0x3a6   : > { %v4517_v34 = vpop.eup %4516  ;;  %v2384_v0 = vpop.xlane.xlu1 %2383  ;;  %v2867_v56 = vsub.f32 1.0, %v6929_v19  ;;  %v2613_v23 = vadd.f32 %v6798_v2, %v2484_v32  ;;  %v2525_v31 = vmul.f32 %v6798_v2, %v7020_v1  ;;  %v2869_v19 = vsub.f32 1.0, %v6963_v30 }
 0x3a7   : > { %v2641_v35 = vmul.f32 %v4517_v34, %v2609_v39  ;;  %v2553_v11 = vadd.f32 %v2521_v57, %v2488_v54  ;;  %v2426_v29 = vmul.f32 2.0, %v2384_v0  ;;  %2764 = vperm.xlu1 %4035, %v2650_v61   ;;  %v7022_v12 = vmul.f32 %v4517_v34, %v2865_v33 }
 0x3a8   : > { %v7040_v43 = vmul.f32 %v6557_v22, %v6557_v22  ;;  %v2615_v32 = vadd.f32 %v6798_v2, %v2486_v58  ;;  %v2871_v30 = vsub.f32 1.0, %v6977_v6  ;;  %v7050_v22 = vmul.f32 %v6587_v20, %v6587_v20 }
 0x3a9   : > { %4524 = vrcp.f32 %v2553_v11  ;;  %v2490_v37 = vadd.f32 1.0, %v2426_v29  ;;  %2719 = vperm.xlu0 %4034, %v2641_v35   ;;  %v2527_v11 = vmul.f32 %v6798_v2, %v7030_v17  ;;  %v2617_v58 = vadd.f32 %v6798_v2, %v2488_v54 }
 0x3aa   : > { %v4519_v16 = vpop.eup %4518  ;;  %v2388_v4 = vpop.xlane.xlu1 %2387  ;;  %v2873_v6 = vsub.f32 1.0, %v6991_v48  ;;  %v7060_v20 = vmul.f32 %v6652_v63, %v6652_v63  ;;  %v7069_v48 = vmul.f32 %v6634_v14, %v6634_v14  ;;  %v2875_v63 = vsub.f32 1.0, %v7004_v62 }
 0x3ab   : > { %v2643_v44 = vmul.f32 %v4519_v16, %v2611_v49  ;;  %v2555_v51 = vadd.f32 %v2523_v25, %v2490_v37  ;;  %v2428_v38 = vmul.f32 2.0, %v2388_v4  ;;  %v7032_v50 = vmul.f32 %v4519_v16, %v2867_v56 }
 0x3ac   : > { %v2619_v54 = vadd.f32 %v6798_v2, %v2490_v37  ;;  %v2524_v37 = vmul.f32 %v6798_v2, %v7060_v20 }
 0x3ad   : > { %4526 = vrcp.f32 %v2555_v51  ;;  %v2492_v39 = vadd.f32 1.0, %v2428_v38  ;;  %2729 = vperm.xlu0 %4034, %v2643_v44   ;;  %v2529_v51 = vmul.f32 %v6798_v2, %v7040_v43 }
 0x3ae   : > { %v4521_v57 = vpop.eup %4520  ;;  %v2392_v34 = vpop.xlane.xlu1 %2391 }
 0x3af   : > { %v2645_v0 = vmul.f32 %v4521_v57, %v2613_v23  ;;  %v2557_v61 = vadd.f32 %v2525_v31, %v2492_v39  ;;  %v2430_v33 = vmul.f32 2.0, %v2392_v34  ;;  %v7042_v35 = vmul.f32 %v4521_v57, %v2869_v19 }
 0x3b1   : > { %4528 = vrcp.f32 %v2557_v61  ;;  %v2494_v29 = vadd.f32 1.0, %v2430_v33  ;;  %2739 = vperm.xlu0 %4034, %v2645_v0   ;;  %v2531_v61 = vmul.f32 %v6798_v2, %v7050_v22 }
 0x3b2   : > { %v4523_v49 = vpop.eup %4522  ;;  %v2396_v25 = vpop.xlane.xlu1 %2395 }
 0x3b3   : > { %v2647_v16 = vmul.f32 %v4523_v49, %v2615_v32  ;;  %v2559_v4 = vadd.f32 %v2527_v11, %v2494_v29  ;;  %v2432_v56 = vmul.f32 2.0, %v2396_v25  ;;  %v7052_v44 = vmul.f32 %v4523_v49, %v2871_v30 }
 0x3b5   : > { %4530 = vrcp.f32 %v2559_v4  ;;  %v2496_v38 = vadd.f32 1.0, %v2432_v56  ;;  %2749 = vperm.xlu0 %4034, %v2647_v16  }
 0x3b6   : > { %v4525_v23 = vpop.eup %4524  ;;  %v2400_v31 = vpop.xlane.xlu1 %2399 }
 0x3b7   : > { %v2649_v57 = vmul.f32 %v4525_v23, %v2617_v58  ;;  %v2561_v34 = vadd.f32 %v2529_v51, %v2496_v38  ;;  %v2434_v19 = vmul.f32 2.0, %v2400_v31  ;;  %v7062_v0 = vmul.f32 %v4525_v23, %v2873_v6 }
 0x3b8   : > { %v7078_v58 = vmul.f32 %v6655_v26, %v6655_v26  ;;  %v2621_v51 = vadd.f32 %v6798_v2, %v2492_v39  ;;  %v2533_v31 = vmul.f32 %v6798_v2, %v7069_v48  ;;  %v2879_v26 = vsub.f32 1.0, %v7030_v17 }
 0x3b9   : > { %4532 = vrcp.f32 %v2561_v34  ;;  %v2498_v33 = vadd.f32 1.0, %v2434_v19  ;;  %2759 = vperm.xlu0 %4034, %v2649_v57   ;;  %v2877_v57 = vsub.f32 1.0, %v7020_v1  ;;  %v2623_v39 = vadd.f32 %v6798_v2, %v2494_v29 }
 0x3ba   : > { %v4527_v32 = vpop.eup %4526  ;;  %v2404_v49 = vpop.xlane.xlu1 %2403  ;;  %v2463_v1 = vmul.f32 %v6667_v10, %v6667_v10  ;;  %v2625_v17 = vadd.f32 %v6798_v2, %v2496_v38  ;;  %v2881_v29 = vsub.f32 1.0, %v7040_v43  ;;  %v2883_v38 = vsub.f32 1.0, %v7050_v22 }
 0x3bb   : > { %v2386_v11 = vpop.xlane.xlu0 %2385  ;;  %v2651_v25 = vmul.f32 %v4527_v32, %v2619_v54  ;;  %v2563_v16 = vadd.f32 %v2531_v61, %v2498_v33  ;;  %v2436_v4 = vmul.f32 2.0, %v2404_v49  ;;  %v7074_v56 = vmul.f32 %v4527_v32, %v2875_v63 }
 0x3bc   : > { %v2427_v30 = vmul.f32 2.0, %v2386_v11  ;;  %v2526_v11 = vmul.f32 %v6798_v2, %v7078_v58 }
 0x3bd   : > { %4534 = vrcp.f32 %v2563_v16  ;;  %2769 = vperm.xlu0 %4034, %v2651_v25   ;;  %v2500_v6 = vadd.f32 1.0, %v2436_v4 }
 0x3be   : > { %v2491_v14 = vadd.f32 1.0, %v2427_v30  ;;  %v4529_v23 = vpop.eup %4528 }
 0x3bf   : > { %v2390_v62 = vpop.xlane.xlu0 %2389  ;;  %v2653_v34 = vmul.f32 %v4529_v23, %v2621_v51  ;;  %v2565_v61 = vadd.f32 %v2533_v31, %v2500_v6  ;;  %v7084_v32 = vmul.f32 %v4529_v23, %v2877_v57  ;;  %v2465_v23 = vmul.f32 %v6674_v52, %v6674_v52 }
 0x3c0   : > { %v2556_v19 = vadd.f32 %v2524_v37, %v2491_v14  ;;  %v2429_v54 = vmul.f32 2.0, %v2390_v62  ;;  %v2528_v62 = vmul.f32 %v6798_v2, %v2463_v1  ;;  %v2629_v22 = vadd.f32 %v6798_v2, %v2500_v6 }
 0x3c1   : > { %2779 = vperm.xlu0 %4034, %v2653_v34   ;;  %v2530_v43 = vmul.f32 %v6798_v2, %v2465_v23  ;;  %v2880_v6 = vsub.f32 1.0, %v2463_v1 }
 0x3c2   : > { %4536 = vrcp.f32 %v2556_v19  ;;  %v2493_v49 = vadd.f32 1.0, %v2429_v54  ;;  %v4531_v63 = vpop.eup %4530 }
 0x3c3   : > { %4538 = vrcp.f32 %v2565_v61  ;;  %v2655_v25 = vmul.f32 %v4531_v63, %v2623_v39  ;;  %v2394_v16 = vpop.xlane.xlu0 %2393  ;;  %v7092_v37 = vmul.f32 %v4531_v63, %v2879_v26  ;;  %v2627_v61 = vadd.f32 %v6798_v2, %v2498_v33 }
 0x3c4   : > { %v2558_v30 = vadd.f32 %v2526_v11, %v2493_v49  ;;  %v2431_v4 = vmul.f32 2.0, %v2394_v16  ;;  %v2885_v33 = vsub.f32 1.0, %v7069_v48 }
 0x3c5   : > { %2789 = vperm.xlu0 %4034, %v2655_v25   ;;  %v2620_v25 = vadd.f32 %v6798_v2, %v2491_v14  ;;  %v2878_v14 = vsub.f32 1.0, %v7078_v58 }
 0x3c6   : > { %4540 = vrcp.f32 %v2558_v30  ;;  %v4533_v51 = vpop.eup %4532  ;;  %v2495_v10 = vadd.f32 1.0, %v2431_v4  ;;  %v2876_v30 = vsub.f32 1.0, %v7060_v20 }
 0x3c7   : > { %v2657_v31 = vmul.f32 %v4533_v51, %v2625_v17  ;;  %v2398_v57 = vpop.xlane.xlu0 %2397  ;;  %v7099_v34 = vmul.f32 %v4533_v51, %v2881_v29 }
 0x3c8   : > { %v2560_v19 = vadd.f32 %v2528_v62, %v2495_v10  ;;  %v2433_v54 = vmul.f32 2.0, %v2398_v57  ;;  %v2624_v48 = vadd.f32 %v6798_v2, %v2495_v10 }
 0x3c9   : > { %2799 = vperm.xlu0 %4034, %v2657_v31   ;;  %v2622_v31 = vadd.f32 %v6798_v2, %v2493_v49  ;;  %v2467_v49 = vmul.f32 %v6677_v24, %v6677_v24 }
 0x3ca   : > { %v4535_v26 = vpop.eup %4534  ;;  %4542 = vrcp.f32 %v2560_v19  ;;  %v2497_v39 = vadd.f32 1.0, %v2433_v54 }
 0x3cb   : > { %v2659_v52 = vmul.f32 %v4535_v26, %v2627_v61  ;;  %v7104_v11 = vmul.f32 %v4535_v26, %v2883_v38  ;;  %v2884_v24 = vsub.f32 1.0, %v2467_v49 }
 0x3cc   : > { %v2562_v63 = vadd.f32 %v2530_v43, %v2497_v39  ;;  %v2626_v26 = vadd.f32 %v6798_v2, %v2497_v39  ;;  %v2882_v43 = vsub.f32 1.0, %v2465_v23 }
 0x3cd   : > { %2809 = vperm.xlu0 %4034, %v2659_v52  }
 0x3ce   : > { %4544 = vrcp.f32 %v2562_v63 }
 0x3cf   : > { %v4537_v16 = vpop.eup %4536 }
 0x3d0   : > { %v4539_v4 = vpop.eup %4538  ;;  %v2652_v17 = vmul.f32 %v4537_v16, %v2620_v25  ;;  %v7110_v29 = vmul.f32 %v4537_v16, %v2876_v30 }
 0x3d1   : > { %v2661_v51 = vmul.f32 %v4539_v4, %v2629_v22  ;;  %v2917_v62 = vmul.f32 %v4539_v4, %v2885_v33 }
 0x3d2   : > { %2774 = vperm.xlu1 %4035, %v2652_v17  }
 0x3d3   : > { %v4541_v57 = vpop.eup %4540  ;;  %2819 = vperm.xlu0 %4034, %v2661_v51  }
 0x3d4   : > { %v2654_v20 = vmul.f32 %v4541_v57, %v2622_v31  ;;  %v7114_v19 = vmul.f32 %v4541_v57, %v2878_v14 }
 0x3d6   : > { %2784 = vperm.xlu1 %4035, %v2654_v20  }
 0x3d7   : > { %2925 = vperm.xlu0 %4034, %v6809_v41   ;;  %v4543_v54 = vpop.eup %4542  ;;  %v2532_v41 = vmul.f32 %v6798_v2, %v2467_v49 }
 0x3d8   : > { %v2656_v61 = vmul.f32 %v4543_v54, %v2624_v48  ;;  %v2912_v38 = vmul.f32 %v4543_v54, %v2880_v6 }
 0x3da   : > { %v2402_v58 = vpop.xlane.xlu0 %2401  ;;  %2794 = vperm.xlu1 %4035, %v2656_v61  }
 0x3db   : > { %2935 = vperm.xlu0 %4034, %v6966_v5   ;;  %v4545_v52 = vpop.eup %4544  ;;  %v2435_v63 = vmul.f32 2.0, %v2402_v58 }
 0x3dc   : > { %v2658_v25 = vmul.f32 %v4545_v52, %v2626_v26  ;;  %v2914_v10 = vmul.f32 %v4545_v52, %v2882_v43 }
 0x3dd   : > { %v2499_v1 = vadd.f32 1.0, %v2435_v63 }
 0x3de   : > { %2804 = vperm.xlu1 %4035, %v2658_v25  }
 0x3df   : > { %2945 = vperm.xlu0 %4034, %v6979_v21   ;;  %v2564_v30 = vadd.f32 %v2532_v41, %v2499_v1  ;;  %v2628_v5 = vadd.f32 %v6798_v2, %v2499_v1 }
 0x3e1   : > { %4546 = vrcp.f32 %v2564_v30 }
 0x3e3   : > { %2955 = vperm.xlu0 %4034, %v6993_v18  }
 0x3e7   : > { %2965 = vperm.xlu0 %4034, %v7008_v46  }
 0x3eb   : > { %2975 = vperm.xlu0 %4034, %v7022_v12  }
 0x3ee   : > { %v4547_v23 = vpop.eup %4546 }
 0x3ef   : > { %2985 = vperm.xlu0 %4034, %v7032_v50   ;;  %v2660_v39 = vmul.f32 %v4547_v23, %v2628_v5  ;;  %v2916_v16 = vmul.f32 %v4547_v23, %v2884_v24 }
 0x3f1   : > { %2814 = vperm.xlu1 %4035, %v2660_v39  }
 0x3f3   : > { %2995 = vperm.xlu0 %4034, %v7042_v35  }
 0x3f5   : > { %2920 = vperm.xlu1 %4035, %v6946_v42  }
 0x3f7   : > { %3005 = vperm.xlu0 %4034, %v7052_v44  }
 0x3f9   : > { %2930 = vperm.xlu1 %4035, %v6814_v47  }
 0x3fb   : > { %3015 = vperm.xlu0 %4034, %v7062_v0  }
 0x3fd   : > { %2940 = vperm.xlu1 %4035, %v6823_v13  }
 0x3ff   : > { %3025 = vperm.xlu0 %4034, %v7074_v56  }
 0x401   : > { %2950 = vperm.xlu1 %4035, %v6837_v8   ;;  %v2670_v8 = vpop.permute.xlu1 %2669 }
 0x402   : > { %v2823_v17 = vmul.f32 %v2670_v8, %v6658_v53  ;;  %v8046_v8 = vld [vmem:[#allocation38_spill] sm:$0xff] }
 0x403   : > { %3035 = vperm.xlu0 %4034, %v7084_v32  }
 0x405   : > { %2960 = vperm.xlu1 %4035, %v6872_v15  }
 0x407   : > { %3045 = vperm.xlu0 %4034, %v7092_v37  }
 0x409   : > { %2970 = vperm.xlu1 %4035, %v6894_v40   ;;  %v2675_v40 = vpop.permute.xlu1 %2674 }
 0x40a   : > { %v2824_v24 = vmul.f32 %v2675_v40, %v6669_v36 }
 0x40b   : > { %3055 = vperm.xlu0 %4034, %v7099_v34  }
 0x40d   : > { %2980 = vperm.xlu1 %4035, %v6915_v45   ;;  %v2685_v45 = vpop.permute.xlu1 %2684 }
 0x40e   : > { %v2826_v36 = vmul.f32 %v2685_v45, %v6679_v60  ;;  %v8047_v45 = vld [vmem:[#allocation19_spill] sm:$0xff] }
 0x40f   : > { %3065 = vperm.xlu0 %4034, %v7104_v11  }
 0x410   : > { %v2665_v2 = vpop.permute.xlu0 %2664 }
 0x411   : > { %2990 = vperm.xlu1 %4035, %v6948_v28   ;;  %v7156_v28 = vpop.permute.xlu1 %2694  ;;  %v2822_v43 = vmul.f32 %v2665_v2, %v6698_v7 }
 0x413   : > { %3075 = vperm.xlu0 %4034, %v2917_v62  }
 0x414   : > { %v2680_v47 = vpop.permute.xlu0 %2679 }
 0x415   : > { %3000 = vperm.xlu1 %4035, %v6968_v3   ;;  %v7160_v18 = vpop.permute.xlu1 %2704  ;;  %v2825_v52 = vmul.f32 %v2680_v47, %v6704_v59 }
 0x418   : > { %v2690_v13 = vpop.permute.xlu0 %2689 }
 0x419   : > { %3010 = vperm.xlu1 %4035, %v6995_v55   ;;  %v7164_v46 = vpop.permute.xlu1 %2714  ;;  %v2827_v5 = vmul.f32 %v2690_v13, %v6712_v27 }
 0x41c   : > { %v7147_v15 = vpop.permute.xlu0 %2699 }
 0x41d   : > { %3020 = vperm.xlu1 %4035, %v7016_v9   ;;  %v7170_v50 = vpop.permute.xlu1 %2724  ;;  %v2829_v27 = vmul.f32 %v7147_v15, %v8046_v8  ;;  %v8052_v8 = vld [vmem:[#allocation23_spill] sm:$0xff] }
 0x420   : > { %v7150_v42 = vpop.permute.xlu0 %2709 }
 0x421   : > { %3030 = vperm.xlu1 %4035, %v7110_v29   ;;  %v7174_v44 = vpop.permute.xlu1 %2734  ;;  %v7196_v29 = vld [vmem:[%s7878_s2] ss:$0 sm:$0xff]  ;;  %v2831_v15 = vmul.f32 %v7150_v42, %v8047_v45 }
 0x424   : > { %v7153_v21 = vpop.permute.xlu0 %2719 }
 0x425   : > { %3040 = vperm.xlu1 %4035, %v7114_v19   ;;  %v7180_v32 = vpop.permute.xlu1 %2744 }
 0x428   : > { %v7158_v3 = vpop.permute.xlu0 %2729 }
 0x429   : > { %3050 = vperm.xlu1 %4035, %v2912_v38   ;;  %v7184_v34 = vpop.permute.xlu1 %2754 }
 0x42c   : > { %v7162_v55 = vpop.permute.xlu0 %2739 }
 0x42d   : > { %3060 = vperm.xlu1 %4035, %v2914_v10   ;;  %v7190_v22 = vpop.permute.xlu1 %2764 }
 0x430   : > { %v7166_v9 = vpop.permute.xlu0 %2749 }
 0x431   : > { %3070 = vperm.xlu1 %4035, %v2916_v16  }
 0x434   : > { %v7168_v12 = vpop.permute.xlu0 %2759 }
 0x438   : > { %v7172_v35 = vpop.permute.xlu0 %2769 }
 0x43c   : > { %v7176_v0 = vpop.permute.xlu0 %2779 }
 0x440   : > { %v7178_v56 = vpop.permute.xlu0 %2789 }
 0x444   : > { %v7182_v37 = vpop.permute.xlu0 %2799 }
 0x448   : > { %v7186_v11 = vpop.permute.xlu0 %2809 }
 0x44d   : > { %v7199_v62 = vpop.permute.xlu1 %2774 }
 0x44e   : > { %v7188_v33 = vpop.permute.xlu0 %2819 }
 0x451   : > { %v7205_v19 = vpop.permute.xlu1 %2784 }
 0x452   : > { %v2926_v4 = vpop.permute.xlu0 %2925 }
 0x453   : > { %v3079_v51 = vmul.f32 %v7196_v29, %v2926_v4 }
 0x455   : > { %v7201_v31 = vadd.f32 %v3079_v51, %v2823_v17  ;;  %v7207_v48 = vpop.permute.xlu1 %2794 }
 0x456   : > { %v2936_v14 = vpop.permute.xlu0 %2935 }
 0x457   : > { %v3143_v57 = vmul.f32 %v7201_v31, %v7201_v31  ;;  %v3081_v26 = vmul.f32 %v7196_v29, %v2936_v14 }
 0x459   : > { %3176 = vadd.xlane.f32.xlu0 %v3143_v57  ;;  %v7209_v54 = vpop.permute.xlu1 %2804  ;;  %v7219_v10 = vadd.f32 %v3081_v26, %v2825_v52 }
 0x45a   : > { %v2946_v20 = vpop.permute.xlu0 %2945 }
 0x45b   : > { %v3083_v41 = vmul.f32 %v7196_v29, %v2946_v20  ;;  %v3145_v16 = vmul.f32 %v7219_v10, %v7219_v10  ;;  %v8048_v20 = vld [vmem:[#allocation36_spill] sm:$0xff] }
 0x45d   : > { %v7229_v39 = vadd.f32 %v3083_v41, %v2827_v5 }
 0x45e   : > { %v2956_v53 = vpop.permute.xlu0 %2955 }
 0x45f   : > { %v3085_v2 = vmul.f32 %v7196_v29, %v2956_v53  ;;  %v3147_v60 = vmul.f32 %v7229_v39, %v7229_v39  ;;  %v2828_v53 = vmul.f32 %v7156_v28, %v8048_v20  ;;  %v8054_v20 = vld [vmem:[#allocation35_spill] sm:$0xff] }
 0x461   : > { %v7243_v14 = vadd.f32 %v3085_v2, %v2829_v27  ;;  %v2835_v27 = vmul.f32 %v7158_v3, %v8052_v8 }
 0x462   : > { %v2966_v6 = vpop.permute.xlu0 %2965 }
 0x463   : > { %v3087_v4 = vmul.f32 %v7196_v29, %v2966_v6  ;;  %v3149_v52 = vmul.f32 %v7243_v14, %v7243_v14 }
 0x466   : > { %v2976_v61 = vpop.permute.xlu0 %2975 }
 0x467   : > { %v3089_v42 = vmul.f32 %v7196_v29, %v2976_v61 }
 0x46a   : > { %v2986_v49 = vpop.permute.xlu0 %2985 }
 0x46c   : > { %v7211_v38 = vpop.permute.xlu1 %2814 }
 0x46e   : > { %v2996_v30 = vpop.permute.xlu0 %2995 }
 0x470   : > { %v2921_v58 = vpop.permute.xlu1 %2920 }
 0x471   : > { %v3078_v63 = vmul.f32 %v7196_v29, %v2921_v58  ;;  %v7254_v58 = vadd.f32 %v3087_v4, %v2831_v15  ;;  %v3093_v4 = vmul.f32 %v7196_v29, %v2996_v30  ;;  %v8053_v15 = vld [vmem:[#allocation41_spill] sm:$0xff] }
 0x472   : > { %v3006_v17 = vpop.permute.xlu0 %3005  ;;  %v2837_v3 = vmul.f32 %v7162_v55, %v8053_v15  ;;  %v8059_v15 = vld [vmem:[#allocation33_spill] sm:$0xff] }
 0x473   : > { %v7217_v25 = vadd.f32 %v3078_v63, %v2822_v43  ;;  %v3095_v55 = vmul.f32 %v7196_v29, %v3006_v17 }
 0x474   : > { %v2931_v1 = vpop.permute.xlu1 %2930 }
 0x475   : > { %v3080_v23 = vmul.f32 %v7196_v29, %v2931_v1  ;;  %v3142_v7 = vmul.f32 %v7217_v25, %v7217_v25  ;;  %v8049_v1 = vld [vmem:[#allocation15_spill] sm:$0xff] }
 0x476   : > { %v3016_v41 = vpop.permute.xlu0 %3015  ;;  %v2830_v28 = vmul.f32 %v7160_v18, %v8049_v1 }
 0x477   : > { %v7227_v59 = vadd.f32 %v3080_v23, %v2824_v24  ;;  %3174 = vadd.xlane.f32.xlu1 %v3142_v7  ;;  %v8050_v24 = vld [vmem:[#allocation20_spill] sm:$0xff] }
 0x478   : > { %v2941_v47 = vpop.permute.xlu1 %2940  ;;  %v2833_v5 = vmul.f32 %v7153_v21, %v8050_v24  ;;  %v8056_v24 = vld [vmem:[#allocation43_spill] sm:$0xff] }
 0x479   : > { %v3082_v13 = vmul.f32 %v7196_v29, %v2941_v47  ;;  %v3144_v40 = vmul.f32 %v7227_v59, %v7227_v59  ;;  %v3091_v47 = vmul.f32 %v7196_v29, %v2986_v49 }
 0x47a   : > { %v7272_v61 = vadd.f32 %v3089_v42, %v2833_v5  ;;  %v2839_v5 = vmul.f32 %v7166_v9, %v8056_v24 }
 0x47b   : > { %v7241_v51 = vadd.f32 %v3082_v13, %v2826_v36  ;;  %3178 = vadd.xlane.f32.xlu0 %v3144_v40  ;;  %3180 = vadd.xlane.f32.xlu1 %v3145_v16  ;;  %v3151_v16 = vmul.f32 %v7254_v58, %v7254_v58  ;;  %v8051_v36 = vld [vmem:[#allocation16_spill] sm:$0xff]  ;;  %v7285_v49 = vadd.f32 %v3091_v47, %v2835_v27 }
 0x47c   : > { %v2951_v57 = vpop.permute.xlu1 %2950  ;;  %v2832_v21 = vmul.f32 %v7164_v46, %v8051_v36  ;;  %v3153_v46 = vmul.f32 %v7272_v61, %v7272_v61  ;;  %v7314_v17 = vadd.f32 %v3095_v55, %v2839_v5  ;;  %v8057_v36 = vld [vmem:[#allocation18_spill] sm:$0xff] }
 0x47d   : > { %v3084_v26 = vmul.f32 %v7196_v29, %v2951_v57  ;;  %v3146_v6 = vmul.f32 %v7241_v51, %v7241_v51  ;;  %v3155_v42 = vmul.f32 %v7285_v49, %v7285_v49  ;;  %v2838_v9 = vmul.f32 %v7180_v32, %v8057_v36  ;;  %v8064_v36 = vld [vmem:[#allocation24_spill] sm:$0xff] }
 0x47e   : > { %v3159_v32 = vmul.f32 %v7314_v17, %v7314_v17 }
 0x47f   : > { %v7256_v43 = vadd.f32 %v3084_v26, %v2828_v53  ;;  %3182 = vadd.xlane.f32.xlu0 %v3146_v6  ;;  %3184 = vadd.xlane.f32.xlu1 %v3147_v60  ;;  %v3026_v60 = vpop.permute.xlu0 %3025  ;;  %v2834_v53 = vmul.f32 %v7170_v50, %v8054_v20  ;;  %v7296_v6 = vadd.f32 %v3093_v4, %v2837_v3 }
 0x480   : > { %v2961_v63 = vpop.permute.xlu1 %2960 }
 0x481   : > { %v3086_v23 = vmul.f32 %v7196_v29, %v2961_v63  ;;  %v3148_v7 = vmul.f32 %v7256_v43, %v7256_v43 }
 0x483   : > { %v7270_v2 = vadd.f32 %v3086_v23, %v2830_v28  ;;  %3186 = vadd.xlane.f32.xlu0 %v3148_v7  ;;  %3188 = vadd.xlane.f32.xlu1 %v3149_v52  ;;  %v3036_v1 = vpop.permute.xlu0 %3035  ;;  %v8055_v28 = vld [vmem:[#allocation37_spill] sm:$0xff] }
 0x484   : > { %v2971_v18 = vpop.permute.xlu1 %2970  ;;  %v2836_v50 = vmul.f32 %v7174_v44, %v8055_v28  ;;  %v8061_v28 = vld [vmem:[#allocation22_spill] sm:$0xff] }
 0x485   : > { %v3088_v13 = vmul.f32 %v7196_v29, %v2971_v18  ;;  %v3150_v40 = vmul.f32 %v7270_v2, %v7270_v2  ;;  %v3097_v18 = vmul.f32 %v7196_v29, %v3016_v41 }
 0x487   : > { %v7283_v45 = vadd.f32 %v3088_v13, %v2832_v21  ;;  %3190 = vadd.xlane.f32.xlu0 %v3150_v40  ;;  %3192 = vadd.xlane.f32.xlu1 %v3151_v16  ;;  %v3157_v16 = vmul.f32 %v7296_v6, %v7296_v6  ;;  %v8058_v21 = vld [vmem:[#allocation44_spill] sm:$0xff]  ;;  %v3099_v40 = vmul.f32 %v7196_v29, %v3026_v60  ;;  %v3046_v4 = vpop.permute.xlu0 %3045 }
 0x488   : > { %v2981_v57 = vpop.permute.xlu1 %2980  ;;  %v2841_v8 = vmul.f32 %v7168_v12, %v8058_v21  ;;  %v2843_v12 = vmul.f32 %v7172_v35, %v8059_v15  ;;  %v3101_v35 = vmul.f32 %v7196_v29, %v3036_v1 }
 0x489   : > { %v3090_v26 = vmul.f32 %v7196_v29, %v2981_v57  ;;  %v3152_v30 = vmul.f32 %v7283_v45, %v7283_v45  ;;  %v8060_v57 = vld [vmem:[#allocation45_spill] sm:$0xff] }
 0x48a   : > { %v7327_v41 = vadd.f32 %v3097_v18, %v2841_v8  ;;  %v2840_v20 = vmul.f32 %v7184_v34, %v8060_v57  ;;  %v2842_v34 = vmul.f32 %v7190_v22, %v8061_v28  ;;  %v3103_v18 = vmul.f32 %v7196_v29, %v3046_v4  ;;  %v8068_v28 = vld [vmem:[#allocation21_spill] sm:$0xff] }
 0x48b   : > { %v7298_v52 = vadd.f32 %v3090_v26, %v2834_v53  ;;  %3194 = vadd.xlane.f32.xlu0 %v3152_v30  ;;  %3196 = vadd.xlane.f32.xlu1 %v3153_v46  ;;  %v7338_v26 = vadd.f32 %v3099_v40, %v2843_v12  ;;  %v8066_v12 = vld [vmem:[#allocation42_spill] sm:$0xff] }
 0x48c   : > { %v2991_v63 = vpop.permute.xlu1 %2990 }
 0x48d   : > { %v3092_v23 = vmul.f32 %v7196_v29, %v2991_v63  ;;  %v3154_v7 = vmul.f32 %v7298_v52, %v7298_v52  ;;  %v3056_v63 = vpop.permute.xlu0 %3055 }
 0x48f   : > { %v7312_v47 = vadd.f32 %v3092_v23, %v2836_v50  ;;  %3198 = vadd.xlane.f32.xlu0 %v3154_v7  ;;  %3200 = vadd.xlane.f32.xlu1 %v3155_v42  ;;  %v3161_v42 = vmul.f32 %v7327_v41, %v7327_v41  ;;  %v8062_v50 = vld [vmem:[#allocation39_spill] sm:$0xff]  ;;  %v3163_v7 = vmul.f32 %v7338_v26, %v7338_v26 }
 0x490   : > { %v3001_v44 = vpop.permute.xlu1 %3000  ;;  %v2845_v24 = vmul.f32 %v7176_v0, %v8062_v50 }
 0x491   : > { %v3094_v27 = vmul.f32 %v7196_v29, %v3001_v44  ;;  %v3156_v13 = vmul.f32 %v7312_v47, %v7312_v47  ;;  %v8063_v44 = vld [vmem:[#allocation40_spill] sm:$0xff] }
 0x492   : > { %v7356_v1 = vadd.f32 %v3101_v35, %v2845_v24  ;;  %v2844_v0 = vmul.f32 %v7199_v62, %v8063_v44  ;;  %v8070_v44 = vld [vmem:[#allocation27_spill] sm:$0xff] }
 0x493   : > { %v7325_v46 = vadd.f32 %v3094_v27, %v2838_v9  ;;  %3202 = vadd.xlane.f32.xlu0 %v3156_v13  ;;  %3204 = vadd.xlane.f32.xlu1 %v3157_v16  ;;  %v2847_v9 = vmul.f32 %v7178_v56, %v8064_v36  ;;  %v3105_v27 = vmul.f32 %v7196_v29, %v3056_v63  ;;  %v3066_v13 = vpop.permute.xlu0 %3065  ;;  %v8067_v63 = vld [vmem:[#allocation28_spill] sm:$0xff] }
 0x494   : > { %v3011_v3 = vpop.permute.xlu1 %3010  ;;  %v3165_v62 = vmul.f32 %v7356_v1, %v7356_v1 }
 0x495   : > { %v3096_v53 = vmul.f32 %v7196_v29, %v3011_v3  ;;  %v3158_v60 = vmul.f32 %v7325_v46, %v7325_v46  ;;  %v7369_v4 = vadd.f32 %v3103_v18, %v2847_v9  ;;  %v2846_v3 = vmul.f32 %v7205_v19, %v8066_v12 }
 0x496   : > { %v2848_v19 = vmul.f32 %v7207_v48, %v8067_v63 }
 0x497   : > { %v7340_v30 = vadd.f32 %v3096_v53, %v2840_v20  ;;  %3206 = vadd.xlane.f32.xlu0 %v3158_v60  ;;  %3208 = vadd.xlane.f32.xlu1 %v3159_v32  ;;  %v8065_v32 = vld [vmem:[#allocation25_spill] sm:$0xff] }
 0x498   : > { %v3021_v55 = vpop.permute.xlu1 %3020  ;;  %v2849_v56 = vmul.f32 %v7182_v37, %v8065_v32  ;;  %v3107_v37 = vmul.f32 %v7196_v29, %v3066_v13 }
 0x499   : > { %v3098_v5 = vmul.f32 %v7196_v29, %v3021_v55  ;;  %v3160_v23 = vmul.f32 %v7340_v30, %v7340_v30  ;;  %v3076_v55 = vpop.permute.xlu0 %3075 }
 0x49a   : > { %v7380_v53 = vadd.f32 %v3105_v27, %v2849_v56  ;;  %v3109_v18 = vmul.f32 %v7196_v29, %v3076_v55 }
 0x49b   : > { %v7354_v16 = vadd.f32 %v3098_v5, %v2842_v34  ;;  %3210 = vadd.xlane.f32.xlu0 %v3160_v23  ;;  %3212 = vadd.xlane.f32.xlu1 %v3161_v42  ;;  %v3167_v42 = vmul.f32 %v7369_v4, %v7369_v4  ;;  %v2851_v34 = vmul.f32 %v7186_v11, %v8068_v28 }
 0x49c   : > { %v3031_v22 = vpop.permute.xlu1 %3030  ;;  %v3169_v5 = vmul.f32 %v7380_v53, %v7380_v53 }
 0x49d   : > { %v3100_v21 = vmul.f32 %v7196_v29, %v3031_v22  ;;  %v3162_v8 = vmul.f32 %v7354_v16, %v7354_v16  ;;  %v8069_v22 = vld [vmem:[#allocation31_spill] sm:$0xff] }
 0x49e   : > { %v2850_v11 = vmul.f32 %v7209_v54, %v8069_v22 }
 0x49f   : > { %v7367_v40 = vadd.f32 %v3100_v21, %v2844_v0  ;;  %3214 = vadd.xlane.f32.xlu0 %v3162_v8  ;;  %3216 = vadd.xlane.f32.xlu1 %v3163_v7  ;;  %v7398_v7 = vadd.f32 %v3107_v37, %v2851_v34  ;;  %v2853_v0 = vmul.f32 %v7188_v33, %v8070_v44 }
 0x4a0   : > { %v3041_v15 = vpop.permute.xlu1 %3040 }
 0x4a1   : > { %v3102_v57 = vmul.f32 %v7196_v29, %v3041_v15  ;;  %v3164_v20 = vmul.f32 %v7367_v40, %v7367_v40  ;;  %v7410_v8 = vadd.f32 %v3109_v18, %v2853_v0  ;;  %v3171_v27 = vmul.f32 %v7398_v7, %v7398_v7 }
 0x4a3   : > { %v7382_v60 = vadd.f32 %v3102_v57, %v2846_v3  ;;  %3218 = vadd.xlane.f32.xlu0 %v3164_v20  ;;  %3220 = vadd.xlane.f32.xlu1 %v3165_v62  ;;  %v8071_v62 = vld [vmem:[#allocation17_spill] sm:$0xff]  ;;  %v3173_v15 = vmul.f32 %v7410_v8, %v7410_v8 }
 0x4a4   : > { %v3051_v35 = vpop.permute.xlu1 %3050  ;;  %v2852_v54 = vmul.f32 %v7211_v38, %v8071_v62 }
 0x4a5   : > { %v3104_v50 = vmul.f32 %v7196_v29, %v3051_v35  ;;  %v3166_v24 = vmul.f32 %v7382_v60, %v7382_v60 }
 0x4a7   : > { %v7396_v23 = vadd.f32 %v3104_v50, %v2848_v19  ;;  %3222 = vadd.xlane.f32.xlu0 %v3166_v24  ;;  %3224 = vadd.xlane.f32.xlu1 %v3167_v42 }
 0x4a8   : > { %v3061_v48 = vpop.permute.xlu1 %3060 }
 0x4a9   : > { %v3106_v36 = vmul.f32 %v7196_v29, %v3061_v48  ;;  %v3168_v9 = vmul.f32 %v7396_v23, %v7396_v23 }
 0x4ab   : > { %v7408_v21 = vadd.f32 %v3106_v36, %v2850_v11  ;;  %3226 = vadd.xlane.f32.xlu0 %v3168_v9  ;;  %3228 = vadd.xlane.f32.xlu1 %v3169_v5 }
 0x4ac   : > { %v3071_v13 = vpop.permute.xlu1 %3070 }
 0x4ad   : > { %v3108_v33 = vmul.f32 %v7196_v29, %v3071_v13  ;;  %v3170_v32 = vmul.f32 %v7408_v21, %v7408_v21 }
 0x4af   : > { %v7419_v56 = vadd.f32 %v3108_v33, %v2852_v54  ;;  %3230 = vadd.xlane.f32.xlu0 %v3170_v32  ;;  %3232 = vadd.xlane.f32.xlu1 %v3171_v27 }
 0x4b1   : > { %v3172_v12 = vmul.f32 %v7419_v56, %v7419_v56 }
 0x4b3   : > { %3234 = vadd.xlane.f32.xlu0 %v3172_v12  ;;  %3236 = vadd.xlane.f32.xlu1 %v3173_v15 }
 0x4e2   : > { %v3177_v3 = vpop.xlane.xlu0 %3176 }
 0x4e3   : > { %4548 = vrsqrt.f32 %v3177_v3  ;;  %vm3247_vm2 = vcmp.eq.f32.partialorder %v3177_v3, inf  ;;  %v3250_v29 = vand.u32 2147483648, %v3177_v3  ;;  %vm3249_vm3 = vcmp.eq.f32.partialorder %v3177_v3, 0.0 }
 0x4f0   : > { %v4549_v38 = vpop.eup %4548 }
 0x4f1   : > { %v3246_v57 = vmul.f32 %v4549_v38, %v3177_v3 }
 0x4f3   : > { %v3248_v20 = vsel %vm3247_vm2, %v3177_v3, %v3246_v57 }
 0x4f4   : > { %v3251_v42 = vsel %vm3249_vm3, %v3250_v29, %v3248_v20 }
 0x4f5   : > { %v3463_v37 = vmax.f32 %v3251_v42, 1e-07 }
 0x4f7   : > { %4550 = vrcp.f32 %v3463_v37 }
 0x500   : > { %v3175_v35 = vpop.xlane.xlu1 %3174 }
 0x501   : > { %4552 = vrsqrt.f32 %v3175_v35  ;;  %vm3240_vm4 = vcmp.eq.f32.partialorder %v3175_v35, inf  ;;  %vm3242_vm5 = vcmp.eq.f32.partialorder %v3175_v35, 0.0 }
 0x504   : > { %v4551_v55 = vpop.eup %4550  ;;  %v3181_v19 = vpop.xlane.xlu1 %3180 }
 0x505   : > { %v3527_v63 = vmul.f32 0.99999, %v4551_v55  ;;  %v3179_v28 = vpop.xlane.xlu0 %3178  ;;  %4554 = vrsqrt.f32 %v3181_v19  ;;  %vm3261_vm6 = vcmp.eq.f32.partialorder %v3181_v19, inf  ;;  %vm3263_vm7 = vcmp.eq.f32.partialorder %v3181_v19, 0.0 }
 0x506   : > { %4556 = vrsqrt.f32 %v3179_v28  ;;  %v3264_v44 = vand.u32 2147483648, %v3181_v19  ;;  %vm3254_vm8 = vcmp.eq.f32.partialorder %v3179_v28, inf  ;;  %vm3256_vm9 = vcmp.eq.f32.partialorder %v3179_v28, 0.0 }
 0x507   : > { %v3559_v34 = vmin.f32 %v3527_v63, 1.0  ;;  %v3257_v27 = vand.u32 2147483648, %v3179_v28 }
 0x508   : > { %v7426_v24 = vpop.xlane.xlu1 %3184 }
 0x509   : > { %v3591_v50 = vmul.f32 %v3559_v34, %v7201_v31  ;;  %v7428_v5 = vpop.xlane.xlu0 %3182  ;;  %4558 = vrsqrt.f32 %v7426_v24  ;;  %v3243_v31 = vand.u32 2147483648, %v3175_v35  ;;  %vm3275_vm10 = vcmp.eq.f32.partialorder %v7426_v24, inf }
 0x50a   : > { %4560 = vrsqrt.f32 %v7428_v5  ;;  %vm3277_vm11 = vcmp.eq.f32.partialorder %v7426_v24, 0.0  ;;  %v3278_v15 = vand.u32 2147483648, %v7426_v24  ;;  %vm3268_vm12 = vcmp.eq.f32.partialorder %v7428_v5, inf }
 0x50b   : > { %3623 = vst [vmem:[%s5032_s29 + $0x8] sm:$0xff] %v3591_v50  ;;  %vm3270_vm13 = vcmp.eq.f32.partialorder %v7428_v5, 0.0  ;;  %v3271_v3 = vand.u32 2147483648, %v7428_v5 }
 0x50c   : > { %v7433_v18 = vpop.xlane.xlu1 %3188 }
 0x50d   : > { %v7435_v48 = vpop.xlane.xlu0 %3186  ;;  %4562 = vrsqrt.f32 %v7433_v18  ;;  %vm3289_vm14 = vcmp.eq.f32.partialorder %v7433_v18, inf  ;;  %vm3291_vm15 = vcmp.eq.f32.partialorder %v7433_v18, 0.0  ;;  %v3292_v20 = vand.u32 2147483648, %v7433_v18 }
 0x50e   : > { %v4553_v22 = vpop.eup %4552  ;;  %4564 = vrsqrt.f32 %v7435_v48  ;;  %vm3282_vm0 = vcmp.eq.f32.partialorder %v7435_v48, inf  ;;  %vm3284_vm1 = vcmp.eq.f32.partialorder %v7435_v48, 0.0 }
 0x50f   : > { %v3239_v11 = vmul.f32 %v4553_v22, %v3175_v35 }
 0x510   : > { %v7439_v0 = vpop.xlane.xlu1 %3192 }
 0x511   : > { %v7441_v36 = vpop.xlane.xlu0 %3190  ;;  %v3241_v9 = vsel %vm3240_vm4, %v3175_v35, %v3239_v11  ;;  %4566 = vrsqrt.f32 %v7439_v0  ;;  %vm3303_vm2 = vcmp.eq.f32.partialorder %v7439_v0, inf  ;;  %vm3305_vm3 = vcmp.eq.f32.partialorder %v7439_v0, 0.0 }
 0x512   : > { %v4555_v13 = vpop.eup %4554  ;;  %v3244_v62 = vsel %vm3242_vm5, %v3243_v31, %v3241_v9  ;;  %4568 = vrsqrt.f32 %v7441_v36  ;;  %vm3296_vm4 = vcmp.eq.f32.partialorder %v7441_v36, inf  ;;  %vm3298_vm5 = vcmp.eq.f32.partialorder %v7441_v36, 0.0 }
 0x513   : > { %v4557_v54 = vpop.eup %4556  ;;  %v3462_v33 = vmax.f32 %v3244_v62, 1e-07  ;;  %v3260_v32 = vmul.f32 %v4555_v13, %v3181_v19 }
 0x514   : > { %v3253_v12 = vmul.f32 %v4557_v54, %v3179_v28  ;;  %v7452_v38 = vpop.xlane.xlu1 %3196 }
 0x515   : > { %v7454_v57 = vpop.xlane.xlu0 %3194  ;;  %4570 = vrcp.f32 %v3462_v33  ;;  %v3262_v29 = vsel %vm3261_vm6, %v3181_v19, %v3260_v32  ;;  %v3285_v19 = vand.u32 2147483648, %v7435_v48  ;;  %vm3317_vm6 = vcmp.eq.f32.partialorder %v7452_v38, inf }
 0x516   : > { %v4559_v42 = vpop.eup %4558  ;;  %v3265_v37 = vsel %vm3263_vm7, %v3264_v44, %v3262_v29  ;;  %v3255_v35 = vsel %vm3254_vm8, %v3179_v28, %v3253_v12  ;;  %4572 = vrsqrt.f32 %v7452_v38  ;;  %v3306_v28 = vand.u32 2147483648, %v7439_v0 }
 0x517   : > { %v4561_v55 = vpop.eup %4560  ;;  %v3465_v63 = vmax.f32 %v3265_v37, 1e-07  ;;  %v3258_v34 = vsel %vm3256_vm9, %v3257_v27, %v3255_v35  ;;  %v3274_v50 = vmul.f32 %v4559_v42, %v7426_v24  ;;  %4574 = vrsqrt.f32 %v7454_v57 }
 0x518   : > { %v3464_v22 = vmax.f32 %v3258_v34, 1e-07  ;;  %v3267_v11 = vmul.f32 %v4561_v55, %v7428_v5  ;;  %v7470_v31 = vpop.xlane.xlu1 %3200  ;;  %vm3319_vm7 = vcmp.eq.f32.partialorder %v7452_v38, 0.0  ;;  %vm3310_vm8 = vcmp.eq.f32.partialorder %v7454_v57, inf }
 0x519   : > { %4576 = vrcp.f32 %v3465_v63  ;;  %v3276_v44 = vsel %vm3275_vm10, %v7426_v24, %v3274_v50  ;;  %v7477_v9 = vpop.xlane.xlu0 %3198  ;;  %vm3312_vm9 = vcmp.eq.f32.partialorder %v7454_v57, 0.0  ;;  %vm3331_vm10 = vcmp.eq.f32.partialorder %v7470_v31, inf }
 0x51a   : > { %v4563_v27 = vpop.eup %4562  ;;  %4578 = vrcp.f32 %v3464_v22  ;;  %v3279_v13 = vsel %vm3277_vm11, %v3278_v15, %v3276_v44  ;;  %v3269_v62 = vsel %vm3268_vm12, %v7428_v5, %v3267_v11  ;;  %v3299_v5 = vand.u32 2147483648, %v7441_v36 }
 0x51b   : > { %v4565_v54 = vpop.eup %4564  ;;  %v3467_v33 = vmax.f32 %v3279_v13, 1e-07  ;;  %v3272_v32 = vsel %vm3270_vm13, %v3271_v3, %v3269_v62  ;;  %v3288_v12 = vmul.f32 %v4563_v27, %v7433_v18  ;;  %4580 = vrsqrt.f32 %v7470_v31 }
 0x51c   : > { %v3466_v29 = vmax.f32 %v3272_v32, 1e-07  ;;  %v3281_v42 = vmul.f32 %v4565_v54, %v7435_v48  ;;  %4582 = vrsqrt.f32 %v7477_v9  ;;  %v7492_v24 = vpop.xlane.xlu1 %3204  ;;  %v3334_v54 = vand.u32 2147483648, %v7470_v31 }
 0x51d   : > { %4584 = vrcp.f32 %v3467_v33  ;;  %v3290_v15 = vsel %vm3289_vm14, %v7433_v18, %v3288_v12  ;;  %v7509_v22 = vpop.xlane.xlu0 %3202  ;;  %vm3333_vm11 = vcmp.eq.f32.partialorder %v7470_v31, 0.0  ;;  %vm3324_vm12 = vcmp.eq.f32.partialorder %v7477_v9, inf }
 0x51e   : > { %v4567_v3 = vpop.eup %4566  ;;  %4586 = vrcp.f32 %v3466_v29  ;;  %v3293_v37 = vsel %vm3291_vm15, %v3292_v20, %v3290_v15  ;;  %v3283_v35 = vsel %vm3282_vm0, %v7435_v48, %v3281_v42  ;;  %v3320_v20 = vand.u32 2147483648, %v7452_v38 }
 0x51f   : > { %v4569_v55 = vpop.eup %4568  ;;  %v3469_v63 = vmax.f32 %v3293_v37, 1e-07  ;;  %v3286_v34 = vsel %vm3284_vm1, %v3285_v19, %v3283_v35  ;;  %v3302_v50 = vmul.f32 %v4567_v3, %v7439_v0  ;;  %4588 = vrsqrt.f32 %v7492_v24 }
 0x520   : > { %v3468_v11 = vmax.f32 %v3286_v34, 1e-07  ;;  %v3295_v18 = vmul.f32 %v4569_v55, %v7441_v36  ;;  %v3313_v48 = vand.u32 2147483648, %v7454_v57  ;;  %v7519_v19 = vpop.xlane.xlu1 %3208  ;;  %vm3326_vm13 = vcmp.eq.f32.partialorder %v7477_v9, 0.0 }
 0x521   : > { %4590 = vrcp.f32 %v3469_v63  ;;  %v3304_v44 = vsel %vm3303_vm2, %v7439_v0, %v3302_v50  ;;  %v3327_v35 = vand.u32 2147483648, %v7477_v9  ;;  %vm3345_vm14 = vcmp.eq.f32.partialorder %v7492_v24, inf }
 0x522   : > { %v4571_v27 = vpop.eup %4570  ;;  %4592 = vrcp.f32 %v3468_v11  ;;  %v3307_v13 = vsel %vm3305_vm3, %v3306_v28, %v3304_v44  ;;  %v3297_v62 = vsel %vm3296_vm4, %v7441_v36, %v3295_v18  ;;  %v7537_v36 = vpop.xlane.xlu0 %3206  ;;  %vm3347_vm15 = vcmp.eq.f32.partialorder %v7492_v24, 0.0 }
 0x523   : > { %v4573_v33 = vpop.eup %4572  ;;  %v3526_v32 = vmul.f32 0.99999, %v4571_v27  ;;  %v3471_v12 = vmax.f32 %v3307_v13, 1e-07  ;;  %v3300_v29 = vsel %vm3298_vm5, %v3299_v5, %v3297_v62  ;;  %4594 = vrsqrt.f32 %v7509_v22 }
 0x524   : > { %v4575_v0 = vpop.eup %4574  ;;  %v3470_v28 = vmax.f32 %v3300_v29, 1e-07  ;;  %v3316_v42 = vmul.f32 %v4573_v33, %v7452_v38  ;;  %4596 = vrsqrt.f32 %v7519_v19  ;;  %v7551_v18 = vpop.xlane.xlu1 %3212  ;;  %vm3338_vm0 = vcmp.eq.f32.partialorder %v7509_v22, inf }
 0x525   : > { %v3558_v15 = vmin.f32 %v3526_v32, 1.0  ;;  %4598 = vrcp.f32 %v3471_v12  ;;  %v3309_v3 = vmul.f32 %v4575_v0, %v7454_v57  ;;  %v3348_v32 = vand.u32 2147483648, %v7492_v24 }
 0x526   : > { %v4577_v5 = vpop.eup %4576  ;;  %4600 = vrcp.f32 %v3470_v28  ;;  %v3318_v37 = vsel %vm3317_vm6, %v7452_v38, %v3316_v42  ;;  %vm3340_vm1 = vcmp.eq.f32.partialorder %v7509_v22, 0.0  ;;  %vm3359_vm2 = vcmp.eq.f32.partialorder %v7519_v19, inf }
 0x527   : > { %v4579_v55 = vpop.eup %4578  ;;  %v3590_v63 = vmul.f32 %v3558_v15, %v7217_v25  ;;  %v3529_v34 = vmul.f32 0.99999, %v4577_v5  ;;  %v3321_v50 = vsel %vm3319_vm7, %v3320_v20, %v3318_v37  ;;  %v3311_v11 = vsel %vm3310_vm8, %v7454_v57, %v3309_v3  ;;  %v7566_v15 = vpop.xlane.xlu0 %3210 }
 0x528   : > { %v4581_v44 = vpop.eup %4580  ;;  %v3528_v27 = vmul.f32 0.99999, %v4579_v55  ;;  %v3473_v13 = vmax.f32 %v3321_v50, 1e-07  ;;  %v3314_v62 = vsel %vm3312_vm9, %v3313_v48, %v3311_v11  ;;  %4602 = vrsqrt.f32 %v7537_v36 }
 0x529   : > { %v4583_v25 = vpop.eup %4582  ;;  %3622 = vst [vmem:[%s5032_s29] sm:$0xff] %v3590_v63  ;;  %v3561_v38 = vmin.f32 %v3529_v34, 1.0  ;;  %v3472_v20 = vmax.f32 %v3314_v62, 1e-07  ;;  %v3330_v33 = vmul.f32 %v4581_v44, %v7470_v31  ;;  %v7578_v44 = vpop.xlane.xlu1 %3216  ;;  %vm3361_vm3 = vcmp.eq.f32.partialorder %v7519_v19, 0.0 }
 0x52a   : > { %v4585_v12 = vpop.eup %4584  ;;  %v3560_v29 = vmin.f32 %v3528_v27, 1.0  ;;  %4604 = vrcp.f32 %v3473_v13  ;;  %v3323_v0 = vmul.f32 %v4583_v25, %v7477_v9  ;;  %vm3352_vm4 = vcmp.eq.f32.partialorder %v7537_v36, inf }
 0x52b   : > { %v4587_v57 = vpop.eup %4586  ;;  %v3593_v48 = vmul.f32 %v3561_v38, %v7219_v10  ;;  %v3531_v28 = vmul.f32 0.99999, %v4585_v12  ;;  %4606 = vrcp.f32 %v3472_v20  ;;  %v3332_v42 = vsel %vm3331_vm10, %v7470_v31, %v3330_v33 }
 0x52c   : > { %v4589_v3 = vpop.eup %4588  ;;  %v3592_v5 = vmul.f32 %v3560_v29, %v7227_v59  ;;  %v3530_v37 = vmul.f32 0.99999, %v4587_v57  ;;  %v3335_v55 = vsel %vm3333_vm11, %v3334_v54, %v3332_v42  ;;  %v3325_v10 = vsel %vm3324_vm12, %v7477_v9, %v3323_v0  ;;  %v7593_v57 = vpop.xlane.xlu0 %3214 }
 0x52d   : > { %3625 = vst [vmem:[%s5032_s29 + $0x18] sm:$0xff] %v3593_v48  ;;  %v3563_v63 = vmin.f32 %v3531_v28, 1.0  ;;  %v3475_v34 = vmax.f32 %v3335_v55, 1e-07  ;;  %v3328_v50 = vsel %vm3326_vm13, %v3327_v35, %v3325_v10  ;;  %v3344_v11 = vmul.f32 %v4589_v3, %v7492_v24 }
 0x52e   : > { %v4591_v27 = vpop.eup %4590  ;;  %3624 = vst [vmem:[%s5032_s29 + $0x10] sm:$0xff] %v3592_v5  ;;  %v3562_v59 = vmin.f32 %v3530_v37, 1.0  ;;  %v3474_v31 = vmax.f32 %v3328_v50, 1e-07  ;;  %v3341_v54 = vand.u32 2147483648, %v7509_v22  ;;  %4608 = vrsqrt.f32 %v7551_v18  ;;  %v7603_v37 = vpop.xlane.xlu1 %3220 }
 0x52f   : > { %v4593_v13 = vpop.eup %4592  ;;  %v3595_v62 = vmul.f32 %v3563_v63, %v7229_v39  ;;  %v3533_v25 = vmul.f32 0.99999, %v4591_v27  ;;  %4610 = vrcp.f32 %v3475_v34  ;;  %v3346_v9 = vsel %vm3345_vm14, %v7492_v24, %v3344_v11 }
 0x530   : > { %v4595_v35 = vpop.eup %4594  ;;  %v3594_v38 = vmul.f32 %v3562_v59, %v7241_v51  ;;  %v3532_v20 = vmul.f32 0.99999, %v4593_v13  ;;  %4612 = vrcp.f32 %v3474_v31  ;;  %v3349_v33 = vsel %vm3347_vm15, %v3348_v32, %v3346_v9  ;;  %v7621_v13 = vpop.xlane.xlu0 %3218 }
 0x531   : > { %v4597_v12 = vpop.eup %4596  ;;  %3627 = vst [vmem:[%s5032_s29 + $0x28] sm:$0xff] %v3595_v62  ;;  %v3565_v29 = vmin.f32 %v3533_v25, 1.0  ;;  %v3477_v0 = vmax.f32 %v3349_v33, 1e-07  ;;  %v3337_v39 = vmul.f32 %v4595_v35, %v7509_v22  ;;  %v3362_v24 = vand.u32 2147483648, %v7519_v19 }
 0x532   : > { %v4599_v48 = vpop.eup %4598  ;;  %3626 = vst [vmem:[%s5032_s29 + $0x20] sm:$0xff] %v3594_v38  ;;  %v3564_v28 = vmin.f32 %v3532_v20, 1.0  ;;  %v3358_v51 = vmul.f32 %v4597_v12, %v7519_v19  ;;  %vm3354_vm5 = vcmp.eq.f32.partialorder %v7537_v36, 0.0  ;;  %vm3373_vm6 = vcmp.eq.f32.partialorder %v7551_v18, inf }
 0x533   : > { %v4601_v32 = vpop.eup %4600  ;;  %v3597_v42 = vmul.f32 %v3565_v29, %v7243_v14  ;;  %v3535_v3 = vmul.f32 0.99999, %v4599_v48  ;;  %4614 = vrcp.f32 %v3477_v0  ;;  %v3339_v5 = vsel %vm3338_vm0, %v7509_v22, %v3337_v39 }
 0x534   : > { %v3596_v55 = vmul.f32 %v3564_v28, %v7256_v43  ;;  %v3534_v10 = vmul.f32 0.99999, %v4601_v32  ;;  %v3342_v63 = vsel %vm3340_vm1, %v3341_v54, %v3339_v5  ;;  %v3360_v34 = vsel %vm3359_vm2, %v7519_v19, %v3358_v51  ;;  %v7637_v32 = vpop.xlane.xlu0 %3222 }
 0x535   : > { %v4603_v50 = vpop.eup %4602  ;;  %3629 = vst [vmem:[%s5032_s29 + $0x38] sm:$0xff] %v3597_v42  ;;  %v3567_v14 = vmin.f32 %v3535_v3, 1.0  ;;  %v3476_v11 = vmax.f32 %v3342_v63, 1e-07  ;;  %v3363_v27 = vsel %vm3361_vm3, %v3362_v24, %v3360_v34  ;;  %4616 = vrsqrt.f32 %v7566_v15 }
 0x536   : > { %3628 = vst [vmem:[%s5032_s29 + $0x30] sm:$0xff] %v3596_v55  ;;  %v3566_v43 = vmin.f32 %v3534_v10, 1.0  ;;  %v3479_v59 = vmax.f32 %v3363_v27, 1e-07  ;;  %v3351_v22 = vmul.f32 %v4603_v50, %v7537_v36  ;;  %v3355_v19 = vand.u32 2147483648, %v7537_v36 }
 0x537   : > { %v4605_v31 = vpop.eup %4604  ;;  %v3599_v54 = vmul.f32 %v3567_v14, %v7254_v58  ;;  %4618 = vrcp.f32 %v3476_v11  ;;  %v7627_v58 = vpop.xlane.xlu1 %3224  ;;  %v3376_v24 = vand.u32 2147483648, %v7551_v18  ;;  %vm3375_vm7 = vcmp.eq.f32.partialorder %v7551_v18, 0.0 }
 0x538   : > { %v4607_v62 = vpop.eup %4606  ;;  %v3598_v25 = vmul.f32 %v3566_v43, %v7270_v2  ;;  %v3537_v9 = vmul.f32 0.99999, %v4605_v31  ;;  %4620 = vrcp.f32 %v3479_v59  ;;  %v3353_v35 = vsel %vm3352_vm4, %v7537_v36, %v3351_v22 }
 0x539   : > { %3631 = vst [vmem:[%s5032_s29 + $0x48] sm:$0xff] %v3599_v54  ;;  %v3536_v38 = vmul.f32 0.99999, %v4607_v62  ;;  %v3356_v20 = vsel %vm3354_vm5, %v3355_v19, %v3353_v35  ;;  %4622 = vrsqrt.f32 %v7578_v44  ;;  %vm3366_vm8 = vcmp.eq.f32.partialorder %v7566_v15, inf }
 0x53a   : > { %3630 = vst [vmem:[%s5032_s29 + $0x40] sm:$0xff] %v3598_v25  ;;  %v3569_v33 = vmin.f32 %v3537_v9, 1.0  ;;  %v3478_v12 = vmax.f32 %v3356_v20, 1e-07  ;;  %4624 = vrsqrt.f32 %v7593_v57  ;;  %vm3368_vm9 = vcmp.eq.f32.partialorder %v7566_v15, 0.0 }
 0x53b   : > { %v4609_v29 = vpop.eup %4608  ;;  %v3568_v0 = vmin.f32 %v3536_v38, 1.0  ;;  %v3369_v34 = vand.u32 2147483648, %v7566_v15  ;;  %vm3387_vm10 = vcmp.eq.f32.partialorder %v7578_v44, inf  ;;  %vm3389_vm11 = vcmp.eq.f32.partialorder %v7578_v44, 0.0 }
 0x53c   : > { %v4611_v2 = vpop.eup %4610  ;;  %v3601_v39 = vmul.f32 %v3569_v33, %v7272_v61  ;;  %4626 = vrcp.f32 %v3478_v12  ;;  %v3372_v36 = vmul.f32 %v4609_v29, %v7551_v18  ;;  %v3390_v27 = vand.u32 2147483648, %v7578_v44 }
 0x53d   : > { %v4613_v48 = vpop.eup %4612  ;;  %v3600_v28 = vmul.f32 %v3568_v0, %v7283_v45  ;;  %v3539_v51 = vmul.f32 0.99999, %v4611_v2  ;;  %4628 = vrsqrt.f32 %v7603_v37  ;;  %v7645_v45 = vpop.xlane.xlu1 %3228  ;;  %vm3380_vm12 = vcmp.eq.f32.partialorder %v7593_v57, inf }
 0x53e   : > { %3633 = vst [vmem:[%s5032_s29 + $0x58] sm:$0xff] %v3601_v39  ;;  %v3538_v42 = vmul.f32 0.99999, %v4613_v48  ;;  %v3374_v3 = vsel %vm3373_vm6, %v7551_v18, %v3372_v36  ;;  %4630 = vrsqrt.f32 %v7621_v13  ;;  %vm3382_vm13 = vcmp.eq.f32.partialorder %v7593_v57, 0.0 }
 0x53f   : > { %3632 = vst [vmem:[%s5032_s29 + $0x50] sm:$0xff] %v3600_v28  ;;  %v3571_v61 = vmin.f32 %v3539_v51, 1.0  ;;  %v3377_v5 = vsel %vm3375_vm7, %v3376_v24, %v3374_v3  ;;  %4632 = vrsqrt.f32 %v7627_v58  ;;  %vm3401_vm14 = vcmp.eq.f32.partialorder %v7603_v37, inf }
 0x540   : > { %v4615_v55 = vpop.eup %4614  ;;  %v3570_v10 = vmin.f32 %v3538_v42, 1.0  ;;  %v3481_v63 = vmax.f32 %v3377_v5, 1e-07  ;;  %vm3403_vm15 = vcmp.eq.f32.partialorder %v7603_v37, 0.0  ;;  %v3404_v25 = vand.u32 2147483648, %v7603_v37 }
 0x541   : > { %v3603_v50 = vmul.f32 %v3571_v61, %v7285_v49  ;;  %v3541_v18 = vmul.f32 0.99999, %v4615_v55  ;;  %v7659_v49 = vpop.xlane.xlu0 %3226  ;;  %v7672_v9 = vpop.xlane.xlu1 %3232  ;;  %vm3394_vm0 = vcmp.eq.f32.partialorder %v7621_v13, inf  ;;  %vm3396_vm1 = vcmp.eq.f32.partialorder %v7621_v13, 0.0 }
 0x542   : > { %v4617_v14 = vpop.eup %4616  ;;  %v3602_v11 = vmul.f32 %v3570_v10, %v7298_v52  ;;  %4634 = vrcp.f32 %v3481_v63  ;;  %v3383_v52 = vand.u32 2147483648, %v7593_v57  ;;  %v3397_v29 = vand.u32 2147483648, %v7621_v13 }
 0x543   : > { %3635 = vst [vmem:[%s5032_s29 + $0x68] sm:$0xff] %v3603_v50  ;;  %v3573_v43 = vmin.f32 %v3541_v18, 1.0  ;;  %v3365_v59 = vmul.f32 %v4617_v14, %v7566_v15  ;;  %4636 = vrsqrt.f32 %v7637_v32  ;;  %vm3415_vm2 = vcmp.eq.f32.partialorder %v7627_v58, inf }
 0x544   : > { %v4619_v22 = vpop.eup %4618  ;;  %3634 = vst [vmem:[%s5032_s29 + $0x60] sm:$0xff] %v3602_v11  ;;  %4638 = vrsqrt.f32 %v7645_v45  ;;  %vm3417_vm3 = vcmp.eq.f32.partialorder %v7627_v58, 0.0  ;;  %vm3408_vm4 = vcmp.eq.f32.partialorder %v7637_v32, inf  ;;  %vm3410_vm5 = vcmp.eq.f32.partialorder %v7637_v32, 0.0 }
 0x545   : > { %v4621_v31 = vpop.eup %4620  ;;  %v3605_v54 = vmul.f32 %v3573_v43, %v7296_v6  ;;  %v3540_v19 = vmul.f32 0.99999, %v4619_v22  ;;  %v3367_v62 = vsel %vm3366_vm8, %v7566_v15, %v3365_v59  ;;  %4640 = vrsqrt.f32 %v7659_v49  ;;  %v7691_v51 = vpop.xlane.xlu0 %3230 }
 0x546   : > { %v4623_v35 = vpop.eup %4622  ;;  %v3543_v38 = vmul.f32 0.99999, %v4621_v31  ;;  %v3370_v20 = vsel %vm3368_vm9, %v3369_v34, %v3367_v62  ;;  %v3418_v15 = vand.u32 2147483648, %v7627_v58  ;;  %4642 = vrsqrt.f32 %v7672_v9  ;;  %v7713_v14 = vpop.xlane.xlu1 %3236 }
 0x547   : > { %3637 = vst [vmem:[%s5032_s29 + $0x78] sm:$0xff] %v3605_v54  ;;  %v3572_v6 = vmin.f32 %v3540_v19, 1.0  ;;  %v3480_v33 = vmax.f32 %v3370_v20, 1e-07  ;;  %v3386_v12 = vmul.f32 %v4623_v35, %v7578_v44  ;;  %v4625_v0 = vpop.eup %4624  ;;  %v3411_v10 = vand.u32 2147483648, %v7637_v32 }
 0x548   : > { %v3575_v2 = vmin.f32 %v3543_v38, 1.0  ;;  %v3379_v28 = vmul.f32 %v4625_v0, %v7593_v57  ;;  %vm3429_vm6 = vcmp.eq.f32.partialorder %v7645_v45, inf  ;;  %vm3431_vm7 = vcmp.eq.f32.partialorder %v7645_v45, 0.0 }
 0x549   : > { %v4627_v39 = vpop.eup %4626  ;;  %v3604_v36 = vmul.f32 %v3572_v6, %v7312_v47  ;;  %4644 = vrcp.f32 %v3480_v33  ;;  %v3388_v48 = vsel %vm3387_vm10, %v7578_v44, %v3386_v12  ;;  %v3432_v43 = vand.u32 2147483648, %v7645_v45  ;;  %v7741_v0 = vpop.xlane.xlu0 %3234 }
 0x54a   : > { %v4629_v24 = vpop.eup %4628  ;;  %v3607_v42 = vmul.f32 %v3575_v2, %v7314_v17  ;;  %v3542_v3 = vmul.f32 0.99999, %v4627_v39  ;;  %v3391_v61 = vsel %vm3389_vm11, %v3390_v27, %v3388_v48  ;;  %v3381_v5 = vsel %vm3380_vm12, %v7593_v57, %v3379_v28 }
 0x54b   : > { %3636 = vst [vmem:[%s5032_s29 + $0x70] sm:$0xff] %v3604_v36  ;;  %v3483_v47 = vmax.f32 %v3391_v61, 1e-07  ;;  %v3400_v55 = vmul.f32 %v4629_v24, %v7603_v37  ;;  %v4631_v63 = vpop.eup %4630  ;;  %v3384_v44 = vsel %vm3382_vm13, %v3383_v52, %v3381_v5  ;;  %4646 = vrsqrt.f32 %v7691_v51 }
 0x54c   : > { %3639 = vst [vmem:[%s5032_s29 + $0x88] sm:$0xff] %v3607_v42  ;;  %v3574_v17 = vmin.f32 %v3542_v3, 1.0  ;;  %v3482_v34 = vmax.f32 %v3384_v44, 1e-07  ;;  %v3393_v18 = vmul.f32 %v4631_v63, %v7621_v13  ;;  %v4633_v11 = vpop.eup %4632  ;;  %vm3422_vm8 = vcmp.eq.f32.partialorder %v7659_v49, inf }
 0x54d   : > { %4648 = vrcp.f32 %v3483_v47  ;;  %v3402_v50 = vsel %vm3401_vm14, %v7603_v37, %v3400_v55  ;;  %v3414_v31 = vmul.f32 %v4633_v11, %v7627_v58  ;;  %vm3424_vm9 = vcmp.eq.f32.partialorder %v7659_v49, 0.0 }
 0x54e   : > { %v3606_v27 = vmul.f32 %v3574_v17, %v7325_v46  ;;  %v3405_v57 = vsel %vm3403_vm15, %v3404_v25, %v3402_v50  ;;  %4650 = vrcp.f32 %v3482_v34  ;;  %v3395_v52 = vsel %vm3394_vm0, %v7621_v13, %v3393_v18 }
 0x54f   : > { %v4635_v59 = vpop.eup %4634  ;;  %v3485_v22 = vmax.f32 %v3405_v57, 1e-07  ;;  %v3398_v46 = vsel %vm3396_vm1, %v3397_v29, %v3395_v52  ;;  %4652 = vrsqrt.f32 %v7713_v14  ;;  %v3416_v25 = vsel %vm3415_vm2, %v7627_v58, %v3414_v31 }
 0x550   : > { %v4637_v54 = vpop.eup %4636  ;;  %3638 = vst [vmem:[%s5032_s29 + $0x80] sm:$0xff] %v3606_v27  ;;  %v3545_v19 = vmul.f32 0.99999, %v4635_v59  ;;  %v3484_v62 = vmax.f32 %v3398_v46, 1e-07  ;;  %v3419_v20 = vsel %vm3417_vm3, %v3418_v15, %v3416_v25  ;;  %v3425_v29 = vand.u32 2147483648, %v7659_v49 }
 0x551   : > { %v4639_v37 = vpop.eup %4638  ;;  %4654 = vrcp.f32 %v3485_v22  ;;  %v3407_v35 = vmul.f32 %v4637_v54, %v7637_v32  ;;  %v3487_v33 = vmax.f32 %v3419_v20, 1e-07  ;;  %vm3443_vm10 = vcmp.eq.f32.partialorder %v7672_v9, inf }
 0x552   : > { %v3577_v38 = vmin.f32 %v3545_v19, 1.0  ;;  %v3428_v13 = vmul.f32 %v4639_v37, %v7645_v45  ;;  %v4641_v6 = vpop.eup %4640  ;;  %4656 = vrcp.f32 %v3484_v62  ;;  %vm3445_vm11 = vcmp.eq.f32.partialorder %v7672_v9, 0.0 }
 0x553   : > { %v3409_v12 = vsel %vm3408_vm4, %v7637_v32, %v3407_v35  ;;  %v3421_v39 = vmul.f32 %v4641_v6, %v7659_v49  ;;  %v4643_v36 = vpop.eup %4642  ;;  %4658 = vrcp.f32 %v3487_v33  ;;  %vm3436_vm12 = vcmp.eq.f32.partialorder %v7691_v51, inf }
 0x554   : > { %v3609_v2 = vmul.f32 %v3577_v38, %v7327_v41  ;;  %v3412_v58 = vsel %vm3410_vm5, %v3411_v10, %v3409_v12  ;;  %v3430_v15 = vsel %vm3429_vm6, %v7645_v45, %v3428_v13  ;;  %v3442_v42 = vmul.f32 %v4643_v36, %v7672_v9 }
 0x555   : > { %v3486_v48 = vmax.f32 %v3412_v58, 1e-07  ;;  %v3433_v28 = vsel %vm3431_vm7, %v3432_v43, %v3430_v15  ;;  %v3423_v32 = vsel %vm3422_vm8, %v7659_v49, %v3421_v39  ;;  %4660 = vrsqrt.f32 %v7741_v0 }
 0x556   : > { %v4645_v24 = vpop.eup %4644  ;;  %3641 = vst [vmem:[%s5032_s29 + $0x98] sm:$0xff] %v3609_v2  ;;  %v3489_v41 = vmax.f32 %v3433_v28, 1e-07  ;;  %v3426_v61 = vsel %vm3424_vm9, %v3425_v29, %v3423_v32  ;;  %v3446_v45 = vand.u32 2147483648, %v7672_v9  ;;  %v3444_v5 = vsel %vm3443_vm10, %v7672_v9, %v3442_v42 }
 0x557   : > { %v3544_v3 = vmul.f32 0.99999, %v4645_v24  ;;  %4662 = vrcp.f32 %v3486_v48  ;;  %v3488_v47 = vmax.f32 %v3426_v61, 1e-07  ;;  %v3439_v18 = vand.u32 2147483648, %v7691_v51 }
 0x558   : > { %4664 = vrcp.f32 %v3489_v41  ;;  %v4647_v55 = vpop.eup %4646  ;;  %v3447_v63 = vsel %vm3445_vm11, %v3446_v45, %v3444_v5  ;;  %vm3438_vm13 = vcmp.eq.f32.partialorder %v7691_v51, 0.0  ;;  %vm3457_vm14 = vcmp.eq.f32.partialorder %v7713_v14, inf }
 0x559   : > { %v3576_v10 = vmin.f32 %v3544_v3, 1.0  ;;  %4666 = vrcp.f32 %v3488_v47  ;;  %v3491_v44 = vmax.f32 %v3447_v63, 1e-07  ;;  %v3435_v34 = vmul.f32 %v4647_v55, %v7691_v51 }
 0x55a   : > { %v4649_v17 = vpop.eup %4648  ;;  %v3460_v46 = vand.u32 2147483648, %v7713_v14  ;;  %vm3459_vm15 = vcmp.eq.f32.partialorder %v7713_v14, 0.0  ;;  %vm3450_vm0 = vcmp.eq.f32.partialorder %v7741_v0, inf  ;;  %v3453_v39 = vand.u32 2147483648, %v7741_v0 }
 0x55b   : > { %v3608_v49 = vmul.f32 %v3576_v10, %v7340_v30  ;;  %v3547_v50 = vmul.f32 0.99999, %v4649_v17  ;;  %v4651_v11 = vpop.eup %4650  ;;  %4668 = vrcp.f32 %v3491_v44  ;;  %v3437_v9 = vsel %vm3436_vm12, %v7691_v51, %v3435_v34 }
 0x55c   : > { %v4653_v27 = vpop.eup %4652  ;;  %v3546_v43 = vmul.f32 0.99999, %v4651_v11  ;;  %v3440_v59 = vsel %vm3438_vm13, %v3439_v18, %v3437_v9  ;;  %vm3452_vm1 = vcmp.eq.f32.partialorder %v7741_v0, 0.0 }
 0x55d   : > { %3640 = vst [vmem:[%s5032_s29 + $0x90] sm:$0xff] %v3608_v49  ;;  %v3579_v57 = vmin.f32 %v3547_v50, 1.0  ;;  %v3490_v52 = vmax.f32 %v3440_v59, 1e-07  ;;  %v3456_v30 = vmul.f32 %v4653_v27, %v7713_v14 }
 0x55e   : > { %v4655_v22 = vpop.eup %4654  ;;  %v3578_v54 = vmin.f32 %v3546_v43, 1.0 }
 0x55f   : > { %v3611_v31 = vmul.f32 %v3579_v57, %v7338_v26  ;;  %v3549_v19 = vmul.f32 0.99999, %v4655_v22  ;;  %v4657_v51 = vpop.eup %4656  ;;  %4670 = vrcp.f32 %v3490_v52  ;;  %v3458_v37 = vsel %vm3457_vm14, %v7713_v14, %v3456_v30 }
 0x560   : > { %v3610_v62 = vmul.f32 %v3578_v54, %v7354_v16  ;;  %v3548_v35 = vmul.f32 0.99999, %v4657_v51  ;;  %v3461_v38 = vsel %vm3459_vm15, %v3460_v46, %v3458_v37  ;;  %v4659_v20 = vpop.eup %4658 }
 0x561   : > { %3643 = vst [vmem:[%s5032_s29 + $0xa8] sm:$0xff] %v3611_v31  ;;  %v3581_v25 = vmin.f32 %v3549_v19, 1.0  ;;  %v3493_v26 = vmax.f32 %v3461_v38, 1e-07  ;;  %v3551_v12 = vmul.f32 0.99999, %v4659_v20 }
 0x562   : > { %v4661_v13 = vpop.eup %4660  ;;  %3642 = vst [vmem:[%s5032_s29 + $0xa0] sm:$0xff] %v3610_v62  ;;  %v3580_v33 = vmin.f32 %v3548_v35, 1.0 }
 0x563   : > { %v3613_v6 = vmul.f32 %v3581_v25, %v7356_v1  ;;  %4672 = vrcp.f32 %v3493_v26  ;;  %v3449_v14 = vmul.f32 %v4661_v13, %v7741_v0  ;;  %v3583_v58 = vmin.f32 %v3551_v12, 1.0 }
 0x564   : > { %v4663_v29 = vpop.eup %4662  ;;  %v3612_v2 = vmul.f32 %v3580_v33, %v7367_v40 }
 0x565   : > { %v4665_v16 = vpop.eup %4664  ;;  %3645 = vst [vmem:[%s5032_s29 + $0xb8] sm:$0xff] %v3613_v6  ;;  %v3550_v15 = vmul.f32 0.99999, %v4663_v29  ;;  %v3451_v1 = vsel %vm3450_vm0, %v7741_v0, %v3449_v14  ;;  %v3615_v28 = vmul.f32 %v3583_v58, %v7369_v4 }
 0x566   : > { %v3553_v36 = vmul.f32 0.99999, %v4665_v16  ;;  %v4667_v48 = vpop.eup %4666  ;;  %3644 = vst [vmem:[%s5032_s29 + $0xb0] sm:$0xff] %v3612_v2  ;;  %v3454_v41 = vsel %vm3452_vm1, %v3453_v39, %v3451_v1 }
 0x567   : > { %v3582_v24 = vmin.f32 %v3550_v15, 1.0  ;;  %v3552_v32 = vmul.f32 0.99999, %v4667_v48  ;;  %v3492_v42 = vmax.f32 %v3454_v41, 1e-07  ;;  %3647 = vst [vmem:[%s5032_s29 + $0xc8] sm:$0xff] %v3615_v28 }
 0x568   : > { %v3585_v40 = vmin.f32 %v3553_v36, 1.0  ;;  %v4669_v3 = vpop.eup %4668 }
 0x569   : > { %v3614_v61 = vmul.f32 %v3582_v24, %v7382_v60  ;;  %v3584_v0 = vmin.f32 %v3552_v32, 1.0  ;;  %v3555_v47 = vmul.f32 0.99999, %v4669_v3  ;;  %4674 = vrcp.f32 %v3492_v42 }
 0x56a   : > { %v3617_v45 = vmul.f32 %v3585_v40, %v7380_v53 }
 0x56b   : > { %3646 = vst [vmem:[%s5032_s29 + $0xc0] sm:$0xff] %v3614_v61  ;;  %v3616_v4 = vmul.f32 %v3584_v0, %v7396_v23  ;;  %v3587_v5 = vmin.f32 %v3555_v47, 1.0 }
 0x56c   : > { %3649 = vst [vmem:[%s5032_s29 + $0xd8] sm:$0xff] %v3617_v45  ;;  %v4671_v55 = vpop.eup %4670 }
 0x56d   : > { %3648 = vst [vmem:[%s5032_s29 + $0xd0] sm:$0xff] %v3616_v4  ;;  %v3619_v10 = vmul.f32 %v3587_v5, %v7398_v7  ;;  %v3554_v63 = vmul.f32 0.99999, %v4671_v55 }
 0x56f   : > { %3651 = vst [vmem:[%s5032_s29 + $0xe8] sm:$0xff] %v3619_v10  ;;  %v3586_v60 = vmin.f32 %v3554_v63, 1.0 }
 0x570   : > { %v4673_v17 = vpop.eup %4672 }
 0x571   : > { %v3618_v53 = vmul.f32 %v3586_v60, %v7408_v21  ;;  %v3557_v44 = vmul.f32 0.99999, %v4673_v17 }
 0x573   : > { %3650 = vst [vmem:[%s5032_s29 + $0xe0] sm:$0xff] %v3618_v53  ;;  %v3589_v34 = vmin.f32 %v3557_v44, 1.0 }
 0x575   : > { %v3621_v49 = vmul.f32 %v3589_v34, %v7410_v8 }
 0x576   : > { %v4675_v50 = vpop.eup %4674 }
 0x577   : > { %3653 = vst [vmem:[%s5032_s29 + $0xf8] sm:$0xff] %v3621_v49  ;;  %v3556_v23 = vmul.f32 0.99999, %v4675_v50 }
 0x579   : > { %v3588_v18 = vmin.f32 %v3556_v23, 1.0 }
 0x57b   : > { %v3620_v11 = vmul.f32 %v3588_v18, %v7419_v56 }
 0x57d   : > { %3652 = vst [vmem:[%s5032_s29 + $0xf0] sm:$0xff] %v3620_v11 }
 0x57e PF: > { %s3828_s10 = sshll.u32 %s4848_s24, 12  ;;  %s3668_s5 = sshll.u32 %s5032_s29, 4  ;;  %s7812_s5 = int_to_ptr.vmem [resolvable:$true] %s3668_s5 }
 0x57f   : > { %s7809_s11 = scalar_lea.hbm %s7880_s4, %s3828_s10  ;;  %s7816_s28 = scalar_lea.sflag [#allocation7], %s246_s14 }
 0x580   : > { %s4740_s20 = scalar_lea.vmem %s7812_s5, 4096  ;;  %s4868_s24 = smov [#allocation8]  }
 0x581   : > { %p4741_p8 = scmp.ne.s32.totalorder %s7812_s5, %s4740_s20  ;;  %s4744_s27 = sshll.u32 %s4868_s24, 4  ;;  %s4745_s27 = int_to_ptr.vmem [resolvable:$false] %s4744_s27 }
 0x582   : > { %s4746_s6 = scalar_lea.vmem %s4745_s27, 8192  ;;  %p4747_p11 = scmp.lt.s32.totalorder %s7812_s5, %s4745_s27 }
 0x583   : > { %p4742_p9 = pnand %p4741_p8, %p4981_p12  ;;  %p4748_p13 = scmp.lt.s32.totalorder %s4746_s6, %s4740_s20 }
 0x585   : > { %p4743_p10 = pneg %p4742_p9  ;;  %p4749_p0 = por %p4748_p13, %p4747_p11 }
 0x587   : > { %p4750_p3 = pnand %p4749_p0, %p4743_p10 }
 0x589   : > { %4753 = shalt.err (!%p4750_p3)
}
 0x58a   : > { %s4754_s14 = scalar_lea.hbm %s7809_s11, 4096  ;;  %s4758_s9 = scalar_lea.hbm %s7880_s4, 8192 }
 0x58b   : > { %p4755_p1 = scmp.ne.s32.totalorder %s7809_s11, %s4754_s14  ;;  %p4759_p6 = scmp.lt.s32.totalorder %s7809_s11, %s7880_s4 }
 0x58c   : > { %p4760_p7 = scmp.lt.s32.totalorder %s4758_s9, %s4754_s14 }
 0x58d   : > { %p4756_p5 = pnand %p4755_p1, %p4981_p12 }
 0x58e   : > { %p4761_p8 = por %p4760_p7, %p4759_p6 }
 0x58f   : > { %p4757_p4 = pneg %p4756_p5 }
 0x591   : > { %p4762_p9 = pnand %p4761_p8, %p4757_p4 }
 0x593   : > { %4765 = shalt.err (!%p4762_p9)
}
 0x594   : > { %s4869_s16 = smov 128   ;;  %s4870_s10 = smov 8  }
 0x595   : > { %3919 = dma.vmem_to_hbm [thread:$0]  (%p4981_p12), %s7812_s5, 4096, %s7809_s11, %s7816_s28, %s4869_s16, %s4869_s16, %s4870_s10  }
 0x596 PF: > { %p3930_p10 = scmp.ge.s32.totalorder %s4860_s26, 2  ;;  %s3683_s22 = sand.u32 1, %s4820_s17  }
 0x597   : > { %s3684_s8 = scalar_lea.sflag [#allocation7], %s3683_s22 }
 0x598   : > { %p3926_p11 = pnand %p3930_p10, %p4994_p2 }
 0x59a   : > { %p3927_p13 = pneg %p3926_p11 }
 0x59c   : > { %4815 = dma.done.wait (%p3927_p13), %s3684_s8, 4096  }
 0x59d   : > { %4817 = vsyncadd (%p3927_p13), %s3684_s8, 4294963200  ;;  %s21_s26 = sadd.s32 1, %s4860_s26   ;;  %s8072_s12 = sld [smem:[#allocation11_spill]] }
 0x59e   : > { %p18_p0 = scmp.ge.s32.totalorder %s21_s26, 6   ;;  %s8073_s22 = sld [smem:[#allocation14_spill]] }
 0x59f   : > { %s8074_s11 = sld [smem:[#allocation12_spill]]  ;;  %s8076_s17 = smov %s4824_s18 }
 0x5a0   : > { %s8075_s5 = sld [smem:[#allocation13_spill]]  ;;  %s8077_s18 = smov %s4828_s19 }
 0x5a1   : > { %s8078_s19 = smov %s4986_s13  ;;  %s8079_s20 = smov %s4836_s21 }
 0x5a2   : > { %s8081_s23 = smov %s4852_s3  ;;  %s8082_s24 = smov %s4856_s25 }
 0x5a3   : > { %s8080_s21 = smov %s8072_s12  ;;  %20 = sbr.rel (!%p18_p0) target bundleno = 11 (0xb), region = 92 }
 0x5a5   : > { %s8083_s3 = smov %s8074_s11 }
 0x5a6   : > { %s8084_s25 = smov %s8075_s5 }
 0x5a8   :  { %3689 = vsyncpa [#allocation6], 1 }
 0x5a9   :  { %3691 = vsyncpa [#allocation6 + $0x1], 1 }
 0x5aa   :  { %3692 = vsyncpa [#allocation7], 1 }
 0x5ab   :  { %3694 = vsyncpa [#allocation7 + $0x1], 1 }

</bundles_post_ra>
